<compile_context>
chip_gen: v5e
topology: v5e:2x2
jax: 0.10.0
libtpu: 0.0.40
codegen_flags: <defaults>
</compile_context>

<pallas_src>
import functools

import numpy as np
import jax
import jax.numpy as jnp
from jax import lax
from jax.experimental import pallas as pl
from jax.experimental.pallas import tpu as pltpu

LEAK = 0.1  # negative slope of the LeakyReLU inside `layers`


def _geom(H, W):
    """Padded-pitch geometry shared by the wrapper and the kernel."""
    Wp = W + 2                                   # row pitch with 1 zero column per side
    Lh = H * Wp                                  # rows of the (junk-column-carrying) conv output
    base = ((2 * Wp + 7) // 8) * 8               # sublane-aligned top halo (>= one padded row + 1)
    ltot = ((base + Lh + Wp + 1 + 7) // 8) * 8   # total flat rows, sublane aligned
    return Wp, Lh, base, ltot


# ------------------------------- Pallas kernel ------------------------------ #
def _resblk_kernel(x_ref, w1_ref, b1_ref, w2_ref, b2_ref, wby_ref, bby_ref,
                   o_ref, padh_ref, *, W, Wp, Lh, base, Cin, Cout):
    """Fused ResBlk main+bypass for ONE image (halo-padded, pitch W+2 layout)."""
    LTOT = padh_ref.shape[0]

    def conv3x3(src_ref, w_ref, b_ref, cin):
        # src_ref : (LTOT, cin) bf16, zero-haloed, image row y / padded col c at
        #           flat index base + y*Wp + c  (c in [0, Wp), image cols at c in [1, W]).
        # w_ref   : (9*cin, Cout) bf16, tap-major (dy-major, dx-minor) packing.
        # Output  : (Lh, Cout) f32 at the same padded pitch (2 junk columns / row).
        acc = None
        if cin % 128 == 0:
            # Per-dy tap grouping: one K = 3*cin matmul per dy (lane-aligned concat).
            for d, dy in enumerate((-1, 0, 1)):
                r0 = base + dy * Wp
                taps = jnp.concatenate(
                    [src_ref[pl.ds(r0 - 1, Lh), :],
                     src_ref[pl.ds(r0, Lh), :],
                     src_ref[pl.ds(r0 + 1, Lh), :]], axis=1)        # (Lh, 3*cin) bf16
                wk = w_ref[pl.ds(d * 3 * cin, 3 * cin), :]           # (3*cin, Cout)
                part = jnp.dot(taps, wk, preferred_element_type=jnp.float32)
                acc = part if acc is None else acc + part
        else:
            # TODO(synk): sub-128-channel taps could also be lane-concatenated to
            # K=3*cin once unaligned minor-dim concat lowering is validated.
            for k, (dy, dx) in enumerate([(dy, dx) for dy in (-1, 0, 1)
                                          for dx in (-1, 0, 1)]):
                tap = src_ref[pl.ds(base + dy * Wp + dx, Lh), :]     # (Lh, cin) bf16
                wk = w_ref[pl.ds(k * cin, cin), :]                   # (cin, Cout)
                part = jnp.dot(tap, wk, preferred_element_type=jnp.float32)
                acc = part if acc is None else acc + part            # init from first dot
        return acc + b_ref[...]                                      # (1, Cout) f32 broadcast

    # ---- main branch: conv3x3 -> LeakyReLU(0.1) ----
    h1 = conv3x3(x_ref, w1_ref, b1_ref, Cin)                         # (Lh, Cout) f32
    h1 = jnp.where(h1 > 0, h1, LEAK * h1)

    # Re-zero the two pad columns of h1 (the ONLY mask left), then stage it into
    # the zero-haloed scratch so conv2's taps are mask-free shifted slices too.
    col = lax.broadcasted_iota(jnp.int32, (Lh, 1), 0) % Wp
    h1 = jnp.where((col >= 1) & (col <= W), h1, 0.0)

    # Halo-only zeroing of the staging scratch (top/bottom guard rows; the pad
    # columns inside the interior are already zero via the mask above).
    padh_ref[pl.ds(0, base), :] = jnp.zeros((base, Cout), padh_ref.dtype)
    padh_ref[pl.ds(base + Lh, LTOT - base - Lh), :] = (
        jnp.zeros((LTOT - base - Lh, Cout), padh_ref.dtype))
    padh_ref[pl.ds(base, Lh), :] = h1.astype(padh_ref.dtype)         # aligned store

    # ---- second conv of the main branch ----
    h2 = conv3x3(padh_ref, w2_ref, b2_ref, Cout)                     # (Lh, Cout) f32

    # ---- bypass branch: conv1x1 on the interior rows (pad cols are zero) ----
    byp = jnp.dot(x_ref[pl.ds(base, Lh), :], wby_ref[...],
                  preferred_element_type=jnp.float32) + bby_ref[...]

    # Residual add, written once in f32 (pad columns carry junk; wrapper drops them).
    o_ref[...] = h2 + byp


# ------------------------------ call wrapper -------------------------------- #
def _resblk_pallas(xp, p, *, B, H, W, Cin, Cout):
    Wp, Lh, base, ltot = _geom(H, W)

    kernel = functools.partial(_resblk_kernel, W=W, Wp=Wp, Lh=Lh, base=base,
                               Cin=Cin, Cout=Cout)

    inputs = [xp, p["w1"], p["b1"], p["w2"], p["b2"], p["wby"], p["bby"]]
    flops = 2 * B * Lh * (9 * Cin * Cout + 9 * Cout * Cout + Cin * Cout)
    bytes_accessed = int(sum(int(a.size) * a.dtype.itemsize for a in inputs)
                         + B * Lh * Cout * 4)

    return pl.pallas_call(
        kernel,
        out_shape=jax.ShapeDtypeStruct((B, Lh, Cout), jnp.float32),
        grid=(B,),
        in_specs=[
            pl.BlockSpec((None, ltot, Cin), lambda b: (b, 0, 0)),    # halo-padded image
            pl.BlockSpec((9 * Cin, Cout), lambda b: (0, 0)),         # conv1 weights
            pl.BlockSpec((1, Cout), lambda b: (0, 0)),
            pl.BlockSpec((9 * Cout, Cout), lambda b: (0, 0)),        # conv2 weights
            pl.BlockSpec((1, Cout), lambda b: (0, 0)),
            pl.BlockSpec((Cin, Cout), lambda b: (0, 0)),             # bypass 1x1 weights
            pl.BlockSpec((1, Cout), lambda b: (0, 0)),
        ],
        out_specs=pl.BlockSpec((None, Lh, Cout), lambda b: (b, 0, 0)),
        scratch_shapes=[
            pltpu.VMEM((ltot, Cout), jnp.bfloat16),   # zero-haloed staging of h1 for conv2
        ],
        # One image per grid step; "parallel" lets v7x's two TensorCores split the batch.
        compiler_params=pltpu.CompilerParams(dimension_semantics=("parallel",)),
        cost_estimate=pl.CostEstimate(flops=flops, transcendentals=0,
                                      bytes_accessed=bytes_accessed),
    )(*inputs)


def resblk_forward(packed, x_nchw, *, stride=2):
    """ResBlk forward: layers(x) + bypass(x). Input/output in PyTorch NCHW layout."""
    assert stride in (1, 2), "TODO(synk): stride == -2 (Upsample bypass) not implemented"
    B, Cin, H, W = x_nchw.shape
    if stride == 2:
        assert H % 2 == 0 and W % 2 == 0, "AvgPool2d(2) needs even spatial dims"
    Cout = packed["b1"].shape[-1]
    Wp, Lh, base, ltot = _geom(H, W)

    # Layout plumbing only (no compute): NCHW -> NHWC bf16, then present the image
    # already halo-padded (1 zero column per side, zero guard rows, pitch W+2) so the
    # kernel's BlockSpec DMA lands it directly in its final layout — no in-kernel
    # staging copy, no in-kernel zero fill for x, no tap masking.
    x_nhwc = jnp.transpose(x_nchw, (0, 2, 3, 1)).astype(jnp.bfloat16)
    xrow = jnp.pad(x_nhwc, ((0, 0), (0, 0), (1, 1), (0, 0))).reshape(B, Lh, Cin)
    xp = jnp.pad(xrow, ((0, 0), (base, ltot - base - Lh), (0, 0)))

    out = _resblk_pallas(xp, packed, B=B, H=H, W=W, Cin=Cin, Cout=Cout)   # (B, Lh, Cout) f32

    # Drop the halo junk columns; AvgPool2d(2) is linear, so pooling the residual
    # sum here (f32, O(L) cost) is exact and replaces the old O(L^2) pool matmul.
    out = out.reshape(B, H, Wp, Cout)[:, :, 1:W + 1, :]
    if stride == 2:
        out = out.reshape(B, H // 2, 2, W // 2, 2, Cout).mean(axis=(2, 4))
    return jnp.transpose(out, (0, 3, 1, 2))                               # back to NCHW


# --------------------------- parameters & packing ---------------------------- #
def init_params(key, cin, cout):
    def uniform(k, shape, fan_in):
        bound = 1.0 / float(np.sqrt(fan_in))
        return jax.random.uniform(k, shape, jnp.float32, -bound, bound)

    ks = jax.random.split(key, 6)
    return {
        "w1": uniform(ks[0], (cout, cin, 3, 3), cin * 9),     # layers conv1 (OIHW)
        "b1": uniform(ks[1], (cout,), cin * 9),
        "w2": uniform(ks[2], (cout, cout, 3, 3), cout * 9),   # layers conv2 (OIHW)
        "b2": uniform(ks[3], (cout,), cout * 9),
        "wby": uniform(ks[4], (cout, cin, 1, 1), cin),        # bypass conv1x1 (OIHW)
        "bby": uniform(ks[5], (cout,), cin),
    }


def prepare_params(params):
    """One-time weight packing: fold all transposes/reshapes out of the forward path."""
    def pack3x3(w):   # (Cout, Cin, 3, 3) -> (9*Cin, Cout), tap-major (dy-major, dx-minor), bf16
        cout, cin, kh, kw = w.shape
        return jnp.transpose(w, (2, 3, 1, 0)).reshape(kh * kw * cin, cout).astype(jnp.bfloat16)

    return {
        "w1": pack3x3(params["w1"]),
        "b1": params["b1"].reshape(1, -1).astype(jnp.float32),
        "w2": pack3x3(params["w2"]),
        "b2": params["b2"].reshape(1, -1).astype(jnp.float32),
        "wby": jnp.transpose(params["wby"][:, :, 0, 0], (1, 0)).astype(jnp.bfloat16),
        "bby": params["bby"].reshape(1, -1).astype(jnp.float32),
    }


# ------------------------------ pure-JAX reference --------------------------- #
def resblk_reference(params, x, stride):
    def conv(x, w, b, pad):
        out = lax.conv_general_dilated(x, w, window_strides=(1, 1),
                                       padding=[(pad, pad), (pad, pad)],
                                       dimension_numbers=("NCHW", "OIHW", "NCHW"))
        return out + b.reshape(1, -1, 1, 1)

    h = conv(x, params["w1"], params["b1"], 1)
    h = jnp.where(h > 0, h, LEAK * h)
    h = conv(h, params["w2"], params["b2"], 1)
    byp = conv(x, params["wby"], params["bby"], 0)
    s = h + byp
    if stride == 2:
        B, C, H, W = s.shape
        s = s.reshape(B, C, H // 2, 2, W // 2, 2).mean(axis=(3, 5))
    return s


if __name__ == "__main__":
    key = jax.random.PRNGKey(0)
    pkey, xkey = jax.random.split(key)

    B, CIN, COUT, H, W = 2, 64, 128, 16, 16
    params = init_params(pkey, CIN, COUT)
    packed = prepare_params(params)                 # one-time pre-pack (bf16)
    x = jax.random.normal(xkey, (B, CIN, H, W), jnp.float32)   # NCHW like PyTorch

    for stride in (2, 1):                           # downsample block and identity-stride block
        fwd = jax.jit(functools.partial(resblk_forward, stride=stride))
        y = fwd(packed, x)
        jax.block_until_ready(y)

        y_ref = resblk_reference(params, x, stride)
        assert y.shape == y_ref.shape, (y.shape, y_ref.shape)
        assert bool(jnp.all(jnp.isfinite(y)))
        err = float(jnp.max(jnp.abs(y - y_ref)))
        assert err < 1e-1, f"stride={stride} max abs err {err}"

    print("KERNEL_OK")
</pallas_src>

<mosaic_0001>
module attributes {stable_mosaic.version = 11 : i64} {
  func.func @_resblk_kernel(%arg0: i32, %arg1: memref<1x352x64xbf16, #tpu.memory_space<vmem>>, %arg2: memref<576x128xbf16, #tpu.memory_space<vmem>>, %arg3: memref<1x128xf32, #tpu.memory_space<vmem>>, %arg4: memref<1152x128xbf16, #tpu.memory_space<vmem>>, %arg5: memref<1x128xf32, #tpu.memory_space<vmem>>, %arg6: memref<64x128xbf16, #tpu.memory_space<vmem>>, %arg7: memref<1x128xf32, #tpu.memory_space<vmem>>, %arg8: memref<1x288x128xf32, #tpu.memory_space<vmem>>, %arg9: memref<352x128xbf16, #tpu.memory_space<vmem>>) attributes {dimension_semantics = [#tpu.dimension_semantics<parallel>], iteration_bounds = array<i64: 2>, scalar_prefetch = 0 : i64, scratch_operands = 1 : i64, tpu.core_type = #tpu.core_type<tc>, window_params = [{transform_indices = @transform_0, window_bounds = array<i64: 1, 352, 64>}, {pipeline_mode = #tpu.pipeline_mode<synchronous>, transform_indices = @transform_1, window_bounds = array<i64: 576, 128>}, {pipeline_mode = #tpu.pipeline_mode<synchronous>, transform_indices = @transform_2, window_bounds = array<i64: 1, 128>}, {pipeline_mode = #tpu.pipeline_mode<synchronous>, transform_indices = @transform_3, window_bounds = array<i64: 1152, 128>}, {pipeline_mode = #tpu.pipeline_mode<synchronous>, transform_indices = @transform_4, window_bounds = array<i64: 1, 128>}, {pipeline_mode = #tpu.pipeline_mode<synchronous>, transform_indices = @transform_5, window_bounds = array<i64: 64, 128>}, {pipeline_mode = #tpu.pipeline_mode<synchronous>, transform_indices = @transform_6, window_bounds = array<i64: 1, 128>}, {transform_indices = @transform_7, window_bounds = array<i64: 1, 288, 128>}]} {
    %c0 = arith.constant 0 : index
    %c21 = arith.constant 21 : index
    %c0_0 = arith.constant 0 : index
    %0 = vector.load %arg1[%c0, %c21, %c0_0] : memref<1x352x64xbf16, #tpu.memory_space<vmem>>, vector<1x288x64xbf16>
    %1 = vector.shape_cast %0 : vector<1x288x64xbf16> to vector<288x64xbf16>
    %c0_1 = arith.constant 0 : index
    %c0_2 = arith.constant 0 : index
    %2 = vector.load %arg2[%c0_1, %c0_2] : memref<576x128xbf16, #tpu.memory_space<vmem>>, vector<64x128xbf16>
    %cst = arith.constant dense<0.000000e+00> : vector<288x128xf32>
    %3 = tpu.matmul %1, %2, %cst {dimension_numbers = #tpu.dot_dimension_numbers<[1], [0], [0], [1], [0, 0, 1, 1], [], []>} : vector<288x64xbf16>, vector<64x128xbf16>, vector<288x128xf32> -> vector<288x128xf32>
    %c0_3 = arith.constant 0 : index
    %c22 = arith.constant 22 : index
    %c0_4 = arith.constant 0 : index
    %4 = vector.load %arg1[%c0_3, %c22, %c0_4] : memref<1x352x64xbf16, #tpu.memory_space<vmem>>, vector<1x288x64xbf16>
    %5 = vector.shape_cast %4 : vector<1x288x64xbf16> to vector<288x64xbf16>
    %c64 = arith.constant 64 : index
    %c0_5 = arith.constant 0 : index
    %6 = vector.load %arg2[%c64, %c0_5] : memref<576x128xbf16, #tpu.memory_space<vmem>>, vector<64x128xbf16>
    %cst_6 = arith.constant dense<0.000000e+00> : vector<288x128xf32>
    %7 = tpu.matmul %5, %6, %cst_6 {dimension_numbers = #tpu.dot_dimension_numbers<[1], [0], [0], [1], [0, 0, 1, 1], [], []>} : vector<288x64xbf16>, vector<64x128xbf16>, vector<288x128xf32> -> vector<288x128xf32>
    %8 = arith.addf %3, %7 : vector<288x128xf32>
    %c0_7 = arith.constant 0 : index
    %c23 = arith.constant 23 : index
    %c0_8 = arith.constant 0 : index
    %9 = vector.load %arg1[%c0_7, %c23, %c0_8] : memref<1x352x64xbf16, #tpu.memory_space<vmem>>, vector<1x288x64xbf16>
    %10 = vector.shape_cast %9 : vector<1x288x64xbf16> to vector<288x64xbf16>
    %c128 = arith.constant 128 : index
    %c0_9 = arith.constant 0 : index
    %11 = vector.load %arg2[%c128, %c0_9] : memref<576x128xbf16, #tpu.memory_space<vmem>>, vector<64x128xbf16>
    %cst_10 = arith.constant dense<0.000000e+00> : vector<288x128xf32>
    %12 = tpu.matmul %10, %11, %cst_10 {dimension_numbers = #tpu.dot_dimension_numbers<[1], [0], [0], [1], [0, 0, 1, 1], [], []>} : vector<288x64xbf16>, vector<64x128xbf16>, vector<288x128xf32> -> vector<288x128xf32>
    %13 = arith.addf %8, %12 : vector<288x128xf32>
    %c0_11 = arith.constant 0 : index
    %c39 = arith.constant 39 : index
    %c0_12 = arith.constant 0 : index
    %14 = vector.load %arg1[%c0_11, %c39, %c0_12] : memref<1x352x64xbf16, #tpu.memory_space<vmem>>, vector<1x288x64xbf16>
    %15 = vector.shape_cast %14 : vector<1x288x64xbf16> to vector<288x64xbf16>
    %c192 = arith.constant 192 : index
    %c0_13 = arith.constant 0 : index
    %16 = vector.load %arg2[%c192, %c0_13] : memref<576x128xbf16, #tpu.memory_space<vmem>>, vector<64x128xbf16>
    %cst_14 = arith.constant dense<0.000000e+00> : vector<288x128xf32>
    %17 = tpu.matmul %15, %16, %cst_14 {dimension_numbers = #tpu.dot_dimension_numbers<[1], [0], [0], [1], [0, 0, 1, 1], [], []>} : vector<288x64xbf16>, vector<64x128xbf16>, vector<288x128xf32> -> vector<288x128xf32>
    %18 = arith.addf %13, %17 : vector<288x128xf32>
    %c0_15 = arith.constant 0 : index
    %c40 = arith.constant 40 : index
    %c0_16 = arith.constant 0 : index
    %19 = vector.load %arg1[%c0_15, %c40, %c0_16] : memref<1x352x64xbf16, #tpu.memory_space<vmem>>, vector<1x288x64xbf16>
    %20 = vector.shape_cast %19 : vector<1x288x64xbf16> to vector<288x64xbf16>
    %c256 = arith.constant 256 : index
    %c0_17 = arith.constant 0 : index
    %21 = vector.load %arg2[%c256, %c0_17] : memref<576x128xbf16, #tpu.memory_space<vmem>>, vector<64x128xbf16>
    %cst_18 = arith.constant dense<0.000000e+00> : vector<288x128xf32>
    %22 = tpu.matmul %20, %21, %cst_18 {dimension_numbers = #tpu.dot_dimension_numbers<[1], [0], [0], [1], [0, 0, 1, 1], [], []>} : vector<288x64xbf16>, vector<64x128xbf16>, vector<288x128xf32> -> vector<288x128xf32>
    %23 = arith.addf %18, %22 : vector<288x128xf32>
    %c0_19 = arith.constant 0 : index
    %c41 = arith.constant 41 : index
    %c0_20 = arith.constant 0 : index
    %24 = vector.load %arg1[%c0_19, %c41, %c0_20] : memref<1x352x64xbf16, #tpu.memory_space<vmem>>, vector<1x288x64xbf16>
    %25 = vector.shape_cast %24 : vector<1x288x64xbf16> to vector<288x64xbf16>
    %c320 = arith.constant 320 : index
    %c0_21 = arith.constant 0 : index
    %26 = vector.load %arg2[%c320, %c0_21] : memref<576x128xbf16, #tpu.memory_space<vmem>>, vector<64x128xbf16>
    %cst_22 = arith.constant dense<0.000000e+00> : vector<288x128xf32>
    %27 = tpu.matmul %25, %26, %cst_22 {dimension_numbers = #tpu.dot_dimension_numbers<[1], [0], [0], [1], [0, 0, 1, 1], [], []>} : vector<288x64xbf16>, vector<64x128xbf16>, vector<288x128xf32> -> vector<288x128xf32>
    %28 = arith.addf %23, %27 : vector<288x128xf32>
    %c0_23 = arith.constant 0 : index
    %c57 = arith.constant 57 : index
    %c0_24 = arith.constant 0 : index
    %29 = vector.load %arg1[%c0_23, %c57, %c0_24] : memref<1x352x64xbf16, #tpu.memory_space<vmem>>, vector<1x288x64xbf16>
    %30 = vector.shape_cast %29 : vector<1x288x64xbf16> to vector<288x64xbf16>
    %c384 = arith.constant 384 : index
    %c0_25 = arith.constant 0 : index
    %31 = vector.load %arg2[%c384, %c0_25] : memref<576x128xbf16, #tpu.memory_space<vmem>>, vector<64x128xbf16>
    %cst_26 = arith.constant dense<0.000000e+00> : vector<288x128xf32>
    %32 = tpu.matmul %30, %31, %cst_26 {dimension_numbers = #tpu.dot_dimension_numbers<[1], [0], [0], [1], [0, 0, 1, 1], [], []>} : vector<288x64xbf16>, vector<64x128xbf16>, vector<288x128xf32> -> vector<288x128xf32>
    %33 = arith.addf %28, %32 : vector<288x128xf32>
    %c0_27 = arith.constant 0 : index
    %c58 = arith.constant 58 : index
    %c0_28 = arith.constant 0 : index
    %34 = vector.load %arg1[%c0_27, %c58, %c0_28] : memref<1x352x64xbf16, #tpu.memory_space<vmem>>, vector<1x288x64xbf16>
    %35 = vector.shape_cast %34 : vector<1x288x64xbf16> to vector<288x64xbf16>
    %c448 = arith.constant 448 : index
    %c0_29 = arith.constant 0 : index
    %36 = vector.load %arg2[%c448, %c0_29] : memref<576x128xbf16, #tpu.memory_space<vmem>>, vector<64x128xbf16>
    %cst_30 = arith.constant dense<0.000000e+00> : vector<288x128xf32>
    %37 = tpu.matmul %35, %36, %cst_30 {dimension_numbers = #tpu.dot_dimension_numbers<[1], [0], [0], [1], [0, 0, 1, 1], [], []>} : vector<288x64xbf16>, vector<64x128xbf16>, vector<288x128xf32> -> vector<288x128xf32>
    %38 = arith.addf %33, %37 : vector<288x128xf32>
    %c0_31 = arith.constant 0 : index
    %c59 = arith.constant 59 : index
    %c0_32 = arith.constant 0 : index
    %39 = vector.load %arg1[%c0_31, %c59, %c0_32] : memref<1x352x64xbf16, #tpu.memory_space<vmem>>, vector<1x288x64xbf16>
    %40 = vector.shape_cast %39 : vector<1x288x64xbf16> to vector<288x64xbf16>
    %c512 = arith.constant 512 : index
    %c0_33 = arith.constant 0 : index
    %41 = vector.load %arg2[%c512, %c0_33] : memref<576x128xbf16, #tpu.memory_space<vmem>>, vector<64x128xbf16>
    %cst_34 = arith.constant dense<0.000000e+00> : vector<288x128xf32>
    %42 = tpu.matmul %40, %41, %cst_34 {dimension_numbers = #tpu.dot_dimension_numbers<[1], [0], [0], [1], [0, 0, 1, 1], [], []>} : vector<288x64xbf16>, vector<64x128xbf16>, vector<288x128xf32> -> vector<288x128xf32>
    %43 = arith.addf %38, %42 : vector<288x128xf32>
    %c0_35 = arith.constant 0 : index
    %c0_36 = arith.constant 0 : index
    %44 = vector.load %arg3[%c0_35, %c0_36] : memref<1x128xf32, #tpu.memory_space<vmem>>, vector<1x128xf32>
    %45 = vector.broadcast %44 : vector<1x128xf32> to vector<288x128xf32>
    %46 = arith.addf %43, %45 : vector<288x128xf32>
    %cst_37 = arith.constant 0.000000e+00 : f32
    %47 = vector.broadcast %cst_37 : f32 to vector<288x128xf32>
    %48 = arith.cmpf ogt, %46, %47 : vector<288x128xf32>
    %cst_38 = arith.constant 1.000000e-01 : f32
    %49 = vector.broadcast %cst_38 : f32 to vector<288x128xf32>
    %50 = arith.mulf %49, %46 : vector<288x128xf32>
    %51 = arith.select %48, %46, %50 : vector<288x128xi1>, vector<288x128xf32>
    %52 = tpu.iota {dimensions = array<i32: 0>} : vector<288x1xi32>
    %c18_i32 = arith.constant 18 : i32
    %c0_i32 = arith.constant 0 : i32
    %53 = arith.cmpi eq, %c18_i32, %c0_i32 : i32
    %c1_i32 = arith.constant 1 : i32
    %54 = arith.select %53, %c1_i32, %c18_i32 : i32
    %55 = vector.broadcast %54 : i32 to vector<288x1xi32>
    %56 = arith.remsi %52, %55 : vector<288x1xi32>
    %c0_i32_39 = arith.constant 0 : i32
    %57 = vector.broadcast %c0_i32_39 : i32 to vector<288x1xi32>
    %58 = arith.cmpi ne, %56, %57 : vector<288x1xi32>
    %c0_i32_40 = arith.constant 0 : i32
    %59 = vector.broadcast %c0_i32_40 : i32 to vector<288x1xi32>
    %60 = arith.cmpi slt, %56, %59 : vector<288x1xi32>
    %c0_i32_41 = arith.constant 0 : i32
    %61 = arith.cmpi slt, %54, %c0_i32_41 : i32
    %62 = vector.broadcast %61 : i1 to vector<288x1xi1>
    %63 = vector.broadcast %62 : vector<288x1xi1> to vector<288x1xi1>
    %64 = arith.xori %60, %63 : vector<288x1xi1>
    %65 = arith.andi %64, %58 : vector<288x1xi1>
    %66 = vector.broadcast %54 : i32 to vector<288x1xi32>
    %67 = arith.addi %56, %66 : vector<288x1xi32>
    %68 = arith.select %65, %67, %56 : vector<288x1xi1>, vector<288x1xi32>
    %c1_i32_42 = arith.constant 1 : i32
    %69 = vector.broadcast %c1_i32_42 : i32 to vector<288x1xi32>
    %70 = arith.cmpi sge, %68, %69 : vector<288x1xi32>
    %c16_i32 = arith.constant 16 : i32
    %71 = vector.broadcast %c16_i32 : i32 to vector<288x1xi32>
    %72 = arith.cmpi sle, %68, %71 : vector<288x1xi32>
    %73 = arith.andi %70, %72 : vector<288x1xi1>
    %cst_43 = arith.constant 0.000000e+00 : f32
    %74 = vector.shape_cast %73 : vector<288x1xi1> to vector<288x1xi1>
    %75 = vector.broadcast %74 : vector<288x1xi1> to vector<288x128xi1>
    %76 = vector.broadcast %cst_43 : f32 to vector<288x128xf32>
    %77 = arith.select %75, %51, %76 : vector<288x128xi1>, vector<288x128xf32>
    %cst_44 = arith.constant 0.000000e+00 : bf16
    %78 = vector.broadcast %cst_44 : bf16 to vector<40x128xbf16>
    %c0_45 = arith.constant 0 : index
    %c0_46 = arith.constant 0 : index
    %79 = vector.load %arg9[%c0_45, %c0_46] : memref<352x128xbf16, #tpu.memory_space<vmem>>, vector<40x128xbf16>
    tpu.vector_store %arg9[%c0_45, %c0_46], %78 {strides = array<i32>} : memref<352x128xbf16, #tpu.memory_space<vmem>>, vector<40x128xbf16>,
    %cst_47 = arith.constant 0.000000e+00 : bf16
    %80 = vector.broadcast %cst_47 : bf16 to vector<24x128xbf16>
    %c328 = arith.constant 328 : index
    %c0_48 = arith.constant 0 : index
    %81 = vector.load %arg9[%c328, %c0_48] : memref<352x128xbf16, #tpu.memory_space<vmem>>, vector<24x128xbf16>
    tpu.vector_store %arg9[%c328, %c0_48], %80 {strides = array<i32>} : memref<352x128xbf16, #tpu.memory_space<vmem>>, vector<24x128xbf16>,
    %82 = arith.truncf %77 : vector<288x128xf32> to vector<288x128xbf16>
    %c40_49 = arith.constant 40 : index
    %c0_50 = arith.constant 0 : index
    %83 = vector.load %arg9[%c40_49, %c0_50] : memref<352x128xbf16, #tpu.memory_space<vmem>>, vector<288x128xbf16>
    tpu.vector_store %arg9[%c40_49, %c0_50], %82 {strides = array<i32>} : memref<352x128xbf16, #tpu.memory_space<vmem>>, vector<288x128xbf16>,
    %c21_51 = arith.constant 21 : index
    %c0_52 = arith.constant 0 : index
    %84 = vector.load %arg9[%c21_51, %c0_52] : memref<352x128xbf16, #tpu.memory_space<vmem>>, vector<288x128xbf16>
    %c22_53 = arith.constant 22 : index
    %c0_54 = arith.constant 0 : index
    %85 = vector.load %arg9[%c22_53, %c0_54] : memref<352x128xbf16, #tpu.memory_space<vmem>>, vector<288x128xbf16>
    %c23_55 = arith.constant 23 : index
    %c0_56 = arith.constant 0 : index
    %86 = vector.load %arg9[%c23_55, %c0_56] : memref<352x128xbf16, #tpu.memory_space<vmem>>, vector<288x128xbf16>
    %87 = tpu.concatenate %84, %85, %86 in 1 : vector<288x128xbf16>, vector<288x128xbf16>, vector<288x128xbf16> -> vector<288x384xbf16>
    %c0_57 = arith.constant 0 : index
    %c0_58 = arith.constant 0 : index
    %88 = vector.load %arg4[%c0_57, %c0_58] : memref<1152x128xbf16, #tpu.memory_space<vmem>>, vector<384x128xbf16>
    %cst_59 = arith.constant dense<0.000000e+00> : vector<288x128xf32>
    %89 = tpu.matmul %87, %88, %cst_59 {dimension_numbers = #tpu.dot_dimension_numbers<[1], [0], [0], [1], [0, 0, 1, 1], [], []>} : vector<288x384xbf16>, vector<384x128xbf16>, vector<288x128xf32> -> vector<288x128xf32>
    %c39_60 = arith.constant 39 : index
    %c0_61 = arith.constant 0 : index
    %90 = vector.load %arg9[%c39_60, %c0_61] : memref<352x128xbf16, #tpu.memory_space<vmem>>, vector<288x128xbf16>
    %c40_62 = arith.constant 40 : index
    %c0_63 = arith.constant 0 : index
    %91 = vector.load %arg9[%c40_62, %c0_63] : memref<352x128xbf16, #tpu.memory_space<vmem>>, vector<288x128xbf16>
    %c41_64 = arith.constant 41 : index
    %c0_65 = arith.constant 0 : index
    %92 = vector.load %arg9[%c41_64, %c0_65] : memref<352x128xbf16, #tpu.memory_space<vmem>>, vector<288x128xbf16>
    %93 = tpu.concatenate %90, %91, %92 in 1 : vector<288x128xbf16>, vector<288x128xbf16>, vector<288x128xbf16> -> vector<288x384xbf16>
    %c384_66 = arith.constant 384 : index
    %c0_67 = arith.constant 0 : index
    %94 = vector.load %arg4[%c384_66, %c0_67] : memref<1152x128xbf16, #tpu.memory_space<vmem>>, vector<384x128xbf16>
    %cst_68 = arith.constant dense<0.000000e+00> : vector<288x128xf32>
    %95 = tpu.matmul %93, %94, %cst_68 {dimension_numbers = #tpu.dot_dimension_numbers<[1], [0], [0], [1], [0, 0, 1, 1], [], []>} : vector<288x384xbf16>, vector<384x128xbf16>, vector<288x128xf32> -> vector<288x128xf32>
    %96 = arith.addf %89, %95 : vector<288x128xf32>
    %c57_69 = arith.constant 57 : index
    %c0_70 = arith.constant 0 : index
    %97 = vector.load %arg9[%c57_69, %c0_70] : memref<352x128xbf16, #tpu.memory_space<vmem>>, vector<288x128xbf16>
    %c58_71 = arith.constant 58 : index
    %c0_72 = arith.constant 0 : index
    %98 = vector.load %arg9[%c58_71, %c0_72] : memref<352x128xbf16, #tpu.memory_space<vmem>>, vector<288x128xbf16>
    %c59_73 = arith.constant 59 : index
    %c0_74 = arith.constant 0 : index
    %99 = vector.load %arg9[%c59_73, %c0_74] : memref<352x128xbf16, #tpu.memory_space<vmem>>, vector<288x128xbf16>
    %100 = tpu.concatenate %97, %98, %99 in 1 : vector<288x128xbf16>, vector<288x128xbf16>, vector<288x128xbf16> -> vector<288x384xbf16>
    %c768 = arith.constant 768 : index
    %c0_75 = arith.constant 0 : index
    %101 = vector.load %arg4[%c768, %c0_75] : memref<1152x128xbf16, #tpu.memory_space<vmem>>, vector<384x128xbf16>
    %cst_76 = arith.constant dense<0.000000e+00> : vector<288x128xf32>
    %102 = tpu.matmul %100, %101, %cst_76 {dimension_numbers = #tpu.dot_dimension_numbers<[1], [0], [0], [1], [0, 0, 1, 1], [], []>} : vector<288x384xbf16>, vector<384x128xbf16>, vector<288x128xf32> -> vector<288x128xf32>
    %103 = arith.addf %96, %102 : vector<288x128xf32>
    %c0_77 = arith.constant 0 : index
    %c0_78 = arith.constant 0 : index
    %104 = vector.load %arg5[%c0_77, %c0_78] : memref<1x128xf32, #tpu.memory_space<vmem>>, vector<1x128xf32>
    %105 = vector.broadcast %104 : vector<1x128xf32> to vector<288x128xf32>
    %106 = arith.addf %103, %105 : vector<288x128xf32>
    %c0_79 = arith.constant 0 : index
    %c40_80 = arith.constant 40 : index
    %c0_81 = arith.constant 0 : index
    %107 = vector.load %arg1[%c0_79, %c40_80, %c0_81] : memref<1x352x64xbf16, #tpu.memory_space<vmem>>, vector<1x288x64xbf16>
    %108 = vector.shape_cast %107 : vector<1x288x64xbf16> to vector<288x64xbf16>
    %c0_82 = arith.constant 0 : index
    %c0_83 = arith.constant 0 : index
    %109 = vector.load %arg6[%c0_82, %c0_83] : memref<64x128xbf16, #tpu.memory_space<vmem>>, vector<64x128xbf16>
    %cst_84 = arith.constant dense<0.000000e+00> : vector<288x128xf32>
    %110 = tpu.matmul %108, %109, %cst_84 {dimension_numbers = #tpu.dot_dimension_numbers<[1], [0], [0], [1], [0, 0, 1, 1], [], []>} : vector<288x64xbf16>, vector<64x128xbf16>, vector<288x128xf32> -> vector<288x128xf32>
    %c0_85 = arith.constant 0 : index
    %c0_86 = arith.constant 0 : index
    %111 = vector.load %arg7[%c0_85, %c0_86] : memref<1x128xf32, #tpu.memory_space<vmem>>, vector<1x128xf32>
    %112 = vector.broadcast %111 : vector<1x128xf32> to vector<288x128xf32>
    %113 = arith.addf %110, %112 : vector<288x128xf32>
    %114 = arith.addf %106, %113 : vector<288x128xf32>
    %c0_87 = arith.constant 0 : index
    %c0_88 = arith.constant 0 : index
    %c0_89 = arith.constant 0 : index
    %115 = vector.load %arg8[%c0_87, %c0_88, %c0_89] : memref<1x288x128xf32, #tpu.memory_space<vmem>>, vector<1x288x128xf32>
    %116 = vector.shape_cast %115 : vector<1x288x128xf32> to vector<288x128xf32>
    %117 = vector.shape_cast %114 : vector<288x128xf32> to vector<1x288x128xf32>
    tpu.vector_store %arg8[%c0_87, %c0_88, %c0_89], %117 {strides = array<i32>} : memref<1x288x128xf32, #tpu.memory_space<vmem>>, vector<1x288x128xf32>,
    return
  }
  func.func @transform_0(%arg0: i32) -> (i32, i32, i32) {
    %c0_i32 = arith.constant 0 : i32
    %c0_i32_0 = arith.constant 0 : i32
    %c0_i32_1 = arith.constant 0 : i32
    return %arg0, %c0_i32, %c0_i32_0 : i32, i32, i32
  }
  func.func @transform_1(%arg0: i32) -> (i32, i32) {
    %c0_i32 = arith.constant 0 : i32
    %c0_i32_0 = arith.constant 0 : i32
    %c0_i32_1 = arith.constant 0 : i32
    return %c0_i32, %c0_i32_0 : i32, i32
  }
  func.func @transform_2(%arg0: i32) -> (i32, i32) {
    %c0_i32 = arith.constant 0 : i32
    %c0_i32_0 = arith.constant 0 : i32
    %c0_i32_1 = arith.constant 0 : i32
    return %c0_i32, %c0_i32_0 : i32, i32
  }
  func.func @transform_3(%arg0: i32) -> (i32, i32) {
    %c0_i32 = arith.constant 0 : i32
    %c0_i32_0 = arith.constant 0 : i32
    %c0_i32_1 = arith.constant 0 : i32
    return %c0_i32, %c0_i32_0 : i32, i32
  }
  func.func @transform_4(%arg0: i32) -> (i32, i32) {
    %c0_i32 = arith.constant 0 : i32
    %c0_i32_0 = arith.constant 0 : i32
    %c0_i32_1 = arith.constant 0 : i32
    return %c0_i32, %c0_i32_0 : i32, i32
  }
  func.func @transform_5(%arg0: i32) -> (i32, i32) {
    %c0_i32 = arith.constant 0 : i32
    %c0_i32_0 = arith.constant 0 : i32
    %c0_i32_1 = arith.constant 0 : i32
    return %c0_i32, %c0_i32_0 : i32, i32
  }
  func.func @transform_6(%arg0: i32) -> (i32, i32) {
    %c0_i32 = arith.constant 0 : i32
    %c0_i32_0 = arith.constant 0 : i32
    %c0_i32_1 = arith.constant 0 : i32
    return %c0_i32, %c0_i32_0 : i32, i32
  }
  func.func @transform_7(%arg0: i32) -> (i32, i32, i32) {
    %c0_i32 = arith.constant 0 : i32
    %c0_i32_0 = arith.constant 0 : i32
    %c0_i32_1 = arith.constant 0 : i32
    return %arg0, %c0_i32, %c0_i32_0 : i32, i32, i32
  }
}

</mosaic_0001>

<bundles_post_ra>
// kernel: resblk_forward.1
= control target key start
LH: loop header
LB: loop body
LE: loop exit
PB: predicated region body
PF: predicated region fallthrough
CT: control target
= control target key end

     0   :  { %s11328_s24 = smov 0   ;;  %s16569_s0 = inlined_call_operand.vmem [shape: bf16[2,352,64], index: 0, kind: input, shape index: {}]   ;;  %s16570_s1 = inlined_call_operand.vmem [shape: bf16[576,128], index: 1, kind: input, shape index: {}]   ;;  %s16571_s2 = inlined_call_operand.vmem [shape: f32[1,128], index: 2, kind: input, shape index: {}]   ;;  %s16572_s3 = inlined_call_operand.vmem [shape: bf16[1152,128], index: 3, kind: input, shape index: {}]   ;;  %s16573_s4 = inlined_call_operand.vmem [shape: f32[1,128], index: 4, kind: input, shape index: {}]   ;;  %s16574_s5 = inlined_call_operand.vmem [shape: bf16[64,128], index: 5, kind: input, shape index: {}]   ;;  %s16575_s6 = inlined_call_operand.vmem [shape: f32[1,128], index: 6, kind: input, shape index: {}]   ;;  %s16576_s7 = inlined_call_operand.vmem [shape: f32[2,288,128], index: 7, kind: output, shape index: {}]  }
   0x1 LB: > { %s9529_s25 = sadd.s32 4294967295, %s11285_s24   ;;  %p9533_p0 = scmp.ge.s32.totalorder %s11285_s24, 1  ;;  %s11285_s24 = sphi %s11328_s24, %s17_s24  }
   0x2   : > { %p237_p1 = scmp.lt.s32.totalorder %s11285_s24, 3 }
   0x4   : > { %p238_p2 = pnand %p9533_p0, %p237_p1 }
   0x6   : > { %241 = sbr.rel (%p238_p2) target bundleno = 1869 (0x74d), region = 48 }
   0xb   : > { %v10538_v0 = vld [vmem:[%s16570_s1 + $0x38] sm:$0xff]  ;;  %p269_p3 = scmp.lt.s32.totalorder %s9529_s25, 1  ;;  %v10537_v3 = vld [vmem:[%s16570_s1 + $0x30] sm:$0xff]  ;;  %v10536_v6 = vld [vmem:[%s16570_s1 + $0x28] sm:$0xff]  ;;  %vm427_vm0 = vcmask 1044480   ;;  %vm489_vm1 = vcmask 523264  }
   0xc   : > { %v11342_v1 = vld [vmem:[%s16570_s1 + $0x18] sm:$0xff]  ;;  %548 = vmatpush.bf16.msra.mxu0 %v10538_v0  ;;  %11202 = vmatpush.bf16.msra.mxu3 %v10538_v0  ;;  %v11359_v4 = vld [vmem:[%s16570_s1 + $0x10] sm:$0xff]  ;;  %v11373_v7 = vld [vmem:[%s16570_s1 + $0x8] sm:$0xff]  ;;  %vm1006_vm2 = vsmask.f32 4352  ;;  %vm3076_vm5 = vcmask 1046528  }
   0xd   : > { %v11347_v2 = vld [vmem:[%s16570_s1 + $0x58] sm:$0xff]  ;;  %s17275_s25 = smov (!%p269_p3, %s9529_s25), 1  ;;  %899 = vmatpush.bf16.msra.mxu1 %v11342_v1  ;;  %v11364_v5 = vld [vmem:[%s16570_s1 + $0x50] sm:$0xff]  ;;  %v11378_v8 = vld [vmem:[%s16570_s1 + $0x48] sm:$0xff]  ;;  %vm646_vm3 = vsmask.f32 5376 }
   0xe   : > { %1174 = vmatpush.bf16.msra.mxu2 %v11347_v2  ;;  %s11214_s15 = smul.u32 176, %s17275_s25  ;;  %v10535_v20 = vld [vmem:[%s16570_s1 + $0x20] sm:$0xff]  ;;  %v10550_v32 = vld [vmem:[%s16570_s1 + $0x98] sm:$0xff]  ;;  %vm16634_vm4 = vsmask.f32 7424 }
   0xf   : > { %v10531_v25 = vld [vmem:[%s16570_s1] sm:$0xff]  ;;  %vm3339_vm6 = vsmask.f32 6400  ;;  %s11215_s22 = smul.u32 288, %s17275_s25 }
  0x10   : > { %549 = vmatpush.bf16.msra.mxu0 %v10537_v3  ;;  %11203 = vmatpush.bf16.msra.mxu3 %v10537_v3  ;;  %s11383_s26 = scalar_lea.vmem %s16569_s0, %s11214_s15  ;;  %v11415_v26 = vld [vmem:[%s16570_s1 + $0x40] sm:$0xff] }
  0x11   : > { %900 = vmatpush.bf16.msra.mxu1 %v11359_v4  ;;  %v281_v9 = vld [vmem:[%s11383_s26 + $0xc] sm:$0xf]  ;;  %v11389_v10 = vld [vmem:[%s11383_s26 + $0x10] sm:$0xff]  ;;  %v325_v11 = vld [vmem:[%s11383_s26 + $0x8] sm:$0x8]  ;;  %s16348_s28 = scalar_lea.vmem %s16576_s7, %s11215_s22 }
  0x12   : > { %1175 = vmatpush.bf16.msra.mxu2 %v11364_v5  ;;  %v371_v12 = vunpack.c.l.b16 %v325_v11  ;;  %v372_v13 = vunpack.c.l.b16 %v281_v9  ;;  %v11393_v14 = vld [vmem:[%s11383_s26 + $0x78] sm:$0xff]  ;;  %v11396_v15 = vld [vmem:[%s11383_s26 + $0x80] sm:$0xff]  ;;  %v280_v16 = vld [vmem:[%s11383_s26 + $0x8] sm:$0xc]  ;;  %v656_v18 = vshrl.u32 %v11389_v10, 16  ;;  %v659_v19 = vshll.u32 %v11389_v10, 16 }
  0x13   : > { %v644_v17 = vunpack.c.l.b16 %v280_v16  ;;  %v429_v22 = vrot.slane %v11389_v10, 3  ;;  %v455_v23 = vrot.slane %v11393_v14, 3  ;;  %v457_v24 = vrot.slane %v11396_v15, 3  ;;  %v10515_v47 = vld [vmem:[%s11383_s26 + $0x18] sm:$0xff]  ;;  %v11435_v53 = vld [vmem:[%s11383_s26 + $0x88] sm:$0xff] }
  0x14   : > { %550 = vmatpush.bf16.msra.mxu0 %v10536_v6  ;;  %11204 = vmatpush.bf16.msra.mxu3 %v10536_v6  ;;  %v408_v21 = vpack.c.b16 %v372_v13, %v371_v12  ;;  %v658_v28 = vrot.slane %v656_v18, 2  ;;  %v661_v29 = vrot.slane %v659_v19, 3  ;;  %v1015_v30 = vrot.slane %v656_v18, 3  ;;  %v10549_v6 = vld [vmem:[%s16570_s1 + $0x90] sm:$0xff] }
  0x15   : > { %901 = vmatpush.bf16.msra.mxu1 %v11373_v7  ;;  %v645_v27 = vpack.c.b16 %v372_v13, %v644_v17  ;;  %v1016_v37 = vrot.slane %v659_v19, 4  ;;  %v458_v39 = vsel %vm427_vm0, %v455_v23, %v457_v24  ;;  %v665_v51 = vshrl.u32 %v10515_v47, 16 }
  0x16   : > { %1176 = vmatpush.bf16.msra.mxu2 %v11378_v8  ;;  %v428_v31 = vrot.slane %v408_v21, 3  ;;  %v1008_v33 = vshrl.u32 %v408_v21, 16  ;;  %v1011_v34 = vshll.u32 %v408_v21, 16  ;;  %v662_v44 = vor.u32 %v661_v29, %v658_v28 }
  0x17   : > { %v648_v35 = vshrl.u32 %v645_v27, 16  ;;  %v651_v36 = vshll.u32 %v645_v27, 16  ;;  %v1017_v45 = vor.u32 %v1016_v37, %v1015_v30  ;;  %v668_v52 = vshll.u32 %v10515_v47, 16 }
  0x18   : > { %551 = vmatpush.bf16.msra.mxu0 %v10535_v20  ;;  %11205 = vmatpush.bf16.msra.mxu3 %v10535_v20  ;;  %v430_v38 = vsel %vm427_vm0, %v428_v31, %v429_v22  ;;  %v1010_v40 = vrot.slane %v1008_v33, 3  ;;  %v1013_v41 = vrot.slane %v1011_v34, 4  ;;  %v1019_v54 = vrot.slane %v665_v51, 3  ;;  %v316_v20 = vld [vmem:[%s11383_s26 + $0x98] sm:$0x7] }
  0x19   : > { %902 = vmatpush.bf16.msra.mxu1 %v10531_v25  ;;  %v650_v42 = vrot.slane %v648_v35, 2  ;;  %v653_v43 = vrot.slane %v651_v36, 3  ;;  %v1020_v55 = vrot.slane %v668_v52, 4  ;;  %v667_v56 = vrot.slane %v665_v51, 2 }
  0x1a   : > { %1177 = vmatpush.bf16.msra.mxu2 %v11415_v26  ;;  %v1014_v46 = vor.u32 %v1013_v41, %v1010_v40  ;;  %v670_v57 = vrot.slane %v668_v52, 3  ;;  %v431_v58 = vrot.slane %v10515_v47, 3  ;;  %v459_v59 = vrot.slane %v11435_v53, 3 }
  0x1b   : > { %9620 = vmatmul.msk.bf16.vlgmr.msra.gmra.mxu0 %vm489_vm1, %v430_v38  ;;  %9634 = vmatmul.msk.bf16.vlgmr.msra.gmra.mxu3 %vm489_vm1, %v458_v39  ;;  %v654_v48 = vor.u32 %v653_v43, %v650_v42  ;;  %v1021_v60 = vor.u32 %v1020_v55, %v1019_v54  ;;  %v10518_v39 = vld [vmem:[%s11383_s26 + $0x30] sm:$0xff]  ;;  %v773_v41 = vshrl.u32 %v11393_v14, 16  ;;  %v776_v42 = vshll.u32 %v11393_v14, 16 }
  0x1c   : > { %1934 = vmatpush.bf16.msrb.mxu0 %v10550_v32  ;;  %11206 = vmatpush.bf16.msrb.mxu3 %v11342_v1  ;;  %v1018_v49 = vsel %vm1006_vm2, %v1014_v46, %v1017_v45  ;;  %v671_v61 = vor.u32 %v670_v57, %v667_v56  ;;  %v432_v62 = vsel %vm427_vm0, %v429_v22, %v431_v58  ;;  %v10516_v1 = vld [vmem:[%s11383_s26 + $0x20] sm:$0xff]  ;;  %v10517_v22 = vld [vmem:[%s11383_s26 + $0x28] sm:$0xff]  ;;  %v782_v43 = vshrl.u32 %v11396_v15, 16 }
  0x1d   : > { %v663_v50 = vsel %vm646_vm3, %v654_v48, %v662_v44  ;;  %9688 = vmatmul.msk.bf16.vlgmr.msra.gmra.mxu2 %vm489_vm1, %v1018_v49  ;;  %v460_v63 = vsel %vm427_vm0, %v457_v24, %v459_v59  ;;  %v1022_v0 = vsel %vm1006_vm2, %v1017_v45, %v1021_v60  ;;  %v433_v12 = vrot.slane %v10516_v1, 3 }
  0x1e   : > { %9654 = vmatmul.msk.bf16.vlgmr.msra.gmra.mxu1 %vm489_vm1, %v663_v50  ;;  %v672_v3 = vsel %vm646_vm3, %v662_v44, %v671_v61  ;;  %v407_v24 = vunpack.c.l.b16 %v316_v20  ;;  %v435_v32 = vrot.slane %v10517_v22, 3  ;;  %v785_v44 = vshll.u32 %v11396_v15, 16 }
  0x1f   : > { %v434_v18 = vsel %vm427_vm0, %v431_v58, %v433_v12  ;;  %v692_v45 = vshrl.u32 %v10518_v39, 16  ;;  %v695_v46 = vshll.u32 %v10518_v39, 16  ;;  %v775_v47 = vrot.slane %v773_v41, 2 }
  0x20   : > { %11207 = vmatpush.bf16.msrb.mxu3 %v11359_v4  ;;  %v677_v4 = vshll.u32 %v10516_v1, 16  ;;  %1935 = vmatpush.bf16.msrb.mxu0 %v10549_v6  ;;  %v11469_v27 = vpack.c.b16 %v407_v24, %v407_v24  ;;  %v436_v36 = vsel %vm427_vm0, %v433_v12, %v435_v32  ;;  %v778_v48 = vrot.slane %v776_v42, 3 }
  0x21   : > { %v784_v49 = vrot.slane %v782_v43, 2  ;;  %v787_v50 = vrot.slane %v785_v44, 3  ;;  %v1031_v51 = vrot.slane %v692_v45, 3  ;;  %v1032_v52 = vrot.slane %v695_v46, 4 }
  0x22   : > { %v1024_v10 = vrot.slane %v677_v4, 4  ;;  %v679_v11 = vrot.slane %v677_v4, 3  ;;  %v463_v33 = vrot.slane %v11469_v27, 3  ;;  %v694_v54 = vrot.slane %v692_v45, 2 }
  0x23   : > { %v697_v55 = vrot.slane %v695_v46, 3  ;;  %v437_v56 = vrot.slane %v10518_v39, 3  ;;  %v11493_v57 = vor.u32 %v778_v48, %v775_v47  ;;  %v788_v58 = vor.u32 %v787_v50, %v784_v49 }
  0x24   : > { %11208 = vmatpush.bf16.msrb.mxu3 %v11373_v7  ;;  %v11454_v7 = vld [vmem:[%s11383_s26 + $0x90] sm:$0xff]  ;;  %v1067_v45 = vrot.slane %v773_v41, 3  ;;  %v1068_v46 = vrot.slane %v776_v42, 4  ;;  %v1071_v47 = vrot.slane %v782_v43, 3  ;;  %v1072_v48 = vrot.slane %v785_v44, 4 }
  0x25   : > { %v461_v13 = vrot.slane %v11454_v7, 3  ;;  %v809_v42 = vshrl.u32 %v11469_v27, 16  ;;  %v812_v15 = vshll.u32 %v11469_v27, 16 }
  0x27   : > { %v462_v19 = vsel %vm427_vm0, %v459_v59, %v461_v13  ;;  %v464_v37 = vsel %vm427_vm0, %v461_v13, %v463_v33  ;;  %v1033_v59 = vor.u32 %v1032_v52, %v1031_v51  ;;  %v11539_v51 = vor.u32 %v1068_v46, %v1067_v45 }
  0x28   : > { %11209 = vmatpush.bf16.msrb.mxu3 %v10531_v25  ;;  %v683_v25 = vshrl.u32 %v10517_v22, 16  ;;  %v1073_v52 = vor.u32 %v1072_v48, %v1071_v47 }
  0x2a   : > { %v1027_v28 = vrot.slane %v683_v25, 3  ;;  %v685_v30 = vrot.slane %v683_v25, 2  ;;  %v10548_v25 = vld [vmem:[%s16570_s1 + $0x88] sm:$0xff] }
  0x2b   : > { %9621 = vmatmul.msk.bf16.gmra.mxu0 %vm489_vm1, %v432_v62  ;;  %9635 = vmatmul.msk.bf16.gmra.mxu3 %vm489_vm1, %v460_v63  ;;  %v789_v62 = vsel %vm646_vm3, %v11493_v57, %v788_v58 }
  0x2c   : > { %11210 = vmatpush.bf16.msra.mxu3 %v11347_v2  ;;  %v674_v2 = vshrl.u32 %v10516_v1, 16  ;;  %1936 = vmatpush.bf16.msrb.mxu0 %v10548_v25 }
  0x2d   : > { %9689 = vmatmul.msk.bf16.gmra.mxu2 %vm489_vm1, %v1022_v0  ;;  %v10519_v0 = vld [vmem:[%s11383_s26 + $0x38] sm:$0xff] }
  0x2e   : > { %9655 = vmatmul.msk.bf16.gmra.mxu1 %vm489_vm1, %v672_v3  ;;  %v1023_v9 = vrot.slane %v674_v2, 3  ;;  %v791_v3 = vshrl.u32 %v11435_v53, 16  ;;  %v701_v4 = vshrl.u32 %v10519_v0, 16  ;;  %v704_v6 = vshll.u32 %v10519_v0, 16 }
  0x30   : > { %11211 = vmatpush.bf16.msra.mxu3 %v11364_v5  ;;  %v676_v5 = vrot.slane %v674_v2, 2  ;;  %v1025_v16 = vor.u32 %v1024_v10, %v1023_v9  ;;  %v794_v2 = vshll.u32 %v11435_v53, 16  ;;  %v793_v9 = vrot.slane %v791_v3, 2 }
  0x31   : > { %v703_v12 = vrot.slane %v701_v4, 2  ;;  %v706_v13 = vrot.slane %v704_v6, 3  ;;  %v1075_v27 = vrot.slane %v791_v3, 3 }
  0x32   : > { %v680_v17 = vor.u32 %v679_v11, %v676_v5  ;;  %v1026_v21 = vsel %vm1006_vm2, %v1021_v60, %v1025_v16  ;;  %v698_v60 = vor.u32 %v697_v55, %v694_v54  ;;  %v796_v10 = vrot.slane %v794_v2, 3  ;;  %v10521_v55 = vld [vmem:[%s11383_s26 + $0x48] sm:$0xff] }
  0x33   : > { %v1035_v5 = vrot.slane %v701_v4, 3  ;;  %v1036_v11 = vrot.slane %v704_v6, 4  ;;  %v719_v43 = vshrl.u32 %v10521_v55, 16  ;;  %v722_v44 = vshll.u32 %v10521_v55, 16 }
  0x34   : > { %11212 = vmatpush.bf16.msra.mxu3 %v11378_v8  ;;  %v681_v8 = vsel %vm646_vm3, %v671_v61, %v680_v17  ;;  %v438_v61 = vsel %vm427_vm0, %v435_v32, %v437_v56  ;;  %v1076_v6 = vrot.slane %v794_v2, 4 }
  0x38   : > { %11213 = vmatpush.bf16.msra.mxu3 %v11415_v26  ;;  %v686_v26 = vshll.u32 %v10517_v22, 16 }
  0x3a   : > { %v1028_v29 = vrot.slane %v686_v26, 4  ;;  %v688_v31 = vrot.slane %v686_v26, 3  ;;  %v800_v26 = vshrl.u32 %v11454_v7, 16 }
  0x3b   : > { %9622 = vmatmul.msk.bf16.gmra.mxu0 %vm489_vm1, %v434_v18  ;;  %9636 = vmatmul.msk.bf16.gmra.mxu3 %vm489_vm1, %v462_v19  ;;  %v1037_v18 = vor.u32 %v1036_v11, %v1035_v5  ;;  %v707_v19 = vor.u32 %v706_v13, %v703_v12  ;;  %v1077_v5 = vor.u32 %v1076_v6, %v1075_v27  ;;  %v10522_v12 = vld [vmem:[%s11383_s26 + $0x50] sm:$0xff] }
  0x3c   : > { %v1029_v34 = vor.u32 %v1028_v29, %v1027_v28  ;;  %v689_v35 = vor.u32 %v688_v31, %v685_v30  ;;  %v803_v28 = vshll.u32 %v11454_v7, 16  ;;  %v802_v31 = vrot.slane %v800_v26, 2 }
  0x3d   : > { %9690 = vmatmul.msk.bf16.gmra.mxu2 %vm489_vm1, %v1026_v21  ;;  %v1038_v22 = vsel %vm1006_vm2, %v1033_v59, %v1037_v18  ;;  %v708_v24 = vsel %vm646_vm3, %v698_v60, %v707_v19  ;;  %v728_v53 = vshrl.u32 %v10522_v12, 16  ;;  %v731_v3 = vshll.u32 %v10522_v12, 16 }
  0x3e   : > { %9656 = vmatmul.msk.bf16.gmra.mxu1 %vm489_vm1, %v681_v8  ;;  %v1030_v38 = vsel %vm1006_vm2, %v1025_v16, %v1029_v34  ;;  %v690_v40 = vsel %vm646_vm3, %v680_v17, %v689_v35  ;;  %v1034_v63 = vsel %vm1006_vm2, %v1029_v34, %v1033_v59  ;;  %v699_v1 = vsel %vm646_vm3, %v689_v35, %v698_v60  ;;  %v10520_v8 = vld [vmem:[%s11383_s26 + $0x40] sm:$0xff] }
  0x3f   : > { %v439_v16 = vrot.slane %v10519_v0, 3  ;;  %v797_v17 = vor.u32 %v796_v10, %v793_v9  ;;  %v710_v29 = vshrl.u32 %v10520_v8, 16  ;;  %v713_v30 = vshll.u32 %v10520_v8, 16 }
  0x40   : > { %v805_v32 = vrot.slane %v803_v28, 3  ;;  %v1043_v59 = vrot.slane %v719_v43, 3  ;;  %v1044_v60 = vrot.slane %v722_v44, 4  ;;  %v1047_v2 = vrot.slane %v728_v53, 3 }
  0x41   : > { %v440_v20 = vsel %vm427_vm0, %v437_v56, %v439_v16  ;;  %v798_v21 = vsel %vm646_vm3, %v788_v58, %v797_v17  ;;  %v712_v33 = vrot.slane %v710_v29, 2  ;;  %v715_v34 = vrot.slane %v713_v30, 3 }
  0x42   : > { %v1039_v35 = vrot.slane %v710_v29, 3  ;;  %v811_v56 = vrot.slane %v809_v42, 2  ;;  %v814_v58 = vrot.slane %v812_v15, 3  ;;  %v1080_v25 = vrot.slane %v803_v28, 4 }
  0x43   : > { %v716_v39 = vor.u32 %v715_v34, %v712_v33  ;;  %v11578_v34 = vld [vmem:[%s11383_s26 + $0x58] sm:$0xff] }
  0x44   : > { %v815_v0 = vor.u32 %v814_v58, %v811_v56 }
  0x45   : > { %v717_v41 = vsel %vm646_vm3, %v707_v19, %v716_v39  ;;  %v733_v19 = vrot.slane %v731_v3, 3 }
  0x4b   : > { %9623 = vmatmul.msk.bf16.gmra.mxu0 %vm489_vm1, %v436_v36  ;;  %9637 = vmatmul.msk.bf16.gmra.mxu3 %vm489_vm1, %v464_v37  ;;  %v1040_v36 = vrot.slane %v713_v30, 4  ;;  %v441_v37 = vrot.slane %v10520_v8, 3 }
  0x4d   : > { %9691 = vmatmul.msk.bf16.gmra.mxu2 %vm489_vm1, %v1030_v38  ;;  %v806_v38 = vor.u32 %v805_v32, %v802_v31  ;;  %v442_v49 = vsel %vm427_vm0, %v439_v16, %v441_v37  ;;  %v1078_v16 = vsel %vm1006_vm2, %v1073_v52, %v1077_v5  ;;  %v1074_v31 = vsel %vm1006_vm2, %v11539_v51, %v1073_v52 }
  0x4e   : > { %9657 = vmatmul.msk.bf16.gmra.mxu1 %vm489_vm1, %v690_v40  ;;  %v1041_v40 = vor.u32 %v1040_v36, %v1039_v35 }
  0x4f   : > { %v807_v50 = vsel %vm646_vm3, %v797_v17, %v806_v38  ;;  %v816_v10 = vsel %vm646_vm3, %v806_v38, %v815_v0  ;;  %v1048_v17 = vrot.slane %v731_v3, 4  ;;  %v740_v38 = vshll.u32 %v11578_v34, 16  ;;  %v10544_v3 = vld [vmem:[%s16570_s1 + $0x68] sm:$0xff] }
  0x50   : > { %v1042_v54 = vsel %vm1006_vm2, %v1037_v18, %v1041_v40  ;;  %v730_v18 = vrot.slane %v728_v53, 2 }
  0x51   : > { %v1052_v47 = vrot.slane %v740_v38, 4 }
  0x52   : > { %v734_v8 = vor.u32 %v733_v19, %v730_v18 }
  0x5b   : > { %9624 = vmatmul.msk.bf16.gmra.mxu0 %vm489_vm1, %v438_v61  ;;  %9668 = vmatmul.msk.bf16.vlgmr.msrb.gmra.mxu3 %vm489_vm1, %v789_v62  ;;  %v721_v61 = vrot.slane %v719_v43, 2  ;;  %v724_v62 = vrot.slane %v722_v44, 3 }
  0x5d   : > { %9692 = vmatmul.msk.bf16.gmra.mxu2 %vm489_vm1, %v1034_v63  ;;  %v443_v63 = vrot.slane %v10521_v55, 3  ;;  %v725_v4 = vor.u32 %v724_v62, %v721_v61  ;;  %v10545_v55 = vld [vmem:[%s16570_s1 + $0x70] sm:$0xff]  ;;  %v11609_v61 = vld [vmem:[%s11383_s26 + $0x60] sm:$0xff] }
  0x5e   : > { %9658 = vmatmul.msk.bf16.gmra.mxu1 %vm489_vm1, %v699_v1  ;;  %v1045_v1 = vor.u32 %v1044_v60, %v1043_v59  ;;  %v749_v27 = vshll.u32 %v11609_v61, 16 }
  0x5f   : > { %v444_v9 = vsel %vm427_vm0, %v441_v37, %v443_v63  ;;  %v726_v13 = vsel %vm646_vm3, %v716_v39, %v725_v4  ;;  %v735_v7 = vsel %vm646_vm3, %v725_v4, %v734_v8  ;;  %v737_v37 = vshrl.u32 %v11578_v34, 16 }
  0x60   : > { %v1046_v11 = vsel %vm1006_vm2, %v1041_v40, %v1045_v1  ;;  %v746_v4 = vshrl.u32 %v11609_v61, 16  ;;  %v751_v53 = vrot.slane %v749_v27, 3 }
  0x61   : > { %v1051_v46 = vrot.slane %v737_v37, 3 }
  0x63   : > { %v1053_v15 = vor.u32 %v1052_v47, %v1051_v46 }
  0x6b   : > { %9625 = vmatmul.msk.bf16.gmra.mxu0 %vm489_vm1, %v440_v20  ;;  %9669 = vmatmul.msk.bf16.gmra.mxu3 %vm489_vm1, %v798_v21  ;;  %v445_v20 = vrot.slane %v10522_v12, 3  ;;  %v10546_v21 = vld [vmem:[%s16570_s1 + $0x78] sm:$0xff]  ;;  %v1056_v12 = vrot.slane %v749_v27, 4 }
  0x6c   : > { %1695 = vmatpush.bf16.msrb.mxu3 %v10546_v21 }
  0x6d   : > { %9693 = vmatmul.msk.bf16.gmra.mxu2 %vm489_vm1, %v1038_v22  ;;  %v1049_v22 = vor.u32 %v1048_v17, %v1047_v2  ;;  %v446_v30 = vsel %vm427_vm0, %v443_v63, %v445_v20  ;;  %v449_v17 = vrot.slane %v11609_v61, 3 }
  0x6e   : > { %9659 = vmatmul.msk.bf16.gmra.mxu1 %vm489_vm1, %v708_v24  ;;  %v1079_v24 = vrot.slane %v800_v26, 3 }
  0x6f   : > { %v1050_v33 = vsel %vm1006_vm2, %v1045_v1, %v1049_v22  ;;  %v1054_v60 = vsel %vm1006_vm2, %v1049_v22, %v1053_v15  ;;  %v10543_v22 = vld [vmem:[%s16570_s1 + $0x60] sm:$0xff] }
  0x70   : > { %v11574_v32 = vor.u32 %v1080_v25, %v1079_v24  ;;  %1696 = vmatpush.bf16.msrb.mxu3 %v10545_v55  ;;  %v10572_v55 = vld [vmem:[%s16570_s1 + $0xb8] sm:$0xff] }
  0x71   : > { %2434 = vmatpush.bf16.msrb.mxu1 %v10572_v55 }
  0x72   : > { %v11585_v26 = vsel %vm1006_vm2, %v1077_v5, %v11574_v32  ;;  %v994_v5 = vld [vmem:[%s11383_s26 + $0x98] sm:$0xf] }
  0x73   : > { %v1004_v18 = vunpack.c.l.b16 %v994_v5 }
  0x74   : > { %1697 = vmatpush.bf16.msrb.mxu3 %v10544_v3  ;;  %v11682_v3 = vld [vmem:[%s11383_s26 + $0x70] sm:$0xff] }
  0x78   : > { %1698 = vmatpush.bf16.msrb.mxu3 %v10543_v22 }
  0x7b   : > { %9626 = vmatmul.msk.bf16.gmra.mxu0 %vm489_vm1, %v442_v49  ;;  %9670 = vmatmul.msk.bf16.gmra.mxu3 %vm489_vm1, %v807_v50  ;;  %v739_v49 = vrot.slane %v737_v37, 2  ;;  %v742_v50 = vrot.slane %v740_v38, 3 }
  0x7d   : > { %9694 = vmatmul.msk.bf16.gmra.mxu2 %vm489_vm1, %v1042_v54  ;;  %v447_v54 = vrot.slane %v11578_v34, 3  ;;  %v743_v43 = vor.u32 %v742_v50, %v739_v49  ;;  %v1305_v50 = vld [vmem:[%s11383_s26 + $0x10] sm:$0x8] }
  0x7e   : > { %9660 = vmatmul.msk.bf16.gmra.mxu1 %vm489_vm1, %v717_v41  ;;  %v10547_v41 = vld [vmem:[%s16570_s1 + $0x80] sm:$0xff] }
  0x7f   : > { %1937 = vmatpush.bf16.msrb.mxu0 %v10547_v41  ;;  %v448_v58 = vsel %vm427_vm0, %v445_v20, %v447_v54  ;;  %v744_v63 = vsel %vm646_vm3, %v734_v8, %v743_v43  ;;  %v450_v25 = vsel %vm427_vm0, %v447_v54, %v449_v17 }
  0x8b   : > { %9627 = vmatmul.msk.bf16.gmra.mxu0 %vm489_vm1, %v444_v9  ;;  %9671 = vmatmul.msk.bf16.gmra.mxu3 %vm489_vm1, %v816_v10 }
  0x8d   : > { %9695 = vmatmul.msk.bf16.gmra.mxu2 %vm489_vm1, %v1046_v11  ;;  %v1055_v11 = vrot.slane %v746_v4, 3 }
  0x8e   : > { %9661 = vmatmul.msk.bf16.gmra.mxu1 %vm489_vm1, %v726_v13 }
  0x8f   : > { %v1057_v20 = vor.u32 %v1056_v12, %v1055_v11 }
  0x98   : > { %v553_v29 = vpop.f32.mrf.mxu0 }
  0x9b   : > { %v904_v35 = vpop.f32.mrf.mxu1  ;;  %9628 = vmatmul.msk.bf16.gmra.mxu0 %vm489_vm1, %v446_v30  ;;  %9702 = vmatmul.msk.bf16.vlgmr.msra.gmra.mxu3 %vm489_vm1, %v1074_v31  ;;  %v1058_v31 = vsel %vm1006_vm2, %v1053_v15, %v1057_v20 }
  0x9c   : > { %v905_v28 = vadd.f32 %v904_v35, %v553_v29  ;;  %v1005_v29 = vpack.c.b16 %v1004_v18, %v1004_v18 }
  0x9d   : > { %9696 = vmatmul.msk.bf16.gmra.mxu2 %vm489_vm1, %v1050_v33  ;;  %v11637_v33 = vld [vmem:[%s11383_s26 + $0x68] sm:$0xff] }
  0x9e   : > { %9662 = vmatmul.msk.bf16.gmra.mxu1 %vm489_vm1, %v735_v7  ;;  %v11589_v36 = vpop.f32.mrf.mxu3  ;;  %v1087_v37 = vshll.u32 %v1005_v29, 16 }
  0xa0   : > { %v1179_v39 = vpop.f32.mrf.mxu2  ;;  %v555_v40 = vpop.f32.mrf.mxu0  ;;  %v1089_v49 = vrot.slane %v1087_v37, 4  ;;  %v10592_v37 = vld [vmem:[%s16570_s1 + $0xd0] sm:$0xff] }
  0xa1   : > { %v11593_v45 = vadd.f32 %v1179_v39, %v905_v28  ;;  %v1084_v28 = vshrl.u32 %v1005_v29, 16  ;;  %v755_v39 = vshrl.u32 %v11637_v33, 16  ;;  %v767_v29 = vshll.u32 %v11682_v3, 16 }
  0xa3   : > { %v906_v48 = vpop.f32.mrf.mxu1  ;;  %v1059_v41 = vrot.slane %v755_v39, 3 }
  0xa4   : > { %v907_v52 = vadd.f32 %v906_v48, %v555_v40  ;;  %v758_v40 = vshll.u32 %v11637_v33, 16  ;;  %v1086_v48 = vrot.slane %v1084_v28, 3 }
  0xa6   : > { %v11602_v42 = vpop.f32.mrf.mxu3  ;;  %v1060_v15 = vrot.slane %v758_v40, 4 }
  0xa8   : > { %v1181_v44 = vpop.f32.mrf.mxu2  ;;  %v558_v56 = vpop.f32.mrf.mxu0 }
  0xa9   : > { %v11605_v59 = vadd.f32 %v1181_v44, %v907_v52  ;;  %v11654_v52 = vld [vmem:[%s11383_s26 + $0x14] sm:$0xf]  ;;  %v757_v44 = vrot.slane %v755_v39, 2 }
  0xaa   : > { %v10571_v39 = vld [vmem:[%s16570_s1 + $0xb0] sm:$0xff] }
  0xab   : > { %v909_v62 = vpop.f32.mrf.mxu1  ;;  %9629 = vmatmul.msk.bf16.gmra.mxu0 %vm489_vm1, %v448_v58  ;;  %9703 = vmatmul.msk.bf16.gmra.mxu3 %vm489_vm1, %v1078_v16  ;;  %v748_v16 = vrot.slane %v746_v4, 2  ;;  %v1387_v58 = vunpack.c.l.b16 %v1305_v50  ;;  %v11665_v4 = vor.u32 %v1060_v15, %v1059_v41  ;;  %v453_v50 = vrot.slane %v11682_v3, 3  ;;  %v10597_v15 = vld [vmem:[%s16570_s1 + $0xf8] sm:$0xff] }
  0xac   : > { %v910_v0 = vadd.f32 %v909_v62, %v558_v56  ;;  %v760_v56 = vrot.slane %v758_v40, 3  ;;  %v451_v62 = vrot.slane %v11637_v33, 3  ;;  %2435 = vmatpush.bf16.msrb.mxu1 %v10571_v39  ;;  %3196 = vmatpush.bf16.msra.mxu3 %v10597_v15 }
  0xad   : > { %9697 = vmatmul.msk.bf16.gmra.mxu2 %vm489_vm1, %v1054_v60  ;;  %v752_v21 = vor.u32 %v751_v53, %v748_v16  ;;  %v1388_v60 = vunpack.c.l.b16 %v11654_v52  ;;  %v11677_v16 = vld [vmem:[%s11383_s26 + $0x18] sm:$0xff]   ;;  %v1062_v53 = vsel %vm1006_vm2, %v1057_v20, %v11665_v4  ;;  %v10937_v52 = vld [vmem:[%s11383_s26 + $0x30] sm:$0xff]  }
  0xae   : > { %9663 = vmatmul.msk.bf16.gmra.mxu1 %vm489_vm1, %v744_v63  ;;  %v11616_v1 = vpop.f32.mrf.mxu3  ;;  %v1090_v63 = vor.u32 %v1089_v49, %v1086_v48  ;;  %v11667_v27 = vor.u32 %v760_v56, %v757_v44  ;;  %v452_v11 = vsel %vm427_vm0, %v449_v17, %v451_v62  ;;  %v769_v48 = vrot.slane %v767_v29, 3  ;;  %v10570_v44 = vld [vmem:[%s16570_s1 + $0xa8] sm:$0xff] }
  0xaf   : > { %v753_v35 = vsel %vm646_vm3, %v743_v43, %v752_v21 }
  0xb0   : > { %v1184_v6 = vpop.f32.mrf.mxu2  ;;  %v560_v9 = vpop.f32.mrf.mxu0  ;;  %v1091_v12 = vsel %vm1006_vm2, %v11574_v32, %v1090_v63  ;;  %v762_v17 = vsel %vm646_vm3, %v752_v21, %v11667_v27  ;;  %2436 = vmatpush.bf16.msrb.mxu1 %v10570_v44  ;;  %v11767_v44 = vld [vmem:[%s11383_s26 + $0x24] sm:$0xff] }
  0xb1   : > { %v11620_v10 = vadd.f32 %v1184_v6, %v910_v0  ;;  %v1424_v6 = vpack.c.b16 %v1388_v60, %v1387_v58 }
  0xb3   : > { %v911_v13 = vpop.f32.mrf.mxu1  ;;  %v1444_v18 = vshrl.u32 %v1424_v6, 16  ;;  %v1447_v32 = vshll.u32 %v1424_v6, 16 }
  0xb4   : > { %v912_v2 = vadd.f32 %v911_v13, %v560_v9 }
  0xb5   : > { %v1446_v21 = vrot.slane %v1444_v18, 3 }
  0xb6   : > { %v11627_v19 = vpop.f32.mrf.mxu3 }
  0xb8   : > { %v1186_v8 = vpop.f32.mrf.mxu2  ;;  %v563_v24 = vpop.f32.mrf.mxu0 }
  0xb9   : > { %v11633_v30 = vadd.f32 %v1186_v8, %v912_v2  ;;  %v1452_v8 = vshrl.u32 %v11677_v16, 16 }
  0xbb   : > { %v914_v34 = vpop.f32.mrf.mxu1  ;;  %9630 = vmatmul.msk.bf16.gmra.mxu0 %vm489_vm1, %v450_v25  ;;  %9704 = vmatmul.msk.bf16.gmra.mxu3 %vm489_vm1, %v11585_v26  ;;  %v10593_v26 = vld [vmem:[%s16570_s1 + $0xd8] sm:$0xff]  ;;  %v764_v25 = vshrl.u32 %v11682_v3, 16  ;;  %v10569_v3 = vld [vmem:[%s16570_s1 + $0xa0] sm:$0xff] }
  0xbc   : > { %v915_v7 = vadd.f32 %v914_v34, %v563_v24  ;;  %2933 = vmatpush.bf16.msrb.mxu2 %v10593_v26  ;;  %v1455_v24 = vshll.u32 %v11677_v16, 16  ;;  %v1449_v34 = vrot.slane %v1447_v32, 4  ;;  %v1064_v26 = vrot.slane %v767_v29, 4  ;;  %2437 = vmatpush.bf16.msrb.mxu1 %v10569_v3 }
  0xbd   : > { %9698 = vmatmul.msk.bf16.gmra.mxu2 %vm489_vm1, %v1058_v31  ;;  %v1063_v40 = vrot.slane %v764_v25, 3 }
  0xbe   : > { %9664 = vmatmul.msk.bf16.gmra.mxu1 %vm489_vm1, %v753_v35  ;;  %v11645_v38 = vpop.f32.mrf.mxu3  ;;  %v1454_v35 = vrot.slane %v1452_v8, 3  ;;  %v1450_v55 = vor.u32 %v1449_v34, %v1446_v21  ;;  %v10601_v8 = vld [vmem:[%s16570_s1 + $0x118] sm:$0xff] }
  0xbf   : > { %v1065_v58 = vor.u32 %v1064_v26, %v1063_v40  ;;  %3507 = vmatpush.bf16.msra.mxu0 %v10601_v8  ;;  %v2565_v34 = vld [vmem:[%s11383_s26 + $0x1c] sm:$0xff]  }
  0xc0   : > { %v1189_v46 = vpop.f32.mrf.mxu2  ;;  %v565_v47 = vpop.f32.mrf.mxu0  ;;  %2934 = vmatpush.bf16.msrb.mxu2 %v10592_v37  ;;  %v2704_v3 = vshrl.u32 %v2565_v34, 16 }
  0xc1   : > { %v11656_v54 = vadd.f32 %v1189_v46, %v915_v7  ;;  %v1457_v7 = vrot.slane %v1455_v24, 4 }
  0xc3   : > { %v916_v43 = vpop.f32.mrf.mxu1  ;;  %v1458_v41 = vor.u32 %v1457_v7, %v1454_v35  ;;  %v11745_v35 = vld [vmem:[%s11383_s26 + $0x1c] sm:$0xf0] }
  0xc4   : > { %v917_v61 = vadd.f32 %v916_v43, %v565_v47  ;;  %v766_v47 = vrot.slane %v764_v25, 2  ;;  %v10591_v43 = vld [vmem:[%s16570_s1 + $0xc8] sm:$0xff] }
  0xc5   : > { %2935 = vmatpush.bf16.msrb.mxu2 %v10591_v43 }
  0xc6   : > { %v11663_v0 = vpop.f32.mrf.mxu3 }
  0xc8   : > { %v1191_v9 = vpop.f32.mrf.mxu2  ;;  %v568_v5 = vpop.f32.mrf.mxu0 }
  0xc9   : > { %v11674_v13 = vadd.f32 %v1191_v9, %v917_v61  ;;  %v770_v61 = vor.u32 %v769_v48, %v766_v47  ;;  %v454_v9 = vsel %vm427_vm0, %v451_v62, %v453_v50 }
  0xcb   : > { %v919_v2 = vpop.f32.mrf.mxu1  ;;  %9631 = vmatmul.msk.bf16.gmra.mxu0 %vm489_vm1, %v452_v11  ;;  %9705 = vmatmul.msk.bf16.gmra.mxu3 %vm489_vm1, %v1091_v12  ;;  %v10935_v12 = vld [vmem:[%s11383_s26 + $0x20] sm:$0xff]   ;;  %v771_v62 = vsel %vm646_vm3, %v11667_v27, %v770_v61  ;;  %v780_v14 = vsel %vm646_vm3, %v770_v61, %v11493_v57 }
  0xcc   : > { %v920_v22 = vadd.f32 %v919_v2, %v568_v5  ;;  %v1459_v5 = vsel %vm1006_vm2, %v1450_v55, %v1458_v41  ;;  %v1066_v2 = vsel %vm1006_vm2, %v11665_v4, %v1065_v58  ;;  %v1464_v32 = vshll.u32 %v10935_v12, 16 }
  0xcd   : > { %9699 = vmatmul.msk.bf16.gmra.mxu2 %vm489_vm1, %v1062_v53  ;;  %v10590_v53 = vld [vmem:[%s16570_s1 + $0xc0] sm:$0xff]  ;;  %v1070_v55 = vsel %vm1006_vm2, %v1065_v58, %v11539_v51  ;;  %v2706_v51 = vshll.u32 %v2565_v34, 16 }
  0xce   : > { %9665 = vmatmul.msk.bf16.gmra.mxu1 %vm489_vm1, %v762_v17  ;;  %v11692_v20 = vpop.f32.mrf.mxu3  ;;  %2936 = vmatpush.bf16.msrb.mxu2 %v10590_v53  ;;  %v10715_v53 = vunpack.c.l.b16 %v11677_v16 }
  0xd0   : > { %v1194_v31 = vpop.f32.mrf.mxu2  ;;  %v570_v33 = vpop.f32.mrf.mxu0 }
  0xd1   : > { %v11696_v28 = vadd.f32 %v1194_v31, %v920_v22  ;;  %v1461_v22 = vshrl.u32 %v10935_v12, 16  ;;  %v1466_v31 = vrot.slane %v1464_v32, 4 }
  0xd3   : > { %v921_v46 = vpop.f32.mrf.mxu1  ;;  %v1463_v29 = vrot.slane %v1461_v22, 3 }
  0xd4   : > { %v922_v49 = vadd.f32 %v921_v46, %v570_v33  ;;  %v456_v46 = vsel %vm427_vm0, %v453_v50, %v455_v23 }
  0xd5   : > { %v1467_v37 = vor.u32 %v1466_v31, %v1463_v29 }
  0xd6   : > { %v11714_v56 = vpop.f32.mrf.mxu3 }
  0xd7   : > { %v1468_v47 = vsel %vm1006_vm2, %v1458_v41, %v1467_v37 }
  0xd8   : > { %v1196_v63 = vpop.f32.mrf.mxu2  ;;  %v573_v6 = vpop.f32.mrf.mxu0 }
  0xd9   : > { %v11718_v11 = vadd.f32 %v1196_v63, %v922_v49  ;;  %v10936_v49 = vld [vmem:[%s11383_s26 + $0x28] sm:$0xff]   ;;  %v10552_v63 = vld [vmem:[%s11383_s26 + $0x1c] sm:$0xff] }
  0xda   : > { %v1470_v50 = vshrl.u32 %v10936_v49, 16  ;;  %v1473_v43 = vshll.u32 %v10936_v49, 16  ;;  %v1482_v49 = vshll.u32 %v10937_v52, 16 }
  0xdb   : > { %v924_v17 = vpop.f32.mrf.mxu1  ;;  %9632 = vmatmul.msk.bf16.gmra.mxu0 %vm489_vm1, %v454_v9  ;;  %9722 = vmatmul.msk.bf16.vlgmr.msrb.gmra.mxu3 %vm489_vm1, %v1459_v5 }
  0xdc   : > { %v925_v18 = vadd.f32 %v924_v17, %v573_v6  ;;  %v1472_v57 = vrot.slane %v1470_v50, 3  ;;  %v1475_v61 = vrot.slane %v1473_v43, 4  ;;  %v16589_v17 = vshll.u32 %v11767_v44, 16 }
  0xdd   : > { %9700 = vmatmul.msk.bf16.gmra.mxu2 %vm489_vm1, %v1066_v2  ;;  %v2708_v2 = vrot.slane %v2706_v51, 1  ;;  %v1484_v43 = vrot.slane %v1482_v49, 4  ;;  %v16586_v51 = vshrl.u32 %v11767_v44, 16 }
  0xde   : > { %9666 = vmatmul.msk.bf16.gmra.mxu1 %vm489_vm1, %v771_v62  ;;  %v974_v4 = vpop.f32.mrf.mxu3  ;;  %v1476_v8 = vor.u32 %v1475_v61, %v1472_v57  ;;  %v2713_v29 = vrot.slane %v16589_v17, 1 }
  0xdf   : > { %v11739_v24 = vadd.f32 %v974_v4, %v11589_v36 }
  0xe0   : > { %v1199_v27 = vpop.f32.mrf.mxu2  ;;  %v575_v25 = vpop.f32.mrf.mxu0 }
  0xe1   : > { %v11741_v33 = vadd.f32 %v1199_v27, %v925_v18  ;;  %v1834_v27 = vpack.c.b16 %v10715_v53, %v1388_v60 }
  0xe3   : > { %v926_v21 = vpop.f32.mrf.mxu1 }
  0xe4   : > { %v927_v7 = vadd.f32 %v926_v21, %v575_v25  ;;  %v2709_v25 = vor.u32 %v2708_v2, %v2704_v3  ;;  %v2717_v3 = vor.u32 %v16586_v51, %v2713_v29 }
  0xe6   : > { %v976_v39 = vpop.f32.mrf.mxu3  ;;  %v2714_v60 = vsel %vm16634_vm4, %v2709_v25, %v2713_v29  ;;  %v10938_v25 = vld [vmem:[%s11383_s26 + $0x38] sm:$0xff]  }
  0xe7   : > { %v11748_v40 = vadd.f32 %v976_v39, %v11602_v42  ;;  %v10551_v42 = vld [vmem:[%s11383_s26 + $0x14] sm:$0xff]  ;;  %v1477_v39 = vsel %vm1006_vm2, %v1467_v37, %v1476_v8 }
  0xe8   : > { %v1201_v36 = vpop.f32.mrf.mxu2  ;;  %v578_v26 = vpop.f32.mrf.mxu0  ;;  %v2207_v6 = vshll.u32 %v10551_v42, 16  ;;  %v2205_v18 = vshrl.u32 %v10551_v42, 16 }
  0xe9   : > { %v11754_v48 = vadd.f32 %v1201_v36, %v927_v7 }
  0xea   : > { %v2209_v22 = vrot.slane %v2207_v6, 1 }
  0xeb   : > { %v929_v15 = vpop.f32.mrf.mxu1  ;;  %9633 = vmatmul.msk.bf16.gmra.mxu0 %vm489_vm1, %v456_v46  ;;  %9723 = vmatmul.msk.bf16.gmra.mxu3 %vm489_vm1, %v1468_v47  ;;  %v1479_v47 = vshrl.u32 %v10937_v52, 16 }
  0xec   : > { %v930_v23 = vadd.f32 %v929_v15, %v578_v26  ;;  %v2210_v31 = vor.u32 %v2209_v22, %v2205_v18  ;;  %v11142_v18 = vld [vmem:[%s11383_s26 + $0x1c] sm:$0xff]  }
  0xed   : > { %9701 = vmatmul.msk.bf16.gmra.mxu2 %vm489_vm1, %v1070_v55  ;;  %v11795_v55 = vld [vmem:[%s11383_s26 + $0x2c] sm:$0xff]  ;;  %v1481_v50 = vrot.slane %v1479_v47, 3 }
  0xee   : > { %9667 = vmatmul.msk.bf16.gmra.mxu1 %vm489_vm1, %v780_v14  ;;  %v979_v41 = vpop.f32.mrf.mxu3  ;;  %v10553_v14 = vld [vmem:[%s11383_s26 + $0x24] sm:$0xff]  ;;  %v16584_v6 = vshll.u32 %v11795_v55, 16 }
  0xef   : > { %v11770_v58 = vadd.f32 %v979_v41, %v11616_v1  ;;  %v2212_v1 = vshll.u32 %v10552_v63, 16  ;;  %v2220_v57 = vshll.u32 %v10553_v14, 16  ;;  %v1485_v53 = vor.u32 %v1484_v43, %v1481_v50 }
  0xf0   : > { %v1204_v9 = vpop.f32.mrf.mxu2  ;;  %v580_v5 = vpop.f32.mrf.mxu0  ;;  %v2721_v2 = vrot.slane %v16584_v6, 1  ;;  %v2224_v50 = vshrl.u32 %v10553_v14, 16 }
  0xf1   : > { %v11773_v12 = vadd.f32 %v1204_v9, %v930_v23  ;;  %v2214_v21 = vrot.slane %v2212_v1, 1  ;;  %v2222_v1 = vrot.slane %v2220_v57, 1 }
  0xf2   : > { %v2722_v29 = vsel %vm16634_vm4, %v2717_v3, %v2721_v2  ;;  %v11144_v3 = vld [vmem:[%s11383_s26 + $0x24] sm:$0xff]  }
  0xf3   : > { %v931_v62 = vpop.f32.mrf.mxu1 }
  0xf4   : > { %v932_v32 = vadd.f32 %v931_v62, %v580_v5  ;;  %v2216_v5 = vshrl.u32 %v10552_v63, 16  ;;  %v1486_v63 = vsel %vm1006_vm2, %v1476_v8, %v1485_v53 }
  0xf6   : > { %v981_v4 = vpop.f32.mrf.mxu3  ;;  %v2218_v22 = vor.u32 %v2216_v5, %v2214_v21 }
  0xf7   : > { %v11782_v16 = vadd.f32 %v981_v4, %v11627_v19  ;;  %v2215_v19 = vsel %vm16634_vm4, %v2210_v31, %v2214_v21 }
  0xf8   : > { %v1206_v34 = vpop.f32.mrf.mxu2  ;;  %v583_v7 = vpop.f32.mrf.mxu0 }
  0xf9   : > { %v11785_v36 = vadd.f32 %v1206_v34, %v932_v32  ;;  %v1488_v34 = vshrl.u32 %v10938_v25, 16 }
  0xfb   : > { %v934_v26 = vpop.f32.mrf.mxu1  ;;  %9724 = vmatmul.msk.bf16.gmra.mxu3 %vm489_vm1, %v1477_v39  ;;  %9756 = vmatmul.msk.bf16.vlgmr.msrb.gmra.mxu0 %vm489_vm1, %v1834_v27  ;;  %v11824_v39 = vld [vmem:[%s11383_s26 + $0x34] sm:$0xff] }
  0xfc   : > { %v935_v46 = vadd.f32 %v934_v26, %v583_v7  ;;  %v1491_v7 = vshll.u32 %v10938_v25, 16  ;;  %v10939_v25 = vld [vmem:[%s11383_s26 + $0x40] sm:$0xff]  }
  0xfd   : > { %9964 = vmatmul.msk.bf16.vlgmr.msrb.gmra.mxu2 %vm489_vm1, %v2714_v60  ;;  %v10554_v60 = vld [vmem:[%s11383_s26 + $0x2c] sm:$0xff] }
  0xfe   : > { %9862 = vmatmul.msk.bf16.vlgmr.msrb.gmra.mxu1 %vm489_vm1, %v2215_v19  ;;  %v984_v37 = vpop.f32.mrf.mxu3  ;;  %v1493_v47 = vrot.slane %v1491_v7, 4  ;;  %v2228_v43 = vshll.u32 %v10554_v60, 16 }
  0xff   : > { %v11798_v15 = vadd.f32 %v984_v37, %v11645_v38  ;;  %v16585_v37 = vshrl.u32 %v11795_v55, 16 }
 0x100   : > { %v1209_v42 = vpop.f32.mrf.mxu2  ;;  %v585_v23 = vpop.f32.mrf.mxu0 }
 0x101   : > { %v11801_v41 = vadd.f32 %v1209_v42, %v935_v46  ;;  %v1490_v46 = vrot.slane %v1488_v34, 3  ;;  %v16580_v42 = vshll.u32 %v11824_v39, 16  ;;  %v2725_v57 = vor.u32 %v16585_v37, %v2721_v2  ;;  %v11856_v34 = vld [vmem:[%s11383_s26 + $0x3c] sm:$0xff] }
 0x103   : > { %v936_v9 = vpop.f32.mrf.mxu1  ;;  %v1494_v5 = vor.u32 %v1493_v47, %v1490_v46 }
 0x104   : > { %v937_v61 = vadd.f32 %v936_v9, %v585_v23 }
 0x105   : > { %v1495_v14 = vsel %vm1006_vm2, %v1485_v53, %v1494_v5  ;;  %v10596_v53 = vld [vmem:[%s16570_s1 + $0xf0] sm:$0xff] }
 0x106   : > { %v986_v38 = vpop.f32.mrf.mxu3  ;;  %3197 = vmatpush.bf16.msra.mxu3 %v10596_v53  ;;  %v10940_v53 = vld [vmem:[%s11383_s26 + $0x48] sm:$0xff]  }
 0x107   : > { %v11810_v62 = vadd.f32 %v986_v38, %v11663_v0  ;;  %v2223_v0 = vsel %vm16634_vm4, %v2218_v22, %v2222_v1  ;;  %v2230_v22 = vrot.slane %v2228_v43, 1  ;;  %v16578_v43 = vshll.u32 %v11856_v34, 16 }
 0x108   : > { %v1211_v32 = vpop.f32.mrf.mxu2  ;;  %v588_v4 = vpop.f32.mrf.mxu0 }
 0x109   : > { %v11814_v27 = vadd.f32 %v1211_v32, %v937_v61  ;;  %v2729_v61 = vrot.slane %v16580_v42, 1 }
 0x10b   : > { %v939_v31 = vpop.f32.mrf.mxu1  ;;  %9725 = vmatmul.msk.bf16.gmra.mxu3 %vm489_vm1, %v1486_v63  ;;  %9757 = vmatmul.msk.bf16.gmra.mxu0 %vm489_vm1, %v11142_v18  ;;  %v2226_v18 = vor.u32 %v2224_v50, %v2222_v1  ;;  %v2730_v2 = vsel %vm16634_vm4, %v2725_v57, %v2729_v61  ;;  %v16581_v50 = vshrl.u32 %v11824_v39, 16 }
 0x10c   : > { %v940_v21 = vadd.f32 %v939_v31, %v588_v4  ;;  %v1497_v31 = vshrl.u32 %v10939_v25, 16 }
 0x10d   : > { %9965 = vmatmul.msk.bf16.gmra.mxu2 %vm489_vm1, %v2722_v29 }
 0x10e   : > { %9863 = vmatmul.msk.bf16.gmra.mxu1 %vm489_vm1, %v2223_v0  ;;  %v989_v8 = vpop.f32.mrf.mxu3  ;;  %v1500_v0 = vshll.u32 %v10939_v25, 16  ;;  %v1499_v46 = vrot.slane %v1497_v31, 3 }
 0x10f   : > { %v11827_v52 = vadd.f32 %v989_v8, %v11692_v20  ;;  %v10555_v8 = vld [vmem:[%s11383_s26 + $0x34] sm:$0xff] }
 0x110   : > { %v1214_v26 = vpop.f32.mrf.mxu2  ;;  %v590_v19 = vpop.f32.mrf.mxu0  ;;  %v1502_v47 = vrot.slane %v1500_v0, 4  ;;  %v2236_v57 = vshll.u32 %v10555_v8, 16 }
 0x111   : > { %v11830_v49 = vadd.f32 %v1214_v26, %v940_v21 }
 0x113   : > { %v941_v23 = vpop.f32.mrf.mxu1 }
 0x114   : > { %v942_v9 = vadd.f32 %v941_v23, %v590_v19 }
 0x116   : > { %v991_v20 = vpop.f32.mrf.mxu3 }
 0x117   : > { %v11839_v38 = vadd.f32 %v991_v20, %v11714_v56  ;;  %v2231_v56 = vsel %vm16634_vm4, %v2226_v18, %v2230_v22  ;;  %v2232_v20 = vshrl.u32 %v10554_v60, 16  ;;  %v1503_v18 = vor.u32 %v1502_v47, %v1499_v46  ;;  %v11146_v60 = vld [vmem:[%s11383_s26 + $0x2c] sm:$0xff]   ;;  %v11888_v46 = vld [vmem:[%s11383_s26 + $0x44] sm:$0xff] }
 0x118   : > { %v1216_v32 = vpop.f32.mrf.mxu2  ;;  %v593_v4 = vpop.f32.mrf.mxu0 }
 0x119   : > { %v11843_v63 = vadd.f32 %v1216_v32, %v942_v9  ;;  %v1504_v31 = vsel %vm1006_vm2, %v1494_v5, %v1503_v18 }
 0x11b   : > { %v944_v29 = vpop.f32.mrf.mxu1  ;;  %9726 = vmatmul.msk.bf16.gmra.mxu3 %vm489_vm1, %v1495_v14  ;;  %9758 = vmatmul.msk.bf16.gmra.mxu0 %vm489_vm1, %v11144_v3  ;;  %v2737_v14 = vrot.slane %v16578_v43, 1 }
 0x11c   : > { %v945_v1 = vadd.f32 %v944_v29, %v593_v4  ;;  %v2733_v4 = vor.u32 %v16581_v50, %v2729_v61  ;;  %v2238_v29 = vrot.slane %v2236_v57, 1 }
 0x11d   : > { %9966 = vmatmul.msk.bf16.gmra.mxu2 %vm489_vm1, %v2730_v2  ;;  %v2234_v2 = vor.u32 %v2232_v20, %v2230_v22 }
 0x11e   : > { %9864 = vmatmul.msk.bf16.gmra.mxu1 %vm489_vm1, %v2231_v56  ;;  %v1249_v21 = vpop.f32.mrf.mxu3  ;;  %v2738_v61 = vsel %vm16634_vm4, %v2733_v4, %v2737_v14  ;;  %v16579_v4 = vshrl.u32 %v11856_v34, 16 }
 0x11f   : > { %v11859_v7 = vadd.f32 %v1249_v21, %v11739_v24  ;;  %v10600_v24 = vld [vmem:[%s16570_s1 + $0x110] sm:$0xff] }
 0x120   : > { %v1219_v26 = vpop.f32.mrf.mxu2  ;;  %v595_v19 = vpop.f32.mrf.mxu0  ;;  %3508 = vmatpush.bf16.msra.mxu0 %v10600_v24 }
 0x121   : > { %v11862_v23 = vadd.f32 %v1219_v26, %v945_v1  ;;  %v1506_v26 = vshrl.u32 %v10940_v53, 16 }
 0x123   : > { %v946_v9 = vpop.f32.mrf.mxu1 }
 0x124   : > { %v947_v3 = vadd.f32 %v946_v9, %v595_v19  ;;  %v1509_v19 = vshll.u32 %v10940_v53, 16  ;;  %v10556_v9 = vld [vmem:[%s11383_s26 + $0x3c] sm:$0xff] }
 0x126   : > { %v1251_v32 = vpop.f32.mrf.mxu3  ;;  %v1511_v24 = vrot.slane %v1509_v19, 4 }
 0x127   : > { %v11874_v25 = vadd.f32 %v1251_v32, %v11748_v40  ;;  %v2239_v40 = vsel %vm16634_vm4, %v2234_v2, %v2238_v29 }
 0x128   : > { %v1221_v56 = vpop.f32.mrf.mxu2  ;;  %v598_v1 = vpop.f32.mrf.mxu0 }
 0x129   : > { %v11878_v0 = vadd.f32 %v1221_v56, %v947_v3  ;;  %v1508_v3 = vrot.slane %v1506_v26, 3  ;;  %v2240_v56 = vshrl.u32 %v10555_v8, 16 }
 0x12b   : > { %v949_v21 = vpop.f32.mrf.mxu1  ;;  %9727 = vmatmul.msk.bf16.gmra.mxu3 %vm489_vm1, %v1504_v31  ;;  %9759 = vmatmul.msk.bf16.gmra.mxu0 %vm489_vm1, %v11146_v60  ;;  %v16577_v60 = vshll.u32 %v11888_v46, 16  ;;  %v1512_v53 = vor.u32 %v1511_v24, %v1508_v3  ;;  %v2242_v26 = vor.u32 %v2240_v56, %v2238_v29  ;;  %v10941_v3 = vld [vmem:[%s11383_s26 + $0x50] sm:$0xff]  }
 0x12c   : > { %v950_v22 = vadd.f32 %v949_v21, %v598_v1  ;;  %v2244_v1 = vshll.u32 %v10556_v9, 16  ;;  %v1518_v56 = vshll.u32 %v10941_v3, 16 }
 0x12d   : > { %9967 = vmatmul.msk.bf16.gmra.mxu2 %vm489_vm1, %v2738_v61  ;;  %v2741_v61 = vor.u32 %v16579_v4, %v2737_v14  ;;  %v2745_v21 = vrot.slane %v16577_v60, 1  ;;  %v1513_v8 = vsel %vm1006_vm2, %v1503_v18, %v1512_v53 }
 0x12e   : > { %9865 = vmatmul.msk.bf16.gmra.mxu1 %vm489_vm1, %v2239_v40  ;;  %v1254_v5 = vpop.f32.mrf.mxu3  ;;  %v2246_v19 = vrot.slane %v2244_v1, 1  ;;  %v11917_v1 = vld [vmem:[%s11383_s26 + $0x4c] sm:$0xff] }
 0x12f   : > { %v11891_v47 = vadd.f32 %v1254_v5, %v11770_v58  ;;  %v2746_v14 = vsel %vm16634_vm4, %v2741_v61, %v2745_v21  ;;  %16738 = vst [vmem:[#allocation3_spill] sm:$0xff] %v11917_v1 }
 0x130   : > { %v1224_v20 = vpop.f32.mrf.mxu2  ;;  %v600_v57 = vpop.f32.mrf.mxu0 }
 0x131   : > { %v11894_v32 = vadd.f32 %v1224_v20, %v950_v22  ;;  %v11148_v22 = vld [vmem:[%s11383_s26 + $0x34] sm:$0xff]  }
 0x133   : > { %v951_v2 = vpop.f32.mrf.mxu1 }
 0x134   : > { %v952_v31 = vadd.f32 %v951_v2, %v600_v57  ;;  %v1515_v2 = vshrl.u32 %v10941_v3, 16  ;;  %v16582_v3 = vshll.u32 %v11917_v1, 16 }
 0x136   : > { %v1256_v58 = vpop.f32.mrf.mxu3 }
 0x137   : > { %v11903_v40 = vadd.f32 %v1256_v58, %v11782_v16  ;;  %v2247_v16 = vsel %vm16634_vm4, %v2242_v26, %v2246_v19  ;;  %v10557_v58 = vld [vmem:[%s11383_s26 + $0x44] sm:$0xff] }
 0x138   : > { %v1226_v5 = vpop.f32.mrf.mxu2  ;;  %v603_v20 = vpop.f32.mrf.mxu0 }
 0x139   : > { %v11907_v57 = vadd.f32 %v1226_v5, %v952_v31 }
 0x13b   : > { %v954_v24 = vpop.f32.mrf.mxu1  ;;  %9728 = vmatmul.msk.bf16.gmra.mxu3 %vm489_vm1, %v1513_v8  ;;  %9760 = vmatmul.msk.bf16.gmra.mxu0 %vm489_vm1, %v11148_v22  ;;  %v1517_v22 = vrot.slane %v1515_v2, 3  ;;  %v1520_v8 = vrot.slane %v1518_v56, 4  ;;  %v2753_v2 = vrot.slane %v16582_v3, 1  ;;  %v11150_v56 = vld [vmem:[%s11383_s26 + $0x3c] sm:$0xff]  }
 0x13c   : > { %v955_v29 = vadd.f32 %v954_v24, %v603_v20  ;;  %v16583_v20 = vshrl.u32 %v11888_v46, 16  ;;  %v2248_v24 = vshrl.u32 %v10556_v9, 16 }
 0x13d   : > { %9968 = vmatmul.msk.bf16.gmra.mxu2 %vm489_vm1, %v2746_v14  ;;  %v1521_v43 = vor.u32 %v1520_v8, %v1517_v22  ;;  %v10942_v22 = vld [vmem:[%s11383_s26 + $0x58] sm:$0xff]  }
 0x13e   : > { %9866 = vmatmul.msk.bf16.gmra.mxu1 %vm489_vm1, %v2247_v16  ;;  %v1259_v18 = vpop.f32.mrf.mxu3  ;;  %v2252_v16 = vshll.u32 %v10557_v58, 16 }
 0x13f   : > { %v11920_v31 = vadd.f32 %v1259_v18, %v11798_v15  ;;  %v2749_v18 = vor.u32 %v16583_v20, %v2745_v21  ;;  %v1522_v9 = vsel %vm1006_vm2, %v1512_v53, %v1521_v43 }
 0x140   : > { %v1229_v61 = vpop.f32.mrf.mxu2  ;;  %v605_v5 = vpop.f32.mrf.mxu0  ;;  %v2254_v4 = vrot.slane %v2252_v16, 1  ;;  %v10558_v16 = vld [vmem:[%s11383_s26 + $0x4c] sm:$0xff] }
 0x141   : > { %v11923_v26 = vadd.f32 %v1229_v61, %v955_v29  ;;  %v2250_v61 = vor.u32 %v2248_v24, %v2246_v19  ;;  %v2754_v21 = vsel %vm16634_vm4, %v2749_v18, %v2753_v2  ;;  %v1527_v24 = vshll.u32 %v10942_v22, 16 }
 0x143   : > { %v956_v14 = vpop.f32.mrf.mxu1 }
 0x144   : > { %v957_v60 = vadd.f32 %v956_v14, %v605_v5  ;;  %v1524_v14 = vshrl.u32 %v10942_v22, 16 }
 0x146   : > { %v1261_v15 = vpop.f32.mrf.mxu3 }
 0x147   : > { %v11932_v29 = vadd.f32 %v1261_v15, %v11810_v62  ;;  %v2255_v62 = vsel %vm16634_vm4, %v2250_v61, %v2254_v4 }
 0x148   : > { %v1231_v42 = vpop.f32.mrf.mxu2  ;;  %v608_v50 = vpop.f32.mrf.mxu0 }
 0x149   : > { %16739 = vst [vmem:[#allocation4_spill] sm:$0xff] %v11932_v29  ;;  %v11936_v5 = vadd.f32 %v1231_v42, %v957_v60  ;;  %v11946_v42 = vld [vmem:[%s11383_s26 + $0x54] sm:$0xff] }
 0x14a   : > { %16740 = vst [vmem:[#allocation5_spill] sm:$0xff] %v11946_v42  ;;  %v16587_v22 = vshll.u32 %v11946_v42, 16 }
 0x14b   : > { %v959_v8 = vpop.f32.mrf.mxu1  ;;  %9729 = vmatmul.msk.bf16.gmra.mxu3 %vm489_vm1, %v1522_v9  ;;  %9761 = vmatmul.msk.bf16.gmra.mxu0 %vm489_vm1, %v11150_v56  ;;  %v1526_v56 = vrot.slane %v1524_v14, 3  ;;  %v1529_v9 = vrot.slane %v1527_v24, 4  ;;  %v11152_v24 = vld [vmem:[%s11383_s26 + $0x44] sm:$0xff]  }
 0x14c   : > { %v960_v19 = vadd.f32 %v959_v8, %v608_v50  ;;  %v16588_v50 = vshrl.u32 %v11917_v1, 16  ;;  %v2256_v8 = vshrl.u32 %v10557_v58, 16  ;;  %v2761_v14 = vrot.slane %v16587_v22, 1 }
 0x14d   : > { %9969 = vmatmul.msk.bf16.gmra.mxu2 %vm489_vm1, %v2754_v21  ;;  %v1530_v20 = vor.u32 %v1529_v9, %v1526_v56  ;;  %v10943_v56 = vld [vmem:[%s11383_s26 + $0x60] sm:$0xff]  }
 0x14e   : > { %9867 = vmatmul.msk.bf16.gmra.mxu1 %vm489_vm1, %v2255_v62  ;;  %v1264_v53 = vpop.f32.mrf.mxu3  ;;  %v2260_v62 = vshll.u32 %v10558_v16, 16 }
 0x14f   : > { %v11949_v60 = vadd.f32 %v1264_v53, %v11827_v52  ;;  %v2757_v53 = vor.u32 %v16588_v50, %v2753_v2  ;;  %v1531_v58 = vsel %vm1006_vm2, %v1521_v43, %v1530_v20 }
 0x150   : > { %v1234_v15 = vpop.f32.mrf.mxu2  ;;  %v610_v18 = vpop.f32.mrf.mxu0  ;;  %v2262_v6 = vrot.slane %v2260_v62, 1  ;;  %v10559_v62 = vld [vmem:[%s11383_s26 + $0x54] sm:$0xff] }
 0x151   : > { %16741 = vst [vmem:[#allocation6_spill] sm:$0xff] %v11949_v60  ;;  %v11952_v61 = vadd.f32 %v1234_v15, %v960_v19  ;;  %v2258_v15 = vor.u32 %v2256_v8, %v2254_v4  ;;  %v2762_v2 = vsel %vm16634_vm4, %v2757_v53, %v2761_v14  ;;  %v1536_v8 = vshll.u32 %v10943_v56, 16 }
 0x153   : > { %v961_v21 = vpop.f32.mrf.mxu1 }
 0x154   : > { %v962_v3 = vadd.f32 %v961_v21, %v610_v18  ;;  %v1533_v21 = vshrl.u32 %v10943_v56, 16 }
 0x156   : > { %v1266_v52 = vpop.f32.mrf.mxu3 }
 0x157   : > { %v11961_v19 = vadd.f32 %v1266_v52, %v11839_v38  ;;  %v2263_v38 = vsel %vm16634_vm4, %v2258_v15, %v2262_v6 }
 0x158   : > { %v1236_v37 = vpop.f32.mrf.mxu2  ;;  %v613_v51 = vpop.f32.mrf.mxu0 }
 0x159   : > { %16742 = vst [vmem:[#allocation7_spill] sm:$0xff] %v11961_v19  ;;  %v11965_v18 = vadd.f32 %v1236_v37, %v962_v3  ;;  %v11975_v37 = vld [vmem:[%s11383_s26 + $0x5c] sm:$0xff]  ;;  %v10944_v19 = vld [vmem:[%s11383_s26 + $0x68] sm:$0xff]  }
 0x15a   : > { %v16591_v56 = vshll.u32 %v11975_v37, 16 }
 0x15b   : > { %v964_v9 = vpop.f32.mrf.mxu1  ;;  %9730 = vmatmul.msk.bf16.gmra.mxu3 %vm489_vm1, %v1531_v58  ;;  %9762 = vmatmul.msk.bf16.gmra.mxu0 %vm489_vm1, %v11152_v24  ;;  %v1535_v58 = vrot.slane %v1533_v21, 3  ;;  %v1538_v24 = vrot.slane %v1536_v8, 4 }
 0x15c   : > { %v965_v4 = vadd.f32 %v964_v9, %v613_v51  ;;  %v16590_v51 = vshrl.u32 %v11946_v42, 16  ;;  %v2264_v9 = vshrl.u32 %v10558_v16, 16  ;;  %v11154_v16 = vld [vmem:[%s11383_s26 + $0x4c] sm:$0xff]  }
 0x15d   : > { %9970 = vmatmul.msk.bf16.gmra.mxu2 %vm489_vm1, %v2762_v2  ;;  %v1539_v50 = vor.u32 %v1538_v24, %v1535_v58 }
 0x15e   : > { %9868 = vmatmul.msk.bf16.gmra.mxu1 %vm489_vm1, %v2263_v38  ;;  %v1700_v43 = vpop.f32.mrf.mxu3  ;;  %v2268_v38 = vshll.u32 %v10559_v62, 16  ;;  %v2765_v21 = vor.u32 %v16590_v51, %v2761_v14 }
 0x15f   : > { %v11978_v3 = vadd.f32 %v1700_v43, %v11593_v45  ;;  %v10595_v45 = vld [vmem:[%s16570_s1 + $0xe8] sm:$0xff]  ;;  %v1540_v24 = vsel %vm1006_vm2, %v1530_v20, %v1539_v50 }
 0x160   : > { %v1239_v52 = vpop.f32.mrf.mxu2  ;;  %v615_v53 = vpop.f32.mrf.mxu0  ;;  %3198 = vmatpush.bf16.msra.mxu3 %v10595_v45  ;;  %v2270_v17 = vrot.slane %v2268_v38, 1  ;;  %v1545_v38 = vshll.u32 %v10944_v19, 16  ;;  %v10599_v20 = vld [vmem:[%s16570_s1 + $0x108] sm:$0xff] }
 0x161   : > { %v11981_v15 = vadd.f32 %v1239_v52, %v965_v4  ;;  %v2769_v4 = vrot.slane %v16591_v56, 1  ;;  %v2266_v52 = vor.u32 %v2264_v9, %v2262_v6  ;;  %v1542_v9 = vshrl.u32 %v10944_v19, 16  ;;  %v12010_v45 = vld [vmem:[%s11383_s26 + $0x64] sm:$0xff]  ;;  %3509 = vmatpush.bf16.msra.mxu0 %v10599_v20 }
 0x163   : > { %v966_v2 = vpop.f32.mrf.mxu1  ;;  %v2770_v14 = vsel %vm16634_vm4, %v2765_v21, %v2769_v4  ;;  %v10560_v21 = vld [vmem:[%s11383_s26 + $0x5c] sm:$0xff]  ;;  %v1544_v19 = vrot.slane %v1542_v9, 3 }
 0x164   : > { %v967_v22 = vadd.f32 %v966_v2, %v615_v53  ;;  %v2276_v56 = vshll.u32 %v10560_v21, 16 }
 0x166   : > { %v1702_v43 = vpop.f32.mrf.mxu3  ;;  %v2278_v42 = vrot.slane %v2276_v56, 1 }
 0x167   : > { %v11993_v8 = vadd.f32 %v1702_v43, %v11605_v59  ;;  %v2271_v59 = vsel %vm16634_vm4, %v2266_v52, %v2270_v17  ;;  %v1547_v52 = vrot.slane %v1545_v38, 4  ;;  %v11156_v38 = vld [vmem:[%s11383_s26 + $0x54] sm:$0xff]  }
 0x168   : > { %v1241_v53 = vpop.f32.mrf.mxu2  ;;  %v618_v58 = vpop.f32.mrf.mxu0 }
 0x169   : > { %v11997_v2 = vadd.f32 %v1241_v53, %v967_v22  ;;  %v1548_v60 = vor.u32 %v1547_v52, %v1544_v19 }
 0x16b   : > { %v969_v51 = vpop.f32.mrf.mxu1  ;;  %9731 = vmatmul.msk.bf16.gmra.mxu3 %vm489_vm1, %v1540_v24  ;;  %9763 = vmatmul.msk.bf16.gmra.mxu0 %vm489_vm1, %v11154_v16  ;;  %v16596_v24 = vshll.u32 %v12010_v45, 16 }
 0x16c   : > { %v970_v6 = vadd.f32 %v969_v51, %v618_v58  ;;  %v16597_v58 = vshrl.u32 %v11975_v37, 16 }
 0x16d   : > { %9971 = vmatmul.msk.bf16.gmra.mxu2 %vm489_vm1, %v2770_v14  ;;  %v2777_v9 = vrot.slane %v16596_v24, 1 }
 0x16e   : > { %9869 = vmatmul.msk.bf16.gmra.mxu1 %vm489_vm1, %v2271_v59  ;;  %v1705_v22 = vpop.f32.mrf.mxu3  ;;  %v2272_v59 = vshrl.u32 %v10559_v62, 16  ;;  %v1549_v62 = vsel %vm1006_vm2, %v1539_v50, %v1548_v60  ;;  %v12040_v50 = vld [vmem:[%s11383_s26 + $0x6c] sm:$0xff] }
 0x16f   : > { %v12013_v43 = vadd.f32 %v1705_v22, %v11620_v10  ;;  %v2773_v22 = vor.u32 %v16597_v58, %v2769_v4  ;;  %v10945_v4 = vld [vmem:[%s11383_s26 + $0x70] sm:$0xff]   ;;  %16743 = vst [vmem:[#allocation8_spill] sm:$0xff] %v12040_v50 }
 0x170   : > { %v1244_v16 = vpop.f32.mrf.mxu2  ;;  %v620_v51 = vpop.f32.mrf.mxu0  ;;  %v1551_v56 = vshrl.u32 %v10945_v4, 16 }
 0x171   : > { %v12016_v53 = vadd.f32 %v1244_v16, %v970_v6  ;;  %v2274_v16 = vor.u32 %v2272_v59, %v2270_v17  ;;  %v2778_v52 = vsel %vm16634_vm4, %v2773_v22, %v2777_v9  ;;  %v1554_v59 = vshll.u32 %v10945_v4, 16 }
 0x172   : > { %v1553_v22 = vrot.slane %v1551_v56, 3  ;;  %v16598_v4 = vshll.u32 %v12040_v50, 16 }
 0x173   : > { %v971_v14 = vpop.f32.mrf.mxu1 }
 0x174   : > { %v972_v20 = vadd.f32 %v971_v14, %v620_v51 }
 0x176   : > { %v1707_v10 = vpop.f32.mrf.mxu3 }
 0x177   : > { %v12025_v6 = vadd.f32 %v1707_v10, %v11633_v30  ;;  %v2279_v30 = vsel %vm16634_vm4, %v2274_v16, %v2278_v42 }
 0x178   : > { %v1246_v29 = vpop.f32.mrf.mxu2  ;;  %v1939_v1 = vpop.f32.mrf.mxu0 }
 0x179   : > { %v12029_v51 = vadd.f32 %v1246_v29, %v972_v20  ;;  %v2029_v19 = vadd.f32 %v1939_v1, %v11978_v3  ;;  %v10561_v3 = vld [vmem:[%s11383_s26 + $0x64] sm:$0xff] }
 0x17b   : > { %v2439_v14 = vpop.f32.mrf.mxu1  ;;  %9732 = vmatmul.msk.bf16.gmra.mxu3 %vm489_vm1, %v1549_v62  ;;  %9764 = vmatmul.msk.bf16.gmra.mxu0 %vm489_vm1, %v11156_v38  ;;  %v1556_v38 = vrot.slane %v1554_v59, 4 }
 0x17c   : > { %v2529_v17 = vadd.f32 %v2439_v14, %v2029_v19  ;;  %v16599_v19 = vshrl.u32 %v12010_v45, 16  ;;  %v2280_v14 = vshrl.u32 %v10560_v21, 16 }
 0x17d   : > { %9972 = vmatmul.msk.bf16.gmra.mxu2 %vm489_vm1, %v2778_v52 }
 0x17e   : > { %9870 = vmatmul.msk.bf16.gmra.mxu1 %vm489_vm1, %v2279_v30  ;;  %v1710_v29 = vpop.f32.mrf.mxu3  ;;  %v2284_v30 = vshll.u32 %v10561_v3, 16  ;;  %v2781_v58 = vor.u32 %v16599_v19, %v2777_v9  ;;  %v2282_v59 = vor.u32 %v2280_v14, %v2278_v42  ;;  %v10946_v9 = vld [vmem:[%s11383_s26 + $0x78] sm:$0xff]  }
 0x17f   : > { %v12043_v1 = vadd.f32 %v1710_v29, %v11656_v54  ;;  %v1557_v29 = vor.u32 %v1556_v38, %v1553_v22  ;;  %v1563_v14 = vshll.u32 %v10946_v9, 16 }
 0x180   : > { %v2938_v20 = vpop.f32.mrf.mxu2  ;;  %v1941_v10 = vpop.f32.mrf.mxu0 }
 0x181   : > { %v12046_v16 = vadd.f32 %v2938_v20, %v2529_v17  ;;  %v2030_v62 = vadd.f32 %v1941_v10, %v11993_v8  ;;  %v2785_v17 = vrot.slane %v16598_v4, 1  ;;  %v11158_v8 = vld [vmem:[%s11383_s26 + $0x5c] sm:$0xff]   ;;  %v2286_v20 = vrot.slane %v2284_v30, 1  ;;  %v12071_v30 = vld [vmem:[%s11383_s26 + $0x74] sm:$0xff] }
 0x182   : > { %v1558_v21 = vsel %vm1006_vm2, %v1548_v60, %v1557_v29  ;;  %16746 = vst [vmem:[#allocation11_spill] sm:$0xff] %v12071_v30 }
 0x183   : > { %16744 = vst [vmem:[#allocation9_spill] sm:$0xff] %v12046_v16  ;;  %v2441_v52 = vpop.f32.mrf.mxu1  ;;  %v2786_v38 = vsel %vm16634_vm4, %v2781_v58, %v2785_v17  ;;  %v12077_v58 = vld [vmem:[%s11383_s26 + $0x6c] sm:$0xff] }
 0x184   : > { %v2530_v54 = vadd.f32 %v2441_v52, %v2030_v62 }
 0x186   : > { %v1712_v24 = vpop.f32.mrf.mxu3 }
 0x187   : > { %v12056_v56 = vadd.f32 %v1712_v24, %v11674_v13  ;;  %v2287_v13 = vsel %vm16634_vm4, %v2282_v59, %v2286_v20  ;;  %v1560_v24 = vshrl.u32 %v10946_v9, 16  ;;  %v1565_v59 = vrot.slane %v1563_v14, 4  ;;  %v11160_v14 = vld [vmem:[%s11383_s26 + $0x64] sm:$0xff]  }
 0x188   : > { %v2940_v10 = vpop.f32.mrf.mxu2  ;;  %v1944_v16 = vpop.f32.mrf.mxu0  ;;  %v16600_v9 = vshll.u32 %v12071_v30, 16 }
 0x189   : > { %v12060_v62 = vadd.f32 %v2940_v10, %v2530_v54  ;;  %v2031_v22 = vadd.f32 %v1944_v16, %v12013_v43 }
 0x18b   : > { %16745 = vst [vmem:[#allocation10_spill] sm:$0xff] %v12060_v62  ;;  %v2444_v52 = vpop.f32.mrf.mxu1  ;;  %9733 = vmatmul.msk.bf16.gmra.mxu3 %vm489_vm1, %v1558_v21  ;;  %9765 = vmatmul.msk.bf16.gmra.mxu0 %vm489_vm1, %v11158_v8  ;;  %v1562_v8 = vrot.slane %v1560_v24, 3 }
 0x18c   : > { %v2531_v42 = vadd.f32 %v2444_v52, %v2031_v22  ;;  %v16601_v22 = vshrl.u32 %v12040_v50, 16  ;;  %v2288_v52 = vshrl.u32 %v10561_v3, 16  ;;  %v16792_v50 = vld [vmem:[#allocation6_spill] sm:$0xff] }
 0x18d   : > { %9973 = vmatmul.msk.bf16.gmra.mxu2 %vm489_vm1, %v2786_v38 }
 0x18e   : > { %9871 = vmatmul.msk.bf16.gmra.mxu1 %vm489_vm1, %v2287_v13  ;;  %v1715_v60 = vpop.f32.mrf.mxu3  ;;  %v2789_v24 = vor.u32 %v16601_v22, %v2785_v17  ;;  %v10947_v17 = vld [vmem:[%s11383_s26 + $0x80] sm:$0xff]  }
 0x18f   : > { %v12074_v43 = vadd.f32 %v1715_v60, %v11696_v28  ;;  %v2292_v28 = vshll.u32 %v12077_v58, 16  ;;  %v1566_v60 = vor.u32 %v1565_v59, %v1562_v8 }
 0x190   : > { %v2943_v16 = vpop.f32.mrf.mxu2  ;;  %v1946_v54 = vpop.f32.mrf.mxu0 }
 0x191   : > { %v12079_v10 = vadd.f32 %v2943_v16, %v2531_v42  ;;  %v2032_v21 = vadd.f32 %v1946_v54, %v12025_v6  ;;  %v2793_v42 = vrot.slane %v16600_v9, 1  ;;  %v2290_v16 = vor.u32 %v2288_v52, %v2286_v20 }
 0x192   : > { %v2294_v54 = vrot.slane %v2292_v28, 1  ;;  %v1569_v20 = vshrl.u32 %v10947_v17, 16  ;;  %v1572_v52 = vshll.u32 %v10947_v17, 16  ;;  %v12114_v28 = vld [vmem:[%s11383_s26 + $0x74] sm:$0xff] }
 0x193   : > { %16747 = vst [vmem:[#allocation12_spill] sm:$0xff] %v12079_v10  ;;  %v2446_v38 = vpop.f32.mrf.mxu1  ;;  %v1567_v10 = vsel %vm1006_vm2, %v1557_v29, %v1566_v60  ;;  %v2794_v59 = vsel %vm16634_vm4, %v2789_v24, %v2793_v42  ;;  %v10641_v29 = vld [vmem:[%s16572_s3 + $0x138] sm:$0xff] }
 0x194   : > { %v2532_v13 = vadd.f32 %v2446_v38, %v2032_v21  ;;  %6726 = vmatpush.bf16.msra.mxu2 %v10641_v29  ;;  %v10633_v17 = vld [vmem:[%s16572_s3 + $0xf8] sm:$0xff] }
 0x195   : > { %6627 = vmatpush.bf16.msra.mxu1 %v10633_v17 }
 0x196   : > { %v1717_v4 = vpop.f32.mrf.mxu3 }
 0x197   : > { %v12090_v6 = vadd.f32 %v1717_v4, %v11718_v11  ;;  %v2295_v11 = vsel %vm16634_vm4, %v2290_v16, %v2294_v54  ;;  %v1574_v16 = vrot.slane %v1572_v52, 4 }
 0x198   : > { %v2945_v19 = vpop.f32.mrf.mxu2  ;;  %v1949_v3 = vpop.f32.mrf.mxu0 }
 0x199   : > { %v12094_v21 = vadd.f32 %v2945_v19, %v2532_v13  ;;  %v2033_v8 = vadd.f32 %v1949_v3, %v12043_v1  ;;  %v12105_v1 = vld [vmem:[%s11383_s26 + $0x7c] sm:$0xff] }
 0x19a   : > { %16749 = vst [vmem:[#allocation14_spill] sm:$0xff] %v12105_v1 }
 0x19b   : > { %16748 = vst [vmem:[#allocation13_spill] sm:$0xff] %v12094_v21  ;;  %v2449_v38 = vpop.f32.mrf.mxu1  ;;  %9734 = vmatmul.msk.bf16.gmra.mxu3 %vm489_vm1, %v1567_v10  ;;  %9766 = vmatmul.msk.bf16.gmra.mxu0 %vm489_vm1, %v11160_v14  ;;  %v1571_v14 = vrot.slane %v1569_v20, 3  ;;  %v2300_v20 = vshll.u32 %v12114_v28, 16 }
 0x19c   : > { %v2533_v4 = vadd.f32 %v2449_v38, %v2033_v8 }
 0x19d   : > { %9974 = vmatmul.msk.bf16.gmra.mxu2 %vm489_vm1, %v2794_v59  ;;  %v16607_v59 = vshrl.u32 %v12071_v30, 16  ;;  %v2302_v22 = vrot.slane %v2300_v20, 1  ;;  %v12155_v20 = vld [vmem:[%s11383_s26 + $0x7c] sm:$0xff] }
 0x19e   : > { %9872 = vmatmul.msk.bf16.gmra.mxu1 %vm489_vm1, %v2295_v11  ;;  %v1720_v19 = vpop.f32.mrf.mxu3  ;;  %v2296_v11 = vshrl.u32 %v12077_v58, 16  ;;  %v16790_v30 = vld [vmem:[#allocation5_spill] sm:$0xff] }
 0x19f   : > { %v12111_v10 = vadd.f32 %v1720_v19, %v11741_v33  ;;  %v16602_v33 = vshll.u32 %v12105_v1, 16 }
 0x1a0   : > { %v2948_v13 = vpop.f32.mrf.mxu2  ;;  %v1951_v24 = vpop.f32.mrf.mxu0  ;;  %v2298_v9 = vor.u32 %v2296_v11, %v2294_v54 }
 0x1a1   : > { %v12116_v3 = vadd.f32 %v2948_v13, %v2533_v4  ;;  %v2034_v8 = vadd.f32 %v1951_v24, %v12056_v56  ;;  %v1575_v4 = vor.u32 %v1574_v16, %v1571_v14  ;;  %v2797_v56 = vor.u32 %v16607_v59, %v2793_v42  ;;  %v11162_v24 = vld [vmem:[%s11383_s26 + $0x6c] sm:$0xff]  }
 0x1a2   : > { %v2801_v29 = vrot.slane %v16602_v33, 1  ;;  %v10948_v16 = vld [vmem:[%s11383_s26 + $0x88] sm:$0xff]   ;;  %v10949_v33 = vld [vmem:[%s11383_s26 + $0x90] sm:$0xff]  }
 0x1a3   : > { %16750 = vst [vmem:[#allocation15_spill] sm:$0xff] %v12116_v3  ;;  %v2451_v38 = vpop.f32.mrf.mxu1  ;;  %v1576_v21 = vsel %vm1006_vm2, %v1566_v60, %v1575_v4  ;;  %v1581_v11 = vshll.u32 %v10948_v16, 16  ;;  %v10594_v60 = vld [vmem:[%s16570_s1 + $0xe0] sm:$0xff] }
 0x1a4   : > { %v2534_v52 = vadd.f32 %v2451_v38, %v2034_v8  ;;  %v2802_v42 = vsel %vm16634_vm4, %v2797_v56, %v2801_v29  ;;  %v1578_v38 = vshrl.u32 %v10948_v16, 16  ;;  %3199 = vmatpush.bf16.msra.mxu3 %v10594_v60 }
 0x1a5   : > { %v1583_v56 = vrot.slane %v1581_v11, 4 }
 0x1a6   : > { %v1722_v19 = vpop.f32.mrf.mxu3 }
 0x1a7   : > { %v12131_v13 = vadd.f32 %v1722_v19, %v11754_v48  ;;  %v2303_v48 = vsel %vm16634_vm4, %v2298_v9, %v2302_v22  ;;  %v1580_v19 = vrot.slane %v1578_v38, 3  ;;  %v10598_v38 = vld [vmem:[%s16570_s1 + $0x100] sm:$0xff] }
 0x1a8   : > { %v2950_v58 = vpop.f32.mrf.mxu2  ;;  %v1954_v3 = vpop.f32.mrf.mxu0  ;;  %3510 = vmatpush.bf16.msra.mxu0 %v10598_v38 }
 0x1a9   : > { %v12135_v8 = vadd.f32 %v2950_v58, %v2534_v52  ;;  %v2035_v14 = vadd.f32 %v1954_v3, %v12074_v43  ;;  %v12149_v3 = vld [vmem:[%s11383_s26 + $0x84] sm:$0xff]  ;;  %v1584_v60 = vor.u32 %v1583_v56, %v1580_v19 }
 0x1aa   : > { %16752 = vst [vmem:[#allocation17_spill] sm:$0xff] %v12149_v3  ;;  %v16603_v16 = vshll.u32 %v12149_v3, 16 }
 0x1ab   : > { %16751 = vst [vmem:[#allocation16_spill] sm:$0xff] %v12135_v8  ;;  %v2454_v17 = vpop.f32.mrf.mxu1  ;;  %9735 = vmatmul.msk.bf16.gmra.mxu3 %vm489_vm1, %v1576_v21  ;;  %9767 = vmatmul.msk.bf16.gmra.mxu0 %vm489_vm1, %v11162_v24  ;;  %v1585_v56 = vsel %vm1006_vm2, %v1575_v4, %v1584_v60 }
 0x1ac   : > { %v2535_v54 = vadd.f32 %v2454_v17, %v2035_v14  ;;  %v16604_v14 = vshrl.u32 %v12105_v1, 16  ;;  %v2304_v17 = vshrl.u32 %v12114_v28, 16  ;;  %v2809_v11 = vrot.slane %v16603_v16, 1  ;;  %v11164_v28 = vld [vmem:[%s11383_s26 + $0x74] sm:$0xff]  }
 0x1ad   : > { %9975 = vmatmul.msk.bf16.gmra.mxu2 %vm489_vm1, %v2802_v42 }
 0x1ae   : > { %9873 = vmatmul.msk.bf16.gmra.mxu1 %vm489_vm1, %v2303_v48  ;;  %v1725_v43 = vpop.f32.mrf.mxu3 }
 0x1af   : > { %v12152_v21 = vadd.f32 %v1725_v43, %v11773_v12  ;;  %v2308_v12 = vshll.u32 %v12155_v20, 16 }
 0x1b0   : > { %v2953_v9 = vpop.f32.mrf.mxu2  ;;  %v1956_v52 = vpop.f32.mrf.mxu0 }
 0x1b1   : > { %v12157_v24 = vadd.f32 %v2953_v9, %v2535_v54  ;;  %v2036_v58 = vadd.f32 %v1956_v52, %v12090_v6  ;;  %v2805_v6 = vor.u32 %v16604_v14, %v2801_v29  ;;  %v2306_v9 = vor.u32 %v2304_v17, %v2302_v22 }
 0x1b2   : > { %v2310_v52 = vrot.slane %v2308_v12, 1  ;;  %v1587_v17 = vshrl.u32 %v10949_v33, 16  ;;  %v1590_v12 = vshll.u32 %v10949_v33, 16 }
 0x1b3   : > { %16753 = vst [vmem:[#allocation18_spill] sm:$0xff] %v12157_v24  ;;  %v2456_v42 = vpop.f32.mrf.mxu1  ;;  %v2810_v16 = vsel %vm16634_vm4, %v2805_v6, %v2809_v11  ;;  %v2601_v24 = vld [vmem:[%s11383_s26 + $0xac] sm:$0x1] }
 0x1b4   : > { %v2536_v48 = vadd.f32 %v2456_v42, %v2036_v58 }
 0x1b6   : > { %v1727_v54 = vpop.f32.mrf.mxu3 }
 0x1b7   : > { %v12172_v43 = vadd.f32 %v1727_v54, %v11785_v36  ;;  %v2311_v36 = vsel %vm16634_vm4, %v2306_v9, %v2310_v52  ;;  %v12193_v54 = vld [vmem:[%s11383_s26 + $0x84] sm:$0xff] }
 0x1b8   : > { %v2955_v58 = vpop.f32.mrf.mxu2  ;;  %v1959_v19 = vpop.f32.mrf.mxu0  ;;  %v2320_v59 = vshrl.u32 %v12193_v54, 16 }
 0x1b9   : > { %v12176_v42 = vadd.f32 %v2955_v58, %v2536_v48  ;;  %v2037_v29 = vadd.f32 %v1959_v19, %v12111_v10  ;;  %v12187_v48 = vld [vmem:[%s11383_s26 + $0x8c] sm:$0xff]  ;;  %v1592_v19 = vrot.slane %v1590_v12, 4 }
 0x1ba   : > { %16755 = vst [vmem:[#allocation20_spill] sm:$0xff] %v12187_v48 }
 0x1bb   : > { %16754 = vst [vmem:[#allocation19_spill] sm:$0xff] %v12176_v42  ;;  %v2459_v38 = vpop.f32.mrf.mxu1  ;;  %9736 = vmatmul.msk.bf16.gmra.mxu3 %vm489_vm1, %v1585_v56  ;;  %9768 = vmatmul.msk.bf16.gmra.mxu0 %vm489_vm1, %v11164_v28  ;;  %v1589_v28 = vrot.slane %v1587_v17, 3  ;;  %v16605_v56 = vshrl.u32 %v12149_v3, 16 }
 0x1bc   : > { %v2537_v22 = vadd.f32 %v2459_v38, %v2037_v29  ;;  %v2312_v38 = vshrl.u32 %v12155_v20, 16 }
 0x1bd   : > { %9976 = vmatmul.msk.bf16.gmra.mxu2 %vm489_vm1, %v2810_v16  ;;  %v10640_v16 = vld [vmem:[%s16572_s3 + $0x130] sm:$0xff] }
 0x1be   : > { %9874 = vmatmul.msk.bf16.gmra.mxu1 %vm489_vm1, %v2311_v36  ;;  %v1730_v4 = vpop.f32.mrf.mxu3  ;;  %v2316_v36 = vshll.u32 %v12193_v54, 16  ;;  %6727 = vmatpush.bf16.msra.mxu2 %v10640_v16  ;;  %v2314_v16 = vor.u32 %v2312_v38, %v2310_v52 }
 0x1bf   : > { %v12190_v10 = vadd.f32 %v1730_v4, %v11801_v41  ;;  %v16606_v41 = vshll.u32 %v12187_v48, 16  ;;  %v2813_v4 = vor.u32 %v16605_v56, %v2809_v11  ;;  %v12221_v56 = vld [vmem:[%s11383_s26 + $0x98] sm:$0xff]  }
 0x1c0   : > { %v2958_v6 = vpop.f32.mrf.mxu2  ;;  %v1961_v58 = vpop.f32.mrf.mxu0  ;;  %v1599_v38 = vshll.u32 %v12221_v56, 16 }
 0x1c1   : > { %v12195_v9 = vadd.f32 %v2958_v6, %v2537_v22  ;;  %v2038_v33 = vadd.f32 %v1961_v58, %v12131_v13  ;;  %v1593_v22 = vor.u32 %v1592_v19, %v1589_v28  ;;  %v10632_v13 = vld [vmem:[%s16572_s3 + $0xf0] sm:$0xff]  ;;  %v2817_v6 = vrot.slane %v16606_v41, 1  ;;  %v11166_v58 = vld [vmem:[%s11383_s26 + $0x7c] sm:$0xff]  }
 0x1c2   : > { %6628 = vmatpush.bf16.msra.mxu1 %v10632_v13 }
 0x1c3   : > { %16756 = vst [vmem:[#allocation21_spill] sm:$0xff] %v12195_v9  ;;  %v2461_v29 = vpop.f32.mrf.mxu1  ;;  %v1594_v19 = vsel %vm1006_vm2, %v1584_v60, %v1593_v22  ;;  %v2818_v13 = vsel %vm16634_vm4, %v2813_v4, %v2817_v6  ;;  %v1596_v60 = vshrl.u32 %v12221_v56, 16 }
 0x1c4   : > { %v2538_v17 = vadd.f32 %v2461_v29, %v2038_v33  ;;  %v2318_v33 = vrot.slane %v2316_v36, 1  ;;  %v12232_v36 = vld [vmem:[%s11383_s26 + $0x94] sm:$0xff] }
 0x1c5   : > { %16758 = vst [vmem:[#allocation23_spill] sm:$0xff] %v12232_v36 }
 0x1c6   : > { %v1732_v12 = vpop.f32.mrf.mxu3 }
 0x1c7   : > { %v12213_v20 = vadd.f32 %v1732_v12, %v11814_v27  ;;  %v2319_v27 = vsel %vm16634_vm4, %v2314_v16, %v2318_v33  ;;  %v10566_v12 = vld [vmem:[%s11383_s26 + $0x8c] sm:$0xff]  ;;  %v1598_v16 = vrot.slane %v1596_v60, 3 }
 0x1c8   : > { %v2960_v29 = vpop.f32.mrf.mxu2  ;;  %v1964_v28 = vpop.f32.mrf.mxu0 }
 0x1c9   : > { %v12217_v14 = vadd.f32 %v2960_v29, %v2538_v17  ;;  %v2039_v11 = vadd.f32 %v1964_v28, %v12152_v21  ;;  %v1601_v29 = vrot.slane %v1599_v38, 4 }
 0x1cb   : > { %16757 = vst [vmem:[#allocation22_spill] sm:$0xff] %v12217_v14  ;;  %v2464_v41 = vpop.f32.mrf.mxu1  ;;  %9737 = vmatmul.msk.bf16.gmra.mxu3 %vm489_vm1, %v1594_v19  ;;  %9769 = vmatmul.msk.bf16.gmra.mxu0 %vm489_vm1, %v11166_v58  ;;  %v1341_v19 = vld [vmem:[%s11383_s26 + $0xa0] sm:$0xf]  ;;  %v1602_v14 = vor.u32 %v1601_v29, %v1598_v16 }
 0x1cc   : > { %v2539_v52 = vadd.f32 %v2464_v41, %v2039_v11  ;;  %v16611_v11 = vshrl.u32 %v12187_v48, 16  ;;  %v12245_v3 = vunpack.c.l.b16 %v1341_v19  ;;  %v11171_v48 = vld [vmem:[%s11383_s26 + $0x94] sm:$0xff]  }
 0x1cd   : > { %9977 = vmatmul.msk.bf16.gmra.mxu2 %vm489_vm1, %v2818_v13  ;;  %v16610_v13 = vshll.u32 %v12232_v36, 16  ;;  %v1603_v16 = vsel %vm1006_vm2, %v1593_v22, %v1602_v14 }
 0x1ce   : > { %9875 = vmatmul.msk.bf16.gmra.mxu1 %vm489_vm1, %v2319_v27  ;;  %v1735_v21 = vpop.f32.mrf.mxu3  ;;  %v1442_v29 = vpack.c.b16 %v12245_v3, %v12245_v3 }
 0x1cf   : > { %v12235_v17 = vadd.f32 %v1735_v21, %v11830_v49  ;;  %v2324_v49 = vshll.u32 %v10566_v12, 16 }
 0x1d0   : > { %v2963_v4 = vpop.f32.mrf.mxu2  ;;  %v1966_v58 = vpop.f32.mrf.mxu0  ;;  %v1605_v22 = vshrl.u32 %v1442_v29, 16 }
 0x1d1   : > { %v12238_v41 = vadd.f32 %v2963_v4, %v2539_v52  ;;  %v2040_v28 = vadd.f32 %v1966_v58, %v12172_v43  ;;  %v2821_v52 = vor.u32 %v16611_v11, %v2817_v6  ;;  %v2825_v43 = vrot.slane %v16610_v13, 1  ;;  %v11168_v4 = vld [vmem:[%s11383_s26 + $0x84] sm:$0xff]  }
 0x1d2   : > { %v2322_v58 = vor.u32 %v2320_v59, %v2318_v33 }
 0x1d3   : > { %16759 = vst [vmem:[#allocation24_spill] sm:$0xff] %v12238_v41  ;;  %v2466_v27 = vpop.f32.mrf.mxu1  ;;  %v2326_v41 = vrot.slane %v2324_v49, 1  ;;  %v2826_v19 = vsel %vm16634_vm4, %v2821_v52, %v2825_v43  ;;  %v12270_v49 = vld [vmem:[%s11383_s26 + $0x9c] sm:$0xff] }
 0x1d4   : > { %v2540_v21 = vadd.f32 %v2466_v27, %v2040_v28  ;;  %v1608_v27 = vshll.u32 %v1442_v29, 16  ;;  %16761 = vst [vmem:[#allocation26_spill] sm:$0xff] %v12270_v49  ;;  %v16614_v29 = vshll.u32 %v12270_v49, 16 }
 0x1d5   : > { %v2327_v59 = vsel %vm16634_vm4, %v2322_v58, %v2326_v41 }
 0x1d6   : > { %v1737_v60 = vpop.f32.mrf.mxu3  ;;  %v1610_v58 = vrot.slane %v1608_v27, 4 }
 0x1d7   : > { %v12252_v38 = vadd.f32 %v1737_v60, %v11843_v63 }
 0x1d8   : > { %v2965_v9 = vpop.f32.mrf.mxu2  ;;  %v1969_v54 = vpop.f32.mrf.mxu0 }
 0x1d9   : > { %v12258_v28 = vadd.f32 %v2965_v9, %v2540_v21  ;;  %v2041_v6 = vadd.f32 %v1969_v54, %v12190_v10  ;;  %v10567_v21 = vld [vmem:[%s11383_s26 + $0x94] sm:$0xff] }
 0x1db   : > { %16760 = vst [vmem:[#allocation25_spill] sm:$0xff] %v12258_v28  ;;  %v2469_v63 = vpop.f32.mrf.mxu1  ;;  %9738 = vmatmul.msk.bf16.gmra.mxu3 %vm489_vm1, %v1603_v16  ;;  %9770 = vmatmul.msk.bf16.gmra.mxu0 %vm489_vm1, %v11168_v4  ;;  %v1607_v4 = vrot.slane %v1605_v22, 3  ;;  %v16615_v16 = vshrl.u32 %v12232_v36, 16 }
 0x1dc   : > { %v12265_v33 = vadd.f32 %v2469_v63, %v2041_v6 }
 0x1dd   : > { %9978 = vmatmul.msk.bf16.gmra.mxu2 %vm489_vm1, %v2826_v19  ;;  %v2328_v19 = vshrl.u32 %v10566_v12, 16  ;;  %v1611_v63 = vor.u32 %v1610_v58, %v1607_v4  ;;  %v2829_v22 = vor.u32 %v16615_v16, %v2825_v43  ;;  %v11274_v43 = vld [vmem:[%s11383_s26 + $0x1c] sm:$0xe] }
 0x1de   : > { %9876 = vmatmul.msk.bf16.gmra.mxu1 %vm489_vm1, %v2327_v59  ;;  %v1740_v9 = vpop.f32.mrf.mxu3  ;;  %v10639_v59 = vld [vmem:[%s16572_s3 + $0x128] sm:$0xff] }
 0x1df   : > { %v12273_v10 = vadd.f32 %v1740_v9, %v11862_v23  ;;  %v2332_v23 = vshll.u32 %v10567_v21, 16  ;;  %6728 = vmatpush.bf16.msra.mxu2 %v10639_v59  ;;  %v2330_v12 = vor.u32 %v2328_v19, %v2326_v41  ;;  %v1612_v58 = vsel %vm1006_vm2, %v1602_v14, %v1611_v63  ;;  %v10631_v59 = vld [vmem:[%s16572_s3 + $0xe8] sm:$0xff]  ;;  %v10568_v63 = vld [vmem:[%s11383_s26 + $0x9c] sm:$0xff] }
 0x1e0   : > { %v12276_v60 = vpop.f32.mrf.mxu2  ;;  %v1971_v52 = vpop.f32.mrf.mxu0  ;;  %6629 = vmatpush.bf16.msra.mxu1 %v10631_v59 }
 0x1e1   : > { %v12279_v54 = vadd.f32 %v1971_v52, %v12213_v20  ;;  %v2833_v20 = vrot.slane %v16614_v29, 1  ;;  %v11170_v52 = vld [vmem:[%s11383_s26 + $0x8c] sm:$0xff]   ;;  %v2334_v13 = vrot.slane %v2332_v23, 1 }
 0x1e3   : > { %v12283_v6 = vpop.f32.mrf.mxu1  ;;  %v2335_v41 = vsel %vm16634_vm4, %v2330_v12, %v2334_v13  ;;  %v12322_v12 = vor.u32 %v11274_v43, %v11745_v35  ;;  %v16763_v35 = vshll.u32 %v11767_v44, 16  ;;  %v16764_v43 = vshrl.u32 %v11767_v44, 16 }
 0x1e6   : > { %v1742_v9 = vpop.f32.mrf.mxu3 }
 0x1e7   : > { %v12293_v27 = vadd.f32 %v1742_v9, %v11878_v0  ;;  %v2834_v0 = vsel %vm16634_vm4, %v2829_v22, %v2833_v20 }
 0x1e8   : > { %v12296_v11 = vpop.f32.mrf.mxu2  ;;  %v1974_v4 = vpop.f32.mrf.mxu0 }
 0x1e9   : > { %v2043_v36 = vadd.f32 %v1974_v4, %v12235_v17  ;;  %v12313_v17 = vld [vmem:[%s11383_s26 + $0xa4] sm:$0xff]  ;;  %v16620_v4 = vshrl.u32 %v12270_v49, 16 }
 0x1ea   : > { %16762 = vst [vmem:[#allocation27_spill] sm:$0xff] %v12313_v17 }
 0x1eb   : > { %v2474_v9 = vpop.f32.mrf.mxu1  ;;  %9739 = vmatmul.msk.bf16.gmra.mxu3 %vm489_vm1, %v1612_v58  ;;  %9771 = vmatmul.msk.bf16.gmra.mxu0 %vm489_vm1, %v11170_v52  ;;  %v16623_v58 = vshll.u32 %v12313_v17, 16  ;;  %v2837_v16 = vor.u32 %v16620_v4, %v2833_v20  ;;  %v2683_v4 = vunpack.c.l.b16 %v2601_v24 }
 0x1ec   : > { %v12308_v19 = vadd.f32 %v2474_v9, %v2043_v36  ;;  %v3077_v9 = vrot.slane %v12322_v12, 1 }
 0x1ed   : > { %9979 = vmatmul.msk.bf16.gmra.mxu2 %vm489_vm1, %v2834_v0  ;;  %v2340_v0 = vshll.u32 %v10568_v63, 16 }
 0x1ee   : > { %9877 = vmatmul.msk.bf16.gmra.mxu1 %vm489_vm1, %v2335_v41  ;;  %v1745_v14 = vpop.f32.mrf.mxu3  ;;  %v11228_v41 = vld [vmem:[%s11383_s26 + $0x24] sm:$0xff] }
 0x1ef   : > { %v12316_v23 = vadd.f32 %v1745_v14, %v11894_v32  ;;  %v2336_v32 = vshrl.u32 %v10567_v21, 16  ;;  %v3078_v14 = vrot.slane %v11228_v41, 1  ;;  %v2841_v21 = vrot.slane %v16623_v58, 1 }
 0x1f0   : > { %v12319_v22 = vpop.f32.mrf.mxu2  ;;  %v1976_v52 = vpop.f32.mrf.mxu0  ;;  %v2342_v41 = vrot.slane %v2340_v0, 1 }
 0x1f1   : > { %v12325_v36 = vadd.f32 %v1976_v52, %v12252_v38  ;;  %v3349_v38 = vrot.slane %v16763_v35, 2  ;;  %v3348_v52 = vrot.slane %v16764_v43, 1  ;;  %v2338_v42 = vor.u32 %v2336_v32, %v2334_v13  ;;  %v2101_v43 = vld [vmem:[%s11383_s26 + $0xa4] sm:$0x1] }
 0x1f2   : > { %v3079_v44 = vsel %vm3076_vm5, %v3077_v9, %v3078_v14  ;;  %v2842_v20 = vsel %vm16634_vm4, %v2837_v16, %v2841_v21  ;;  %v2183_v13 = vunpack.c.l.b16 %v2101_v43  ;;  %v12361_v16 = vpack.c.b16 %v2683_v4, %v2683_v4 }
 0x1f3   : > { %v12329_v59 = vpop.f32.mrf.mxu1  ;;  %v12352_v49 = vor.u32 %v3349_v38, %v3348_v52  ;;  %v10780_v38 = vunpack.c.h.b16 %v12221_v56  ;;  %v2344_v52 = vshrl.u32 %v10568_v63, 16 }
 0x1f4   : > { %16765 = vst [vmem:[#allocation28_spill] sm:$0xff] %v12361_v16  ;;  %v2202_v32 = vpack.c.b16 %v2183_v13, %v2183_v13 }
 0x1f5   : > { %v2346_v13 = vor.u32 %v2344_v52, %v2342_v41 }
 0x1f6   : > { %v1747_v29 = vpop.f32.mrf.mxu3  ;;  %v2348_v4 = vshll.u32 %v2202_v32, 16  ;;  %v10638_v32 = vld [vmem:[%s16572_s3 + $0x120] sm:$0xff] }
 0x1f7   : > { %v12342_v28 = vadd.f32 %v1747_v29, %v11907_v57  ;;  %v2343_v57 = vsel %vm16634_vm4, %v2338_v42, %v2342_v41  ;;  %v2847_v42 = vshll.u32 %v12361_v16, 16  ;;  %6729 = vmatpush.bf16.msra.mxu2 %v10638_v32  ;;  %v10630_v41 = vld [vmem:[%s16572_s3 + $0xe0] sm:$0xff] }
 0x1f8   : > { %v12346_v1 = vpop.f32.mrf.mxu2  ;;  %v1979_v35 = vpop.f32.mrf.mxu0  ;;  %6630 = vmatpush.bf16.msra.mxu1 %v10630_v41 }
 0x1f9   : > { %v2045_v8 = vadd.f32 %v1979_v35, %v12273_v10  ;;  %v11229_v35 = vld [vmem:[%s11383_s26 + $0x2c] sm:$0xff] }
 0x1fb   : > { %v2479_v58 = vpop.f32.mrf.mxu1  ;;  %9772 = vmatmul.msk.bf16.gmra.mxu0 %vm489_vm1, %v11171_v48  ;;  %9998 = vmatmul.msk.bf16.vlgmr.msra.gmra.mxu3 %vm489_vm1, %v3079_v44  ;;  %v3080_v44 = vrot.slane %v11229_v35, 1 }
 0x1fc   : > { %v12357_v29 = vadd.f32 %v2479_v58, %v2045_v8  ;;  %v16625_v8 = vshrl.u32 %v12313_v17, 16 }
 0x1fd   : > { %9980 = vmatmul.msk.bf16.gmra.mxu2 %vm489_vm1, %v2842_v20  ;;  %v2849_v20 = vrot.slane %v2847_v42, 1  ;;  %v3081_v56 = vsel %vm3076_vm5, %v3078_v14, %v3080_v44  ;;  %v3341_v14 = vshrl.u32 %v12322_v12, 16 }
 0x1fe   : > { %9878 = vmatmul.msk.bf16.gmra.mxu1 %vm489_vm1, %v2343_v57  ;;  %v1750_v10 = vpop.f32.mrf.mxu3  ;;  %v2845_v43 = vor.u32 %v16625_v8, %v2841_v21  ;;  %v1851_v57 = vpack.c.b16 %v12245_v3, %v10780_v38 }
 0x1ff   : > { %v1810_v24 = vadd.f32 %v1750_v10, %v11923_v26  ;;  %v2350_v10 = vrot.slane %v2348_v4, 1  ;;  %v3343_v35 = vrot.slane %v3341_v14, 1 }
 0x200   : > { %v12364_v0 = vpop.f32.mrf.mxu2  ;;  %v1981_v48 = vpop.f32.mrf.mxu0  ;;  %v2850_v21 = vsel %vm16634_vm4, %v2845_v43, %v2849_v20  ;;  %v11230_v20 = vld [vmem:[%s11383_s26 + $0x34] sm:$0xff] }
 0x201   : > { %v12367_v9 = vadd.f32 %v1981_v48, %v12293_v27 }
 0x203   : > { %v12371_v58 = vpop.f32.mrf.mxu1 }
 0x206   : > { %v1752_v26 = vpop.f32.mrf.mxu3 }
 0x207   : > { %v1811_v27 = vadd.f32 %v1752_v26, %v11936_v5  ;;  %v2351_v5 = vsel %vm16634_vm4, %v2346_v13, %v2350_v10 }
 0x208   : > { %v12379_v48 = vpop.f32.mrf.mxu2  ;;  %v1984_v16 = vpop.f32.mrf.mxu0 }
 0x209   : > { %v2047_v63 = vadd.f32 %v1984_v16, %v12316_v23  ;;  %v3344_v23 = vshll.u32 %v12322_v12, 16 }
 0x20b   : > { %v2484_v42 = vpop.f32.mrf.mxu1  ;;  %9773 = vmatmul.msk.bf16.gmra.mxu0 %vm489_vm1, %v1851_v57  ;;  %9999 = vmatmul.msk.bf16.gmra.mxu3 %vm489_vm1, %v3081_v56  ;;  %v3346_v26 = vrot.slane %v3344_v23, 2  ;;  %v3082_v57 = vrot.slane %v11230_v20, 1  ;;  %v11231_v20 = vld [vmem:[%s11383_s26 + $0x3c] sm:$0xff] }
 0x20c   : > { %v12390_v3 = vadd.f32 %v2484_v42, %v2047_v63 }
 0x20d   : > { %9981 = vmatmul.msk.bf16.gmra.mxu2 %vm489_vm1, %v2850_v21  ;;  %v3347_v13 = vor.u32 %v3346_v26, %v3343_v35  ;;  %v3083_v32 = vsel %vm3076_vm5, %v3080_v44, %v3082_v57 }
 0x20e   : > { %9879 = vmatmul.msk.bf16.gmra.mxu1 %vm489_vm1, %v2351_v5  ;;  %v1755_v16 = vpop.f32.mrf.mxu3 }
 0x20f   : > { %v1812_v38 = vadd.f32 %v1755_v16, %v11952_v61  ;;  %v3351_v21 = vsel %vm3339_vm6, %v3347_v13, %v12352_v49  ;;  %v16766_v16 = vshrl.u32 %v11795_v55, 16  ;;  %v3084_v13 = vrot.slane %v11231_v20, 1 }
 0x210   : > { %v12400_v52 = vpop.f32.mrf.mxu2  ;;  %v1986_v4 = vpop.f32.mrf.mxu0 }
 0x211   : > { %v12403_v12 = vadd.f32 %v1986_v4, %v12342_v28  ;;  %v3352_v44 = vrot.slane %v16766_v16, 1  ;;  %v16767_v4 = vshll.u32 %v11795_v55, 16 }
 0x213   : > { %v12405_v43 = vpop.f32.mrf.mxu1  ;;  %v3353_v35 = vrot.slane %v16767_v4, 2  ;;  %v16769_v4 = vshll.u32 %v11824_v39, 16 }
 0x216   : > { %v1757_v10 = vpop.f32.mrf.mxu3 }
 0x217   : > { %v1813_v56 = vadd.f32 %v1757_v10, %v11965_v18  ;;  %v3354_v10 = vor.u32 %v3353_v35, %v3352_v44  ;;  %v3357_v35 = vrot.slane %v16769_v4, 2 }
 0x218   : > { %v12409_v63 = vpop.f32.mrf.mxu2  ;;  %v1989_v61 = vpop.f32.mrf.mxu0 }
 0x219   : > { %v2049_v28 = vadd.f32 %v1989_v61, %v1810_v24 }
 0x21b   : > { %v2489_v42 = vpop.f32.mrf.mxu1  ;;  %10000 = vmatmul.msk.bf16.gmra.mxu3 %vm489_vm1, %v3083_v32  ;;  %10032 = vmatmul.msk.bf16.vlgmr.msra.gmra.mxu0 %vm489_vm1, %v3351_v21 }
 0x21c   : > { %v12416_v5 = vadd.f32 %v2489_v42, %v2049_v28  ;;  %v3085_v28 = vsel %vm3076_vm5, %v3082_v57, %v3084_v13  ;;  %v3355_v42 = vsel %vm3339_vm6, %v12352_v49, %v3354_v10 }
 0x21e   : > { %v1760_v14 = vpop.f32.mrf.mxu3 }
 0x21f   : > { %v1814_v18 = vadd.f32 %v1760_v14, %v11981_v15 }
 0x220   : > { %v12419_v23 = vpop.f32.mrf.mxu2  ;;  %v1991_v41 = vpop.f32.mrf.mxu0 }
 0x221   : > { %v12425_v24 = vadd.f32 %v1991_v41, %v1811_v27 }
 0x223   : > { %v12427_v26 = vpop.f32.mrf.mxu1 }
 0x226   : > { %v1762_v61 = vpop.f32.mrf.mxu3 }
 0x227   : > { %v1815_v32 = vadd.f32 %v1762_v61, %v11997_v2  ;;  %v10637_v2 = vld [vmem:[%s16572_s3 + $0x118] sm:$0xff] }
 0x228   : > { %v12431_v15 = vpop.f32.mrf.mxu2  ;;  %v1994_v21 = vpop.f32.mrf.mxu0  ;;  %6730 = vmatpush.bf16.msra.mxu2 %v10637_v2  ;;  %v10629_v61 = vld [vmem:[%s16572_s3 + $0xd8] sm:$0xff] }
 0x229   : > { %v2051_v55 = vadd.f32 %v1994_v21, %v1812_v38  ;;  %v16768_v38 = vshrl.u32 %v11824_v39, 16  ;;  %6631 = vmatpush.bf16.msra.mxu1 %v10629_v61 }
 0x22b   : > { %v2494_v14 = vpop.f32.mrf.mxu1  ;;  %10001 = vmatmul.msk.bf16.gmra.mxu3 %vm489_vm1, %v3085_v28  ;;  %10033 = vmatmul.msk.bf16.gmra.mxu0 %vm489_vm1, %v3355_v42  ;;  %v3356_v44 = vrot.slane %v16768_v38, 1  ;;  %v11232_v28 = vld [vmem:[%s11383_s26 + $0x44] sm:$0xff] }
 0x22c   : > { %v12438_v27 = vadd.f32 %v2494_v14, %v2051_v55 }
 0x22d   : > { %v3358_v42 = vor.u32 %v3357_v35, %v3356_v44 }
 0x22e   : > { %v1765_v41 = vpop.f32.mrf.mxu3 }
 0x22f   : > { %v1816_v57 = vadd.f32 %v1765_v41, %v12016_v53  ;;  %v3086_v53 = vrot.slane %v11232_v28, 1  ;;  %v16770_v28 = vshrl.u32 %v11856_v34, 16 }
 0x230   : > { %v12444_v16 = vpop.f32.mrf.mxu2  ;;  %v1996_v49 = vpop.f32.mrf.mxu0 }
 0x231   : > { %v12450_v20 = vadd.f32 %v1996_v49, %v1813_v56  ;;  %v3087_v39 = vsel %vm3076_vm5, %v3084_v13, %v3086_v53  ;;  %v3359_v56 = vsel %vm3339_vm6, %v3354_v10, %v3358_v42  ;;  %v16771_v13 = vshll.u32 %v11856_v34, 16 }
 0x233   : > { %v12455_v21 = vpop.f32.mrf.mxu1  ;;  %v3361_v10 = vrot.slane %v16771_v13, 2 }
 0x236   : > { %v1767_v55 = vpop.f32.mrf.mxu3 }
 0x237   : > { %v1817_v14 = vadd.f32 %v1767_v55, %v12029_v51  ;;  %v3360_v55 = vrot.slane %v16770_v28, 1 }
 0x238   : > { %v12459_v2 = vpop.f32.mrf.mxu2  ;;  %v1999_v41 = vpop.f32.mrf.mxu0 }
 0x239   : > { %v2053_v49 = vadd.f32 %v1999_v41, %v1814_v18 }
 0x23b   : > { %v2499_v38 = vpop.f32.mrf.mxu1  ;;  %10002 = vmatmul.msk.bf16.gmra.mxu3 %vm489_vm1, %v3087_v39  ;;  %10034 = vmatmul.msk.bf16.gmra.mxu0 %vm489_vm1, %v3359_v56  ;;  %v11233_v39 = vld [vmem:[%s11383_s26 + $0x4c] sm:$0xff] }
 0x23c   : > { %v12465_v4 = vadd.f32 %v2499_v38, %v2053_v49  ;;  %v3088_v56 = vrot.slane %v11233_v39, 1  ;;  %v3362_v49 = vor.u32 %v3361_v10, %v3360_v55  ;;  %v16775_v39 = vshrl.u32 %v11888_v46, 16 }
 0x23e   : > { %v1770_v44 = vpop.f32.mrf.mxu3  ;;  %v3089_v17 = vsel %vm3076_vm5, %v3086_v53, %v3088_v56  ;;  %v3363_v28 = vsel %vm3339_vm6, %v3358_v42, %v3362_v49  ;;  %v3364_v53 = vrot.slane %v16775_v39, 1  ;;  %v16776_v42 = vshll.u32 %v11888_v46, 16 }
 0x23f   : > { %v1818_v35 = vadd.f32 %v1770_v44, %v11859_v7 }
 0x240   : > { %v12468_v51 = vpop.f32.mrf.mxu2  ;;  %v2001_v61 = vpop.f32.mrf.mxu0 }
 0x241   : > { %v12474_v18 = vadd.f32 %v2001_v61, %v1815_v32 }
 0x243   : > { %v12476_v41 = vpop.f32.mrf.mxu1 }
 0x246   : > { %v1772_v38 = vpop.f32.mrf.mxu3 }
 0x247   : > { %v1819_v8 = vadd.f32 %v1772_v38, %v11874_v25  ;;  %v3365_v38 = vrot.slane %v16776_v42, 2 }
 0x248   : > { %v12480_v7 = vpop.f32.mrf.mxu2  ;;  %v2004_v44 = vpop.f32.mrf.mxu0 }
 0x249   : > { %16772 = vst [vmem:[#allocation29_spill] sm:$0xff] %v12480_v7  ;;  %v2055_v34 = vadd.f32 %v2004_v44, %v1816_v57 }
 0x24b   : > { %v2504_v13 = vpop.f32.mrf.mxu1  ;;  %10003 = vmatmul.msk.bf16.gmra.mxu3 %vm489_vm1, %v3089_v17  ;;  %10035 = vmatmul.msk.bf16.gmra.mxu0 %vm489_vm1, %v3363_v28  ;;  %v10636_v17 = vld [vmem:[%s16572_s3 + $0x110] sm:$0xff] }
 0x24c   : > { %v12486_v32 = vadd.f32 %v2504_v13, %v2055_v34  ;;  %6731 = vmatpush.bf16.msra.mxu2 %v10636_v17  ;;  %v11234_v28 = vld [vmem:[%s11383_s26 + $0x54] sm:$0xff]  ;;  %v3366_v34 = vor.u32 %v3365_v38, %v3364_v53 }
 0x24d   : > { %v10628_v13 = vld [vmem:[%s16572_s3 + $0xd0] sm:$0xff] }
 0x24e   : > { %16773 = vst [vmem:[#allocation30_spill] sm:$0xff] %v12486_v32  ;;  %v1775_v61 = vpop.f32.mrf.mxu3  ;;  %6632 = vmatpush.bf16.msra.mxu1 %v10628_v13  ;;  %v3367_v42 = vsel %vm3339_vm6, %v3362_v49, %v3366_v34 }
 0x24f   : > { %v1820_v55 = vadd.f32 %v1775_v61, %v11891_v47  ;;  %v3090_v47 = vrot.slane %v11234_v28, 1 }
 0x250   : > { %v12489_v25 = vpop.f32.mrf.mxu2  ;;  %v2006_v10 = vpop.f32.mrf.mxu0 }
 0x251   : > { %16774 = vst [vmem:[#allocation31_spill] sm:$0xff] %v12489_v25  ;;  %v12495_v57 = vadd.f32 %v2006_v10, %v1817_v14  ;;  %v3091_v39 = vsel %vm3076_vm5, %v3088_v56, %v3090_v47 }
 0x253   : > { %16777 = vst [vmem:[#allocation32_spill] sm:$0xff] %v12495_v57  ;;  %v12500_v44 = vpop.f32.mrf.mxu1 }
 0x254   : > { %16778 = vst [vmem:[#allocation33_spill] sm:$0xff] %v12500_v44 }
 0x256   : > { %v1777_v61 = vpop.f32.mrf.mxu3 }
 0x257   : > { %v1821_v46 = vadd.f32 %v1777_v61, %v11903_v40  ;;  %v16782_v61 = vld [vmem:[#allocation3_spill] sm:$0xff] }
 0x258   : > { %v12507_v14 = vpop.f32.mrf.mxu2  ;;  %v2009_v10 = vpop.f32.mrf.mxu0  ;;  %v16783_v56 = vshrl.u32 %v16782_v61, 16  ;;  %v16784_v49 = vshll.u32 %v16782_v61, 16 }
 0x259   : > { %16779 = vst [vmem:[#allocation34_spill] sm:$0xff] %v12507_v14  ;;  %v2057_v17 = vadd.f32 %v2009_v10, %v1818_v35 }
 0x25a   : > { %v3368_v14 = vrot.slane %v16783_v56, 1  ;;  %v3369_v35 = vrot.slane %v16784_v49, 2  ;;  %v16787_v56 = vld [vmem:[#allocation4_spill] sm:$0xff] }
 0x25b   : > { %v2509_v44 = vpop.f32.mrf.mxu1  ;;  %10004 = vmatmul.msk.bf16.gmra.mxu3 %vm489_vm1, %v3091_v39  ;;  %10036 = vmatmul.msk.bf16.gmra.mxu0 %vm489_vm1, %v3367_v42  ;;  %v3786_v39 = vlaneseq }
 0x25c   : > { %v12513_v53 = vadd.f32 %v2509_v44, %v2057_v17  ;;  %v12529_v44 = vld [vmem:[%s11383_s26 + $0x5c] sm:$0xff] }
 0x25d   : > { %v16628_v42 = vrot.slane %v12529_v44, 1  ;;  %v12534_v17 = vshrl.u32 %v3786_v39, 7 }
 0x25e   : > { %16780 = vst [vmem:[#allocation35_spill] sm:$0xff] %v12513_v53  ;;  %v1780_v38 = vpop.f32.mrf.mxu3 }
 0x25f   : > { %v12516_v28 = vadd.f32 %v1780_v38, %v11920_v31  ;;  %v12532_v31 = vor.u32 %v3369_v35, %v3368_v14  ;;  %v3827_v14 = vshrl.u32 %v12534_v17, 16 }
 0x260   : > { %v12518_v40 = vpop.f32.mrf.mxu2  ;;  %v2011_v13 = vpop.f32.mrf.mxu0 }
 0x261   : > { %16781 = vst [vmem:[#allocation36_spill] sm:$0xff] %v12518_v40  ;;  %v12524_v10 = vadd.f32 %v2011_v13, %v1819_v8  ;;  %v3826_v40 = vand.u32 65535, %v12534_v17  ;;  %v3093_v13 = vsel %vm3076_vm5, %v3090_v47, %v16628_v42  ;;  %v3371_v49 = vsel %vm3339_vm6, %v3366_v34, %v12532_v31 }
 0x262   : > { %v12553_v34 = vadd.s32 8, %v12534_v17 }
 0x263   : > { %16785 = vst [vmem:[#allocation3_spill] sm:$0xff] %v12524_v10  ;;  %v12526_v57 = vpop.f32.mrf.mxu1  ;;  %v3830_v35 = vmul.u32 58254, %v3826_v40  ;;  %v3831_v10 = vmul.u32 14564, %v3827_v14 }
 0x264   : > { %16786 = vst [vmem:[#allocation37_spill] sm:$0xff] %v12526_v57  ;;  %v3829_v57 = vmul.u32 14564, %v3826_v40  ;;  %v3856_v7 = vshrl.u32 %v12553_v34, 16 }
 0x265   : > { %v3833_v25 = vshll.u32 %v3830_v35, 16 }
 0x266   : > { %v1782_v38 = vpop.f32.mrf.mxu3 }
 0x267   : > { %v12538_v53 = vadd.f32 %v1782_v38, %v16787_v56  ;;  %v3832_v56 = vmul.u32 58254, %v3827_v14  ;;  %vm3837_vm7 = vc.u32 %v3829_v57, %v3833_v25  ;;  %v3839_v47 = vadd.s32 %v3833_v25, %v3829_v57 }
 0x268   : > { %v12540_v61 = vpop.f32.mrf.mxu2  ;;  %v2014_v8 = vpop.f32.mrf.mxu0  ;;  %v16793_v57 = vshll.u32 %v16790_v30, 16 }
 0x269   : > { %16788 = vst [vmem:[#allocation4_spill] sm:$0xff] %v12540_v61  ;;  %v2059_v39 = vadd.f32 %v2014_v8, %v1820_v55  ;;  %v3835_v61 = vshll.u32 %v3831_v10, 16  ;;  %v16791_v55 = vshrl.u32 %v16790_v30, 16  ;;  %v16635_v8 = vmov 0  }
 0x26a   : > { %v3838_v62 = vsel %vm3837_vm7, 1, %v16635_v8  ;;  %5265 = vst [vmem:[#allocation2 + $0x8] sm:$0xf] %v16635_v8 }
 0x26b   : > { %v2514_v32 = vpop.f32.mrf.mxu1  ;;  %10005 = vmatmul.msk.bf16.gmra.mxu3 %vm489_vm1, %v3093_v13  ;;  %10037 = vmatmul.msk.bf16.gmra.mxu0 %vm489_vm1, %v3371_v49  ;;  %v3372_v40 = vrot.slane %v16791_v55, 1  ;;  %v3840_v49 = vadd.s32 %v3838_v62, %v3832_v56  ;;  %vm3841_vm8 = vc.u32 %v3839_v47, %v3835_v61  ;;  %5266 = vst [vmem:[#allocation2 + $0xc] sm:$0xf] %v16635_v8  ;;  %v3836_v61 = vshrl.u32 %v3831_v10, 16 }
 0x26c   : > { %v12550_v38 = vadd.f32 %v2514_v32, %v2059_v39  ;;  %v3855_v32 = vand.u32 65535, %v12553_v34  ;;  %v3373_v39 = vrot.slane %v16793_v57, 2  ;;  %v3842_v55 = vsel %vm3841_vm8, 1, %v16635_v8  ;;  %5267 = vst [vmem:[#allocation2 + $0x10] sm:$0xf] %v16635_v8  ;;  %v12582_v57 = vld [vmem:[%s11383_s26 + $0x64] sm:$0xff] }
 0x26d   : > { %v3844_v62 = vadd.s32 %v3842_v55, %v3840_v49  ;;  %v12575_v56 = vmul.u32 14564, %v3856_v7  ;;  %5268 = vst [vmem:[#allocation2 + $0xa4] sm:$0xf] %v16635_v8  ;;  %v12595_v55 = vadd.s32 16, %v12534_v17 }
 0x26e   : > { %16789 = vst [vmem:[#allocation38_spill] sm:$0xff] %v12550_v38  ;;  %v1785_v42 = vpop.f32.mrf.mxu3  ;;  %v3834_v38 = vshrl.u32 %v3830_v35, 16  ;;  %v3858_v30 = vmul.u32 14564, %v3855_v32  ;;  %v2542_v35 = vadd.f32 %v12283_v6, %v12279_v54  ;;  %v12587_v10 = vor.u32 %v3373_v39, %v3372_v40 }
 0x26f   : > { %v12559_v13 = vadd.f32 %v1785_v42, %v16792_v50  ;;  %v12572_v42 = vmul.u32 58254, %v3855_v32  ;;  %v10635_v32 = vld [vmem:[%s16572_s3 + $0x108] sm:$0xff]  ;;  %5269 = vst [vmem:[#allocation2 + $0xa8] sm:$0xf] %v16635_v8  ;;  %v3861_v54 = vmul.u32 58254, %v3856_v7  ;;  %v3864_v6 = vshll.u32 %v12575_v56, 16 }
 0x270   : > { %v12562_v14 = vpop.f32.mrf.mxu2  ;;  %v2016_v25 = vpop.f32.mrf.mxu0  ;;  %v3845_v49 = vadd.s32 %v3844_v62, %v3834_v38  ;;  %v12599_v38 = vadd.f32 %v12276_v60, %v12265_v33  ;;  %5270 = vst [vmem:[#allocation2 + $0xac] sm:$0xf] %v16635_v8  ;;  %v12603_v39 = vadd.f32 %v12296_v11, %v2542_v35  ;;  %v12607_v7 = vadd.f32 %v12319_v22, %v12308_v19 }
 0x271   : > { %v12569_v50 = vadd.f32 %v2016_v25, %v1821_v46  ;;  %v3862_v25 = vshll.u32 %v12572_v42, 16  ;;  %v2544_v46 = vadd.f32 %v12329_v59, %v12325_v36  ;;  %6732 = vmatpush.bf16.msra.mxu2 %v10635_v32  ;;  %v2546_v60 = vadd.f32 %v12371_v58, %v12367_v9 }
 0x272   : > { %v3846_v62 = vadd.s32 %v3845_v49, %v3836_v61  ;;  %v16795_v61 = vld [vmem:[#allocation7_spill] sm:$0xff]  ;;  %v16796_v11 = vrot.slane %v12582_v57, 1  ;;  %v3884_v22 = vand.u32 65535, %v12595_v55  ;;  %v3375_v59 = vsel %vm3339_vm6, %v12532_v31, %v12587_v10 }
 0x273   : > { %v12579_v47 = vpop.f32.mrf.mxu1  ;;  %vm3866_vm9 = vc.u32 %v3858_v30, %v3862_v25  ;;  %v3868_v40 = vadd.s32 %v3862_v25, %v3858_v30  ;;  %v16797_v30 = vrot.slane %v12529_v44, 1  ;;  %v3885_v9 = vshrl.u32 %v12595_v55, 16 }
 0x274   : > { %16794 = vst [vmem:[#allocation5_spill] sm:$0xff] %v12579_v47  ;;  %v3867_v33 = vsel %vm3866_vm9, 1, %v16635_v8  ;;  %v12630_v58 = vadd.f32 %v12346_v1, %v2544_v46  ;;  %v3847_v32 = vshrl.u32 %v3846_v62, 4  ;;  %v12642_v31 = vadd.f32 %v12379_v48, %v2546_v60 }
 0x275   : > { %v3095_v19 = vsel %vm3076_vm5, %v16797_v30, %v16796_v11  ;;  %v3869_v25 = vadd.s32 %v3867_v33, %v3861_v54  ;;  %vm3870_vm10 = vc.u32 %v3868_v40, %v3864_v6  ;;  %v12639_v11 = vadd.f32 %v12364_v0, %v12357_v29 }
 0x276   : > { %v1787_v47 = vpop.f32.mrf.mxu3  ;;  %v12646_v1 = vadd.f32 %v12400_v52, %v12390_v3  ;;  %v2548_v46 = vadd.f32 %v12405_v43, %v12403_v12  ;;  %v2550_v54 = vadd.f32 %v12427_v26, %v12425_v24  ;;  %v12655_v0 = vmul.u32 58254, %v3884_v22 }
 0x277   : > { %v12615_v49 = vadd.f32 %v1787_v47, %v16795_v61  ;;  %v10627_v47 = vld [vmem:[%s16572_s3 + $0xc8] sm:$0xff]  ;;  %v3863_v61 = vshrl.u32 %v12572_v42, 16  ;;  %v3865_v3 = vshrl.u32 %v12575_v56, 16  ;;  %v3887_v52 = vmul.u32 14564, %v3884_v22 }
 0x278   : > { %v12623_v35 = vpop.f32.mrf.mxu2  ;;  %v2019_v36 = vpop.f32.mrf.mxu0  ;;  %6633 = vmatpush.bf16.msra.mxu1 %v10627_v47  ;;  %v12658_v6 = vmul.u32 14564, %v3885_v9  ;;  %v12661_v12 = vadd.f32 %v12409_v63, %v2548_v46  ;;  %v12665_v43 = vadd.f32 %v12419_v23, %v12416_v5  ;;  %v3848_v24 = vmul.u32 18, %v3847_v32 }
 0x279   : > { %16798 = vst [vmem:[#allocation6_spill] sm:$0xff] %v12623_v35  ;;  %v2061_v44 = vadd.f32 %v2019_v36, %v12516_v28  ;;  %v3871_v28 = vsel %vm3870_vm10, 1, %v16635_v8  ;;  %v12668_v62 = vadd.f32 %v12431_v15, %v2550_v54  ;;  %v3890_v33 = vmul.u32 58254, %v3885_v9 }
 0x27a   : > { %v3873_v29 = vadd.s32 %v3871_v28, %v3869_v25  ;;  %v3891_v60 = vshll.u32 %v12655_v0, 16  ;;  %v12672_v56 = vadd.s32 24, %v12534_v17  ;;  %v12676_v63 = vadd.f32 %v12444_v16, %v12438_v27 }
 0x27b   : > { %v2519_v42 = vpop.f32.mrf.mxu1  ;;  %10006 = vmatmul.msk.bf16.gmra.mxu3 %vm489_vm1, %v3095_v19  ;;  %10038 = vmatmul.msk.bf16.gmra.mxu0 %vm489_vm1, %v3375_v59  ;;  %v2552_v5 = vadd.f32 %v12455_v21, %v12450_v20  ;;  %v16799_v23 = vshrl.u32 %v11975_v37, 16  ;;  %v16800_v15 = vshll.u32 %v11975_v37, 16  ;;  %v16801_v59 = vshrl.u32 %v12010_v45, 16 }
 0x27c   : > { %v2561_v48 = vadd.f32 %v2519_v42, %v2061_v44  ;;  %v3874_v26 = vadd.s32 %v3873_v29, %v3863_v61  ;;  %v3893_v44 = vshll.u32 %v12658_v6, 16  ;;  %vm3895_vm11 = vc.u32 %v3887_v52, %v3891_v60  ;;  %v11237_v42 = vld [vmem:[%s11383_s26 + $0x6c] sm:$0xff] }
 0x27d   : > { %v3376_v30 = vrot.slane %v16799_v23, 1  ;;  %v3377_v19 = vrot.slane %v16800_v15, 2  ;;  %v3380_v25 = vrot.slane %v16801_v59, 1  ;;  %v3849_v20 = vsub.s32 %v12534_v17, %v3848_v24 }
 0x27e   : > { %v3201_v40 = vpop.f32.mrf.mxu3  ;;  %v3875_v9 = vadd.s32 %v3874_v26, %v3865_v3  ;;  %v3896_v37 = vsel %vm3895_vm11, 1, %v16635_v8  ;;  %v16804_v21 = vshll.u32 %v12010_v45, 16  ;;  %v3897_v32 = vadd.s32 %v3891_v60, %v3887_v52 }
 0x27f   : > { %v3898_v61 = vadd.s32 %v3896_v37, %v3890_v33  ;;  %v3913_v28 = vand.u32 65535, %v12672_v56  ;;  %v12698_v46 = vadd.f32 %v12459_v2, %v2552_v5  ;;  %v3378_v29 = vor.u32 %v3377_v19, %v3376_v30  ;;  %v12713_v33 = vld [vmem:[%s11383_s26 + $0x74] sm:$0xff] }
 0x280   : > { %v3018_v22 = vpop.f32.mrf.mxu2  ;;  %v2021_v36 = vpop.f32.mrf.mxu0  ;;  %v3381_v47 = vrot.slane %v16804_v21, 2  ;;  %v3876_v3 = vshrl.u32 %v3875_v9, 4  ;;  %v3892_v24 = vshrl.u32 %v12655_v0, 16  ;;  %vm3899_vm12 = vc.u32 %v3897_v32, %v3893_v44 }
 0x281   : > { %v12687_v27 = vadd.f32 %v3018_v22, %v2561_v48  ;;  %v12690_v16 = vadd.f32 %v2021_v36, %v12538_v53  ;;  %v3096_v53 = vrot.slane %v11237_v42, 1  ;;  %v3914_v48 = vshrl.u32 %v12672_v56, 16 }
 0x282   : > { %v12705_v45 = vmul.u32 58254, %v3913_v28  ;;  %v2554_v52 = vadd.f32 %v12476_v41, %v12474_v18  ;;  %vm4867_vm13 = vcmp.ne.s32.totalorder %v3849_v20, 0  ;;  %vm4903_vm14 = vcmp.lt.s32.totalorder %v3849_v20, 0 }
 0x283   : > { %16802 = vst [vmem:[#allocation7_spill] sm:$0xff] %v12687_v27  ;;  %v12700_v54 = vpop.f32.mrf.mxu1  ;;  %v3900_v2 = vsel %vm3899_vm12, 1, %v16635_v8  ;;  %v3098_v60 = vrot.slane %v12713_v33, 1  ;;  %v12716_v5 = vor.u32 %v3381_v47, %v3380_v25  ;;  %v3894_v0 = vshrl.u32 %v12658_v6, 16  ;;  %vm4939_vm15 = vmand %vm4903_vm14, %vm4867_vm13 }
 0x284   : > { %16803 = vst [vmem:[#allocation39_spill] sm:$0xff] %v12690_v16  ;;  %v3902_v23 = vadd.s32 %v3900_v2, %v3898_v61  ;;  %v4975_v30 = vadd.s32 18, %v3849_v20  ;;  %v3916_v15 = vmul.u32 14564, %v3913_v28  ;;  %v12719_v19 = vmul.u32 14564, %v3914_v48 }
 0x285   : > { %16805 = vst [vmem:[#allocation40_spill] sm:$0xff] %v12700_v54  ;;  %v3920_v18 = vshll.u32 %v12705_v45, 16  ;;  %v16807_v36 = vrot.slane %v12582_v57, 1  ;;  %v3379_v25 = vsel %vm3339_vm6, %v12587_v10, %v3378_v29  ;;  %v3877_v6 = vmul.u32 18, %v3876_v3  ;;  %v16808_v57 = vld [vmem:[#allocation29_spill] sm:$0xff] }
 0x286   : > { %v12710_v26 = vpop.f32.mrf.mxu3  ;;  %v3903_v9 = vadd.s32 %v3902_v23, %v3892_v24  ;;  %v12733_v44 = vadd.f32 %v12468_v51, %v12465_v4  ;;  %v3919_v21 = vmul.u32 58254, %v3914_v48  ;;  %v12737_v47 = vadd.s32 32, %v12534_v17  ;;  %v16809_v51 = vld [vmem:[#allocation9_spill] sm:$0xff] }
 0x287   : > { %v3097_v59 = vsel %vm3076_vm5, %v16807_v36, %v3096_v53  ;;  %v12740_v32 = vadd.f32 %v16808_v57, %v2554_v52  ;;  %v12745_v10 = vsel %vm3076_vm5, %v3096_v53, %v3098_v60  ;;  %v12749_v61 = vsel %vm3339_vm6, %v3378_v29, %v12716_v5 }
 0x288   : > { %v12722_v41 = vpop.f32.mrf.mxu2  ;;  %v2024_v22 = vpop.f32.mrf.mxu0  ;;  %v3904_v4 = vadd.s32 %v3903_v9, %v3894_v0  ;;  %v12752_v28 = vadd.f32 %v3201_v40, %v16809_v51  ;;  %v12756_v42 = vsel %vm4939_vm15, %v4975_v30, %v3849_v20  ;;  %v3922_v48 = vshll.u32 %v12719_v19, 16  ;;  %v16810_v30 = vld [vmem:[#allocation8_spill] sm:$0xff] }
 0x289   : > { %16806 = vst [vmem:[#allocation41_spill] sm:$0xff] %v12722_v41  ;;  %v2063_v37 = vadd.f32 %v2024_v22, %v12559_v13  ;;  %vm3924_vm0 = vc.u32 %v3916_v15, %v3920_v18  ;;  %v12760_v3 = vsub.s32 %v12553_v34, %v3877_v6  ;;  %v3926_v52 = vadd.s32 %v3920_v18, %v3916_v15 }
 0x28a   : > { %v3905_v29 = vshrl.u32 %v3904_v4, 4  ;;  %v3925_v24 = vsel %vm3924_vm0, 1, %v16635_v8  ;;  %v3942_v2 = vand.u32 65535, %v12737_v47  ;;  %v3943_v0 = vshrl.u32 %v12737_v47, 16 }
 0x28b   : > { %v2524_v13 = vpop.f32.mrf.mxu1  ;;  %10007 = vmatmul.msk.bf16.gmra.mxu3 %vm489_vm1, %v3097_v59  ;;  %10039 = vmatmul.msk.bf16.gmra.mxu0 %vm489_vm1, %v3379_v25  ;;  %v3927_v40 = vadd.s32 %v3925_v24, %v3919_v21  ;;  %v16811_v22 = vshrl.u32 %v16810_v30, 16  ;;  %v16812_v59 = vshll.u32 %v16810_v30, 16  ;;  %v3921_v34 = vshrl.u32 %v12705_v45, 16 }
 0x28c   : > { %v2563_v53 = vadd.f32 %v2524_v13, %v2063_v37  ;;  %v3906_v20 = vmul.u32 18, %v3905_v29  ;;  %v3923_v6 = vshrl.u32 %v12719_v19, 16  ;;  %vm3928_vm7 = vc.u32 %v3926_v52, %v3922_v48 }
 0x28d   : > { %v3384_v36 = vrot.slane %v16811_v22, 1  ;;  %v3385_v25 = vrot.slane %v16812_v59, 2  ;;  %v3945_v15 = vmul.u32 14564, %v3942_v2  ;;  %v3946_v18 = vmul.u32 58254, %v3942_v2 }
 0x28e   : > { %v12765_v23 = vpop.f32.mrf.mxu3  ;;  %v3907_v21 = vsub.s32 %v12595_v55, %v3906_v20  ;;  %v3929_v57 = vsel %vm3928_vm7, 1, %v16635_v8  ;;  %v3947_v4 = vmul.u32 14564, %v3943_v0  ;;  %v3948_v51 = vmul.u32 58254, %v3943_v0 }
 0x28f   : > { %v3931_v45 = vadd.s32 %v3929_v57, %v3927_v40  ;;  %v3949_v24 = vshll.u32 %v3946_v18, 16  ;;  %vm5047_vm8 = vcmp.ge.s32.totalorder %v12756_v42, 1  ;;  %vm4868_vm9 = vcmp.ne.s32.totalorder %v12760_v3, 0 }
 0x290   : > { %v3023_v9 = vpop.f32.mrf.mxu2  ;;  %v2026_v37 = vpop.f32.mrf.mxu0  ;;  %vm4904_vm10 = vcmp.lt.s32.totalorder %v12760_v3, 0  ;;  %v12784_v55 = vadd.s32 40, %v12534_v17  ;;  %v4976_v19 = vadd.s32 18, %v12760_v3  ;;  %v3951_v52 = vshll.u32 %v3947_v4, 16 }
 0x291   : > { %v12775_v13 = vadd.f32 %v3023_v9, %v2563_v53  ;;  %v12778_v29 = vadd.f32 %v2026_v37, %v12615_v49  ;;  %v3932_v48 = vadd.s32 %v3931_v45, %v3921_v34  ;;  %vm3953_vm11 = vc.u32 %v3945_v15, %v3949_v24  ;;  %v12788_v53 = vld [vmem:[%s11383_s26 + $0x7c] sm:$0xff]  ;;  %vm12800_vm14 = vmand %vm4904_vm10, %vm4868_vm9 }
 0x292   : > { %v16633_v49 = vrot.slane %v12788_v53, 1  ;;  %v12791_v40 = vor.u32 %v3385_v25, %v3384_v36  ;;  %v3954_v2 = vsel %vm3953_vm11, 1, %v16635_v8  ;;  %v3955_v0 = vadd.s32 %v3949_v24, %v3945_v15  ;;  %v10626_v36 = vld [vmem:[%s16572_s3 + $0xc0] sm:$0xff]  ;;  %v16817_v15 = vld [vmem:[#allocation10_spill] sm:$0xff] }
 0x293   : > { %16813 = vst [vmem:[#allocation29_spill] sm:$0xff] %v12775_v13  ;;  %vm4869_vm12 = vcmp.ne.s32.totalorder %v3907_v21, 0  ;;  %vm4905_vm13 = vcmp.lt.s32.totalorder %v3907_v21, 0  ;;  %v3933_v20 = vadd.s32 %v3932_v48, %v3923_v6  ;;  %v3956_v30 = vadd.s32 %v3954_v2, %v3948_v51  ;;  %v12814_v37 = vld [vmem:[%s16571_s2] ss:$0 sm:$0xff]  ;;  %6634 = vmatpush.bf16.msra.mxu1 %v10626_v36 }
 0x294   : > { %16814 = vst [vmem:[#allocation9_spill] sm:$0xff] %v12778_v29  ;;  %v3950_v34 = vshrl.u32 %v3946_v18, 16  ;;  %vm3957_vm15 = vc.u32 %v3955_v0, %v3951_v52  ;;  %v3971_v25 = vand.u32 65535, %v12784_v55  ;;  %v3972_v6 = vshrl.u32 %v12784_v55, 16  ;;  %v12820_v2 = vld [vmem:[#allocation2 + $0x10] sm:$0x8]  ;;  %vm4941_vm7 = vmand %vm4905_vm13, %vm4869_vm12 }
 0x295   : > { %v3292_v9 = vadd.f32 %v12710_v26, %v16817_v15  ;;  %vm5083_vm0 = vcmp.le.s32.totalorder %v12756_v42, 16  ;;  %v3934_v18 = vshrl.u32 %v3933_v20, 4  ;;  %v3958_v57 = vsel %vm3957_vm15, 1, %v16635_v8 }
 0x296   : > { %v12794_v22 = vpop.f32.mrf.mxu3  ;;  %v4977_v45 = vadd.s32 18, %v3907_v21  ;;  %v3952_v24 = vshrl.u32 %v3947_v4, 16  ;;  %v3960_v48 = vadd.s32 %v3958_v57, %v3956_v30  ;;  %v12818_v52 = vmul.u32 58254, %v3971_v25  ;;  %vm5119_vm10 = vmand %vm5047_vm8, %vm5083_vm0 }
 0x297   : > { %v12826_v0 = vsel %vm12800_vm14, %v4976_v19, %v12760_v3  ;;  %v12835_v4 = vsel %vm3076_vm5, %v3098_v60, %v16633_v49  ;;  %v3935_v20 = vmul.u32 18, %v3934_v18  ;;  %v3974_v59 = vmul.u32 14564, %v3971_v25  ;;  %v16818_v19 = vld [vmem:[#allocation12_spill] sm:$0xff] }
 0x298   : > { %v3512_v51 = vpop.f32.mrf.mxu0  ;;  %v3961_v30 = vadd.s32 %v3960_v48, %v3950_v34  ;;  %v12842_v3 = vmul.u32 14564, %v3972_v6  ;;  %v12846_v36 = vadd.f32 %v12765_v23, %v16818_v19  ;;  %v3978_v33 = vshll.u32 %v12818_v52, 16 }
 0x299   : > { %v3602_v26 = vadd.f32 %v3512_v51, %v12752_v28  ;;  %v12840_v28 = vsel %vm3339_vm6, %v12716_v5, %v12791_v40  ;;  %v12855_v5 = vsel %vm4941_vm7, %v4977_v45, %v3907_v21  ;;  %v3977_v25 = vmul.u32 58254, %v3972_v6 }
 0x29a   : > { %v3962_v34 = vadd.s32 %v3961_v30, %v3952_v24  ;;  %v12858_v23 = vadd.s32 48, %v12534_v17  ;;  %v3980_v24 = vshll.u32 %v12842_v3, 16  ;;  %vm3982_vm11 = vc.u32 %v3974_v59, %v3978_v33  ;;  %v12871_v30 = vld [vmem:[%s11383_s26 + $0x84] sm:$0xff] }
 0x29b   : > { %v3642_v15 = vadd.f32 %v12814_v37, %v3602_v26  ;;  %10008 = vmatmul.msk.bf16.gmra.mxu3 %vm489_vm1, %v12745_v10  ;;  %10040 = vmatmul.msk.bf16.gmra.mxu0 %vm489_vm1, %v12749_v61  ;;  %v3936_v10 = vsub.s32 %v12672_v56, %v3935_v20  ;;  %v16819_v61 = vld [vmem:[#allocation11_spill] sm:$0xff]  ;;  %v16637_v19 = vrot.slane %v12871_v30, 1  ;;  %v3983_v42 = vsel %vm3982_vm11, 1, %v16635_v8 }
 0x29c   : > { %v16820_v57 = vshrl.u32 %v16819_v61, 16  ;;  %v3963_v21 = vshrl.u32 %v3962_v34, 4  ;;  %v16821_v45 = vshll.u32 %v16819_v61, 16  ;;  %v3984_v60 = vadd.s32 %v3978_v33, %v3974_v59 }
 0x29d   : > { %vm3678_vm9 = vcmp.gt.f32.partialorder %v3642_v15, 0.0  ;;  %v3714_v18 = vmul.f32 0.1, %v3642_v15  ;;  %v3985_v34 = vadd.s32 %v3983_v42, %v3977_v25  ;;  %vm5048_vm8 = vcmp.ge.s32.totalorder %v12826_v0, 1  ;;  %v10634_v25 = vld [vmem:[%s16572_s3 + $0x100] sm:$0xff] }
 0x29e   : > { %v3388_v51 = vrot.slane %v16820_v57, 1  ;;  %v3211_v48 = vpop.f32.mrf.mxu3  ;;  %v3389_v6 = vrot.slane %v16821_v45, 2  ;;  %v3964_v49 = vmul.u32 18, %v3963_v21  ;;  %v3979_v57 = vshrl.u32 %v12818_v52, 16  ;;  %6733 = vmatpush.bf16.msra.mxu2 %v10634_v25 }
 0x29f   : > { %v3750_v26 = vsel %vm3678_vm9, %v3642_v15, %v3714_v18  ;;  %vm5084_vm12 = vcmp.le.s32.totalorder %v12826_v0, 16  ;;  %vm4870_vm13 = vcmp.ne.s32.totalorder %v3936_v10, 0  ;;  %vm4906_vm14 = vcmp.lt.s32.totalorder %v3936_v10, 0 }
 0x2a0   : > { %v5227_v56 = vsel %vm5119_vm10, %v3750_v26, 0.0  ;;  %v3514_v20 = vpop.f32.mrf.mxu0  ;;  %vm5049_vm15 = vcmp.ge.s32.totalorder %v12855_v5, 1  ;;  %vm5085_vm0 = vcmp.le.s32.totalorder %v12855_v5, 16  ;;  %v3965_v59 = vsub.s32 %v12737_v47, %v3964_v49  ;;  %vm12890_vm9 = vmand %vm4906_vm14, %vm4870_vm13  ;;  %v16824_v49 = vld [vmem:[#allocation13_spill] sm:$0xff] }
 0x2a1   : > { %v5271_v13 = vpack.c.bf16 %v5227_v56, %v5227_v56  ;;  %v3603_v61 = vadd.f32 %v3514_v20, %v3292_v9  ;;  %vm3986_vm7 = vc.u32 %v3984_v60, %v3980_v24  ;;  %v4000_v15 = vand.u32 65535, %v12858_v23 }
 0x2a2   : > { %v4001_v52 = vshrl.u32 %v12858_v23, 16  ;;  %v4978_v33 = vadd.s32 18, %v3936_v10  ;;  %v12887_v18 = vor.u32 %v3389_v6, %v3388_v51  ;;  %v3987_v21 = vsel %vm3986_vm7, 1, %v16635_v8 }
 0x2a3   : > { %5307 = vst [vmem:[#allocation2 + $0x14] sm:$0xf] %v5271_v13  ;;  %v3643_v9 = vadd.f32 %v12814_v37, %v3603_v61  ;;  %vm4871_vm10 = vcmp.ne.s32.totalorder %v3965_v59, 0  ;;  %vm4907_vm11 = vcmp.lt.s32.totalorder %v3965_v59, 0  ;;  %v3981_v47 = vshrl.u32 %v12842_v3, 16  ;;  %v16825_v61 = vld [vmem:[#allocation15_spill] sm:$0xff] }
 0x2a4   : > { %v3989_v13 = vadd.s32 %v3987_v21, %v3985_v34  ;;  %v12897_v60 = vadd.f32 %v12794_v22, %v16824_v49  ;;  %v4979_v26 = vadd.s32 18, %v3965_v59  ;;  %v12899_v51 = vmul.u32 58254, %v4000_v15  ;;  %vm4943_vm13 = vmand %vm4907_vm11, %vm4871_vm10  ;;  %v16827_v49 = vld [vmem:[#allocation16_spill] sm:$0xff] }
 0x2a5   : > { %v3715_v24 = vmul.f32 0.1, %v3643_v9  ;;  %vm3679_vm4 = vcmp.gt.f32.partialorder %v3643_v9, 0.0  ;;  %v4003_v56 = vmul.u32 14564, %v4000_v15  ;;  %v12901_v20 = vmul.u32 14564, %v4001_v52  ;;  %vm12959_vm10 = vmand %vm5049_vm15, %vm5085_vm0 }
 0x2a6   : > { %v3213_v6 = vpop.f32.mrf.mxu3  ;;  %v3990_v42 = vadd.s32 %v3989_v13, %v3979_v57  ;;  %v12904_v8 = vadd.f32 %v3211_v48, %v16825_v61  ;;  %v12908_v3 = vsel %vm12890_vm9, %v4978_v33, %v3936_v10  ;;  %v16826_v22 = vrot.slane %v12788_v53, 1 }
 0x2a7   : > { %v12920_v57 = vsel %vm3339_vm6, %v12791_v40, %v12887_v18  ;;  %v4006_v48 = vmul.u32 58254, %v4001_v52  ;;  %v4007_v21 = vshll.u32 %v12899_v51, 16  ;;  %v12924_v10 = vadd.s32 56, %v12534_v17 }
 0x2a8   : > { %v12915_v34 = vsel %vm3076_vm5, %v16826_v22, %v16637_v19  ;;  %v3517_v15 = vpop.f32.mrf.mxu0  ;;  %v3991_v25 = vadd.s32 %v3990_v42, %v3981_v47  ;;  %v3751_v33 = vsel %vm3679_vm4, %v3643_v9, %v3715_v24  ;;  %v12927_v53 = vsel %vm4943_vm13, %v4979_v26, %v3965_v59  ;;  %vm12947_vm4 = vmand %vm5048_vm8, %vm5084_vm12 }
 0x2a9   : > { %v3604_v45 = vadd.f32 %v3517_v15, %v12846_v36  ;;  %v4009_v13 = vshll.u32 %v12901_v20, 16  ;;  %v12931_v61 = vadd.f32 %v3213_v6, %v16827_v49  ;;  %vm4011_vm14 = vc.u32 %v4003_v56, %v4007_v21 }
 0x2aa   : > { %v3992_v40 = vshrl.u32 %v3991_v25, 4  ;;  %v12933_v22 = vld [vmem:[#allocation2 + $0x10] sm:$0xff]   ;;  %v4013_v52 = vadd.s32 %v4007_v21, %v4003_v56  ;;  %v4008_v59 = vshrl.u32 %v12899_v51, 16  ;;  %v16828_v9 = vmov 0  }
 0x2ab   : > { %v3644_v47 = vadd.f32 %v12814_v37, %v3604_v45  ;;  %10009 = vmatmul.msk.bf16.gmra.mxu3 %vm489_vm1, %v12835_v4  ;;  %10041 = vmatmul.msk.bf16.gmra.mxu0 %vm489_vm1, %v12840_v28  ;;  %v10869_v36 = vunpack.c.h.b16 %v12933_v22  ;;  %v4012_v24 = vsel %vm4011_vm14, 1, %v16828_v9  ;;  %v12952_v4 = vld [vmem:[%s11383_s26 + $0x8c] sm:$0xff]  ;;  %v16833_v0 = vunpack.c.l.b16 %v12820_v2 }
 0x2ac   : > { %v3993_v6 = vmul.u32 18, %v3992_v40  ;;  %v4014_v42 = vadd.s32 %v4012_v24, %v4006_v48  ;;  %vm4015_vm7 = vc.u32 %v4013_v52, %v4009_v13  ;;  %v16834_v13 = vld [vmem:[#allocation14_spill] sm:$0xff]  ;;  %v5228_v5 = vsel %vm12947_vm4, %v3751_v33, 0.0 }
 0x2ad   : > { %vm3680_vm9 = vcmp.gt.f32.partialorder %v3644_v47, 0.0  ;;  %v3716_v56 = vmul.f32 0.1, %v3644_v47  ;;  %v5727_v15 = vpack.c.b16 %v10869_v36, %v16833_v0  ;;  %v4016_v25 = vsel %vm4015_vm7, 1, %v16828_v9 }
 0x2ae   : > { %v3216_v48 = vpop.f32.mrf.mxu3  ;;  %v3994_v21 = vsub.s32 %v12784_v55, %v3993_v6  ;;  %v4018_v45 = vadd.s32 %v4016_v25, %v4014_v42  ;;  %v16835_v49 = vshrl.u32 %v16834_v13, 16  ;;  %v16836_v22 = vshll.u32 %v16834_v13, 16 }
 0x2af   : > { %v3752_v24 = vsel %vm3680_vm9, %v3644_v47, %v3716_v56  ;;  %v6000_v19 = vshrl.u32 %v5727_v15, 16  ;;  %v6003_v28 = vshll.u32 %v5727_v15, 16  ;;  %vm5050_vm8 = vcmp.ge.s32.totalorder %v12908_v3, 1 }
 0x2b0   : > { %v3392_v40 = vrot.slane %v16835_v49, 1  ;;  %v3393_v52 = vrot.slane %v16836_v22, 2  ;;  %v5229_v2 = vsel %vm12959_vm10, %v3752_v24, 0.0  ;;  %v3519_v0 = vpop.f32.mrf.mxu0  ;;  %vm5086_vm12 = vcmp.le.s32.totalorder %v12908_v3, 16 }
 0x2b1   : > { %vm4872_vm15 = vcmp.ne.s32.totalorder %v3994_v21, 0  ;;  %vm4908_vm0 = vcmp.lt.s32.totalorder %v3994_v21, 0  ;;  %v4010_v55 = vshrl.u32 %v12901_v20, 16  ;;  %v10784_v6 = vpack.c.bf16 %v5229_v2, %v5228_v5  ;;  %v16841_v5 = vld [vmem:[#allocation18_spill] sm:$0xff]  ;;  %vm13037_vm9 = vmand %vm5050_vm8, %vm5086_vm12 }
 0x2b2   : > { %v3605_v42 = vadd.f32 %v3519_v0, %v12897_v60  ;;  %vm5051_vm11 = vcmp.ge.s32.totalorder %v12927_v53, 1  ;;  %vm5087_vm13 = vcmp.le.s32.totalorder %v12927_v53, 16  ;;  %v4980_v33 = vadd.s32 18, %v3994_v21  ;;  %vm12988_vm14 = vmand %vm4908_vm0, %vm4872_vm15 }
 0x2b3   : > { %v16837_v47 = vrot.slane %v12952_v4, 1  ;;  %v16838_v26 = vrot.slane %v12871_v30, 1  ;;  %v6002_v20 = vrot.slane %v6000_v19, 3  ;;  %v4019_v15 = vadd.s32 %v4018_v45, %v4008_v59  ;;  %11031 = vst [vmem:[#allocation2 + $0x18] sm:$0xff] %v10784_v6   ;;  %vm13058_vm10 = vmand %vm5051_vm11, %vm5087_vm13 }
 0x2b4   : > { %v12992_v25 = vor.u32 %v3393_v52, %v3392_v40  ;;  %v4029_v60 = vand.u32 65535, %v12924_v10  ;;  %v3645_v13 = vadd.f32 %v12814_v37, %v3605_v42  ;;  %v10872_v49 = vunpack.c.l.b16 %v10784_v6 }
 0x2b5   : > { %v12986_v56 = vsel %vm3076_vm5, %v16838_v26, %v16837_v47  ;;  %v6005_v22 = vrot.slane %v6003_v28, 4  ;;  %v4030_v30 = vshrl.u32 %v12924_v10, 16  ;;  %v12998_v24 = vadd.f32 %v3216_v48, %v16841_v5 }
 0x2b6   : > { %v13000_v2 = vshll.u32 %v10784_v6, 16  ;;  %v13002_v0 = vshrl.u32 %v10784_v6, 16  ;;  %v4020_v19 = vadd.s32 %v4019_v15, %v4010_v55  ;;  %vm3681_vm4 = vcmp.gt.f32.partialorder %v3645_v13, 0.0  ;;  %v3218_v52 = vpop.f32.mrf.mxu3 }
 0x2b7   : > { %v3717_v59 = vmul.f32 0.1, %v3645_v13  ;;  %v13006_v45 = vsel %vm12988_vm14, %v4980_v33, %v3994_v21  ;;  %v4032_v40 = vmul.u32 14564, %v4029_v60  ;;  %v4033_v48 = vmul.u32 58254, %v4029_v60  ;;  %v10649_v60 = vld [vmem:[%s16572_s3 + $0x178] sm:$0xff] }
 0x2b8   : > { %16842 = vst [vmem:[#allocation8_spill] sm:$0xff] %v13000_v2  ;;  %v6007_v28 = vrot.slane %v13002_v0, 3  ;;  %v6008_v42 = vrot.slane %v13000_v2, 4  ;;  %v4021_v47 = vshrl.u32 %v4020_v19, 4  ;;  %v13010_v26 = vpack.c.b16 %v10872_v49, %v10869_v36  ;;  %v3522_v21 = vpop.f32.mrf.mxu0  ;;  %6825 = vmatpush.bf16.msrb.mxu3 %v10649_v60 }
 0x2b9   : > { %16843 = vst [vmem:[#allocation10_spill] sm:$0xff] %v13002_v0  ;;  %v6006_v5 = vor.u32 %v6005_v22, %v6002_v20  ;;  %v13015_v55 = vsel %vm3339_vm6, %v12887_v18, %v12992_v25  ;;  %v13017_v6 = vmul.u32 14564, %v4030_v30  ;;  %v4035_v15 = vmul.u32 58254, %v4030_v30  ;;  %v16844_v20 = vld [vmem:[#allocation19_spill] sm:$0xff] }
 0x2ba   : > { %v13019_v33 = vor.u32 %v6008_v42, %v6007_v28  ;;  %v4022_v51 = vmul.u32 18, %v4021_v47  ;;  %v4036_v27 = vshll.u32 %v4033_v48, 16  ;;  %v3753_v36 = vsel %vm3681_vm4, %v3645_v13, %v3717_v59  ;;  %v13051_v59 = vld [vmem:[%s11383_s26 + $0x94] sm:$0xff] }
 0x2bb   : > { %v13026_v49 = vadd.f32 %v3218_v52, %v16844_v20  ;;  %v3606_v18 = vadd.f32 %v3522_v21, %v12904_v8  ;;  %v4038_v22 = vshll.u32 %v13017_v6, 16  ;;  %10010 = vmatmul.msk.bf16.gmra.mxu3 %vm489_vm1, %v12915_v34  ;;  %10042 = vmatmul.msk.bf16.gmra.mxu0 %vm489_vm1, %v12920_v57  ;;  %v16638_v3 = vrot.slane %v13051_v59, 1 }
 0x2bc   : > { %v6010_v19 = vsel %vm1006_vm2, %v6006_v5, %v13019_v33  ;;  %v4023_v30 = vsub.s32 %v12858_v23, %v4022_v51  ;;  %vm4040_vm7 = vc.u32 %v4032_v40, %v4036_v27  ;;  %v4042_v28 = vadd.s32 %v4036_v27, %v4032_v40 }
 0x2bd   : > { %v3646_v8 = vadd.f32 %v12814_v37, %v3606_v18  ;;  %v4041_v23 = vsel %vm4040_vm7, 1, %v16828_v9  ;;  %v13048_v27 = vadd.s32 64, %v12534_v17  ;;  %6635 = vmatmul.bf16.vlgmr.msra.gmra.mxu1 %v6010_v19  ;;  %vm5052_vm0 = vcmp.ge.s32.totalorder %v13006_v45, 1 }
 0x2be   : > { %vm4873_vm8 = vcmp.ne.s32.totalorder %v4023_v30, 0  ;;  %vm4909_vm12 = vcmp.lt.s32.totalorder %v4023_v30, 0  ;;  %v4981_v34 = vadd.s32 18, %v4023_v30  ;;  %v4043_v57 = vadd.s32 %v4041_v23, %v4035_v15  ;;  %v3221_v47 = vpop.f32.mrf.mxu3 }
 0x2bf   : > { %vm3682_vm15 = vcmp.gt.f32.partialorder %v3646_v8, 0.0  ;;  %v3718_v52 = vmul.f32 0.1, %v3646_v8  ;;  %vm5088_vm14 = vcmp.le.s32.totalorder %v13006_v45, 16  ;;  %vm4945_vm4 = vmand %vm4909_vm12, %vm4873_vm8  ;;  %vm4044_vm7 = vc.u32 %v4042_v28, %v4038_v22 }
 0x2c0   : > { %v4058_v42 = vand.u32 65535, %v13048_v27  ;;  %v5230_v53 = vsel %vm13037_vm9, %v3753_v36, 0.0  ;;  %v4037_v5 = vshrl.u32 %v4033_v48, 16  ;;  %v4045_v21 = vsel %vm4044_vm7, 1, %v16828_v9  ;;  %v3524_v48 = vpop.f32.mrf.mxu0  ;;  %vm13118_vm12 = vmand %vm5052_vm0, %vm5088_vm14 }
 0x2c1   : > { %v4059_v51 = vshrl.u32 %v13048_v27, 16  ;;  %v3754_v15 = vsel %vm3682_vm15, %v3646_v8, %v3718_v52  ;;  %v13069_v60 = vsel %vm4945_vm4, %v4981_v34, %v4023_v30  ;;  %v4039_v20 = vshrl.u32 %v13017_v6, 16  ;;  %v16850_v8 = vld [vmem:[#allocation21_spill] sm:$0xff] }
 0x2c2   : > { %v16849_v18 = vrot.slane %v12952_v4, 1  ;;  %v5231_v36 = vsel %vm13058_vm10, %v3754_v15, 0.0  ;;  %v4047_v19 = vadd.s32 %v4045_v21, %v4043_v57  ;;  %v4061_v28 = vmul.u32 14564, %v4058_v42  ;;  %v16853_v21 = vld [vmem:[#allocation17_spill] sm:$0xff] }
 0x2c3   : > { %v4062_v13 = vmul.u32 58254, %v4058_v42  ;;  %v10789_v23 = vpack.c.bf16 %v5231_v36, %v5230_v53  ;;  %v13082_v30 = vadd.f32 %v3221_v47, %v16850_v8  ;;  %v3607_v6 = vadd.f32 %v3524_v48, %v12931_v61  ;;  %v10609_v61 = vld [vmem:[%s16572_s3 + $0x38] sm:$0xff] }
 0x2c4   : > { %v13077_v22 = vsel %vm3076_vm5, %v16849_v18, %v16638_v3  ;;  %v13085_v34 = vmul.u32 14564, %v4059_v51  ;;  %vm5053_vm11 = vcmp.ge.s32.totalorder %v13069_v60, 1  ;;  %v4048_v4 = vadd.s32 %v4047_v19, %v4037_v5  ;;  %v10625_v53 = vld [vmem:[%s16572_s3 + $0xb8] sm:$0xff]  ;;  %7542 = vmatpush.bf16.msrb.mxu0 %v10609_v61 }
 0x2c5   : > { %v4064_v52 = vmul.u32 58254, %v4059_v51  ;;  %v4065_v18 = vshll.u32 %v4062_v13, 16  ;;  %11032 = vst [vmem:[#allocation2 + $0x20] sm:$0xff] %v10789_v23   ;;  %v3647_v40 = vadd.f32 %v12814_v37, %v3607_v6  ;;  %v13089_v15 = vshll.u32 %v10789_v23, 16  ;;  %v10617_v48 = vld [vmem:[%s16572_s3 + $0x78] sm:$0xff]  ;;  %7740 = vmatpush.bf16.msrb.mxu2 %v10625_v53 }
 0x2c6   : > { %v13091_v57 = vshrl.u32 %v10789_v23, 16  ;;  %v4067_v42 = vshll.u32 %v13085_v34, 16  ;;  %v4049_v47 = vadd.s32 %v4048_v4, %v4039_v20  ;;  %v16854_v51 = vshrl.u32 %v16853_v21, 16  ;;  %v3223_v6 = vpop.f32.mrf.mxu3  ;;  %7641 = vmatpush.bf16.msrb.mxu1 %v10617_v48 }
 0x2c7   : > { %16851 = vst [vmem:[#allocation12_spill] sm:$0xff] %v13089_v15  ;;  %vm4069_vm13 = vc.u32 %v4061_v28, %v4065_v18  ;;  %v4071_v5 = vadd.s32 %v4065_v18, %v4061_v28  ;;  %vm3683_vm9 = vcmp.gt.f32.partialorder %v3647_v40, 0.0  ;;  %v3719_v19 = vmul.f32 0.1, %v3647_v40 }
 0x2c8   : > { %16852 = vst [vmem:[#allocation11_spill] sm:$0xff] %v13091_v57  ;;  %v3396_v36 = vrot.slane %v16854_v51, 1  ;;  %v6045_v23 = vrot.slane %v13091_v57, 3  ;;  %v6046_v8 = vrot.slane %v13089_v15, 4  ;;  %v4050_v3 = vshrl.u32 %v4049_v47, 4 }
 0x2c9   : > { %v4070_v20 = vsel %vm4069_vm13, 1, %v16828_v9  ;;  %vm4073_vm10 = vc.u32 %v4071_v5, %v4067_v42  ;;  %v16855_v28 = vshll.u32 %v16853_v21, 16  ;;  %vm5089_vm8 = vcmp.le.s32.totalorder %v13069_v60, 16  ;;  %v3527_v42 = vpop.f32.mrf.mxu0  ;;  %v16858_v21 = vld [vmem:[#allocation22_spill] sm:$0xff] }
 0x2ca   : > { %v13111_v18 = vor.u32 %v6046_v8, %v6045_v23  ;;  %v4066_v51 = vshrl.u32 %v4062_v13, 16  ;;  %v4072_v29 = vadd.s32 %v4070_v20, %v4064_v52  ;;  %v3755_v41 = vsel %vm3683_vm9, %v3647_v40, %v3719_v19  ;;  %vm13152_vm15 = vmand %vm5053_vm11, %vm5089_vm8 }
 0x2cb   : > { %v3397_v4 = vrot.slane %v16855_v28, 2  ;;  %v4051_v53 = vmul.u32 18, %v4050_v3  ;;  %v4068_v47 = vshrl.u32 %v13085_v34, 16  ;;  %v4074_v5 = vsel %vm4073_vm10, 1, %v16828_v9  ;;  %10011 = vmatmul.msk.bf16.gmra.mxu3 %vm489_vm1, %v12986_v56  ;;  %10043 = vmatmul.msk.bf16.gmra.mxu0 %vm489_vm1, %v13015_v55 }
 0x2cc   : > { %v13125_v48 = vadd.f32 %v3223_v6, %v16858_v21  ;;  %v3608_v13 = vadd.f32 %v3527_v42, %v12998_v24  ;;  %v6048_v52 = vsel %vm1006_vm2, %v13019_v33, %v13111_v18  ;;  %v4076_v45 = vadd.s32 %v4074_v5, %v4072_v29  ;;  %v13134_v23 = vld [vmem:[#allocation2 + $0x1c] sm:$0xff]  }
 0x2cd   : > { %v4052_v40 = vsub.s32 %v12924_v10, %v4051_v53  ;;  %v13132_v19 = vor.u32 %v3397_v4, %v3396_v36  ;;  %v5750_v3 = vshrl.u32 %v13010_v26, 16  ;;  %v5753_v34 = vshll.u32 %v13010_v26, 16  ;;  %6640 = vmatmul.bf16.gmra.mxu1 %v6048_v52 }
 0x2ce   : > { %v5232_v8 = vsel %vm13118_vm12, %v3755_v41, 0.0  ;;  %v3648_v24 = vadd.f32 %v12814_v37, %v3608_v13  ;;  %v4077_v29 = vadd.s32 %v4076_v45, %v4066_v51  ;;  %v13146_v10 = vadd.s32 72, %v12534_v17 }
 0x2cf   : > { %vm4874_vm0 = vcmp.ne.s32.totalorder %v4052_v40, 0  ;;  %vm4910_vm14 = vcmp.lt.s32.totalorder %v4052_v40, 0  ;;  %v4982_v41 = vadd.s32 18, %v4052_v40  ;;  %v5752_v56 = vrot.slane %v5750_v3, 4 }
 0x2d0   : > { %vm3684_vm4 = vcmp.gt.f32.partialorder %v3648_v24, 0.0  ;;  %v3720_v36 = vmul.f32 0.1, %v3648_v24  ;;  %vm4946_vm7 = vmand %vm4910_vm14, %vm4874_vm0  ;;  %v4078_v55 = vadd.s32 %v4077_v29, %v4068_v47  ;;  %v5755_v6 = vrot.slane %v5753_v34, 5 }
 0x2d1   : > { %v3399_v20 = vsel %vm3339_vm6, %v12992_v25, %v13132_v19  ;;  %vm5748_vm13 = vsmask.f32 3328  ;;  %v5758_v60 = vshrl.u32 %v13134_v23, 16  ;;  %v5761_v28 = vshll.u32 %v13134_v23, 16  ;;  %v3529_v47 = vpop.f32.mrf.mxu0 }
 0x2d2   : > { %v3756_v4 = vsel %vm3684_vm4, %v3648_v24, %v3720_v36  ;;  %v5018_v51 = vsel %vm4946_vm7, %v4982_v41, %v4052_v40  ;;  %v4087_v61 = vand.u32 65535, %v13146_v10  ;;  %v13163_v42 = vadd.s32 80, %v12534_v17 }
 0x2d3   : > { %v5233_v53 = vsel %vm13152_vm15, %v3756_v4, 0.0  ;;  %v4079_v5 = vshrl.u32 %v4078_v55, 4  ;;  %v5756_v21 = vor.u32 %v5755_v6, %v5752_v56  ;;  %v5760_v13 = vrot.slane %v5758_v60, 4 }
 0x2d4   : > { %v10794_v25 = vpack.c.bf16 %v5233_v53, %v5232_v8  ;;  %v3609_v52 = vadd.f32 %v3529_v47, %v13026_v49  ;;  %v5763_v45 = vrot.slane %v5761_v28, 5  ;;  %v4088_v3 = vshrl.u32 %v13146_v10, 16  ;;  %v13175_v49 = vpop.f32.mrf.mxu3 }
 0x2d5   : > { %vm5054_vm11 = vcmp.ge.s32.totalorder %v5018_v51, 1  ;;  %v4080_v40 = vmul.u32 18, %v4079_v5  ;;  %v6012_v34 = vshrl.u32 %v5756_v21, 16  ;;  %v6015_v24 = vshll.u32 %v5756_v21, 16 }
 0x2d6   : > { %11033 = vst [vmem:[#allocation2 + $0x28] sm:$0xff] %v10794_v25   ;;  %v3649_v29 = vadd.f32 %v12814_v37, %v3609_v52  ;;  %vm5090_vm9 = vcmp.le.s32.totalorder %v5018_v51, 16  ;;  %v13170_v33 = vor.u32 %v5763_v45, %v5760_v13  ;;  %v4091_v41 = vmul.u32 58254, %v4087_v61 }
 0x2d7   : > { %v4081_v56 = vsub.s32 %v13048_v27, %v4080_v40  ;;  %v6014_v36 = vrot.slane %v6012_v34, 3  ;;  %v6017_v8 = vrot.slane %v6015_v24, 4  ;;  %v13173_v55 = vmul.u32 14564, %v4088_v3  ;;  %vm13193_vm7 = vmand %vm5054_vm11, %vm5090_vm9 }
 0x2d8   : > { %vm3685_vm10 = vcmp.gt.f32.partialorder %v3649_v29, 0.0  ;;  %v3721_v6 = vmul.f32 0.1, %v3649_v29  ;;  %v5765_v60 = vsel %vm5748_vm13, %v5756_v21, %v13170_v33  ;;  %v4090_v28 = vmul.u32 14564, %v4087_v61 }
 0x2d9   : > { %vm4875_vm8 = vcmp.ne.s32.totalorder %v4081_v56, 0  ;;  %vm4911_vm12 = vcmp.lt.s32.totalorder %v4081_v56, 0  ;;  %v4983_v4 = vadd.s32 18, %v4081_v56  ;;  %v4094_v53 = vshll.u32 %v4091_v41, 16  ;;  %v3532_v45 = vpop.f32.mrf.mxu0 }
 0x2da   : > { %vm4947_vm15 = vmand %vm4911_vm12, %vm4875_vm8  ;;  %v6018_v47 = vor.u32 %v6017_v8, %v6014_v36  ;;  %v6020_v5 = vshrl.u32 %v5765_v60, 16  ;;  %v6023_v27 = vshll.u32 %v5765_v60, 16  ;;  %v4093_v13 = vmul.u32 58254, %v4088_v3  ;;  %v16869_v8 = vld [vmem:[#allocation32_spill] sm:$0xff] }
 0x2db   : > { %v3757_v52 = vsel %vm3685_vm10, %v3649_v29, %v3721_v6  ;;  %v5019_v40 = vsel %vm4947_vm15, %v4983_v4, %v4081_v56  ;;  %v4095_v34 = vshrl.u32 %v4091_v41, 16  ;;  %v4096_v24 = vshll.u32 %v13173_v55, 16  ;;  %10012 = vmatmul.msk.bf16.gmra.mxu3 %vm489_vm1, %v13077_v22  ;;  %10044 = vmatmul.msk.bf16.gmra.mxu0 %vm489_vm1, %v3399_v20 }
 0x2dc   : > { %v3610_v35 = vadd.f32 %v3532_v45, %v13082_v30  ;;  %vm5055_vm0 = vcmp.ge.s32.totalorder %v5019_v40, 1  ;;  %vm5091_vm14 = vcmp.le.s32.totalorder %v5019_v40, 16  ;;  %v6022_v61 = vrot.slane %v6020_v5, 3  ;;  %v13214_v4 = vpop.f32.mrf.mxu3 }
 0x2dd   : > { %v6025_v21 = vrot.slane %v6023_v27, 4  ;;  %v4097_v54 = vshrl.u32 %v13173_v55, 16  ;;  %vm4098_vm4 = vc.u32 %v4090_v28, %v4094_v53  ;;  %v4100_v16 = vadd.s32 %v4094_v53, %v4090_v28  ;;  %vm13202_vm12 = vmand %vm5055_vm0, %vm5091_vm14 }
 0x2de   : > { %v3650_v36 = vadd.f32 %v12814_v37, %v3610_v35  ;;  %v4099_v3 = vsel %vm4098_vm4, 1, %v16828_v9  ;;  %v13187_v29 = vshll.u32 %v10794_v25, 16  ;;  %v13189_v30 = vshrl.u32 %v10794_v25, 16 }
 0x2df   : > { %v13197_v56 = vor.u32 %v6025_v21, %v6022_v61  ;;  %v4101_v35 = vadd.s32 %v4099_v3, %v4093_v13  ;;  %vm4102_vm10 = vc.u32 %v4100_v16, %v4096_v24  ;;  %v4116_v22 = vand.u32 65535, %v13163_v42  ;;  %v16867_v61 = vld [vmem:[#allocation30_spill] sm:$0xff]  ;;  %v16868_v21 = vld [vmem:[#allocation31_spill] sm:$0xff] }
 0x2e0   : > { %16861 = vst [vmem:[#allocation13_spill] sm:$0xff] %v13187_v29  ;;  %vm3686_vm8 = vcmp.gt.f32.partialorder %v3650_v36, 0.0  ;;  %v3722_v20 = vmul.f32 0.1, %v3650_v36  ;;  %v4103_v51 = vsel %vm4102_vm10, 1, %v16828_v9  ;;  %v6067_v25 = vrot.slane %v13189_v30, 3 }
 0x2e1   : > { %16862 = vst [vmem:[#allocation15_spill] sm:$0xff] %v13189_v30  ;;  %v6027_v55 = vsel %vm1006_vm2, %v6018_v47, %v13197_v56  ;;  %v4105_v6 = vadd.s32 %v4103_v51, %v4101_v35  ;;  %v6068_v16 = vrot.slane %v13187_v29, 4  ;;  %v4117_v60 = vshrl.u32 %v13163_v42, 16  ;;  %v3534_v45 = vpop.f32.mrf.mxu0  ;;  %v16870_v51 = vld [vmem:[#allocation33_spill] sm:$0xff] }
 0x2e2   : > { %v5234_v28 = vsel %vm13193_vm7, %v3757_v52, 0.0  ;;  %v3758_v53 = vsel %vm3686_vm8, %v3650_v36, %v3722_v20  ;;  %6734 = vmatmul.bf16.vlgmr.msra.gmra.mxu2 %v6027_v55  ;;  %v4119_v5 = vmul.u32 14564, %v4116_v22  ;;  %v4120_v27 = vmul.u32 58254, %v4116_v22 }
 0x2e3   : > { %v5235_v13 = vsel %vm13202_vm12, %v3758_v53, 0.0  ;;  %v4106_v40 = vadd.s32 %v4105_v6, %v4095_v34  ;;  %v13218_v47 = vor.u32 %v6068_v16, %v6067_v25  ;;  %v4121_v24 = vmul.u32 14564, %v4117_v60  ;;  %v13233_v6 = vld [vmem:[#allocation2 + $0x24] sm:$0xff]  }
 0x2e4   : > { %v13222_v3 = vadd.f32 %v16868_v21, %v16867_v61  ;;  %v13224_v52 = vpack.c.bf16 %v5235_v13, %v5234_v28  ;;  %v4122_v41 = vmul.u32 58254, %v4117_v60  ;;  %v4123_v36 = vshll.u32 %v4120_v27, 16  ;;  %v16871_v28 = vld [vmem:[#allocation20_spill] sm:$0xff] }
 0x2e5   : > { %v3611_v35 = vadd.f32 %v3534_v45, %v13125_v48  ;;  %v4107_v22 = vadd.s32 %v4106_v40, %v4097_v54  ;;  %v6070_v20 = vsel %vm1006_vm2, %v13111_v18, %v13218_v47  ;;  %v4125_v34 = vshll.u32 %v4121_v24, 16  ;;  %v13237_v48 = vld [vmem:[%s11383_s26 + $0x9c] sm:$0xff] }
 0x2e6   : > { %v2556_v25 = vadd.f32 %v16870_v51, %v16869_v8  ;;  %11034 = vst [vmem:[#allocation2 + $0x30] sm:$0xff] %v13224_v52   ;;  %6645 = vmatmul.bf16.gmra.mxu1 %v6070_v20  ;;  %vm4127_vm11 = vc.u32 %v4119_v5, %v4123_v36  ;;  %v4129_v55 = vadd.s32 %v4123_v36, %v4119_v5  ;;  %v16641_v54 = vrot.slane %v13237_v48, 1  ;;  %v16873_v13 = vld [vmem:[#allocation24_spill] sm:$0xff] }
 0x2e7   : > { %v4108_v16 = vshrl.u32 %v4107_v22, 4  ;;  %v4128_v60 = vsel %vm4127_vm11, 1, %v16828_v9  ;;  %v16872_v18 = vshrl.u32 %v16871_v28, 16  ;;  %v3301_v45 = vadd.f32 %v13175_v49, %v16873_v13 }
 0x2e8   : > { %v4124_v40 = vshrl.u32 %v4120_v27, 16  ;;  %v4130_v61 = vadd.s32 %v4128_v60, %v4122_v41  ;;  %vm4131_vm9 = vc.u32 %v4129_v55, %v4125_v34  ;;  %v3651_v5 = vadd.f32 %v12814_v37, %v3611_v35  ;;  %v3231_v60 = vpop.f32.mrf.mxu3 }
 0x2e9   : > { %v3400_v53 = vrot.slane %v16872_v18, 1  ;;  %v4109_v21 = vmul.u32 18, %v4108_v16  ;;  %v4132_v36 = vsel %vm4131_vm9, 1, %v16828_v9  ;;  %v16874_v22 = vshll.u32 %v16871_v28, 16  ;;  %v3537_v41 = vpop.f32.mrf.mxu0 }
 0x2ea   : > { %v4126_v8 = vshrl.u32 %v4121_v24, 16  ;;  %v4134_v51 = vadd.s32 %v4132_v36, %v4130_v61  ;;  %v16875_v18 = vrot.slane %v13051_v59, 1  ;;  %v5767_v49 = vshrl.u32 %v13233_v6, 16  ;;  %v16876_v24 = vld [vmem:[#allocation34_spill] sm:$0xff] }
 0x2eb   : > { %v3401_v20 = vrot.slane %v16874_v22, 2  ;;  %v4110_v27 = vsub.s32 %v13146_v10, %v4109_v21  ;;  %v5770_v34 = vshll.u32 %v13233_v6, 16  ;;  %v13259_v55 = vadd.s32 88, %v12534_v17 }
 0x2ec   : > { %v3109_v29 = vsel %vm3076_vm5, %v16875_v18, %v16641_v54  ;;  %v13262_v16 = vadd.f32 %v16876_v24, %v2556_v25  ;;  %v3612_v28 = vadd.f32 %v3537_v41, %v3301_v45  ;;  %v4135_v59 = vadd.s32 %v4134_v51, %v4124_v40 }
 0x2ed   : > { %v13255_v35 = vor.u32 %v3401_v20, %v3400_v53  ;;  %v5769_v13 = vrot.slane %v5767_v49, 4  ;;  %vm4876_vm15 = vcmp.ne.s32.totalorder %v4110_v27, 0  ;;  %vm4912_vm0 = vcmp.lt.s32.totalorder %v4110_v27, 0  ;;  %10013 = vmatmul.msk.bf16.gmra.mxu3 %vm489_vm1, %v3109_v29  ;;  %v16878_v20 = vld [vmem:[#allocation25_spill] sm:$0xff] }
 0x2ee   : > { %v4984_v61 = vadd.s32 18, %v4110_v27  ;;  %v3723_v53 = vmul.f32 0.1, %v3651_v5  ;;  %vm4948_vm14 = vmand %vm4912_vm0, %vm4876_vm15  ;;  %v4136_v21 = vadd.s32 %v4135_v59, %v4126_v8  ;;  %v5772_v25 = vrot.slane %v5770_v34, 5 }
 0x2ef   : > { %v3403_v10 = vsel %vm3339_vm6, %v13132_v19, %v13255_v35  ;;  %v4145_v36 = vand.u32 65535, %v13259_v55  ;;  %vm3687_vm4 = vcmp.gt.f32.partialorder %v3651_v5, 0.0  ;;  %v4146_v40 = vshrl.u32 %v13259_v55, 16 }
 0x2f0   : > { %10045 = vmatmul.msk.bf16.gmra.mxu0 %vm489_vm1, %v3403_v10  ;;  %v5020_v45 = vsel %vm4948_vm14, %v4984_v61, %v4110_v27  ;;  %v13272_v22 = vshll.u32 %v13224_v52, 16  ;;  %v3302_v19 = vadd.f32 %v13214_v4, %v16878_v20  ;;  %v3652_v8 = vadd.f32 %v12814_v37, %v3612_v28 }
 0x2f1   : > { %vm5056_vm7 = vcmp.ge.s32.totalorder %v5020_v45, 1  ;;  %vm5092_vm10 = vcmp.le.s32.totalorder %v5020_v45, 16  ;;  %v4137_v29 = vshrl.u32 %v4136_v21, 4  ;;  %v13277_v51 = vor.u32 %v5772_v25, %v5769_v13  ;;  %v3539_v13 = vpop.f32.mrf.mxu0 }
 0x2f2   : > { %16877 = vst [vmem:[#allocation16_spill] sm:$0xff] %v13272_v22  ;;  %v4148_v18 = vmul.u32 14564, %v4145_v36  ;;  %v4149_v49 = vmul.u32 58254, %v4145_v36  ;;  %v3303_v41 = vadd.f32 %v3231_v60, %v12599_v38  ;;  %v3759_v27 = vsel %vm3687_vm4, %v3651_v5, %v3723_v53  ;;  %vm13285_vm8 = vmand %vm5056_vm7, %vm5092_vm10  ;;  %v3233_v36 = vpop.f32.mrf.mxu3 }
 0x2f3   : > { %v13280_v34 = vmul.u32 14564, %v4146_v40  ;;  %v13283_v24 = vshrl.u32 %v13224_v52, 16  ;;  %v4138_v4 = vmul.u32 18, %v4137_v29  ;;  %v5774_v28 = vsel %vm5748_vm13, %v13170_v33, %v13277_v51  ;;  %v10648_v29 = vld [vmem:[%s16572_s3 + $0x170] sm:$0xff] }
 0x2f4   : > { %v4152_v61 = vshll.u32 %v4149_v49, 16  ;;  %v6090_v10 = vrot.slane %v13272_v22, 4  ;;  %v3724_v38 = vmul.f32 0.1, %v3652_v8  ;;  %v6050_v5 = vshrl.u32 %v5774_v28, 16  ;;  %6826 = vmatpush.bf16.msrb.mxu3 %v10648_v29  ;;  %v16882_v29 = vld [vmem:[#allocation35_spill] sm:$0xff] }
 0x2f5   : > { %16879 = vst [vmem:[#allocation14_spill] sm:$0xff] %v13283_v24  ;;  %v6053_v60 = vshll.u32 %v5774_v28, 16  ;;  %v4151_v53 = vmul.u32 58254, %v4146_v40  ;;  %vm3688_vm12 = vcmp.gt.f32.partialorder %v3652_v8, 0.0  ;;  %v4139_v52 = vsub.s32 %v13163_v42, %v4138_v4 }
 0x2f6   : > { %v4154_v21 = vshll.u32 %v13280_v34, 16  ;;  %vm4156_vm11 = vc.u32 %v4148_v18, %v4152_v61  ;;  %v5236_v25 = vsel %vm13285_vm8, %v3759_v27, 0.0  ;;  %v6052_v45 = vrot.slane %v6050_v5, 3 }
 0x2f7   : > { %v6055_v33 = vrot.slane %v6053_v60, 4  ;;  %v4157_v20 = vsel %vm4156_vm11, 1, %v16828_v9  ;;  %vm4877_vm9 = vcmp.ne.s32.totalorder %v4139_v52, 0  ;;  %vm4913_vm15 = vcmp.lt.s32.totalorder %v4139_v52, 0 }
 0x2f8   : > { %v4985_v40 = vadd.s32 18, %v4139_v52  ;;  %v4158_v28 = vadd.s32 %v4152_v61, %v4148_v18  ;;  %v3760_v42 = vsel %vm3688_vm12, %v3652_v8, %v3724_v38  ;;  %vm4949_vm0 = vmand %vm4913_vm15, %vm4877_vm9  ;;  %v3613_v54 = vadd.f32 %v3539_v13, %v3302_v19 }
 0x2f9   : > { %v13301_v4 = vor.u32 %v6055_v33, %v6052_v45  ;;  %v4159_v59 = vadd.s32 %v4157_v20, %v4151_v53  ;;  %v6089_v5 = vrot.slane %v13283_v24, 3  ;;  %v13305_v60 = vadd.s32 96, %v12534_v17  ;;  %v3542_v38 = vpop.f32.mrf.mxu0 }
 0x2fa   : > { %v5021_v27 = vsel %vm4949_vm0, %v4985_v40, %v4139_v52  ;;  %vm4160_vm14 = vc.u32 %v4158_v28, %v4154_v21  ;;  %v4153_v8 = vshrl.u32 %v4149_v49, 16  ;;  %v4155_v19 = vshrl.u32 %v13280_v34, 16  ;;  %v16884_v28 = vld [vmem:[#allocation3_spill] sm:$0xff] }
 0x2fb   : > { %vm5057_vm4 = vcmp.ge.s32.totalorder %v5021_v27, 1  ;;  %vm5093_vm7 = vcmp.le.s32.totalorder %v5021_v27, 16  ;;  %v6057_v18 = vsel %vm1006_vm2, %v13197_v56, %v13301_v4  ;;  %v4161_v13 = vsel %vm4160_vm14, 1, %v16828_v9  ;;  %v16885_v27 = vld [vmem:[#allocation37_spill] sm:$0xff] }
 0x2fc   : > { %vm5129_vm10 = vmand %vm5057_vm4, %vm5093_vm7  ;;  %6739 = vmatmul.bf16.gmra.mxu2 %v6057_v18  ;;  %v13312_v61 = vor.u32 %v6090_v10, %v6089_v5  ;;  %v4174_v53 = vand.u32 65535, %v13305_v60  ;;  %v4163_v21 = vadd.s32 %v4161_v13, %v4159_v59  ;;  %v3614_v45 = vadd.f32 %v3542_v38, %v3303_v41  ;;  %v16883_v10 = vld [vmem:[#allocation36_spill] sm:$0xff]  ;;  %v13334_v18 = vld [vmem:[%s11383_s26 + $0xa4] sm:$0xff] }
 0x2fd   : > { %v5237_v52 = vsel %vm5129_vm10, %v3760_v42, 0.0  ;;  %v4175_v33 = vshrl.u32 %v13305_v60, 16  ;;  %v13323_v40 = vadd.f32 %v16883_v10, %v16882_v29  ;;  %v13327_v42 = vadd.f32 %v16885_v27, %v16884_v28  ;;  %v13337_v38 = vld [vmem:[#allocation2 + $0x2c] sm:$0xff]  }
 0x2fe   : > { %v13316_v20 = vpack.c.bf16 %v5237_v52, %v5236_v25  ;;  %v6092_v56 = vsel %vm1006_vm2, %v13218_v47, %v13312_v61  ;;  %v4177_v49 = vmul.u32 14564, %v4174_v53  ;;  %v4178_v34 = vmul.u32 58254, %v4174_v53  ;;  %v10647_v53 = vld [vmem:[%s16572_s3 + $0x168] sm:$0xff] }
 0x2ff   : > { %v4164_v59 = vadd.s32 %v4163_v21, %v4153_v8  ;;  %6650 = vmatmul.bf16.gmra.mxu1 %v6092_v56  ;;  %v4179_v41 = vmul.u32 14564, %v4175_v33  ;;  %v13330_v25 = vadd.f32 %v3233_v36, %v12603_v39  ;;  %v4180_v5 = vmul.u32 58254, %v4175_v33  ;;  %v3236_v8 = vpop.f32.mrf.mxu3  ;;  %v16886_v36 = vld [vmem:[#allocation23_spill] sm:$0xff]  ;;  %6827 = vmatpush.bf16.msrb.mxu3 %v10647_v53 }
 0x300   : > { %11035 = vst [vmem:[#allocation2 + $0x38] sm:$0xff] %v13316_v20   ;;  %v4181_v47 = vshll.u32 %v4178_v34, 16  ;;  %v3110_v13 = vrot.slane %v13334_v18, 1  ;;  %v3653_v52 = vadd.f32 %v12814_v37, %v3613_v54  ;;  %v16887_v56 = vshrl.u32 %v16886_v36, 16 }
 0x301   : > { %v4165_v21 = vadd.s32 %v4164_v59, %v4155_v19  ;;  %v4183_v39 = vshll.u32 %v4179_v41, 16  ;;  %v3654_v33 = vadd.f32 %v12814_v37, %v3614_v45  ;;  %v16888_v28 = vrot.slane %v13237_v48, 1 }
 0x302   : > { %v3404_v29 = vrot.slane %v16887_v56, 1  ;;  %vm4185_vm8 = vc.u32 %v4177_v49, %v4181_v47  ;;  %v4187_v10 = vadd.s32 %v4181_v47, %v4177_v49  ;;  %v4182_v24 = vshrl.u32 %v4178_v34, 16 }
 0x303   : > { %v3111_v27 = vsel %vm3076_vm5, %v16888_v28, %v3110_v13  ;;  %v4166_v22 = vshrl.u32 %v4165_v21, 4  ;;  %v4186_v54 = vsel %vm4185_vm8, 1, %v16828_v9  ;;  %v16889_v19 = vshll.u32 %v16886_v36, 16  ;;  %v10608_v36 = vld [vmem:[%s16572_s3 + $0x30] sm:$0xff] }
 0x304   : > { %10014 = vmatmul.msk.bf16.gmra.mxu3 %vm489_vm1, %v3111_v27  ;;  %v4188_v56 = vadd.s32 %v4186_v54, %v4180_v5  ;;  %vm4189_vm12 = vc.u32 %v4187_v10, %v4183_v39  ;;  %v5776_v37 = vshrl.u32 %v13337_v38, 16  ;;  %v5779_v45 = vshll.u32 %v13337_v38, 16  ;;  %v10624_v5 = vld [vmem:[%s16572_s3 + $0xb0] sm:$0xff]  ;;  %7543 = vmatpush.bf16.msrb.mxu0 %v10608_v36  ;;  %v10645_v36 = vld [vmem:[%s16572_s3 + $0x158] sm:$0xff] }
 0x305   : > { %v3405_v59 = vrot.slane %v16889_v19, 2  ;;  %vm3689_vm11 = vcmp.gt.f32.partialorder %v3653_v52, 0.0  ;;  %v4167_v48 = vmul.u32 18, %v4166_v22  ;;  %v4190_v49 = vsel %vm4189_vm12, 1, %v16828_v9  ;;  %v10616_v22 = vld [vmem:[%s16572_s3 + $0x70] sm:$0xff]  ;;  %7741 = vmatpush.bf16.msrb.mxu2 %v10624_v5 }
 0x306   : > { %v4184_v34 = vshrl.u32 %v4179_v41, 16  ;;  %v4192_v53 = vadd.s32 %v4190_v49, %v4188_v56  ;;  %v5778_v21 = vrot.slane %v5776_v37, 4  ;;  %v5781_v28 = vrot.slane %v5779_v45, 5  ;;  %7642 = vmatpush.bf16.msrb.mxu1 %v10616_v22 }
 0x307   : > { %v13358_v47 = vor.u32 %v3405_v59, %v3404_v29  ;;  %v3725_v39 = vmul.f32 0.1, %v3653_v52  ;;  %v4168_v29 = vsub.s32 %v13259_v55, %v4167_v48  ;;  %v13374_v10 = vadd.s32 104, %v12534_v17  ;;  %v10646_v59 = vld [vmem:[%s16572_s3 + $0x160] sm:$0xff]  ;;  %v13392_v49 = vpop.f32.mrf.mxu3 }
 0x308   : > { %vm3690_vm9 = vcmp.gt.f32.partialorder %v3654_v33, 0.0  ;;  %v3726_v27 = vmul.f32 0.1, %v3654_v33  ;;  %v4193_v54 = vadd.s32 %v4192_v53, %v4182_v24  ;;  %v13377_v19 = vor.u32 %v5781_v28, %v5778_v21  ;;  %6828 = vmatpush.bf16.msrb.mxu3 %v10646_v59 }
 0x309   : > { %v3407_v41 = vsel %vm3339_vm6, %v13255_v35, %v13358_v47  ;;  %vm4878_vm15 = vcmp.ne.s32.totalorder %v4168_v29, 0  ;;  %vm4914_vm0 = vcmp.lt.s32.totalorder %v4168_v29, 0  ;;  %v4986_v55 = vadd.s32 18, %v4168_v29 }
 0x30a   : > { %10046 = vmatmul.msk.bf16.gmra.mxu0 %vm489_vm1, %v3407_v41  ;;  %v4203_v35 = vand.u32 65535, %v13374_v10  ;;  %v13384_v56 = vadd.f32 %v3236_v8, %v12607_v7  ;;  %vm4950_vm14 = vmand %vm4914_vm0, %vm4878_vm15  ;;  %v4194_v24 = vadd.s32 %v4193_v54, %v4184_v34  ;;  %v5783_v37 = vsel %vm5748_vm13, %v13277_v51, %v13377_v19 }
 0x30b   : > { %v13390_v45 = vshrl.u32 %v13316_v20, 16  ;;  %v5022_v48 = vsel %vm4950_vm14, %v4986_v55, %v4168_v29  ;;  %v6072_v53 = vshrl.u32 %v5783_v37, 16  ;;  %v6075_v21 = vshll.u32 %v5783_v37, 16  ;;  %v3544_v29 = vpop.f32.mrf.mxu0 }
 0x30c   : > { %v4204_v28 = vshrl.u32 %v13374_v10, 16  ;;  %v13396_v7 = vsel %vm3689_vm11, %v3653_v52, %v3725_v39  ;;  %v13399_v8 = vsel %vm3690_vm9, %v3654_v33, %v3726_v27  ;;  %v4195_v34 = vshrl.u32 %v4194_v24, 4  ;;  %6829 = vmatpush.bf16.msrb.mxu3 %v10645_v36 }
 0x30d   : > { %16890 = vst [vmem:[#allocation18_spill] sm:$0xff] %v13390_v45  ;;  %v13402_v51 = vshll.u32 %v13316_v20, 16  ;;  %v6074_v5 = vrot.slane %v6072_v53, 3  ;;  %v6077_v22 = vrot.slane %v6075_v21, 4  ;;  %v4206_v41 = vmul.u32 14564, %v4203_v35 }
 0x30e   : > { %v4207_v54 = vmul.u32 58254, %v4203_v35  ;;  %vm5058_vm4 = vcmp.ge.s32.totalorder %v5022_v48, 1  ;;  %vm5094_vm7 = vcmp.le.s32.totalorder %v5022_v48, 16  ;;  %v4196_v52 = vmul.u32 18, %v4195_v34 }
 0x30f   : > { %16891 = vst [vmem:[#allocation19_spill] sm:$0xff] %v13402_v51  ;;  %v4208_v39 = vmul.u32 14564, %v4204_v28  ;;  %v13407_v33 = vor.u32 %v6077_v22, %v6074_v5  ;;  %v4209_v27 = vmul.u32 58254, %v4204_v28  ;;  %v6111_v20 = vrot.slane %v13390_v45, 3  ;;  %vm13418_vm8 = vmand %vm5058_vm4, %vm5094_vm7  ;;  %v16895_v28 = vld [vmem:[#allocation26_spill] sm:$0xff] }
 0x310   : > { %v4210_v59 = vshll.u32 %v4207_v54, 16  ;;  %v4197_v55 = vsub.s32 %v13305_v60, %v4196_v52  ;;  %v3615_v24 = vadd.f32 %v3544_v29, %v13330_v25  ;;  %v6112_v53 = vrot.slane %v13402_v51, 4  ;;  %v10644_v52 = vld [vmem:[%s16572_s3 + $0x150] sm:$0xff] }
 0x311   : > { %v4212_v37 = vshll.u32 %v4208_v39, 16  ;;  %v6079_v35 = vsel %vm1006_vm2, %v13301_v4, %v13407_v33  ;;  %v4211_v21 = vshrl.u32 %v4207_v54, 16  ;;  %v4213_v36 = vshrl.u32 %v4208_v39, 16  ;;  %6830 = vmatpush.bf16.msrb.mxu3 %v10644_v52 }
 0x312   : > { %vm4214_vm10 = vc.u32 %v4206_v41, %v4210_v59  ;;  %v4216_v34 = vadd.s32 %v4210_v59, %v4206_v41  ;;  %vm4879_vm12 = vcmp.ne.s32.totalorder %v4197_v55, 0  ;;  %vm4915_vm11 = vcmp.lt.s32.totalorder %v4197_v55, 0  ;;  %6744 = vmatmul.bf16.gmra.mxu2 %v6079_v35  ;;  %v16894_v41 = vld [vmem:[#allocation28_spill] sm:$0xff]  ;;  %v3241_v59 = vpop.f32.mrf.mxu3 }
 0x313   : > { %v4987_v60 = vadd.s32 18, %v4197_v55  ;;  %v4215_v25 = vsel %vm4214_vm10, 1, %v16828_v9  ;;  %vm4951_vm9 = vmand %vm4915_vm11, %vm4879_vm12  ;;  %v13423_v4 = vor.u32 %v6112_v53, %v6111_v20  ;;  %v13427_v48 = vadd.s32 112, %v12534_v17  ;;  %v11180_v35 = vld [vmem:[#allocation2 + $0x34] sm:$0xff]  }
 0x314   : > { %v4217_v5 = vadd.s32 %v4215_v25, %v4209_v27  ;;  %vm4218_vm15 = vc.u32 %v4216_v34, %v4212_v37  ;;  %v3112_v54 = vrot.slane %v16894_v41, 1  ;;  %v5238_v20 = vsel %vm13418_vm8, %v13396_v7, 0.0  ;;  %v10643_v41 = vld [vmem:[%s16572_s3 + $0x148] sm:$0xff] }
 0x315   : > { %v5023_v22 = vsel %vm4951_vm9, %v4987_v60, %v4197_v55  ;;  %v4219_v29 = vsel %vm4218_vm15, 1, %v16828_v9  ;;  %v6114_v27 = vsel %vm1006_vm2, %v13312_v61, %v13423_v4  ;;  %v4232_v55 = vand.u32 65535, %v13427_v48  ;;  %v3547_v61 = vpop.f32.mrf.mxu0  ;;  %6831 = vmatpush.bf16.msrb.mxu3 %v10643_v41 }
 0x316   : > { %vm5059_vm0 = vcmp.ge.s32.totalorder %v5023_v22, 1  ;;  %vm5095_vm14 = vcmp.le.s32.totalorder %v5023_v22, 16  ;;  %v4221_v39 = vadd.s32 %v4219_v29, %v4217_v5  ;;  %6655 = vmatmul.bf16.gmra.mxu1 %v6114_v27  ;;  %v4233_v37 = vshrl.u32 %v13427_v48, 16 }
 0x317   : > { %vm5131_vm4 = vmand %vm5059_vm0, %vm5095_vm14  ;;  %v3113_v53 = vsel %vm3076_vm5, %v3110_v13, %v3112_v54  ;;  %v16896_v7 = vshrl.u32 %v16895_v28, 16  ;;  %v16897_v5 = vshll.u32 %v16895_v28, 16  ;;  %v3306_v29 = vadd.f32 %v13392_v49, %v12630_v58 }
 0x318   : > { %v5239_v34 = vsel %vm5131_vm4, %v13399_v8, 0.0  ;;  %v4222_v60 = vadd.s32 %v4221_v39, %v4211_v21  ;;  %10015 = vmatmul.msk.bf16.gmra.mxu3 %vm489_vm1, %v3113_v53  ;;  %v13455_v13 = vadd.f32 %v3241_v59, %v12639_v11  ;;  %v13460_v8 = vld [vmem:[%s16571_s2] ss:$0 sm:$0xff]  ;;  %v4235_v52 = vmul.u32 14564, %v4232_v55 }
 0x319   : > { %v3408_v25 = vrot.slane %v16896_v7, 1  ;;  %v3409_v22 = vrot.slane %v16897_v5, 2  ;;  %v13452_v18 = vpack.c.bf16 %v5239_v34, %v5238_v20  ;;  %v3655_v21 = vadd.f32 %v13460_v8, %v3615_v24 }
 0x31a   : > { %v4223_v54 = vadd.s32 %v4222_v60, %v4213_v36  ;;  %v4236_v39 = vmul.u32 58254, %v4232_v55  ;;  %v4237_v58 = vmul.u32 14564, %v4233_v37  ;;  %v3616_v11 = vadd.f32 %v3547_v61, %v13384_v56 }
 0x31b   : > { %11036 = vst [vmem:[#allocation2 + $0x40] sm:$0xff] %v13452_v18   ;;  %v13468_v49 = vor.u32 %v3409_v22, %v3408_v25  ;;  %v5785_v59 = vshrl.u32 %v11180_v35, 16  ;;  %v5788_v27 = vshll.u32 %v11180_v35, 16  ;;  %v4238_v53 = vmul.u32 58254, %v4233_v37 }
 0x31c   : > { %v4224_v20 = vshrl.u32 %v4223_v54, 4  ;;  %v4239_v24 = vshll.u32 %v4236_v39, 16  ;;  %v4241_v34 = vshll.u32 %v4237_v58, 16  ;;  %v3727_v28 = vmul.f32 0.1, %v3655_v21 }
 0x31d   : > { %v3411_v36 = vsel %vm3339_vm6, %v13358_v47, %v13468_v49  ;;  %v5787_v55 = vrot.slane %v5785_v59, 4  ;;  %v5790_v60 = vrot.slane %v5788_v27, 5  ;;  %vm3691_vm7 = vcmp.gt.f32.partialorder %v3655_v21, 0.0  ;;  %v10642_v47 = vld [vmem:[%s16572_s3 + $0x140] sm:$0xff] }
 0x31e   : > { %v4225_v7 = vmul.u32 18, %v4224_v20  ;;  %vm4243_vm10 = vc.u32 %v4235_v52, %v4239_v24  ;;  %v4245_v56 = vadd.s32 %v4239_v24, %v4235_v52  ;;  %10047 = vmatmul.msk.bf16.gmra.mxu0 %vm489_vm1, %v3411_v36  ;;  %v3656_v35 = vadd.f32 %v13460_v8, %v3616_v11  ;;  %v3243_v52 = vpop.f32.mrf.mxu3  ;;  %6832 = vmatpush.bf16.msrb.mxu3 %v10642_v47  ;;  %v3549_v24 = vpop.f32.mrf.mxu0 }
 0x31f   : > { %v4244_v61 = vsel %vm4243_vm10, 1, %v16828_v9  ;;  %v13476_v37 = vor.u32 %v5790_v60, %v5787_v55  ;;  %v13479_v25 = vadd.s32 120, %v12534_v17  ;;  %v4240_v22 = vshrl.u32 %v4236_v39, 16 }
 0x320   : > { %v4226_v5 = vsub.s32 %v13374_v10, %v4225_v7  ;;  %v4246_v41 = vadd.s32 %v4244_v61, %v4238_v53  ;;  %vm4247_vm8 = vc.u32 %v4245_v56, %v4241_v34  ;;  %v13485_v54 = vsel %vm3691_vm7, %v3655_v21, %v3727_v28 }
 0x321   : > { %v4242_v11 = vshrl.u32 %v4237_v58, 16  ;;  %v4248_v59 = vsel %vm4247_vm8, 1, %v16828_v9  ;;  %v5792_v27 = vsel %vm5748_vm13, %v13377_v19, %v13476_v37  ;;  %v4261_v10 = vand.u32 65535, %v13479_v25 }
 0x322   : > { %vm4880_vm12 = vcmp.ne.s32.totalorder %v4226_v5, 0  ;;  %vm4916_vm11 = vcmp.lt.s32.totalorder %v4226_v5, 0  ;;  %v4250_v20 = vadd.s32 %v4248_v59, %v4246_v41  ;;  %v4988_v39 = vadd.s32 18, %v4226_v5 }
 0x323   : > { %v3728_v53 = vmul.f32 0.1, %v3656_v35  ;;  %v6094_v34 = vshrl.u32 %v5792_v27, 16  ;;  %v6097_v21 = vshll.u32 %v5792_v27, 16  ;;  %vm4952_vm9 = vmand %vm4916_vm11, %vm4880_vm12  ;;  %v13493_v58 = vadd.f32 %v3243_v52, %v12642_v31 }
 0x324   : > { %vm3692_vm15 = vcmp.gt.f32.partialorder %v3656_v35, 0.0  ;;  %v4251_v28 = vadd.s32 %v4250_v20, %v4240_v22  ;;  %v4262_v36 = vshrl.u32 %v13479_v25, 16  ;;  %v3617_v60 = vadd.f32 %v3549_v24, %v3306_v29 }
 0x325   : > { %v6096_v19 = vrot.slane %v6094_v34, 3  ;;  %v6099_v55 = vrot.slane %v6097_v21, 4  ;;  %v13497_v7 = vshll.u32 %v13452_v18, 16  ;;  %v4264_v61 = vmul.u32 14564, %v4261_v10 }
 0x326   : > { %v4252_v56 = vadd.s32 %v4251_v28, %v4242_v11  ;;  %v4265_v47 = vmul.u32 58254, %v4261_v10  ;;  %v4266_v41 = vmul.u32 14564, %v4262_v36  ;;  %v5024_v59 = vsel %vm4952_vm9, %v4988_v39, %v4226_v5 }
 0x327   : > { %16898 = vst [vmem:[#allocation21_spill] sm:$0xff] %v13497_v7  ;;  %v3764_v27 = vsel %vm3692_vm15, %v3656_v35, %v3728_v53  ;;  %v13499_v51 = vor.u32 %v6099_v55, %v6096_v19  ;;  %v13502_v31 = vshrl.u32 %v13452_v18, 16  ;;  %v4267_v52 = vmul.u32 58254, %v4262_v36 }
 0x328   : > { %v4253_v22 = vshrl.u32 %v4252_v56, 4  ;;  %v4268_v20 = vshll.u32 %v4265_v47, 16  ;;  %v4270_v34 = vshll.u32 %v4266_v41, 16  ;;  %v13508_v11 = vadd.f32 %v13460_v8, %v3617_v60 }
 0x329   : > { %16899 = vst [vmem:[#allocation17_spill] sm:$0xff] %v13502_v31  ;;  %v6101_v29 = vsel %vm1006_vm2, %v13407_v33, %v13499_v51  ;;  %v6133_v24 = vrot.slane %v13502_v31, 3  ;;  %v6134_v35 = vrot.slane %v13497_v7, 4  ;;  %vm5060_vm0 = vcmp.ge.s32.totalorder %v5024_v59, 1 }
 0x32a   : > { %v4254_v5 = vmul.u32 18, %v4253_v22  ;;  %6749 = vmatmul.bf16.gmra.mxu2 %v6101_v29  ;;  %vm4272_vm14 = vc.u32 %v4264_v61, %v4268_v20  ;;  %v4274_v18 = vadd.s32 %v4268_v20, %v4264_v61  ;;  %vm5096_vm4 = vcmp.le.s32.totalorder %v5024_v59, 16 }
 0x32b   : > { %v4273_v10 = vsel %vm4272_vm14, 1, %v16828_v9  ;;  %v13513_v39 = vor.u32 %v6134_v35, %v6133_v24  ;;  %v13516_v53 = vadd.s32 128, %v12534_v17  ;;  %v4269_v21 = vshrl.u32 %v4265_v47, 16  ;;  %vm13525_vm10 = vmand %vm5060_vm0, %vm5096_vm4 }
 0x32c   : > { %v4255_v33 = vsub.s32 %v13427_v48, %v4254_v5  ;;  %v4275_v28 = vadd.s32 %v4273_v10, %v4267_v52  ;;  %vm4276_vm7 = vc.u32 %v4274_v18, %v4270_v34  ;;  %v4271_v36 = vshrl.u32 %v4266_v41, 16  ;;  %v3552_v41 = vpop.f32.mrf.mxu0 }
 0x32d   : > { %v4277_v19 = vsel %vm4276_vm7, 1, %v16828_v9  ;;  %v6136_v55 = vsel %vm1006_vm2, %v13423_v4, %v13513_v39  ;;  %v4290_v60 = vand.u32 65535, %v13516_v53  ;;  %v3729_v47 = vmul.f32 0.1, %v13508_v11  ;;  %v16902_v4 = vld [vmem:[#allocation27_spill] sm:$0xff] }
 0x32e   : > { %vm4881_vm8 = vcmp.ne.s32.totalorder %v4255_v33, 0  ;;  %vm4917_vm12 = vcmp.lt.s32.totalorder %v4255_v33, 0  ;;  %v4989_v48 = vadd.s32 18, %v4255_v33  ;;  %v4279_v61 = vadd.s32 %v4277_v19, %v4275_v28  ;;  %6660 = vmatmul.bf16.gmra.mxu1 %v6136_v55  ;;  %v11182_v28 = vld [vmem:[#allocation2 + $0x3c] sm:$0xff]  }
 0x32f   : > { %vm4953_vm11 = vmand %vm4917_vm12, %vm4881_vm8  ;;  %v4291_v22 = vshrl.u32 %v13516_v53, 16  ;;  %v4293_v52 = vmul.u32 14564, %v4290_v60  ;;  %v16903_v20 = vshrl.u32 %v16902_v4, 16  ;;  %vm3693_vm9 = vcmp.gt.f32.partialorder %v13508_v11, 0.0 }
 0x330   : > { %v5025_v59 = vsel %vm4953_vm11, %v4989_v48, %v4255_v33  ;;  %v4280_v29 = vadd.s32 %v4279_v61, %v4269_v21  ;;  %v4294_v24 = vmul.u32 58254, %v4290_v60  ;;  %v16904_v35 = vshll.u32 %v16902_v4, 16 }
 0x331   : > { %v3412_v34 = vrot.slane %v16903_v20, 1  ;;  %v5240_v18 = vsel %vm13525_vm10, %v13485_v54, 0.0  ;;  %vm5061_vm15 = vcmp.ge.s32.totalorder %v5025_v59, 1  ;;  %vm5097_vm0 = vcmp.le.s32.totalorder %v5025_v59, 16 }
 0x332   : > { %v3413_v5 = vrot.slane %v16904_v35, 2  ;;  %v4295_v10 = vmul.u32 14564, %v4291_v22  ;;  %vm5133_vm14 = vmand %vm5061_vm15, %vm5097_vm0  ;;  %v4281_v19 = vadd.s32 %v4280_v29, %v4271_v36  ;;  %v3618_v55 = vadd.f32 %v3552_v41, %v13455_v13 }
 0x333   : > { %v4296_v33 = vmul.u32 58254, %v4291_v22  ;;  %v4297_v48 = vshll.u32 %v4294_v24, 16  ;;  %v5241_v20 = vsel %vm5133_vm14, %v3764_v27, 0.0  ;;  %v4298_v21 = vshrl.u32 %v4294_v24, 16 }
 0x334   : > { %v4299_v60 = vshll.u32 %v4295_v10, 16  ;;  %v13540_v61 = vor.u32 %v3413_v5, %v3412_v34  ;;  %v13542_v4 = vpack.c.bf16 %v5241_v20, %v5240_v18  ;;  %v4282_v35 = vshrl.u32 %v4281_v19, 4  ;;  %v3246_v5 = vpop.f32.mrf.mxu3 }
 0x335   : > { %vm4301_vm4 = vc.u32 %v4293_v52, %v4297_v48  ;;  %v4303_v54 = vadd.s32 %v4297_v48, %v4293_v52  ;;  %v5794_v59 = vshrl.u32 %v11182_v28, 16  ;;  %v5797_v13 = vshll.u32 %v11182_v28, 16 }
 0x336   : > { %v4302_v56 = vsel %vm4301_vm4, 1, %v16828_v9  ;;  %v3415_v36 = vsel %vm3339_vm6, %v13468_v49, %v13540_v61  ;;  %11037 = vst [vmem:[#allocation2 + $0x48] sm:$0xff] %v13542_v4   ;;  %v4283_v27 = vmul.u32 18, %v4282_v35  ;;  %v4300_v41 = vshrl.u32 %v4295_v10, 16 }
 0x337   : > { %v4304_v22 = vadd.s32 %v4302_v56, %v4296_v33  ;;  %vm4305_vm7 = vc.u32 %v4303_v54, %v4299_v60  ;;  %10048 = vmatmul.msk.bf16.gmra.mxu0 %vm489_vm1, %v3415_v36  ;;  %v5796_v29 = vrot.slane %v5794_v59, 4  ;;  %v5799_v52 = vrot.slane %v5797_v13, 5 }
 0x338   : > { %v4306_v34 = vsel %vm4305_vm7, 1, %v16828_v9  ;;  %v5914_v24 = vrot.slane %v13010_v26, 5  ;;  %v4284_v18 = vsub.s32 %v13479_v25, %v4283_v27  ;;  %vm5913_vm10 = vcmask 1042432   ;;  %v3554_v27 = vpop.f32.mrf.mxu0 }
 0x339   : > { %v4308_v49 = vadd.s32 %v4306_v34, %v4304_v22  ;;  %v16648_v28 = vrot.slane %v13134_v23, 5  ;;  %v3658_v19 = vadd.f32 %v13460_v8, %v3618_v55  ;;  %v13555_v10 = vor.u32 %v5799_v52, %v5796_v29 }
 0x33a   : > { %v6029_v33 = vshrl.u32 %v5914_v24, 16  ;;  %v6032_v48 = vshll.u32 %v5914_v24, 16  ;;  %vm4882_vm8 = vcmp.ne.s32.totalorder %v4284_v18, 0  ;;  %vm4918_vm12 = vcmp.lt.s32.totalorder %v4284_v18, 0 }
 0x33b   : > { %v4990_v20 = vadd.s32 18, %v4284_v18  ;;  %v4309_v60 = vadd.s32 %v4308_v49, %v4298_v21  ;;  %v13558_v35 = vadd.f32 %v3246_v5, %v12646_v1  ;;  %v13563_v26 = vsel %vm3693_vm9, %v13508_v11, %v3729_v47  ;;  %vm4954_vm11 = vmand %vm4918_vm12, %vm4882_vm8  ;;  %v10607_v1 = vld [vmem:[%s16572_s3 + $0x28] sm:$0xff] }
 0x33c   : > { %v5801_v25 = vsel %vm5748_vm13, %v13476_v37, %v13555_v10  ;;  %v5916_v55 = vsel %vm5913_vm10, %v5914_v24, %v16648_v28  ;;  %v10623_v11 = vld [vmem:[%s16572_s3 + $0xa8] sm:$0xff]  ;;  %vm3694_vm9 = vcmp.gt.f32.partialorder %v3658_v19, 0.0  ;;  %v6031_v47 = vrot.slane %v6029_v33, 3  ;;  %7544 = vmatpush.bf16.msrb.mxu0 %v10607_v1 }
 0x33d   : > { %v5026_v54 = vsel %vm4954_vm11, %v4990_v20, %v4284_v18  ;;  %v4310_v56 = vadd.s32 %v4309_v60, %v4300_v41  ;;  %v6116_v21 = vshrl.u32 %v5801_v25, 16  ;;  %v6119_v36 = vshll.u32 %v5801_v25, 16  ;;  %v10615_v37 = vld [vmem:[%s16572_s3 + $0x68] sm:$0xff]  ;;  %7742 = vmatpush.bf16.msrb.mxu2 %v10623_v11 }
 0x33e   : > { %v6034_v59 = vrot.slane %v6032_v48, 4  ;;  %v6037_v13 = vshrl.u32 %v5916_v55, 16  ;;  %v6040_v29 = vshll.u32 %v5916_v55, 16  ;;  %vm5062_vm15 = vcmp.ge.s32.totalorder %v5026_v54, 1  ;;  %7643 = vmatpush.bf16.msrb.mxu1 %v10615_v37 }
 0x33f   : > { %v4311_v41 = vshrl.u32 %v4310_v56, 4  ;;  %v6118_v22 = vrot.slane %v6116_v21, 3  ;;  %v6121_v34 = vrot.slane %v6119_v36, 4  ;;  %v3730_v52 = vmul.f32 0.1, %v3658_v19 }
 0x340   : > { %v6039_v24 = vrot.slane %v6037_v13, 3  ;;  %v13581_v5 = vadd.s32 136, %v12534_v17  ;;  %vm5098_vm0 = vcmp.le.s32.totalorder %v5026_v54, 16  ;;  %v6042_v33 = vrot.slane %v6040_v29, 4 }
 0x341   : > { %v4312_v18 = vmul.u32 18, %v4311_v41  ;;  %v13583_v49 = vor.u32 %v6121_v34, %v6118_v22  ;;  %v6035_v48 = vor.u32 %v6034_v59, %v6031_v47  ;;  %v13588_v25 = vshll.u32 %v13542_v4, 16  ;;  %vm13600_vm14 = vmand %vm5062_vm15, %vm5098_vm0 }
 0x342   : > { %v4319_v20 = vand.u32 65535, %v13581_v5  ;;  %v4320_v60 = vshrl.u32 %v13581_v5, 16  ;;  %v13594_v21 = vor.u32 %v6042_v33, %v6039_v24  ;;  %v13597_v36 = vshrl.u32 %v13542_v4, 16  ;;  %v3557_v24 = vpop.f32.mrf.mxu0 }
 0x343   : > { %16905 = vst [vmem:[#allocation22_spill] sm:$0xff] %v13588_v25  ;;  %v4313_v55 = vsub.s32 %v13516_v53, %v4312_v18  ;;  %v6123_v56 = vsel %vm1006_vm2, %v13499_v51, %v13583_v49  ;;  %v3766_v11 = vsel %vm3694_vm9, %v3658_v19, %v3730_v52  ;;  %v3619_v4 = vadd.f32 %v3554_v27, %v13493_v58 }
 0x344   : > { %16906 = vst [vmem:[#allocation30_spill] sm:$0xff] %v13597_v36  ;;  %6754 = vmatmul.bf16.gmra.mxu2 %v6123_v56  ;;  %v4322_v37 = vmul.u32 14564, %v4319_v20  ;;  %v4323_v47 = vmul.u32 58254, %v4319_v20  ;;  %v4324_v53 = vmul.u32 14564, %v4320_v60  ;;  %v6044_v51 = vsel %vm1006_vm2, %v6035_v48, %v13594_v21  ;;  %v11184_v56 = vld [vmem:[#allocation2 + $0x44] sm:$0xff]  }
 0x345   : > { %vm4883_vm4 = vcmp.ne.s32.totalorder %v4313_v55, 0  ;;  %vm4919_vm7 = vcmp.lt.s32.totalorder %v4313_v55, 0  ;;  %v4991_v59 = vadd.s32 18, %v4313_v55  ;;  %6833 = vmatmul.bf16.vlgmr.msrb.gmra.mxu3 %v6044_v51  ;;  %v4325_v54 = vmul.u32 58254, %v4320_v60  ;;  %v10606_v60 = vld [vmem:[%s16572_s3 + $0x20] sm:$0xff] }
 0x346   : > { %vm4955_vm8 = vmand %vm4919_vm7, %vm4883_vm4  ;;  %v4326_v13 = vshll.u32 %v4323_v47, 16  ;;  %v4328_v41 = vshll.u32 %v4324_v53, 16  ;;  %v5242_v19 = vsel %vm13600_vm14, %v13563_v26, 0.0  ;;  %v6155_v34 = vrot.slane %v13597_v36, 3  ;;  %7545 = vmatpush.bf16.msrb.mxu0 %v10606_v60 }
 0x347   : > { %v5027_v22 = vsel %vm4955_vm8, %v4991_v59, %v4313_v55  ;;  %v6156_v29 = vrot.slane %v13588_v25, 4  ;;  %v4327_v58 = vshrl.u32 %v4323_v47, 16  ;;  %v4329_v27 = vshrl.u32 %v4324_v53, 16  ;;  %v3327_v55 = vld [vmem:[%s11383_s26 + $0xac] sm:$0x3] }
 0x348   : > { %vm5063_vm12 = vcmp.ge.s32.totalorder %v5027_v22, 1  ;;  %vm5099_vm11 = vcmp.le.s32.totalorder %v5027_v22, 16  ;;  %vm4330_vm9 = vc.u32 %v4322_v37, %v4326_v13  ;;  %v4332_v52 = vadd.s32 %v4326_v13, %v4322_v37  ;;  %v10605_v13 = vld [vmem:[%s16572_s3 + $0x18] sm:$0xff] }
 0x349   : > { %vm5135_vm15 = vmand %vm5063_vm12, %vm5099_vm11  ;;  %v4331_v18 = vsel %vm4330_vm9, 1, %v16828_v9  ;;  %v13614_v33 = vor.u32 %v6156_v29, %v6155_v34  ;;  %v13617_v20 = vadd.s32 144, %v12534_v17  ;;  %v5806_v22 = vshll.u32 %v11184_v56, 16 }
 0x34a   : > { %v5243_v48 = vsel %vm5135_vm15, %v3766_v11, 0.0  ;;  %v4333_v26 = vadd.s32 %v4331_v18, %v4325_v54  ;;  %vm4334_vm0 = vc.u32 %v4332_v52, %v4328_v41  ;;  %v3620_v11 = vadd.f32 %v3557_v24, %v13558_v35  ;;  %v16909_v41 = vld [vmem:[#allocation4_spill] sm:$0xff]  ;;  %7546 = vmatpush.bf16.msrb.mxu0 %v10605_v13 }
 0x34b   : > { %v13623_v1 = vpack.c.bf16 %v5243_v48, %v5242_v19  ;;  %v4335_v37 = vsel %vm4334_vm0, 1, %v16828_v9  ;;  %v6158_v47 = vsel %vm1006_vm2, %v13513_v39, %v13614_v33  ;;  %v4348_v59 = vand.u32 65535, %v13617_v20 }
 0x34c   : > { %v4337_v53 = vadd.s32 %v4335_v37, %v4333_v26  ;;  %6665 = vmatmul.bf16.gmra.mxu1 %v6158_v47  ;;  %v4349_v51 = vshrl.u32 %v13617_v20, 16  ;;  %v3337_v54 = vunpack.c.l.b16 %v3327_v55  ;;  %v13637_v19 = vadd.f32 %v16909_v41, %v13327_v42 }
 0x34d   : > { %11038 = vst [vmem:[#allocation2 + $0x50] sm:$0xff] %v13623_v1   ;;  %v13641_v39 = vadd.f32 %v13460_v8, %v3619_v4  ;;  %v5803_v35 = vshrl.u32 %v11184_v56, 16  ;;  %v4351_v29 = vmul.u32 14564, %v4348_v59  ;;  %v4352_v52 = vmul.u32 58254, %v4348_v59  ;;  %v3248_v59 = vpop.f32.mrf.mxu3 }
 0x34e   : > { %v4338_v34 = vadd.s32 %v4337_v53, %v4327_v58  ;;  %v4353_v24 = vmul.u32 14564, %v4349_v51  ;;  %v13644_v18 = vadd.f32 %v13460_v8, %v3620_v11  ;;  %v4354_v48 = vmul.u32 58254, %v4349_v51 }
 0x34f   : > { %v3338_v26 = vpack.c.b16 %v3337_v54, %v3337_v54  ;;  %v5805_v60 = vrot.slane %v5803_v35, 4  ;;  %v4355_v42 = vshll.u32 %v4352_v52, 16  ;;  %v4356_v37 = vshrl.u32 %v4352_v52, 16 }
 0x350   : > { %v4339_v55 = vadd.s32 %v4338_v34, %v4329_v27  ;;  %v4357_v47 = vshll.u32 %v4353_v24, 16  ;;  %v4358_v41 = vshrl.u32 %v4353_v24, 16  ;;  %v5808_v25 = vrot.slane %v5806_v22, 5 }
 0x351   : > { %v3417_v4 = vshrl.u32 %v3338_v26, 16  ;;  %v3420_v28 = vshll.u32 %v3338_v26, 16  ;;  %vm4359_vm14 = vc.u32 %v4351_v29, %v4355_v42  ;;  %v4361_v58 = vadd.s32 %v4355_v42, %v4351_v29 }
 0x352   : > { %v4340_v56 = vshrl.u32 %v4339_v55, 4  ;;  %v5917_v53 = vrot.slane %v13233_v6, 5  ;;  %v4360_v11 = vsel %vm4359_vm14, 1, %v16828_v9  ;;  %v13648_v35 = vor.u32 %v5808_v25, %v5805_v60 }
 0x353   : > { %v3419_v51 = vrot.slane %v3417_v4, 1  ;;  %v3422_v54 = vrot.slane %v3420_v28, 2  ;;  %v4362_v34 = vadd.s32 %v4360_v11, %v4354_v48  ;;  %vm4363_vm4 = vc.u32 %v4361_v58, %v4357_v47 }
 0x354   : > { %v4341_v27 = vmul.u32 18, %v4340_v56  ;;  %v16910_v13 = vrot.slane %v13134_v23, 5  ;;  %v4364_v29 = vsel %vm4363_vm4, 1, %v16828_v9  ;;  %v5810_v24 = vsel %vm5748_vm13, %v13555_v10, %v13648_v35  ;;  %v10604_v10 = vld [vmem:[%s16572_s3 + $0x10] sm:$0xff] }
 0x355   : > { %v3423_v52 = vor.u32 %v3422_v54, %v3419_v51  ;;  %v4366_v25 = vadd.s32 %v4364_v29, %v4362_v34  ;;  %v6138_v60 = vshrl.u32 %v5810_v24, 16  ;;  %v6141_v48 = vshll.u32 %v5810_v24, 16  ;;  %7547 = vmatpush.bf16.msrb.mxu0 %v10604_v10  ;;  %v3251_v24 = vpop.f32.mrf.mxu3 }
 0x356   : > { %v5918_v22 = vsel %vm5913_vm10, %v16910_v13, %v5917_v53  ;;  %v4342_v28 = vsub.s32 %v13581_v5, %v4341_v27  ;;  %vm3695_vm7 = vcmp.gt.f32.partialorder %v13641_v39, 0.0  ;;  %v3731_v5 = vmul.f32 0.1, %v13641_v39  ;;  %v10603_v13 = vld [vmem:[%s16572_s3 + $0x8] sm:$0xff] }
 0x357   : > { %v6059_v26 = vshrl.u32 %v5918_v22, 16  ;;  %v3424_v23 = vsel %vm3339_vm6, %v13540_v61, %v3423_v52  ;;  %v6062_v42 = vshll.u32 %v5918_v22, 16  ;;  %v4367_v4 = vadd.s32 %v4366_v25, %v4356_v37  ;;  %v3559_v25 = vpop.f32.mrf.mxu0 }
 0x358   : > { %vm4884_vm8 = vcmp.ne.s32.totalorder %v4342_v28, 0  ;;  %vm4920_vm12 = vcmp.lt.s32.totalorder %v4342_v28, 0  ;;  %v4992_v47 = vadd.s32 18, %v4342_v28  ;;  %10049 = vmatmul.msk.bf16.gmra.mxu0 %vm489_vm1, %v3424_v23  ;;  %v6140_v56 = vrot.slane %v6138_v60, 3 }
 0x359   : > { %v6061_v55 = vrot.slane %v6059_v26, 3  ;;  %vm4956_vm11 = vmand %vm4920_vm12, %vm4884_vm8  ;;  %v6143_v58 = vrot.slane %v6141_v48, 4  ;;  %v6064_v11 = vrot.slane %v6062_v42, 4  ;;  %v3732_v61 = vmul.f32 0.1, %v13644_v18  ;;  %v16911_v48 = vld [vmem:[#allocation38_spill] sm:$0xff]  ;;  %7548 = vmatpush.bf16.msrb.mxu0 %v10603_v13 }
 0x35a   : > { %v5028_v51 = vsel %vm4956_vm11, %v4992_v47, %v4342_v28  ;;  %v4368_v54 = vadd.s32 %v4367_v4, %v4358_v41  ;;  %v13670_v27 = vadd.s32 152, %v12534_v17  ;;  %v13682_v41 = vshll.u32 %v13623_v1, 16 }
 0x35b   : > { %vm5064_vm6 = vcmp.ge.s32.totalorder %v5028_v51, 1  ;;  %vm5100_vm9 = vcmp.le.s32.totalorder %v5028_v51, 16  ;;  %v13672_v37 = vor.u32 %v6143_v58, %v6140_v56  ;;  %v13674_v34 = vor.u32 %v6064_v11, %v6061_v55 }
 0x35c   : > { %v4369_v22 = vshrl.u32 %v4368_v54, 4  ;;  %v4377_v29 = vand.u32 65535, %v13670_v27  ;;  %v4378_v52 = vshrl.u32 %v13670_v27, 16  ;;  %vm3696_vm15 = vcmp.gt.f32.partialorder %v13644_v18, 0.0  ;;  %vm13704_vm0 = vmand %vm5064_vm6, %vm5100_vm9 }
 0x35d   : > { %v6145_v26 = vsel %vm1006_vm2, %v13583_v49, %v13672_v37  ;;  %v6066_v28 = vsel %vm1006_vm2, %v13594_v21, %v13674_v34  ;;  %v13692_v60 = vshrl.u32 %v13623_v1, 16  ;;  %v13696_v23 = vadd.f32 %v12562_v14, %v16911_v48 }
 0x35e   : > { %v3310_v55 = vadd.f32 %v3248_v59, %v12661_v12  ;;  %v3767_v42 = vsel %vm3695_vm7, %v13641_v39, %v3731_v5  ;;  %v4370_v21 = vmul.u32 18, %v4369_v22  ;;  %6759 = vmatmul.bf16.gmra.mxu2 %v6145_v26  ;;  %6838 = vmatmul.bf16.gmra.mxu3 %v6066_v28  ;;  %v4380_v1 = vmul.u32 14564, %v4377_v29  ;;  %v10602_v28 = vld [vmem:[%s16572_s3] sm:$0xff] }
 0x35f   : > { %v4381_v47 = vmul.u32 58254, %v4377_v29  ;;  %v4382_v4 = vmul.u32 14564, %v4378_v52  ;;  %v6177_v14 = vrot.slane %v13692_v60, 3  ;;  %v3768_v12 = vsel %vm3696_vm15, %v13644_v18, %v3732_v61  ;;  %7549 = vmatpush.bf16.msrb.mxu0 %v10602_v28 }
 0x360   : > { %v4371_v39 = vsub.s32 %v13617_v20, %v4370_v21  ;;  %v3621_v59 = vadd.f32 %v3559_v25, %v3310_v55  ;;  %v6178_v10 = vrot.slane %v13682_v41, 4  ;;  %v5244_v5 = vsel %vm13704_vm0, %v3767_v42, 0.0  ;;  %v11186_v25 = vld [vmem:[#allocation2 + $0x4c] sm:$0xff]  }
 0x361   : > { %v4383_v56 = vmul.u32 58254, %v4378_v52  ;;  %v4384_v58 = vshll.u32 %v4381_v47, 16  ;;  %v4386_v11 = vshll.u32 %v4382_v4, 16  ;;  %v4385_v13 = vshrl.u32 %v4381_v47, 16  ;;  %v3562_v47 = vpop.f32.mrf.mxu0 }
 0x362   : > { %vm4885_vm14 = vcmp.ne.s32.totalorder %v4371_v39, 0  ;;  %vm4921_vm4 = vcmp.lt.s32.totalorder %v4371_v39, 0  ;;  %v4993_v51 = vadd.s32 18, %v4371_v39  ;;  %v13716_v54 = vor.u32 %v6178_v10, %v6177_v14 }
 0x363   : > { %vm4957_vm7 = vmand %vm4921_vm4, %vm4885_vm14  ;;  %vm4388_vm8 = vc.u32 %v4380_v1, %v4384_v58  ;;  %v4390_v18 = vadd.s32 %v4384_v58, %v4380_v1  ;;  %v13719_v20 = vadd.s32 160, %v12534_v17  ;;  %v4387_v22 = vshrl.u32 %v4382_v4, 16 }
 0x364   : > { %v5029_v61 = vsel %vm4957_vm7, %v4993_v51, %v4371_v39  ;;  %v4389_v29 = vsel %vm4388_vm8, 1, %v16828_v9  ;;  %v6180_v52 = vsel %vm1006_vm2, %v13614_v33, %v13716_v54  ;;  %v5919_v49 = vrot.slane %v13337_v38, 5  ;;  %v13732_v33 = vpop.f32.mrf.mxu3  ;;  %v16914_v39 = vld [vmem:[#allocation5_spill] sm:$0xff] }
 0x365   : > { %vm5065_vm12 = vcmp.ge.s32.totalorder %v5029_v61, 1  ;;  %vm5101_vm11 = vcmp.le.s32.totalorder %v5029_v61, 16  ;;  %v4391_v26 = vadd.s32 %v4389_v29, %v4383_v56  ;;  %vm4392_vm6 = vc.u32 %v4390_v18, %v4386_v11  ;;  %6670 = vmatmul.bf16.gmra.mxu1 %v6180_v52 }
 0x366   : > { %vm5137_vm9 = vmand %vm5065_vm12, %vm5101_vm11  ;;  %v4393_v48 = vsel %vm4392_vm6, 1, %v16828_v9  ;;  %v4406_v55 = vand.u32 65535, %v13719_v20  ;;  %v4407_v42 = vshrl.u32 %v13719_v20, 16  ;;  %v5812_v4 = vshrl.u32 %v11186_v25, 16 }
 0x367   : > { %v5245_v21 = vsel %vm5137_vm9, %v3768_v12, 0.0  ;;  %v4395_v1 = vadd.s32 %v4393_v48, %v4391_v26  ;;  %v5815_v14 = vshll.u32 %v11186_v25, 16  ;;  %v13736_v10 = vadd.f32 %v16914_v39, %v12569_v50 }
 0x368   : > { %v3311_v56 = vadd.f32 %v3251_v24, %v12665_v43  ;;  %v13739_v58 = vpack.c.bf16 %v5245_v21, %v5244_v5  ;;  %v13742_v11 = vadd.f32 %v13460_v8, %v3621_v59  ;;  %v4409_v18 = vmul.u32 14564, %v4406_v55  ;;  %v5343_v43 = vld [vmem:[#allocation2 + $0x8] sm:$0xc] }
 0x369   : > { %v4396_v51 = vadd.s32 %v4395_v1, %v4385_v13  ;;  %v4410_v61 = vmul.u32 58254, %v4406_v55  ;;  %v4411_v12 = vmul.u32 14564, %v4407_v42  ;;  %v5814_v52 = vrot.slane %v5812_v4, 4 }
 0x36a   : > { %11039 = vst [vmem:[#allocation2 + $0x58] sm:$0xff] %v13739_v58   ;;  %v3622_v29 = vadd.f32 %v3562_v47, %v3311_v56  ;;  %v5817_v26 = vrot.slane %v5815_v14, 5  ;;  %v5920_v50 = vsel %vm5913_vm10, %v5917_v53, %v5919_v49  ;;  %v4412_v5 = vmul.u32 58254, %v4407_v42  ;;  %v13752_v47 = vld [vmem:[#allocation2 + $0xc] sm:$0xf] }
 0x36b   : > { %v4397_v24 = vadd.s32 %v4396_v51, %v4387_v22  ;;  %v4413_v59 = vshll.u32 %v4410_v61, 16  ;;  %v4415_v28 = vshll.u32 %v4411_v12, 16  ;;  %v4414_v13 = vshrl.u32 %v4410_v61, 16 }
 0x36c   : > { %v13750_v25 = vor.u32 %v5817_v26, %v5814_v52  ;;  %v6081_v48 = vshrl.u32 %v5920_v50, 16  ;;  %v6084_v55 = vshll.u32 %v5920_v50, 16  ;;  %v5419_v4 = vunpack.c.l.b16 %v5343_v43  ;;  %v3256_v26 = vpop.f32.mrf.mxu3 }
 0x36d   : > { %v4398_v21 = vshrl.u32 %v4397_v24, 4  ;;  %vm4417_vm15 = vc.u32 %v4409_v18, %v4413_v59  ;;  %v4419_v1 = vadd.s32 %v4413_v59, %v4409_v18  ;;  %v16651_v18 = vunpack.c.l.b16 %v13752_v47 }
 0x36e   : > { %v4418_v6 = vsel %vm4417_vm15, 1, %v16828_v9  ;;  %v5819_v53 = vsel %vm5748_vm13, %v13648_v35, %v13750_v25  ;;  %v6083_v22 = vrot.slane %v6081_v48, 3  ;;  %v6086_v42 = vrot.slane %v6084_v55, 4  ;;  %v11246_v48 = vld [vmem:[#allocation2 + $0x10] sm:$0xff]  }
 0x36f   : > { %v4399_v14 = vmul.u32 18, %v4398_v21  ;;  %v4420_v39 = vadd.s32 %v4418_v6, %v4412_v5  ;;  %vm4421_vm0 = vc.u32 %v4419_v1, %v4415_v28  ;;  %v6160_v56 = vshrl.u32 %v5819_v53, 16 }
 0x370   : > { %v4422_v51 = vsel %vm4421_vm0, 1, %v16828_v9  ;;  %v6163_v61 = vshll.u32 %v5819_v53, 16  ;;  %v13759_v52 = vor.u32 %v6086_v42, %v6083_v22  ;;  %v4416_v43 = vshrl.u32 %v4411_v12, 16 }
 0x371   : > { %v4400_v50 = vsub.s32 %v13670_v27, %v4399_v14  ;;  %v4424_v24 = vadd.s32 %v4422_v51, %v4420_v39  ;;  %v6162_v59 = vrot.slane %v6160_v56, 3  ;;  %v5456_v28 = vpack.c.b16 %v16651_v18, %v5419_v4  ;;  %v3564_v56 = vpop.f32.mrf.mxu0 }
 0x372   : > { %v6165_v35 = vrot.slane %v6163_v61, 4  ;;  %v6088_v5 = vsel %vm1006_vm2, %v13674_v34, %v13759_v52  ;;  %v5486_v55 = vshll.u32 %v11246_v48, 16  ;;  %v3662_v27 = vadd.f32 %v13460_v8, %v3622_v29 }
 0x373   : > { %vm4886_vm14 = vcmp.ne.s32.totalorder %v4400_v50, 0  ;;  %vm4922_vm4 = vcmp.lt.s32.totalorder %v4400_v50, 0  ;;  %v4994_v21 = vadd.s32 18, %v4400_v50  ;;  %v4425_v1 = vadd.s32 %v4424_v24, %v4414_v13  ;;  %6843 = vmatmul.bf16.gmra.mxu3 %v6088_v5 }
 0x374   : > { %vm4958_vm7 = vmand %vm4922_vm4, %vm4886_vm14  ;;  %v13769_v12 = vor.u32 %v6165_v35, %v6162_v59  ;;  %v13771_v6 = vrot.slane %v5486_v55, 1  ;;  %v5490_v53 = vshrl.u32 %v11246_v48, 16  ;;  %v3312_v34 = vadd.f32 %v13732_v33, %v12668_v62 }
 0x375   : > { %v4426_v22 = vadd.s32 %v4425_v1, %v4416_v43  ;;  %v6925_v4 = vshrl.u32 %v5456_v28, 16  ;;  %v6928_v42 = vshll.u32 %v5456_v28, 16  ;;  %v13776_v14 = vadd.f32 %v3256_v26, %v12676_v63  ;;  %v3258_v28 = vpop.f32.mrf.mxu3 }
 0x376   : > { %16915 = vst [vmem:[#allocation31_spill] sm:$0xff] %v13771_v6  ;;  %v5030_v39 = vsel %vm4958_vm7, %v4994_v21, %v4400_v50  ;;  %v6167_v13 = vsel %vm1006_vm2, %v13672_v37, %v13769_v12  ;;  %v13782_v29 = vor.u32 %v5490_v53, %v13771_v6  ;;  %v6932_v62 = vrot.slane %v5490_v53, 2 }
 0x377   : > { %v4427_v51 = vshrl.u32 %v4426_v22, 4  ;;  %6764 = vmatmul.bf16.gmra.mxu2 %v6167_v13  ;;  %v6927_v61 = vrot.slane %v6925_v4, 2  ;;  %v6930_v24 = vrot.slane %v6928_v42, 3  ;;  %vm3697_vm8 = vcmp.gt.f32.partialorder %v13742_v11, 0.0 }
 0x378   : > { %16916 = vst [vmem:[#allocation32_spill] sm:$0xff] %v13782_v29  ;;  %v3733_v33 = vmul.f32 0.1, %v13742_v11  ;;  %v3734_v63 = vmul.f32 0.1, %v3662_v27  ;;  %v6933_v26 = vrot.slane %v5486_v55, 3  ;;  %v3623_v42 = vadd.f32 %v3564_v56, %v3312_v34 }
 0x379   : > { %v4428_v50 = vmul.u32 18, %v4427_v51  ;;  %v6931_v43 = vor.u32 %v6930_v24, %v6927_v61  ;;  %v13787_v59 = vadd.s32 168, %v12534_v17  ;;  %v13790_v37 = vshll.u32 %v13739_v58, 16 }
 0x37a   : > { %vm5066_vm12 = vcmp.ge.s32.totalorder %v5030_v39, 1  ;;  %vm5102_vm11 = vcmp.le.s32.totalorder %v5030_v39, 16  ;;  %v13792_v35 = vor.u32 %v6933_v26, %v6932_v62  ;;  %v13795_v5 = vshrl.u32 %v13739_v58, 16 }
 0x37b   : > { %v4429_v48 = vsub.s32 %v13719_v20, %v4428_v50  ;;  %v4435_v55 = vand.u32 65535, %v13787_v59  ;;  %v4436_v21 = vshrl.u32 %v13787_v59, 16  ;;  %v6200_v1 = vrot.slane %v13790_v37, 4  ;;  %vm13807_vm9 = vmand %vm5066_vm12, %vm5102_vm11 }
 0x37c   : > { %v3769_v53 = vsel %vm3697_vm8, %v13742_v11, %v3733_v33  ;;  %vm3698_vm6 = vcmp.gt.f32.partialorder %v3662_v27, 0.0  ;;  %v6935_v22 = vsel %vm646_vm3, %v6931_v43, %v13792_v35  ;;  %v6199_v58 = vrot.slane %v13795_v5, 3  ;;  %v3567_v43 = vpop.f32.mrf.mxu0 }
 0x37d   : > { %vm4887_vm15 = vcmp.ne.s32.totalorder %v4429_v48, 0  ;;  %vm4923_vm0 = vcmp.lt.s32.totalorder %v4429_v48, 0  ;;  %v4995_v20 = vadd.s32 18, %v4429_v48  ;;  %7550 = vmatmul.bf16.vlgmr.msrb.gmra.mxu0 %v6935_v22  ;;  %v13812_v39 = vadd.f32 %v3258_v28, %v12698_v46  ;;  %v13830_v28 = vld [vmem:[#allocation2 + $0x54] sm:$0xff]  }
 0x37e   : > { %vm4959_vm14 = vmand %vm4923_vm0, %vm4887_vm15  ;;  %v4438_v11 = vmul.u32 14564, %v4435_v55  ;;  %v4439_v13 = vmul.u32 58254, %v4435_v55  ;;  %v4440_v51 = vmul.u32 14564, %v4436_v21  ;;  %v3770_v61 = vsel %vm3698_vm6, %v3662_v27, %v3734_v63  ;;  %v10622_v63 = vld [vmem:[%s16572_s3 + $0xa0] sm:$0xff] }
 0x37f   : > { %v5031_v24 = vsel %vm4959_vm14, %v4995_v20, %v4429_v48  ;;  %v13814_v62 = vor.u32 %v6200_v1, %v6199_v58  ;;  %v13817_v33 = vadd.s32 176, %v12534_v17  ;;  %v4441_v26 = vmul.u32 58254, %v4436_v21  ;;  %7743 = vmatpush.bf16.msrb.mxu2 %v10622_v63 }
 0x380   : > { %vm5067_vm4 = vcmp.ge.s32.totalorder %v5031_v24, 1  ;;  %vm5103_vm7 = vcmp.le.s32.totalorder %v5031_v24, 16  ;;  %v4442_v50 = vshll.u32 %v4439_v13, 16  ;;  %v5246_v46 = vsel %vm13807_vm9, %v3769_v53, 0.0 }
 0x381   : > { %vm5139_vm8 = vmand %vm5067_vm4, %vm5103_vm7  ;;  %v13822_v34 = vadd.f32 %v13460_v8, %v3623_v42  ;;  %v4444_v56 = vshll.u32 %v4440_v51, 16  ;;  %v6202_v27 = vsel %vm1006_vm2, %v13716_v54, %v13814_v62  ;;  %v4464_v21 = vand.u32 65535, %v13817_v33  ;;  %v10614_v8 = vld [vmem:[%s16572_s3 + $0x60] sm:$0xff] }
 0x382   : > { %v5247_v48 = vsel %vm5139_vm8, %v3770_v61, 0.0  ;;  %vm4446_vm12 = vc.u32 %v4438_v11, %v4442_v50  ;;  %v4448_v55 = vadd.s32 %v4442_v50, %v4438_v11  ;;  %6675 = vmatmul.bf16.gmra.mxu1 %v6202_v27  ;;  %v4443_v53 = vshrl.u32 %v4439_v13, 16 }
 0x383   : > { %v13836_v1 = vpack.c.bf16 %v5247_v48, %v5246_v46  ;;  %v4447_v54 = vsel %vm4446_vm12, 1, %v16828_v9  ;;  %v3624_v22 = vadd.f32 %v3567_v43, %v13776_v14  ;;  %v4445_v58 = vshrl.u32 %v4440_v51, 16  ;;  %7644 = vmatpush.bf16.msrb.mxu1 %v10614_v8 }
 0x384   : > { %v4449_v4 = vadd.s32 %v4447_v54, %v4441_v26  ;;  %vm4450_vm11 = vc.u32 %v4448_v55, %v4444_v56  ;;  %v4465_v20 = vshrl.u32 %v13817_v33, 16  ;;  %v4467_v11 = vmul.u32 14564, %v4464_v21  ;;  %v13845_v56 = vld [vmem:[#allocation2 + $0x34] sm:$0xff]   ;;  %v3261_v54 = vpop.f32.mrf.mxu3 }
 0x385   : > { %11040 = vst [vmem:[#allocation2 + $0x60] sm:$0xff] %v13836_v1   ;;  %v4451_v42 = vsel %vm4450_vm11, 1, %v16828_v9  ;;  %v4468_v61 = vmul.u32 58254, %v4464_v21  ;;  %v5821_v24 = vshrl.u32 %v13830_v28, 16  ;;  %v5824_v14 = vshll.u32 %v13830_v28, 16 }
 0x386   : > { %v4453_v13 = vadd.s32 %v4451_v42, %v4449_v4  ;;  %v4469_v50 = vmul.u32 14564, %v4465_v20  ;;  %v4470_v46 = vmul.u32 58254, %v4465_v20  ;;  %v16652_v27 = vrot.slane %v13845_v56, 5 }
 0x387   : > { %v4471_v43 = vshll.u32 %v4468_v61, 16  ;;  %v4472_v51 = vshrl.u32 %v4468_v61, 16  ;;  %v5823_v26 = vrot.slane %v5821_v24, 4  ;;  %v5826_v8 = vrot.slane %v5824_v14, 5 }
 0x388   : > { %v4454_v63 = vadd.s32 %v4453_v13, %v4443_v53  ;;  %v4473_v48 = vshll.u32 %v4469_v50, 16  ;;  %v4474_v55 = vshrl.u32 %v4469_v50, 16  ;;  %v5922_v4 = vsel %vm5913_vm10, %v5919_v49, %v16652_v27 }
 0x389   : > { %vm4475_vm6 = vc.u32 %v4467_v11, %v4471_v43  ;;  %v4477_v21 = vadd.s32 %v4471_v43, %v4467_v11  ;;  %v6970_v20 = vrot.slane %v13002_v0, 2  ;;  %v13855_v24 = vor.u32 %v5826_v8, %v5823_v26 }
 0x38a   : > { %v4455_v42 = vadd.s32 %v4454_v63, %v4445_v58  ;;  %v4476_v61 = vsel %vm4475_vm6, 1, %v16828_v9  ;;  %v6103_v53 = vshrl.u32 %v5922_v4, 16  ;;  %v6106_v50 = vshll.u32 %v5922_v4, 16 }
 0x38b   : > { %v4478_v13 = vadd.s32 %v4476_v61, %v4470_v46  ;;  %vm4479_vm9 = vc.u32 %v4477_v21, %v4473_v48  ;;  %v6971_v14 = vrot.slane %v13000_v2, 3  ;;  %v5828_v38 = vsel %vm5748_vm13, %v13750_v25, %v13855_v24  ;;  %v13868_v48 = vld [vmem:[%s16571_s2] ss:$0 sm:$0xff] }
 0x38c   : > { %v4456_v11 = vshrl.u32 %v4455_v42, 4  ;;  %v4480_v43 = vsel %vm4479_vm9, 1, %v16828_v9  ;;  %v6105_v49 = vrot.slane %v6103_v53, 3  ;;  %v6182_v58 = vshrl.u32 %v5828_v38, 16 }
 0x38d   : > { %v4482_v18 = vadd.s32 %v4480_v43, %v4478_v13  ;;  %v6185_v63 = vshll.u32 %v5828_v38, 16  ;;  %v6108_v27 = vrot.slane %v6106_v50, 4  ;;  %v13863_v26 = vadd.f32 %v3261_v54, %v12733_v44  ;;  %v13883_v13 = vpop.f32.mrf.mxu1  ;;  %v3263_v50 = vpop.f32.mrf.mxu3 }
 0x38e   : > { %v4457_v46 = vmul.u32 18, %v4456_v11  ;;  %v3664_v8 = vadd.f32 %v13868_v48, %v3624_v22  ;;  %v13871_v21 = vor.u32 %v6971_v14, %v6970_v20  ;;  %v6184_v25 = vrot.slane %v6182_v58, 3 }
 0x38f   : > { %v4483_v4 = vadd.s32 %v4482_v18, %v4472_v51  ;;  %v6187_v42 = vrot.slane %v6185_v63, 4  ;;  %v13873_v61 = vor.u32 %v6108_v27, %v6105_v49  ;;  %vm3699_vm15 = vcmp.gt.f32.partialorder %v13822_v34, 0.0  ;;  %v3569_v27 = vpop.f32.mrf.mxu0 }
 0x390   : > { %v4458_v44 = vsub.s32 %v13787_v59, %v4457_v46  ;;  %v6973_v54 = vsel %vm646_vm3, %v13792_v35, %v13871_v21  ;;  %v13881_v53 = vadd.s32 184, %v12534_v17  ;;  %v13891_v51 = vshll.u32 %v13836_v1, 16 }
 0x391   : > { %v4484_v22 = vadd.s32 %v4483_v4, %v4474_v55  ;;  %v13885_v20 = vor.u32 %v6187_v42, %v6184_v25  ;;  %v6110_v18 = vsel %vm1006_vm2, %v13759_v52, %v13873_v61  ;;  %7555 = vmatmul.bf16.gmra.mxu0 %v6973_v54  ;;  %v3735_v59 = vmul.f32 0.1, %v13822_v34 }
 0x392   : > { %16919 = vst [vmem:[#allocation33_spill] sm:$0xff] %v13891_v51  ;;  %vm4888_vm0 = vcmp.ne.s32.totalorder %v4458_v44, 0  ;;  %vm4924_vm14 = vcmp.lt.s32.totalorder %v4458_v44, 0  ;;  %v4996_v35 = vadd.s32 18, %v4458_v44  ;;  %6848 = vmatmul.bf16.gmra.mxu3 %v6110_v18  ;;  %v3736_v55 = vmul.f32 0.1, %v3664_v8 }
 0x393   : > { %vm4960_vm4 = vmand %vm4924_vm14, %vm4888_vm0  ;;  %v4485_v14 = vshrl.u32 %v4484_v22, 4  ;;  %v6189_v11 = vsel %vm1006_vm2, %v13769_v12, %v13885_v20  ;;  %v4493_v52 = vand.u32 65535, %v13881_v53  ;;  %vm3700_vm7 = vcmp.gt.f32.partialorder %v3664_v8, 0.0 }
 0x394   : > { %v5032_v43 = vsel %vm4960_vm4, %v4996_v35, %v4458_v44  ;;  %6769 = vmatmul.bf16.gmra.mxu2 %v6189_v11  ;;  %v4494_v38 = vshrl.u32 %v13881_v53, 16  ;;  %v13900_v49 = vshrl.u32 %v13836_v1, 16  ;;  %v6222_v63 = vrot.slane %v13891_v51, 4  ;;  %v13932_v44 = vpop.f32.mrf.mxu2 }
 0x395   : > { %vm5068_vm8 = vcmp.ge.s32.totalorder %v5032_v43, 1  ;;  %vm5104_vm12 = vcmp.le.s32.totalorder %v5032_v43, 16  ;;  %v4486_v58 = vmul.u32 18, %v4485_v14  ;;  %v13904_v46 = vadd.f32 %v3263_v50, %v12740_v32  ;;  %v13916_v14 = vpop.f32.mrf.mxu1 }
 0x396   : > { %16920 = vst [vmem:[#allocation20_spill] sm:$0xff] %v13900_v49  ;;  %v4496_v4 = vmul.u32 14564, %v4493_v52  ;;  %v4497_v12 = vmul.u32 58254, %v4493_v52  ;;  %v4498_v25 = vmul.u32 14564, %v4494_v38  ;;  %v3771_v42 = vsel %vm3699_vm15, %v13822_v34, %v3735_v59  ;;  %vm13909_vm11 = vmand %vm5068_vm8, %vm5104_vm12 }
 0x397   : > { %v3772_v1 = vsel %vm3700_vm7, %v3664_v8, %v3736_v55  ;;  %v4487_v54 = vsub.s32 %v13817_v33, %v4486_v58  ;;  %v6221_v22 = vrot.slane %v13900_v49, 3  ;;  %v3625_v18 = vadd.f32 %v3569_v27, %v13812_v39  ;;  %v11190_v58 = vld [vmem:[#allocation2 + $0x5c] sm:$0xff]  }
 0x398   : > { %v4499_v32 = vmul.u32 58254, %v4494_v38  ;;  %v4500_v35 = vshll.u32 %v4497_v12, 16  ;;  %v4502_v50 = vshll.u32 %v4498_v25, 16  ;;  %v5248_v59 = vsel %vm13909_vm11, %v3771_v42, 0.0  ;;  %v3572_v38 = vpop.f32.mrf.mxu0 }
 0x399   : > { %vm4889_vm6 = vcmp.ne.s32.totalorder %v4487_v54, 0  ;;  %vm4925_vm9 = vcmp.lt.s32.totalorder %v4487_v54, 0  ;;  %v4997_v11 = vadd.s32 18, %v4487_v54  ;;  %v13918_v34 = vor.u32 %v6222_v63, %v6221_v22 }
 0x39a   : > { %vm4961_vm15 = vmand %vm4925_vm9, %vm4889_vm6  ;;  %vm4504_vm0 = vc.u32 %v4496_v4, %v4500_v35  ;;  %v4506_v33 = vadd.s32 %v4500_v35, %v4496_v4  ;;  %v13923_v8 = vadd.s32 192, %v12534_v17  ;;  %v4501_v27 = vshrl.u32 %v4497_v12, 16 }
 0x39b   : > { %v5033_v39 = vsel %vm4961_vm15, %v4997_v11, %v4487_v54  ;;  %v4505_v55 = vsel %vm4504_vm0, 1, %v16828_v9  ;;  %v6224_v52 = vsel %vm1006_vm2, %v13814_v62, %v13918_v34  ;;  %v4503_v63 = vshrl.u32 %v4498_v25, 16 }
 0x39c   : > { %vm5069_vm14 = vcmp.ge.s32.totalorder %v5033_v39, 1  ;;  %vm5105_vm4 = vcmp.le.s32.totalorder %v5033_v39, 16  ;;  %v4507_v43 = vadd.s32 %v4505_v55, %v4499_v32  ;;  %vm4508_vm7 = vc.u32 %v4506_v33, %v4502_v50  ;;  %6680 = vmatmul.bf16.gmra.mxu1 %v6224_v52 }
 0x39d   : > { %vm5141_vm8 = vmand %vm5069_vm14, %vm5105_vm4  ;;  %v4509_v4 = vsel %vm4508_vm7, 1, %v16828_v9  ;;  %v4522_v42 = vand.u32 65535, %v13923_v8  ;;  %v4523_v12 = vshrl.u32 %v13923_v8, 16  ;;  %v5830_v62 = vshrl.u32 %v11190_v58, 16 }
 0x39e   : > { %v5249_v54 = vsel %vm5141_vm8, %v3772_v1, 0.0  ;;  %v4511_v22 = vadd.s32 %v4509_v4, %v4507_v43  ;;  %v5833_v35 = vshll.u32 %v11190_v58, 16  ;;  %v13937_v32 = vadd.f32 %v13868_v48, %v3625_v18  ;;  %v13942_v4 = vld [vmem:[#allocation2 + $0x3c] sm:$0xff]  }
 0x39f   : > { %v13934_v11 = vpack.c.bf16 %v5249_v54, %v5248_v59  ;;  %v3626_v50 = vadd.f32 %v3572_v38, %v13863_v26  ;;  %v6992_v25 = vrot.slane %v13091_v57, 2  ;;  %v4525_v39 = vmul.u32 14564, %v4522_v42  ;;  %v13945_v26 = vpop.f32.mrf.mxu1 }
 0x3a0   : > { %v4512_v33 = vadd.s32 %v4511_v22, %v4501_v27  ;;  %v4526_v55 = vmul.u32 58254, %v4522_v42  ;;  %v4527_v52 = vmul.u32 14564, %v4523_v12  ;;  %v4528_v0 = vmul.u32 58254, %v4523_v12  ;;  %16923 = vst [vmem:[#allocation24_spill] sm:$0xff] %v13945_v26 }
 0x3a1   : > { %11041 = vst [vmem:[#allocation2 + $0x68] sm:$0xff] %v13934_v11   ;;  %v5832_v1 = vrot.slane %v5830_v62, 4  ;;  %v5835_v43 = vrot.slane %v5833_v35, 5  ;;  %v16655_v59 = vrot.slane %v13942_v4, 5  ;;  %v16924_v42 = vrot.slane %v13845_v56, 5 }
 0x3a2   : > { %v4513_v58 = vadd.s32 %v4512_v33, %v4503_v63  ;;  %v4529_v18 = vshll.u32 %v4526_v55, 16  ;;  %v4530_v54 = vshrl.u32 %v4526_v55, 16  ;;  %v4531_v6 = vshll.u32 %v4527_v52, 16  ;;  %v3266_v33 = vpop.f32.mrf.mxu3 }
 0x3a3   : > { %v4532_v38 = vshrl.u32 %v4527_v52, 16  ;;  %v13947_v27 = vor.u32 %v5835_v43, %v5832_v1  ;;  %v5924_v12 = vsel %vm5913_vm10, %v16924_v42, %v16655_v59  ;;  %v6993_v22 = vrot.slane %v13089_v15, 3  ;;  %v6735_v59 = vpop.f32.mrf.mxu2 }
 0x3a4   : > { %v4514_v62 = vshrl.u32 %v4513_v58, 4  ;;  %vm4533_vm12 = vc.u32 %v4525_v39, %v4529_v18  ;;  %v4535_v35 = vadd.s32 %v4529_v18, %v4525_v39  ;;  %v6125_v63 = vshrl.u32 %v5924_v12, 16 }
 0x3a5   : > { %v4534_v55 = vsel %vm4533_vm12, 1, %v16828_v9  ;;  %v5837_v52 = vsel %vm5748_vm13, %v13855_v24, %v13947_v27  ;;  %v6128_v1 = vshll.u32 %v5924_v12, 16  ;;  %v13959_v43 = vor.u32 %v6993_v22, %v6992_v25  ;;  %v3574_v22 = vpop.f32.mrf.mxu0 }
 0x3a6   : > { %v4515_v26 = vmul.u32 18, %v4514_v62  ;;  %v4536_v56 = vadd.s32 %v4534_v55, %v4528_v0  ;;  %vm4537_vm11 = vc.u32 %v4535_v35, %v4531_v6  ;;  %v6204_v42 = vshrl.u32 %v5837_v52, 16 }
 0x3a7   : > { %v4538_v58 = vsel %vm4537_vm11, 1, %v16828_v9  ;;  %v6207_v57 = vshll.u32 %v5837_v52, 16  ;;  %v6127_v39 = vrot.slane %v6125_v63, 3  ;;  %v6130_v18 = vrot.slane %v6128_v1, 4 }
 0x3a8   : > { %v4516_v15 = vsub.s32 %v13881_v53, %v4515_v26  ;;  %v4540_v29 = vadd.s32 %v4538_v58, %v4536_v56  ;;  %v6206_v51 = vrot.slane %v6204_v42, 3  ;;  %v6995_v24 = vsel %vm646_vm3, %v13871_v21, %v13959_v43 }
 0x3a9   : > { %v3666_v25 = vadd.f32 %v13868_v48, %v3626_v50  ;;  %v6209_v12 = vrot.slane %v6207_v57, 4  ;;  %v13967_v0 = vor.u32 %v6130_v18, %v6127_v39  ;;  %7560 = vmatmul.bf16.gmra.mxu0 %v6995_v24  ;;  %v13970_v6 = vadd.f32 %v6735_v59, %v13916_v14  ;;  %v16928_v18 = vld [vmem:[#allocation40_spill] sm:$0xff] }
 0x3aa   : > { %vm4890_vm6 = vcmp.ne.s32.totalorder %v4516_v15, 0  ;;  %vm4926_vm9 = vcmp.lt.s32.totalorder %v4516_v15, 0  ;;  %v4998_v62 = vadd.s32 18, %v4516_v15  ;;  %v4541_v53 = vadd.s32 %v4540_v29, %v4530_v54  ;;  %v13987_v54 = vpop.f32.mrf.mxu1 }
 0x3ab   : > { %vm3701_vm15 = vcmp.gt.f32.partialorder %v13937_v32, 0.0  ;;  %vm4962_vm0 = vmand %vm4926_vm9, %vm4890_vm6  ;;  %v13973_v26 = vor.u32 %v6209_v12, %v6206_v51  ;;  %v6132_v57 = vsel %vm1006_vm2, %v13873_v61, %v13967_v0  ;;  %v13979_v21 = vadd.s32 200, %v12534_v17 }
 0x3ac   : > { %v5034_v50 = vsel %vm4962_vm0, %v4998_v62, %v4516_v15  ;;  %v4542_v14 = vadd.s32 %v4541_v53, %v4532_v38  ;;  %6853 = vmatmul.bf16.gmra.mxu3 %v6132_v57  ;;  %v13982_v59 = vshll.u32 %v13934_v11, 16  ;;  %v13985_v29 = vshrl.u32 %v13934_v11, 16  ;;  %v3268_v11 = vpop.f32.mrf.mxu3 }
 0x3ad   : > { %v3737_v51 = vmul.f32 0.1, %v13937_v32  ;;  %vm3702_vm14 = vcmp.gt.f32.partialorder %v3666_v25, 0.0  ;;  %v3738_v35 = vmul.f32 0.1, %v3666_v25  ;;  %v6211_v61 = vsel %vm1006_vm2, %v13885_v20, %v13973_v26  ;;  %v16927_v20 = vld [vmem:[#allocation39_spill] sm:$0xff] }
 0x3ae   : > { %16925 = vst [vmem:[#allocation34_spill] sm:$0xff] %v13982_v59  ;;  %v4543_v63 = vshrl.u32 %v4542_v14, 4  ;;  %6774 = vmatmul.bf16.gmra.mxu2 %v6211_v61  ;;  %v4551_v15 = vand.u32 65535, %v13979_v21  ;;  %v4552_v38 = vshrl.u32 %v13979_v21, 16  ;;  %v6243_v55 = vrot.slane %v13985_v29, 3 }
 0x3af   : > { %16926 = vst [vmem:[#allocation25_spill] sm:$0xff] %v13985_v29  ;;  %vm5070_vm4 = vcmp.ge.s32.totalorder %v5034_v50, 1  ;;  %vm5106_vm7 = vcmp.le.s32.totalorder %v5034_v50, 16  ;;  %v3627_v52 = vadd.f32 %v3574_v22, %v13904_v46  ;;  %v6244_v1 = vrot.slane %v13982_v59, 4 }
 0x3b0   : > { %v4544_v56 = vmul.u32 18, %v4543_v63  ;;  %v4554_v42 = vmul.u32 14564, %v4551_v15  ;;  %v4555_v58 = vmul.u32 58254, %v4551_v15  ;;  %v13998_v39 = vmul.u32 14564, %v4552_v38  ;;  %vm14010_vm8 = vmand %vm5070_vm4, %vm5106_vm7 }
 0x3b1   : > { %v14002_v24 = vadd.f32 %v16928_v18, %v16927_v20  ;;  %v3317_v12 = vadd.f32 %v3266_v33, %v13222_v3  ;;  %v3773_v62 = vsel %vm3701_vm15, %v13937_v32, %v3737_v51  ;;  %v14008_v53 = vor.u32 %v6244_v1, %v6243_v55  ;;  %v3577_v51 = vpop.f32.mrf.mxu0  ;;  %v10621_v1 = vld [vmem:[%s16572_s3 + $0x98] sm:$0xff] }
 0x3b2   : > { %v14015_v22 = vadd.f32 %v3268_v11, %v13262_v16  ;;  %v4545_v57 = vsub.s32 %v13923_v8, %v4544_v56  ;;  %v4557_v50 = vmul.u32 58254, %v4552_v38  ;;  %v4558_v14 = vshll.u32 %v4555_v58, 16  ;;  %v10613_v56 = vld [vmem:[%s16572_s3 + $0x58] sm:$0xff]  ;;  %v14040_v20 = vpop.f32.mrf.mxu1  ;;  %7744 = vmatpush.bf16.msrb.mxu2 %v10621_v1 }
 0x3b3   : > { %v3774_v61 = vsel %vm3702_vm14, %v3666_v25, %v3738_v35  ;;  %v14020_v3 = vadd.f32 %v13868_v48, %v3627_v52  ;;  %v4560_v32 = vshll.u32 %v13998_v39, 16  ;;  %v6246_v33 = vsel %vm1006_vm2, %v13918_v34, %v14008_v53  ;;  %v14032_v34 = vpop.f32.mrf.mxu2  ;;  %v11192_v52 = vld [vmem:[#allocation2 + $0x64] sm:$0xff]   ;;  %16932 = vst [vmem:[#allocation36_spill] sm:$0xff] %v14040_v20  ;;  %7645 = vmatpush.bf16.msrb.mxu1 %v10613_v56 }
 0x3b4   : > { %vm4891_vm12 = vcmp.ne.s32.totalorder %v4545_v57, 0  ;;  %vm4927_vm11 = vcmp.lt.s32.totalorder %v4545_v57, 0  ;;  %v4999_v16 = vadd.s32 18, %v4545_v57  ;;  %vm4562_vm6 = vc.u32 %v4554_v42, %v4558_v14  ;;  %6685 = vmatmul.bf16.gmra.mxu1 %v6246_v33  ;;  %16931 = vst [vmem:[#allocation35_spill] sm:$0xff] %v14032_v34 }
 0x3b5   : > { %v5250_v8 = vsel %vm14010_vm8, %v3773_v62, 0.0  ;;  %vm4963_vm9 = vmand %vm4927_vm11, %vm4891_vm12  ;;  %v4563_v25 = vsel %vm4562_vm6, 1, %v16828_v9  ;;  %v4564_v35 = vadd.s32 %v4558_v14, %v4554_v42  ;;  %v14030_v63 = vadd.s32 208, %v12534_v17  ;;  %v14046_v62 = vld [vmem:[#allocation2 + $0x44] sm:$0xff]  }
 0x3b6   : > { %v5035_v15 = vsel %vm4963_vm9, %v4999_v16, %v4545_v57  ;;  %v4559_v38 = vshrl.u32 %v4555_v58, 16  ;;  %v4565_v55 = vadd.s32 %v4563_v25, %v4557_v50  ;;  %v3628_v11 = vadd.f32 %v3577_v51, %v3317_v12 }
 0x3b7   : > { %vm5071_vm15 = vcmp.ge.s32.totalorder %v5035_v15, 1  ;;  %vm5107_vm0 = vcmp.le.s32.totalorder %v5035_v15, 16  ;;  %v4561_v42 = vshrl.u32 %v13998_v39, 16  ;;  %vm4566_vm14 = vc.u32 %v4564_v35, %v4560_v32 }
 0x3b8   : > { %vm5143_vm4 = vmand %vm5071_vm15, %vm5107_vm0  ;;  %v4567_v58 = vsel %vm4566_vm14, 1, %v16828_v9  ;;  %v4580_v18 = vand.u32 65535, %v14030_v63  ;;  %v4581_v12 = vshrl.u32 %v14030_v63, 16  ;;  %v16663_v46 = vrot.slane %v14046_v62, 5 }
 0x3b9   : > { %v5251_v57 = vsel %vm5143_vm4, %v3774_v61, 0.0  ;;  %v4569_v50 = vadd.s32 %v4567_v58, %v4565_v55  ;;  %v5839_v14 = vshrl.u32 %v11192_v52, 16  ;;  %v5842_v33 = vshll.u32 %v11192_v52, 16 }
 0x3ba   : > { %v14049_v51 = vpack.c.bf16 %v5251_v57, %v5250_v8  ;;  %v14052_v39 = vadd.f32 %v13868_v48, %v3628_v11  ;;  %v4583_v32 = vmul.u32 14564, %v4580_v18  ;;  %v4584_v16 = vmul.u32 58254, %v4580_v18  ;;  %v14061_v11 = vpop.f32.mrf.mxu3 }
 0x3bb   : > { %v4570_v25 = vadd.s32 %v4569_v50, %v4559_v38  ;;  %v4585_v35 = vmul.u32 14564, %v4581_v12  ;;  %v5841_v15 = vrot.slane %v5839_v14, 4  ;;  %v7014_v34 = vrot.slane %v13189_v30, 2  ;;  %v16934_v30 = vld [vmem:[#allocation13_spill] sm:$0xff] }
 0x3bc   : > { %11042 = vst [vmem:[#allocation2 + $0x70] sm:$0xff] %v14049_v51   ;;  %v4586_v1 = vmul.u32 58254, %v4581_v12  ;;  %v4587_v56 = vshll.u32 %v4584_v16, 16  ;;  %v5844_v61 = vrot.slane %v5842_v33, 5  ;;  %v16933_v8 = vrot.slane %v13942_v4, 5 }
 0x3bd   : > { %v4571_v52 = vadd.s32 %v4570_v25, %v4561_v42  ;;  %v4588_v58 = vshrl.u32 %v4584_v16, 16  ;;  %v4589_v38 = vshll.u32 %v4585_v35, 16  ;;  %v7015_v59 = vrot.slane %v16934_v30, 3  ;;  %v6740_v25 = vpop.f32.mrf.mxu2 }
 0x3be   : > { %v5926_v55 = vsel %vm5913_vm10, %v16933_v8, %v16663_v46  ;;  %vm4591_vm7 = vc.u32 %v4583_v32, %v4587_v56  ;;  %v4593_v57 = vadd.s32 %v4587_v56, %v4583_v32  ;;  %v14063_v50 = vor.u32 %v5844_v61, %v5841_v15  ;;  %v14070_v8 = vpop.f32.mrf.mxu1 }
 0x3bf   : > { %v6147_v18 = vshrl.u32 %v5926_v55, 16  ;;  %v6150_v14 = vshll.u32 %v5926_v55, 16  ;;  %v4572_v12 = vshrl.u32 %v4571_v52, 4  ;;  %v4592_v33 = vsel %vm4591_vm7, 1, %v16828_v9 }
 0x3c0   : > { %v4594_v4 = vadd.s32 %v4592_v33, %v4586_v1  ;;  %vm4595_vm8 = vc.u32 %v4593_v57, %v4589_v38  ;;  %v5846_v42 = vsel %vm5748_vm13, %v13947_v27, %v14063_v50  ;;  %v4590_v55 = vshrl.u32 %v4585_v35, 16 }
 0x3c1   : > { %v6149_v20 = vrot.slane %v6147_v18, 3  ;;  %v6152_v16 = vrot.slane %v6150_v14, 4  ;;  %v4573_v32 = vmul.u32 18, %v4572_v12  ;;  %v4596_v15 = vsel %vm4595_vm8, 1, %v16828_v9  ;;  %v3579_v14 = vpop.f32.mrf.mxu0 }
 0x3c2   : > { %v6226_v56 = vshrl.u32 %v5846_v42, 16  ;;  %v6229_v61 = vshll.u32 %v5846_v42, 16  ;;  %v4598_v52 = vadd.s32 %v4596_v15, %v4594_v4  ;;  %v14075_v46 = vor.u32 %v7015_v59, %v7014_v34  ;;  %v14097_v4 = vpop.f32.mrf.mxu3 }
 0x3c3   : > { %v14073_v18 = vor.u32 %v6152_v16, %v6149_v20  ;;  %v4574_v1 = vsub.s32 %v13979_v21, %v4573_v32  ;;  %v14079_v27 = vadd.f32 %v6740_v25, %v13987_v54  ;;  %vm3703_vm12 = vcmp.gt.f32.partialorder %v14020_v3, 0.0 }
 0x3c4   : > { %v6228_v38 = vrot.slane %v6226_v56, 3  ;;  %v6231_v57 = vrot.slane %v6229_v61, 4  ;;  %v4599_v12 = vadd.s32 %v4598_v52, %v4588_v58  ;;  %v7017_v59 = vsel %vm646_vm3, %v13959_v43, %v14075_v46 }
 0x3c5   : > { %v6154_v35 = vsel %vm1006_vm2, %v13967_v0, %v14073_v18  ;;  %vm4892_vm11 = vcmp.ne.s32.totalorder %v4574_v1, 0  ;;  %vm4928_vm6 = vcmp.lt.s32.totalorder %v4574_v1, 0  ;;  %v5000_v21 = vadd.s32 18, %v4574_v1  ;;  %7565 = vmatmul.bf16.gmra.mxu0 %v7017_v59  ;;  %v14156_v59 = vld [vmem:[#allocation2 + $0x4c] sm:$0xff]  }
 0x3c6   : > { %v14088_v34 = vor.u32 %v6231_v57, %v6228_v38  ;;  %6858 = vmatmul.bf16.gmra.mxu3 %v6154_v35  ;;  %v3739_v54 = vmul.f32 0.1, %v14020_v3  ;;  %vm4964_vm9 = vmand %vm4928_vm6, %vm4892_vm11  ;;  %v4600_v20 = vadd.s32 %v4599_v12, %v4590_v55  ;;  %v14092_v58 = vadd.s32 216, %v12534_v17  ;;  %v16937_v55 = vld [vmem:[#allocation6_spill] sm:$0xff]  ;;  %v14122_v57 = vpop.f32.mrf.mxu1 }
 0x3c7   : > { %v14095_v0 = vshll.u32 %v14049_v51, 16  ;;  %v5036_v33 = vsel %vm4964_vm9, %v5000_v21, %v4574_v1  ;;  %vm3704_vm15 = vcmp.gt.f32.partialorder %v14052_v39, 0.0  ;;  %v14104_v42 = vshrl.u32 %v14049_v51, 16  ;;  %v16938_v51 = vld [vmem:[#allocation41_spill] sm:$0xff]  ;;  %16939 = vst [vmem:[#allocation23_spill] sm:$0xff] %v14122_v57  ;;  %v16943_v57 = vld [vmem:[#allocation14_spill] sm:$0xff] }
 0x3c8   : > { %v6233_v43 = vsel %vm1006_vm2, %v13973_v26, %v14088_v34  ;;  %vm5072_vm0 = vcmp.ge.s32.totalorder %v5036_v33, 1  ;;  %v3740_v16 = vmul.f32 0.1, %v14052_v39  ;;  %v4601_v25 = vshrl.u32 %v4600_v20, 4 }
 0x3c9   : > { %16935 = vst [vmem:[#allocation3_spill] sm:$0xff] %v14095_v0  ;;  %6779 = vmatmul.bf16.gmra.mxu2 %v6233_v43  ;;  %v3629_v32 = vadd.f32 %v3579_v14, %v14015_v22  ;;  %vm5108_vm14 = vcmp.le.s32.totalorder %v5036_v33, 16  ;;  %v4609_v15 = vand.u32 65535, %v14092_v58  ;;  %v4610_v56 = vshrl.u32 %v14092_v58, 16 }
 0x3ca   : > { %16936 = vst [vmem:[#allocation37_spill] sm:$0xff] %v14104_v42  ;;  %v6265_v61 = vrot.slane %v14104_v42, 3  ;;  %v14113_v26 = vadd.f32 %v16937_v55, %v13736_v10  ;;  %v14117_v52 = vadd.f32 %v16938_v51, %v14002_v24  ;;  %v4602_v1 = vmul.u32 18, %v4601_v25  ;;  %vm14128_vm4 = vmand %vm5072_vm0, %vm5108_vm14  ;;  %v11194_v51 = vld [vmem:[#allocation2 + $0x6c] sm:$0xff]   ;;  %v16945_v42 = vld [vmem:[#allocation16_spill] sm:$0xff] }
 0x3cb   : > { %v6266_v38 = vrot.slane %v14095_v0, 4  ;;  %v3319_v22 = vadd.f32 %v14061_v11, %v13323_v40  ;;  %v4612_v14 = vmul.u32 14564, %v4609_v15  ;;  %v4613_v12 = vmul.u32 58254, %v4609_v15 }
 0x3cc   : > { %v4614_v35 = vmul.u32 14564, %v4610_v56  ;;  %v3775_v10 = vsel %vm3703_vm12, %v14020_v3, %v3739_v54  ;;  %v3776_v24 = vsel %vm3704_vm15, %v14052_v39, %v3740_v16  ;;  %v4603_v40 = vsub.s32 %v14030_v63, %v4602_v1  ;;  %v3582_v3 = vpop.f32.mrf.mxu0  ;;  %v14146_v16 = vpop.f32.mrf.mxu2 }
 0x3cd   : > { %v14136_v11 = vor.u32 %v6266_v38, %v6265_v61  ;;  %v14139_v21 = vadd.f32 %v13868_v48, %v3629_v32  ;;  %v4615_v20 = vmul.u32 58254, %v4610_v56  ;;  %v4616_v43 = vshll.u32 %v4613_v12, 16  ;;  %16942 = vst [vmem:[#allocation28_spill] sm:$0xff] %v14146_v16 }
 0x3ce   : > { %v4618_v25 = vshll.u32 %v4614_v35, 16  ;;  %vm4893_vm7 = vcmp.ne.s32.totalorder %v4603_v40, 0  ;;  %vm4929_vm8 = vcmp.lt.s32.totalorder %v4603_v40, 0  ;;  %v5001_v54 = vadd.s32 18, %v4603_v40 }
 0x3cf   : > { %v6268_v33 = vsel %vm1006_vm2, %v14008_v53, %v14136_v11  ;;  %v5252_v39 = vsel %vm14128_vm4, %v3775_v10, 0.0  ;;  %vm4965_vm12 = vmand %vm4929_vm8, %vm4893_vm7  ;;  %vm4620_vm11 = vc.u32 %v4612_v14, %v4616_v43  ;;  %v4622_v63 = vadd.s32 %v4616_v43, %v4612_v14  ;;  %v14152_v53 = vpop.f32.mrf.mxu3 }
 0x3d0   : > { %6690 = vmatmul.bf16.gmra.mxu1 %v6268_v33  ;;  %v14149_v32 = vadd.s32 224, %v12534_v17  ;;  %v5037_v15 = vsel %vm4965_vm12, %v5001_v54, %v4603_v40  ;;  %v4617_v56 = vshrl.u32 %v4613_v12, 16  ;;  %v4621_v61 = vsel %vm4620_vm11, 1, %v16828_v9  ;;  %v14165_v33 = vpop.f32.mrf.mxu1 }
 0x3d1   : > { %v3630_v55 = vadd.f32 %v3582_v3, %v3319_v22  ;;  %vm5073_vm6 = vcmp.ge.s32.totalorder %v5037_v15, 1  ;;  %vm5109_vm9 = vcmp.le.s32.totalorder %v5037_v15, 16  ;;  %v4623_v1 = vadd.s32 %v4621_v61, %v4615_v20 }
 0x3d2   : > { %vm4624_vm15 = vc.u32 %v4622_v63, %v4618_v25  ;;  %vm5145_vm0 = vmand %vm5073_vm6, %vm5109_vm9  ;;  %v4619_v38 = vshrl.u32 %v4614_v35, 16  ;;  %v4638_v10 = vand.u32 65535, %v14149_v32  ;;  %v16672_v12 = vrot.slane %v14156_v59, 5 }
 0x3d3   : > { %v4625_v14 = vsel %vm4624_vm15, 1, %v16828_v9  ;;  %v5253_v40 = vsel %vm5145_vm0, %v3776_v24, 0.0  ;;  %v4639_v22 = vshrl.u32 %v14149_v32, 16  ;;  %v5848_v3 = vshrl.u32 %v11194_v51, 16 }
 0x3d4   : > { %v4627_v43 = vadd.s32 %v4625_v14, %v4623_v1  ;;  %v14160_v54 = vpack.c.bf16 %v5253_v40, %v5252_v39  ;;  %v14163_v20 = vadd.f32 %v13868_v48, %v3630_v55  ;;  %v4641_v25 = vmul.u32 14564, %v4638_v10  ;;  %v6745_v2 = vpop.f32.mrf.mxu2 }
 0x3d5   : > { %v4642_v35 = vmul.u32 58254, %v4638_v10  ;;  %v4643_v15 = vmul.u32 14564, %v4639_v22  ;;  %v4644_v61 = vmul.u32 58254, %v4639_v22  ;;  %v7036_v16 = vrot.slane %v16943_v57, 2 }
 0x3d6   : > { %v4628_v63 = vadd.s32 %v4627_v43, %v4617_v56  ;;  %11043 = vst [vmem:[#allocation2 + $0x78] sm:$0xff] %v14160_v54   ;;  %v5850_v1 = vrot.slane %v5848_v3, 4  ;;  %v5851_v14 = vshll.u32 %v11194_v51, 16  ;;  %v16944_v39 = vrot.slane %v14046_v62, 5 }
 0x3d7   : > { %v4645_v24 = vshll.u32 %v4642_v35, 16  ;;  %v4646_v10 = vshrl.u32 %v4642_v35, 16  ;;  %v4647_v30 = vshll.u32 %v4643_v15, 16  ;;  %vm3705_vm14 = vcmp.gt.f32.partialorder %v14139_v21, 0.0 }
 0x3d8   : > { %v5928_v55 = vsel %vm5913_vm10, %v16944_v39, %v16672_v12  ;;  %v4629_v40 = vadd.s32 %v4628_v63, %v4619_v38  ;;  %v5853_v43 = vrot.slane %v5851_v14, 5  ;;  %v7037_v29 = vrot.slane %v16945_v42, 3  ;;  %v14179_v63 = vpop.f32.mrf.mxu3 }
 0x3d9   : > { %v6169_v0 = vshrl.u32 %v5928_v55, 16  ;;  %vm4649_vm4 = vc.u32 %v4641_v25, %v4645_v24  ;;  %v4651_v56 = vadd.s32 %v4645_v24, %v4641_v25  ;;  %v6172_v22 = vshll.u32 %v5928_v55, 16 }
 0x3da   : > { %v4630_v57 = vshrl.u32 %v4629_v40, 4  ;;  %v4650_v3 = vsel %vm4649_vm4, 1, %v16828_v9  ;;  %v14177_v39 = vor.u32 %v5853_v43, %v5850_v1  ;;  %v4648_v12 = vshrl.u32 %v4643_v15, 16 }
 0x3db   : > { %v6171_v51 = vrot.slane %v6169_v0, 3  ;;  %v4652_v62 = vadd.s32 %v4650_v3, %v4644_v61  ;;  %vm4653_vm7 = vc.u32 %v4651_v56, %v4647_v30  ;;  %v6174_v38 = vrot.slane %v6172_v22, 4 }
 0x3dc   : > { %v4631_v35 = vmul.u32 18, %v4630_v57  ;;  %v4654_v25 = vsel %vm4653_vm7, 1, %v16828_v9  ;;  %v14182_v24 = vor.u32 %v7037_v29, %v7036_v16  ;;  %v5855_v0 = vsel %vm5748_vm13, %v14063_v50, %v14177_v39  ;;  %v3584_v29 = vpop.f32.mrf.mxu0 }
 0x3dd   : > { %v4656_v14 = vadd.s32 %v4654_v25, %v4652_v62  ;;  %v14187_v55 = vor.u32 %v6174_v38, %v6171_v51  ;;  %v14190_v30 = vadd.f32 %v6745_v2, %v14070_v8  ;;  %v6248_v57 = vshrl.u32 %v5855_v0, 16 }
 0x3de   : > { %v4632_v61 = vsub.s32 %v14092_v58, %v4631_v35  ;;  %v6251_v1 = vshll.u32 %v5855_v0, 16  ;;  %v7039_v15 = vsel %vm646_vm3, %v14075_v46, %v14182_v24  ;;  %v3741_v16 = vmul.f32 0.1, %v14139_v21  ;;  %v14203_v58 = vpop.f32.mrf.mxu1 }
 0x3df   : > { %v4657_v40 = vadd.s32 %v4656_v14, %v4646_v10  ;;  %v6176_v50 = vsel %vm1006_vm2, %v14073_v18, %v14187_v55  ;;  %7570 = vmatmul.bf16.gmra.mxu0 %v7039_v15  ;;  %v14201_v2 = vadd.s32 232, %v12534_v17  ;;  %16946 = vst [vmem:[#allocation26_spill] sm:$0xff] %v14203_v58  ;;  %v6250_v56 = vrot.slane %v6248_v57, 3 }
 0x3e0   : > { %vm4894_vm8 = vcmp.ne.s32.totalorder %v4632_v61, 0  ;;  %vm4930_vm12 = vcmp.lt.s32.totalorder %v4632_v61, 0  ;;  %v5002_v8 = vadd.s32 18, %v4632_v61  ;;  %6863 = vmatmul.bf16.gmra.mxu3 %v6176_v50  ;;  %v3742_v46 = vmul.f32 0.1, %v14163_v20  ;;  %v14228_v57 = vpop.f32.mrf.mxu3 }
 0x3e1   : > { %vm4966_vm11 = vmand %vm4930_vm12, %vm4894_vm8  ;;  %v4658_v43 = vadd.s32 %v4657_v40, %v4648_v12  ;;  %v6253_v10 = vrot.slane %v6251_v1, 4  ;;  %v4667_v22 = vand.u32 65535, %v14201_v2  ;;  %v3320_v18 = vadd.f32 %v14097_v4, %v13637_v19 }
 0x3e2   : > { %v3321_v3 = vadd.f32 %v14152_v53, %v13696_v23  ;;  %vm3706_vm6 = vcmp.gt.f32.partialorder %v14163_v20, 0.0  ;;  %v4668_v51 = vshrl.u32 %v14201_v2, 16  ;;  %v5038_v62 = vsel %vm4966_vm11, %v5002_v8, %v4632_v61 }
 0x3e3   : > { %v4659_v38 = vshrl.u32 %v4658_v43, 4  ;;  %v14213_v35 = vor.u32 %v6253_v10, %v6250_v56  ;;  %v14216_v25 = vshrl.u32 %v14160_v54, 16  ;;  %v3777_v12 = vsel %vm3705_vm14, %v14139_v21, %v3741_v16 }
 0x3e4   : > { %v4670_v14 = vmul.u32 14564, %v4667_v22  ;;  %v4671_v19 = vmul.u32 58254, %v4667_v22  ;;  %v14222_v4 = vshll.u32 %v14160_v54, 16  ;;  %v3778_v23 = vsel %vm3706_vm6, %v14163_v20, %v3742_v46 }
 0x3e5   : > { %16947 = vst [vmem:[#allocation27_spill] sm:$0xff] %v14216_v25  ;;  %v4660_v53 = vmul.u32 18, %v4659_v38  ;;  %v6255_v0 = vsel %vm1006_vm2, %v14088_v34, %v14213_v35  ;;  %v4672_v61 = vmul.u32 14564, %v4668_v51  ;;  %vm5074_vm9 = vcmp.ge.s32.totalorder %v5038_v62, 1  ;;  %v3587_v34 = vpop.f32.mrf.mxu0 }
 0x3e6   : > { %16948 = vst [vmem:[#allocation4_spill] sm:$0xff] %v14222_v4  ;;  %vm5110_vm15 = vcmp.le.s32.totalorder %v5038_v62, 16  ;;  %6784 = vmatmul.bf16.gmra.mxu2 %v6255_v0  ;;  %v4673_v1 = vmul.u32 58254, %v4668_v51  ;;  %v4674_v21 = vshll.u32 %v4671_v19, 16  ;;  %v3631_v16 = vadd.f32 %v3584_v29, %v3320_v18  ;;  %v14239_v29 = vpop.f32.mrf.mxu1 }
 0x3e7   : > { %v4661_v15 = vsub.s32 %v14149_v32, %v4660_v53  ;;  %v4676_v54 = vshll.u32 %v4672_v61, 16  ;;  %v6287_v40 = vrot.slane %v14216_v25, 3  ;;  %v4675_v20 = vshrl.u32 %v4671_v19, 16  ;;  %vm14234_vm14 = vmand %vm5074_vm9, %vm5110_vm15  ;;  %v14250_v53 = vld [vmem:[#allocation2 + $0x74] sm:$0xff]  }
 0x3e8   : > { %vm4678_vm0 = vc.u32 %v4670_v14, %v4674_v21  ;;  %v4680_v50 = vadd.s32 %v4674_v21, %v4670_v14  ;;  %v6288_v8 = vrot.slane %v14222_v4, 4  ;;  %v4677_v43 = vshrl.u32 %v4672_v61, 16  ;;  %v14254_v61 = vpop.f32.mrf.mxu2 }
 0x3e9   : > { %vm4895_vm4 = vcmp.ne.s32.totalorder %v4661_v15, 0  ;;  %vm4931_vm7 = vcmp.lt.s32.totalorder %v4661_v15, 0  ;;  %v5003_v46 = vadd.s32 18, %v4661_v15  ;;  %v4679_v32 = vsel %vm4678_vm0, 1, %v16828_v9  ;;  %16951 = vst [vmem:[#allocation38_spill] sm:$0xff] %v14254_v61 }
 0x3ea   : > { %vm4967_vm8 = vmand %vm4931_vm7, %vm4895_vm4  ;;  %v4681_v10 = vadd.s32 %v4679_v32, %v4673_v1  ;;  %vm4682_vm12 = vc.u32 %v4680_v50, %v4676_v54  ;;  %v14241_v22 = vor.u32 %v6288_v8, %v6287_v40  ;;  %v3632_v62 = vadd.f32 %v3587_v34, %v3321_v3  ;;  %v16952_v50 = vld [vmem:[#allocation9_spill] sm:$0xff]  ;;  %v14273_v32 = vpop.f32.mrf.mxu3 }
 0x3eb   : > { %v5039_v18 = vsel %vm4967_vm8, %v5003_v46, %v4661_v15  ;;  %v4683_v51 = vsel %vm4682_vm12, 1, %v16828_v9  ;;  %v14245_v38 = vadd.s32 240, %v12534_v17  ;;  %v5254_v0 = vsel %vm14234_vm14, %v3777_v12, 0.0 }
 0x3ec   : > { %vm5075_vm11 = vcmp.ge.s32.totalorder %v5039_v18, 1  ;;  %vm5111_vm6 = vcmp.le.s32.totalorder %v5039_v18, 16  ;;  %v4685_v14 = vadd.s32 %v4683_v51, %v4681_v10  ;;  %v6290_v19 = vsel %vm1006_vm2, %v14136_v11, %v14241_v22 }
 0x3ed   : > { %vm5147_vm9 = vmand %vm5075_vm11, %vm5111_vm6  ;;  %6695 = vmatmul.bf16.gmra.mxu1 %v6290_v19  ;;  %v4696_v3 = vand.u32 65535, %v14245_v38  ;;  %v4697_v1 = vshrl.u32 %v14245_v38, 16  ;;  %v16673_v21 = vrot.slane %v13830_v28, 5  ;;  %v5857_v40 = vshrl.u32 %v14250_v53, 16 }
 0x3ee   : > { %v5255_v15 = vsel %vm5147_vm9, %v3778_v23, 0.0  ;;  %v4686_v54 = vadd.s32 %v4685_v14, %v4675_v20  ;;  %v5860_v11 = vshll.u32 %v14250_v53, 16  ;;  %v14263_v8 = vadd.f32 %v13883_v13, %v16952_v50 }
 0x3ef   : > { %v14265_v12 = vpack.c.bf16 %v5255_v15, %v5254_v0  ;;  %v14268_v34 = vadd.f32 %v13868_v48, %v3631_v16  ;;  %v14271_v56 = vadd.f32 %v13868_v48, %v3632_v62  ;;  %v4699_v23 = vmul.u32 14564, %v4696_v3 }
 0x3f0   : > { %v4687_v46 = vadd.s32 %v4686_v54, %v4677_v43  ;;  %v4700_v20 = vmul.u32 58254, %v4696_v3  ;;  %v4701_v10 = vmul.u32 14564, %v4697_v1  ;;  %v4702_v18 = vmul.u32 58254, %v4697_v1 }
 0x3f1   : > { %11044 = vst [vmem:[#allocation2 + $0x80] sm:$0xff] %v14265_v12   ;;  %v5859_v51 = vrot.slane %v5857_v40, 4  ;;  %v5862_v13 = vrot.slane %v5860_v11, 5  ;;  %v16953_v14 = vrot.slane %v14156_v59, 5  ;;  %vm3707_vm15 = vcmp.gt.f32.partialorder %v14268_v34, 0.0  ;;  %v14284_v40 = vpop.f32.mrf.mxu1 }
 0x3f2   : > { %v4688_v19 = vshrl.u32 %v4687_v46, 4  ;;  %v4703_v48 = vshll.u32 %v4700_v20, 16  ;;  %v4704_v62 = vshrl.u32 %v4700_v20, 16  ;;  %v4705_v43 = vshll.u32 %v4701_v10, 16  ;;  %16954 = vst [vmem:[#allocation5_spill] sm:$0xff] %v14284_v40  ;;  %v6750_v40 = vpop.f32.mrf.mxu2 }
 0x3f3   : > { %v5930_v16 = vsel %vm5913_vm10, %v16953_v14, %v16673_v21  ;;  %v4706_v0 = vshrl.u32 %v4701_v10, 16  ;;  %v14281_v15 = vor.u32 %v5862_v13, %v5859_v51  ;;  %v7058_v59 = vrot.slane %v13390_v45, 2 }
 0x3f4   : > { %v6191_v3 = vshrl.u32 %v5930_v16, 16  ;;  %v6194_v54 = vshll.u32 %v5930_v16, 16  ;;  %v4689_v1 = vmul.u32 18, %v4688_v19  ;;  %vm4707_vm0 = vc.u32 %v4699_v23, %v4703_v48 }
 0x3f5   : > { %v4709_v11 = vadd.s32 %v4703_v48, %v4699_v23  ;;  %v4708_v50 = vsel %vm4707_vm0, 1, %v16828_v9  ;;  %v5864_v46 = vsel %vm5748_vm13, %v14177_v39, %v14281_v15  ;;  %v16955_v23 = vld [vmem:[#allocation19_spill] sm:$0xff]  ;;  %v3589_v39 = vpop.f32.mrf.mxu0  ;;  %vm3708_vm6 = vcmp.gt.f32.partialorder %v14271_v56, 0.0 }
 0x3f6   : > { %v6193_v20 = vrot.slane %v6191_v3, 3  ;;  %v6196_v10 = vrot.slane %v6194_v54, 4  ;;  %v4690_v51 = vsub.s32 %v14201_v2, %v4689_v1  ;;  %v4710_v13 = vadd.s32 %v4708_v50, %v4702_v18  ;;  %v3286_v50 = vpop.f32.mrf.mxu3 }
 0x3f7   : > { %vm4711_vm14 = vc.u32 %v4709_v11, %v4705_v43  ;;  %v6270_v14 = vshrl.u32 %v5864_v46, 16  ;;  %v6273_v19 = vshll.u32 %v5864_v46, 16  ;;  %v7059_v48 = vrot.slane %v16955_v23, 3 }
 0x3f8   : > { %v4712_v16 = vsel %vm4711_vm14, 1, %v16828_v9  ;;  %v14293_v21 = vor.u32 %v6196_v10, %v6193_v20  ;;  %vm4896_vm4 = vcmp.ne.s32.totalorder %v4690_v51, 0  ;;  %vm4932_vm7 = vcmp.lt.s32.totalorder %v4690_v51, 0  ;;  %v10620_v20 = vld [vmem:[%s16572_s3 + $0x90] sm:$0xff] }
 0x3f9   : > { %v5004_v58 = vadd.s32 18, %v4690_v51  ;;  %v4714_v61 = vadd.s32 %v4712_v16, %v4710_v13  ;;  %vm4968_vm8 = vmand %vm4932_vm7, %vm4896_vm4  ;;  %v6272_v3 = vrot.slane %v6270_v14, 3  ;;  %v6275_v54 = vrot.slane %v6273_v19, 4  ;;  %v10612_v10 = vld [vmem:[%s16572_s3 + $0x50] sm:$0xff]  ;;  %7745 = vmatpush.bf16.msrb.mxu2 %v10620_v20  ;;  %v14336_v14 = vpop.f32.mrf.mxu1 }
 0x3fa   : > { %v6198_v2 = vsel %vm1006_vm2, %v14187_v55, %v14293_v21  ;;  %v14299_v18 = vor.u32 %v7059_v48, %v7058_v59  ;;  %v3743_v43 = vmul.f32 0.1, %v14268_v34  ;;  %v14303_v46 = vadd.f32 %v6750_v40, %v14165_v33  ;;  %7646 = vmatpush.bf16.msrb.mxu1 %v10612_v10  ;;  %v16960_v19 = vld [vmem:[#allocation7_spill] sm:$0xff] }
 0x3fb   : > { %v5040_v1 = vsel %vm4968_vm8, %v5004_v58, %v4690_v51  ;;  %v4715_v11 = vadd.s32 %v4714_v61, %v4704_v62  ;;  %6868 = vmatmul.bf16.gmra.mxu3 %v6198_v2  ;;  %v3744_v55 = vmul.f32 0.1, %v14271_v56  ;;  %v14312_v59 = vor.u32 %v6275_v54, %v6272_v3 }
 0x3fc   : > { %vm5076_vm12 = vcmp.ge.s32.totalorder %v5040_v1, 1  ;;  %v7061_v58 = vsel %vm646_vm3, %v14182_v24, %v14299_v18  ;;  %vm5112_vm11 = vcmp.le.s32.totalorder %v5040_v1, 16  ;;  %v14318_v61 = vadd.s32 248, %v12534_v17 }
 0x3fd   : > { %v4716_v33 = vadd.s32 %v4715_v11, %v4706_v0  ;;  %7575 = vmatmul.bf16.gmra.mxu0 %v7061_v58  ;;  %v14321_v62 = vshll.u32 %v14265_v12, 16  ;;  %v3322_v40 = vadd.f32 %v14179_v63, %v14113_v26  ;;  %v6277_v51 = vsel %vm1006_vm2, %v14213_v35, %v14312_v59  ;;  %vm14345_vm9 = vmand %vm5076_vm12, %vm5112_vm11 }
 0x3fe   : > { %v14330_v24 = vshrl.u32 %v14265_v12, 16  ;;  %v14334_v0 = vadd.f32 %v13932_v44, %v14263_v8  ;;  %6789 = vmatmul.bf16.gmra.mxu2 %v6277_v51  ;;  %v4725_v26 = vand.u32 65535, %v14318_v61  ;;  %v4726_v63 = vshrl.u32 %v14318_v61, 16  ;;  %v14379_v51 = vpop.f32.mrf.mxu2 }
 0x3ff   : > { %16956 = vst [vmem:[#allocation39_spill] sm:$0xff] %v14321_v62  ;;  %v4717_v13 = vshrl.u32 %v4716_v33, 4  ;;  %v3779_v35 = vsel %vm3707_vm15, %v14268_v34, %v3743_v43  ;;  %v3633_v44 = vadd.f32 %v3589_v39, %v3322_v40  ;;  %v6310_v16 = vrot.slane %v14321_v62, 4 }
 0x400   : > { %16957 = vst [vmem:[#allocation40_spill] sm:$0xff] %v14330_v24  ;;  %v6309_v8 = vrot.slane %v14330_v24, 3  ;;  %v3323_v48 = vadd.f32 %v14228_v57, %v16960_v19  ;;  %v14355_v3 = vadd.f32 %v14273_v32, %v14117_v52  ;;  %v3780_v34 = vsel %vm3708_vm6, %v14271_v56, %v3744_v55  ;;  %v16961_v57 = vld [vmem:[#allocation29_spill] sm:$0xff]  ;;  %v3592_v52 = vpop.f32.mrf.mxu0 }
 0x401   : > { %v4718_v54 = vmul.u32 18, %v4717_v13  ;;  %v4728_v2 = vmul.u32 14564, %v4725_v26  ;;  %v4729_v43 = vmul.u32 58254, %v4725_v26  ;;  %v4730_v1 = vmul.u32 14564, %v4726_v63  ;;  %v14374_v56 = vld [vmem:[%s16571_s2] ss:$0 sm:$0xff]  ;;  %v14384_v13 = vpop.f32.mrf.mxu3 }
 0x402   : > { %v14360_v39 = vor.u32 %v6310_v16, %v6309_v8  ;;  %v5256_v11 = vsel %vm14345_vm9, %v3779_v35, 0.0  ;;  %v14366_v10 = vadd.f32 %v3286_v50, %v16961_v57  ;;  %v14369_v32 = vadd.s32 256, %v12534_v17  ;;  %16962 = vst [vmem:[#allocation6_spill] sm:$0xff] %v14379_v51  ;;  %v14391_v19 = vld [vmem:[#allocation2 + $0x7c] sm:$0xff]  }
 0x403   : > { %v4719_v20 = vsub.s32 %v14245_v38, %v4718_v54  ;;  %v14377_v55 = vadd.f32 %v14374_v56, %v3633_v44  ;;  %v4731_v58 = vmul.u32 58254, %v4726_v63  ;;  %v4732_v33 = vshll.u32 %v4729_v43, 16 }
 0x404   : > { %v4734_v40 = vshll.u32 %v4730_v1, 16  ;;  %v6312_v50 = vsel %vm1006_vm2, %v14241_v22, %v14360_v39  ;;  %v4733_v26 = vshrl.u32 %v4729_v43, 16  ;;  %v14386_v12 = vadd.f32 %v3592_v52, %v3323_v48  ;;  %v14394_v43 = vpop.f32.mrf.mxu1 }
 0x405   : > { %vm4897_vm15 = vcmp.ne.s32.totalorder %v4719_v20, 0  ;;  %vm4933_vm0 = vcmp.lt.s32.totalorder %v4719_v20, 0  ;;  %v5005_v38 = vadd.s32 18, %v4719_v20  ;;  %vm4736_vm4 = vc.u32 %v4728_v2, %v4732_v33  ;;  %6700 = vmatmul.bf16.gmra.mxu1 %v6312_v50  ;;  %16963 = vst [vmem:[#allocation41_spill] sm:$0xff] %v14394_v43 }
 0x406   : > { %vm4969_vm14 = vmand %vm4933_vm0, %vm4897_vm15  ;;  %v4738_v35 = vadd.s32 %v4732_v33, %v4728_v2  ;;  %v4737_v44 = vsel %vm4736_vm4, 1, %v16828_v9  ;;  %v4754_v8 = vand.u32 65535, %v14369_v32  ;;  %v4755_v16 = vshrl.u32 %v14369_v32, 16 }
 0x407   : > { %v5041_v63 = vsel %vm4969_vm14, %v5005_v38, %v4719_v20  ;;  %v4739_v22 = vadd.s32 %v4737_v44, %v4731_v58  ;;  %v4735_v54 = vshrl.u32 %v4730_v1, 16  ;;  %v5869_v1 = vshll.u32 %v14391_v19, 16 }
 0x408   : > { %vm5077_vm7 = vcmp.ge.s32.totalorder %v5041_v63, 1  ;;  %vm5113_vm8 = vcmp.le.s32.totalorder %v5041_v63, 16  ;;  %vm4740_vm12 = vc.u32 %v4738_v35, %v4734_v40  ;;  %v4757_v48 = vmul.u32 14564, %v4754_v8 }
 0x409   : > { %vm5149_vm11 = vmand %vm5077_vm7, %vm5113_vm8  ;;  %v4741_v2 = vsel %vm4740_vm12, 1, %v16828_v9  ;;  %v4758_v20 = vmul.u32 58254, %v4754_v8  ;;  %v4759_v33 = vmul.u32 14564, %v4755_v16  ;;  %v4760_v38 = vmul.u32 58254, %v4755_v16 }
 0x40a   : > { %v5257_v57 = vsel %vm5149_vm11, %v3780_v34, 0.0  ;;  %v4743_v52 = vadd.s32 %v4741_v2, %v4739_v22  ;;  %v5866_v63 = vshrl.u32 %v14391_v19, 16  ;;  %v14401_v34 = vld [vmem:[#allocation2 + $0x5c] sm:$0xff]   ;;  %v5871_v2 = vrot.slane %v5869_v1, 5 }
 0x40b   : > { %v14396_v50 = vpack.c.bf16 %v5257_v57, %v5256_v11  ;;  %v4761_v51 = vshll.u32 %v4758_v20, 16  ;;  %v4762_v45 = vshrl.u32 %v4758_v20, 16  ;;  %v4763_v40 = vshll.u32 %v4759_v33, 16 }
 0x40c   : > { %v4744_v58 = vadd.s32 %v4743_v52, %v4733_v26  ;;  %v4764_v35 = vshrl.u32 %v4759_v33, 16  ;;  %v5868_v8 = vrot.slane %v5866_v63, 4  ;;  %v16675_v16 = vrot.slane %v14401_v34, 5  ;;  %v6755_v26 = vpop.f32.mrf.mxu2  ;;  %v6834_v33 = vpop.f32.mrf.mxu3 }
 0x40d   : > { %11045 = vst [vmem:[#allocation2 + $0x88] sm:$0xff] %v14396_v50   ;;  %vm4765_vm6 = vc.u32 %v4757_v48, %v4761_v51  ;;  %v4767_v44 = vadd.s32 %v4761_v51, %v4757_v48  ;;  %v7080_v20 = vrot.slane %v13502_v31, 2  ;;  %v16964_v52 = vrot.slane %v13830_v28, 5 }
 0x40e   : > { %v4745_v11 = vadd.s32 %v4744_v58, %v4735_v54  ;;  %v4766_v22 = vsel %vm4765_vm6, 1, %v16828_v9  ;;  %v7081_v48 = vrot.slane %v13497_v7, 3  ;;  %vm3709_vm15 = vcmp.gt.f32.partialorder %v14377_v55, 0.0 }
 0x40f   : > { %v4768_v57 = vadd.s32 %v4766_v22, %v4760_v38  ;;  %vm4769_vm9 = vc.u32 %v4767_v44, %v4763_v40  ;;  %v5932_v51 = vsel %vm5913_vm10, %v16964_v52, %v16675_v16  ;;  %v14414_v58 = vor.u32 %v5871_v2, %v5868_v8 }
 0x410   : > { %v4746_v54 = vshrl.u32 %v4745_v11, 4  ;;  %v4770_v63 = vsel %vm4769_vm9, 1, %v16828_v9  ;;  %v6213_v1 = vshrl.u32 %v5932_v51, 16  ;;  %v6216_v38 = vshll.u32 %v5932_v51, 16 }
 0x411   : > { %v4772_v43 = vadd.s32 %v4770_v63, %v4768_v57  ;;  %v14416_v40 = vor.u32 %v7081_v48, %v7080_v20  ;;  %v14419_v44 = vadd.f32 %v6755_v26, %v14239_v29  ;;  %v5873_v22 = vsel %vm5748_vm13, %v14281_v15, %v14414_v58  ;;  %v14427_v57 = vpop.f32.mrf.mxu1  ;;  %v3594_v20 = vpop.f32.mrf.mxu0 }
 0x412   : > { %v4747_v28 = vmul.u32 18, %v4746_v54  ;;  %v6215_v52 = vrot.slane %v6213_v1, 3  ;;  %v14425_v11 = vadd.f32 %v6834_v33, %v13970_v6  ;;  %v6292_v8 = vshrl.u32 %v5873_v22, 16 }
 0x413   : > { %v4773_v16 = vadd.s32 %v4772_v43, %v4762_v45  ;;  %v6295_v2 = vshll.u32 %v5873_v22, 16  ;;  %v6218_v31 = vrot.slane %v6216_v38, 4  ;;  %v3674_v29 = vadd.f32 %v14374_v56, %v14386_v12 }
 0x414   : > { %v4748_v51 = vsub.s32 %v14318_v61, %v4747_v28  ;;  %v7083_v15 = vsel %vm646_vm3, %v14299_v18, %v14416_v40  ;;  %v14436_v26 = vadd.s32 264, %v12534_v17  ;;  %v6294_v45 = vrot.slane %v6292_v8, 3 }
 0x415   : > { %v4774_v6 = vadd.s32 %v4773_v16, %v4764_v35  ;;  %v6297_v43 = vrot.slane %v6295_v2, 4  ;;  %v14438_v48 = vor.u32 %v6218_v31, %v6215_v52  ;;  %7580 = vmatmul.bf16.gmra.mxu0 %v7083_v15  ;;  %v3745_v33 = vmul.f32 0.1, %v14377_v55 }
 0x416   : > { %vm4898_vm0 = vcmp.ne.s32.totalorder %v4748_v51, 0  ;;  %vm4934_vm14 = vcmp.lt.s32.totalorder %v4748_v51, 0  ;;  %v5006_v61 = vadd.s32 18, %v4748_v51  ;;  %v4783_v35 = vand.u32 65535, %v14436_v26 }
 0x417   : > { %vm4970_vm4 = vmand %vm4934_vm14, %vm4898_vm0  ;;  %v4775_v12 = vshrl.u32 %v4774_v6, 4  ;;  %v14441_v54 = vor.u32 %v6297_v43, %v6294_v45  ;;  %v6220_v18 = vsel %vm1006_vm2, %v14293_v21, %v14438_v48  ;;  %vm3710_vm7 = vcmp.gt.f32.partialorder %v3674_v29, 0.0  ;;  %v14464_v45 = vpop.f32.mrf.mxu2  ;;  %v14466_v43 = vpop.f32.mrf.mxu3 }
 0x418   : > { %v5042_v16 = vsel %vm4970_vm4, %v5006_v61, %v4748_v51  ;;  %v3746_v31 = vmul.f32 0.1, %v3674_v29  ;;  %6873 = vmatmul.bf16.gmra.mxu3 %v6220_v18  ;;  %v4784_v63 = vshrl.u32 %v14436_v26, 16  ;;  %v3635_v28 = vadd.f32 %v3594_v20, %v14355_v3  ;;  %16966 = vst [vmem:[#allocation9_spill] sm:$0xff] %v14464_v45 }
 0x419   : > { %vm5078_vm8 = vcmp.ge.s32.totalorder %v5042_v16, 1  ;;  %v4776_v1 = vmul.u32 18, %v4775_v12  ;;  %v6299_v38 = vsel %vm1006_vm2, %v14312_v59, %v14441_v54  ;;  %vm5114_vm12 = vcmp.le.s32.totalorder %v5042_v16, 16  ;;  %16967 = vst [vmem:[#allocation7_spill] sm:$0xff] %v14466_v43 }
 0x41a   : > { %6794 = vmatmul.bf16.gmra.mxu2 %v6299_v38  ;;  %v4786_v22 = vmul.u32 14564, %v4783_v35  ;;  %v4787_v21 = vmul.u32 58254, %v4783_v35  ;;  %v4788_v52 = vmul.u32 14564, %v4784_v63  ;;  %v3781_v8 = vsel %vm3709_vm15, %v14377_v55, %v3745_v33  ;;  %vm14470_vm11 = vmand %vm5078_vm8, %vm5114_vm12  ;;  %v14502_v55 = vld [vmem:[#allocation2 + $0x64] sm:$0xff]  }
 0x41b   : > { %v14457_v2 = vadd.f32 %v14384_v13, %v14334_v0  ;;  %v4777_v51 = vsub.s32 %v14369_v32, %v4776_v1  ;;  %v14461_v15 = vshll.u32 %v14396_v50, 16  ;;  %v3782_v59 = vsel %vm3710_vm7, %v3674_v29, %v3746_v31  ;;  %v14477_v13 = vpop.f32.mrf.mxu1  ;;  %v3597_v29 = vpop.f32.mrf.mxu0 }
 0x41c   : > { %v4789_v3 = vmul.u32 58254, %v4784_v63  ;;  %v4790_v20 = vshll.u32 %v4787_v21, 16  ;;  %v4792_v6 = vshll.u32 %v4788_v52, 16  ;;  %v14475_v32 = vshrl.u32 %v14396_v50, 16  ;;  %16971 = vst [vmem:[#allocation42_spill] sm:$0xff] %v14477_v13 }
 0x41d   : > { %16965 = vst [vmem:[#allocation16_spill] sm:$0xff] %v14461_v15  ;;  %vm4899_vm6 = vcmp.ne.s32.totalorder %v4777_v51, 0  ;;  %vm4935_vm9 = vcmp.lt.s32.totalorder %v4777_v51, 0  ;;  %v5007_v0 = vadd.s32 18, %v4777_v51  ;;  %v14480_v33 = vadd.f32 %v14374_v56, %v3635_v28 }
 0x41e   : > { %16970 = vst [vmem:[#allocation29_spill] sm:$0xff] %v14475_v32  ;;  %vm4971_vm15 = vmand %vm4935_vm9, %vm4899_vm6  ;;  %vm4794_vm0 = vc.u32 %v4786_v22, %v4790_v20  ;;  %v4796_v61 = vadd.s32 %v4790_v20, %v4786_v22  ;;  %v6332_v12 = vrot.slane %v14461_v15, 4  ;;  %v4791_v35 = vshrl.u32 %v4787_v21, 16  ;;  %v14493_v22 = vld [vmem:[#allocation2 + $0x84] sm:$0xff]  }
 0x41f   : > { %v5043_v18 = vsel %vm4971_vm15, %v5007_v0, %v4777_v51  ;;  %v4795_v16 = vsel %vm4794_vm0, 1, %v16828_v9  ;;  %v6331_v31 = vrot.slane %v14475_v32, 3  ;;  %v5258_v63 = vsel %vm14470_vm11, %v3781_v8, 0.0 }
 0x420   : > { %vm5079_vm14 = vcmp.ge.s32.totalorder %v5043_v18, 1  ;;  %vm5115_vm4 = vcmp.le.s32.totalorder %v5043_v18, 16  ;;  %v4797_v50 = vadd.s32 %v4795_v16, %v4789_v3  ;;  %vm4798_vm7 = vc.u32 %v4796_v61, %v4792_v6 }
 0x421   : > { %vm5151_vm8 = vmand %vm5079_vm14, %vm5115_vm4  ;;  %v4799_v1 = vsel %vm4798_vm7, 1, %v16828_v9  ;;  %v14488_v38 = vor.u32 %v6332_v12, %v6331_v31  ;;  %v14491_v28 = vadd.s32 272, %v12534_v17  ;;  %v4793_v51 = vshrl.u32 %v4788_v52, 16 }
 0x422   : > { %v5259_v21 = vsel %vm5151_vm8, %v3782_v59, 0.0  ;;  %v4801_v20 = vadd.s32 %v4799_v1, %v4797_v50  ;;  %v3636_v0 = vadd.f32 %v3597_v29, %v14366_v10  ;;  %v5875_v52 = vshrl.u32 %v14493_v22, 16  ;;  %v6760_v1 = vpop.f32.mrf.mxu2 }
 0x423   : > { %v14496_v3 = vpack.c.bf16 %v5259_v21, %v5258_v63  ;;  %v6334_v8 = vsel %vm1006_vm2, %v14360_v39, %v14488_v38  ;;  %v4812_v6 = vand.u32 65535, %v14491_v28  ;;  %v4813_v59 = vshrl.u32 %v14491_v28, 16  ;;  %v6839_v21 = vpop.f32.mrf.mxu3  ;;  %v14516_v45 = vpop.f32.mrf.mxu1 }
 0x424   : > { %v4802_v12 = vadd.s32 %v4801_v20, %v4791_v35  ;;  %6705 = vmatmul.bf16.gmra.mxu1 %v6334_v8  ;;  %v5878_v10 = vshll.u32 %v14493_v22, 16  ;;  %v14510_v29 = vmul.f32 0.1, %v14480_v33  ;;  %v7102_v16 = vrot.slane %v13597_v36, 2  ;;  %v3599_v43 = vpop.f32.mrf.mxu0 }
 0x425   : > { %11046 = vst [vmem:[#allocation2 + $0x90] sm:$0xff] %v14496_v3   ;;  %v4815_v39 = vmul.u32 14564, %v4812_v6  ;;  %v4816_v18 = vmul.u32 58254, %v4812_v6  ;;  %v14514_v50 = vadd.f32 %v14374_v56, %v3636_v0  ;;  %v4817_v35 = vmul.u32 14564, %v4813_v59 }
 0x426   : > { %v4803_v31 = vadd.s32 %v4802_v12, %v4793_v51  ;;  %v5877_v63 = vrot.slane %v5875_v52, 4  ;;  %v4818_v20 = vmul.u32 58254, %v4813_v59  ;;  %v5880_v13 = vrot.slane %v5878_v10, 5 }
 0x427   : > { %v4819_v8 = vshll.u32 %v4816_v18, 16  ;;  %v4820_v61 = vshrl.u32 %v4816_v18, 16  ;;  %v4821_v15 = vshll.u32 %v4817_v35, 16  ;;  %v4822_v6 = vshrl.u32 %v4817_v35, 16  ;;  %v16974_v35 = vld [vmem:[#allocation22_spill] sm:$0xff] }
 0x428   : > { %v4804_v7 = vshrl.u32 %v4803_v31, 4  ;;  %v16972_v36 = vrot.slane %v14502_v55, 5  ;;  %v16973_v51 = vrot.slane %v14401_v34, 5  ;;  %vm3711_vm12 = vcmp.gt.f32.partialorder %v14480_v33, 0.0 }
 0x429   : > { %vm4823_vm11 = vc.u32 %v4815_v39, %v4819_v8  ;;  %v4825_v12 = vadd.s32 %v4819_v8, %v4815_v39  ;;  %v14524_v59 = vor.u32 %v5880_v13, %v5877_v63  ;;  %vm3712_vm6 = vcmp.gt.f32.partialorder %v14514_v50, 0.0 }
 0x42a   : > { %v5934_v0 = vsel %vm5913_vm10, %v16973_v51, %v16972_v36  ;;  %v4805_v10 = vmul.u32 18, %v4804_v7  ;;  %v4824_v18 = vsel %vm4823_vm11, 1, %v16828_v9  ;;  %v7103_v32 = vrot.slane %v16974_v35, 3 }
 0x42b   : > { %v6235_v52 = vshrl.u32 %v5934_v0, 16  ;;  %v6238_v31 = vshll.u32 %v5934_v0, 16  ;;  %v4826_v23 = vadd.s32 %v4824_v18, %v4818_v20  ;;  %vm4827_vm9 = vc.u32 %v4825_v12, %v4821_v15 }
 0x42c   : > { %v5882_v36 = vsel %vm5748_vm13, %v14414_v58, %v14524_v59  ;;  %v4806_v39 = vsub.s32 %v14436_v26, %v4805_v10  ;;  %v4828_v13 = vsel %vm4827_vm9, 1, %v16828_v9  ;;  %v14534_v62 = vor.u32 %v7103_v32, %v7102_v16  ;;  %v14556_v10 = vpop.f32.mrf.mxu3 }
 0x42d   : > { %v6237_v34 = vrot.slane %v6235_v52, 3  ;;  %v6314_v63 = vshrl.u32 %v5882_v36, 16  ;;  %v6317_v7 = vshll.u32 %v5882_v36, 16  ;;  %v4830_v8 = vadd.s32 %v4828_v13, %v4826_v23  ;;  %16976 = vst [vmem:[#allocation43_spill] sm:$0xff] %v14556_v10  ;;  %v17039_v10 = vld [vmem:[#allocation19_spill] sm:$0xff] }
 0x42e   : > { %v6240_v51 = vrot.slane %v6238_v31, 4  ;;  %v14537_v0 = vadd.f32 %v6760_v1, %v14336_v14  ;;  %vm4900_vm15 = vcmp.ne.s32.totalorder %v4806_v39, 0  ;;  %vm4936_vm0 = vcmp.lt.s32.totalorder %v4806_v39, 0  ;;  %v14554_v1 = vpop.f32.mrf.mxu2 }
 0x42f   : > { %v5008_v15 = vadd.s32 18, %v4806_v39  ;;  %v6316_v20 = vrot.slane %v6314_v63, 3  ;;  %vm4972_vm14 = vmand %vm4936_vm0, %vm4900_vm15  ;;  %v4831_v58 = vadd.s32 %v4830_v8, %v4820_v61  ;;  %v6319_v12 = vrot.slane %v6317_v7, 4  ;;  %v10619_v61 = vld [vmem:[%s16572_s3 + $0x88] sm:$0xff]  ;;  %16975 = vst [vmem:[#allocation22_spill] sm:$0xff] %v14554_v1 }
 0x430   : > { %v14539_v52 = vor.u32 %v6240_v51, %v6237_v34  ;;  %v7105_v26 = vsel %vm646_vm3, %v14416_v40, %v14534_v62  ;;  %v3748_v32 = vmul.f32 0.1, %v14514_v50  ;;  %v14546_v14 = vadd.f32 %v6839_v21, %v14079_v27  ;;  %v10611_v40 = vld [vmem:[%s16572_s3 + $0x48] sm:$0xff]  ;;  %v14563_v21 = vpop.f32.mrf.mxu1  ;;  %7746 = vmatpush.bf16.msrb.mxu2 %v10619_v61 }
 0x431   : > { %v5044_v23 = vsel %vm4972_vm14, %v5008_v15, %v4806_v39  ;;  %7585 = vmatmul.bf16.gmra.mxu0 %v7105_v26  ;;  %v14549_v16 = vadd.s32 280, %v12534_v17  ;;  %v4832_v18 = vadd.s32 %v4831_v58, %v4822_v6  ;;  %v14561_v27 = vor.u32 %v6319_v12, %v6316_v20  ;;  %16977 = vst [vmem:[#allocation44_spill] sm:$0xff] %v14563_v21  ;;  %v7551_v17 = vpop.f32.mrf.mxu0 }
 0x432   : > { %vm5080_vm4 = vcmp.ge.s32.totalorder %v5044_v23, 1  ;;  %vm5116_vm7 = vcmp.le.s32.totalorder %v5044_v23, 16  ;;  %v6242_v31 = vsel %vm1006_vm2, %v14438_v48, %v14539_v52  ;;  %v3637_v36 = vadd.f32 %v3599_v43, %v14457_v2  ;;  %7647 = vmatpush.bf16.msrb.mxu1 %v10611_v40  ;;  %v14600_v23 = vld [vmem:[#allocation2 + $0x8c] sm:$0xff]  }
 0x433   : > { %v4841_v34 = vand.u32 65535, %v14549_v16  ;;  %v4842_v39 = vshrl.u32 %v14549_v16, 16  ;;  %v4833_v13 = vshrl.u32 %v4832_v18, 4  ;;  %v6321_v6 = vsel %vm1006_vm2, %v14441_v54, %v14561_v27  ;;  %6878 = vmatmul.bf16.gmra.mxu3 %v6242_v31  ;;  %vm14580_vm8 = vmand %vm5080_vm4, %vm5116_vm7 }
 0x434   : > { %v3783_v63 = vsel %vm3711_vm12, %v14480_v33, %v14510_v29  ;;  %6799 = vmatmul.bf16.gmra.mxu2 %v6321_v6  ;;  %v3784_v7 = vsel %vm3712_vm6, %v14514_v50, %v3748_v32  ;;  %v14588_v51 = vshll.u32 %v14496_v3, 16  ;;  %v14591_v33 = vadd.f32 %v14374_v56, %v3637_v36  ;;  %v6844_v18 = vpop.f32.mrf.mxu3 }
 0x435   : > { %v4844_v2 = vmul.u32 14564, %v4841_v34  ;;  %v4845_v43 = vmul.u32 58254, %v4841_v34  ;;  %v4834_v54 = vmul.u32 18, %v4833_v13  ;;  %v4846_v8 = vmul.u32 14564, %v4842_v39 }
 0x436   : > { %16980 = vst [vmem:[#allocation45_spill] sm:$0xff] %v14588_v51  ;;  %v4847_v29 = vmul.u32 58254, %v4842_v39  ;;  %v14594_v20 = vshrl.u32 %v14496_v3, 16  ;;  %v5260_v58 = vsel %vm14580_vm8, %v3783_v63, 0.0  ;;  %v6354_v50 = vrot.slane %v14588_v51, 4  ;;  %v6765_v40 = vpop.f32.mrf.mxu2 }
 0x437   : > { %v4848_v15 = vshll.u32 %v4845_v43, 16  ;;  %v4835_v12 = vsub.s32 %v14491_v28, %v4834_v54  ;;  %v4850_v26 = vshll.u32 %v4846_v8, 16  ;;  %v4849_v32 = vshrl.u32 %v4845_v43, 16 }
 0x438   : > { %16981 = vst [vmem:[#allocation46_spill] sm:$0xff] %v14594_v20  ;;  %v6353_v56 = vrot.slane %v14594_v20, 3  ;;  %v14604_v34 = vpop.f32.mrf.mxu1  ;;  %v4851_v39 = vshrl.u32 %v4846_v8, 16  ;;  %v5884_v43 = vshrl.u32 %v14600_v23, 16  ;;  %vm3713_vm7 = vcmp.gt.f32.partialorder %v14591_v33, 0.0 }
 0x439   : > { %vm4852_vm12 = vc.u32 %v4844_v2, %v4848_v15  ;;  %v4854_v61 = vadd.s32 %v4848_v15, %v4844_v2  ;;  %vm4901_vm11 = vcmp.ne.s32.totalorder %v4835_v12, 0  ;;  %vm4937_vm6 = vcmp.lt.s32.totalorder %v4835_v12, 0  ;;  %v14606_v28 = vpop.f32.mrf.mxu0 }
 0x43a   : > { %v5009_v31 = vadd.s32 18, %v4835_v12  ;;  %v4853_v36 = vsel %vm4852_vm12, 1, %v16828_v9  ;;  %16982 = vst [vmem:[#allocation47_spill] sm:$0xff] %v14606_v28  ;;  %vm4973_vm9 = vmand %vm4937_vm6, %vm4901_vm11  ;;  %v14608_v6 = vor.u32 %v6354_v50, %v6353_v56  ;;  %v14612_v2 = vadd.f32 %v7551_v17, %v14425_v11 }
 0x43b   : > { %v4855_v13 = vadd.s32 %v4853_v36, %v4847_v29  ;;  %vm4856_vm15 = vc.u32 %v4854_v61, %v4850_v26  ;;  %v5886_v8 = vrot.slane %v5884_v43, 4  ;;  %v5887_v29 = vshll.u32 %v14600_v23, 16 }
 0x43c   : > { %v5045_v63 = vsel %vm4973_vm9, %v5009_v31, %v4835_v12  ;;  %v4857_v48 = vsel %vm4856_vm15, 1, %v16828_v9  ;;  %v6356_v15 = vsel %vm1006_vm2, %v14488_v38, %v14608_v6  ;;  %v11255_v12 = vld [vmem:[#allocation2 + $0x6c] sm:$0xff]   ;;  %v7124_v9 = vrot.slane %v13692_v60, 2 }
 0x43d   : > { %vm5081_vm0 = vcmp.ge.s32.totalorder %v5045_v63, 1  ;;  %vm5117_vm14 = vcmp.le.s32.totalorder %v5045_v63, 16  ;;  %v4859_v54 = vadd.s32 %v4857_v48, %v4855_v13  ;;  %6710 = vmatmul.bf16.gmra.mxu1 %v6356_v15  ;;  %v5935_v26 = vrot.slane %v11255_v12, 5 }
 0x43e   : > { %vm5153_vm4 = vmand %vm5081_vm0, %vm5117_vm14  ;;  %v7125_v50 = vrot.slane %v13682_v41, 3  ;;  %v14622_v61 = vadd.f32 %v6765_v40, %v14427_v57  ;;  %v5889_v31 = vrot.slane %v5887_v29, 5  ;;  %v16983_v38 = vrot.slane %v14502_v55, 5  ;;  %v5380_v40 = vld [vmem:[#allocation2 + $0x8] sm:$0x8] }
 0x43f   : > { %v5261_v11 = vsel %vm5153_vm4, %v3784_v7, 0.0  ;;  %v4860_v17 = vadd.s32 %v4859_v54, %v4849_v32  ;;  %v14628_v13 = vadd.f32 %v6844_v18, %v14190_v30  ;;  %v14632_v7 = vpop.f32.mrf.mxu2  ;;  %v14634_v32 = vpop.f32.mrf.mxu3  ;;  %v3749_v57 = vmul.f32 0.1, %v14591_v33 }
 0x440   : > { %v10864_v56 = vpack.c.bf16 %v5261_v11, %v5260_v58  ;;  %v5936_v36 = vsel %vm5913_vm10, %v16983_v38, %v5935_v26  ;;  %v14630_v15 = vor.u32 %v7125_v50, %v7124_v9  ;;  %16984 = vst [vmem:[#allocation48_spill] sm:$0xff] %v14632_v7  ;;  %v14638_v55 = vor.u32 %v5889_v31, %v5886_v8  ;;  %v14640_v58 = vpop.f32.mrf.mxu1  ;;  %v10618_v31 = vld [vmem:[%s16572_s3 + $0x80] sm:$0xff] }
 0x441   : > { %v4861_v63 = vadd.s32 %v4860_v17, %v4851_v39  ;;  %v6257_v48 = vshrl.u32 %v5936_v36, 16  ;;  %v6260_v43 = vshll.u32 %v5936_v36, 16  ;;  %16985 = vst [vmem:[#allocation49_spill] sm:$0xff] %v14634_v32  ;;  %v7556_v30 = vpop.f32.mrf.mxu0  ;;  %v5937_v8 = vrot.slane %v14250_v53, 5  ;;  %7747 = vmatpush.bf16.msrb.mxu2 %v10618_v31 }
 0x442   : > { %11047 = vst [vmem:[#allocation2 + $0x98] sm:$0xff] %v10864_v56   ;;  %v7127_v29 = vsel %vm646_vm3, %v14534_v62, %v14630_v15  ;;  %v5891_v12 = vsel %vm5748_vm13, %v14524_v59, %v14638_v55  ;;  %v14649_v9 = vadd.f32 %v7556_v30, %v14546_v14  ;;  %v5476_v62 = vunpack.c.l.b16 %v5380_v40 }
 0x443   : > { %16986 = vst [vmem:[#allocation50_spill] sm:$0xff] %v14640_v58  ;;  %v4862_v18 = vshrl.u32 %v4861_v63, 4  ;;  %v6259_v39 = vrot.slane %v6257_v48, 3  ;;  %v6262_v54 = vrot.slane %v6260_v43, 4  ;;  %7590 = vmatmul.bf16.gmra.mxu0 %v7127_v29  ;;  %v6336_v17 = vshrl.u32 %v5891_v12, 16 }
 0x444   : > { %v6339_v50 = vshll.u32 %v5891_v12, 16  ;;  %v3785_v59 = vsel %vm3713_vm7, %v14591_v33, %v3749_v57  ;;  %v10933_v38 = vunpack.c.h.b16 %v14496_v3  ;;  %v5938_v14 = vsel %vm5913_vm10, %v5935_v26, %v5937_v8  ;;  %v10610_v3 = vld [vmem:[%s16572_s3 + $0x40] sm:$0xff] }
 0x445   : > { %v4863_v11 = vmul.u32 18, %v4862_v18  ;;  %v14652_v56 = vor.u32 %v6262_v54, %v6259_v39  ;;  %v6338_v36 = vrot.slane %v6336_v17, 3  ;;  %v6279_v43 = vshrl.u32 %v5938_v14, 16  ;;  %7648 = vmatpush.bf16.msrb.mxu1 %v10610_v3 }
 0x446   : > { %v6341_v63 = vrot.slane %v6339_v50, 4  ;;  %v6282_v30 = vshll.u32 %v5938_v14, 16  ;;  %v7146_v40 = vrot.slane %v13795_v5, 2  ;;  %v16686_v33 = vrot.slane %v14391_v19, 5 }
 0x447   : > { %v4864_v53 = vsub.s32 %v14549_v16, %v4863_v11  ;;  %v6264_v48 = vsel %vm1006_vm2, %v14539_v52, %v14652_v56  ;;  %v6770_v52 = vpop.f32.mrf.mxu2  ;;  %v6849_v18 = vpop.f32.mrf.mxu3  ;;  %v6281_v29 = vrot.slane %v6279_v43, 3  ;;  %v7147_v12 = vrot.slane %v13790_v37, 3 }
 0x448   : > { %6883 = vmatmul.bf16.gmra.mxu3 %v6264_v48  ;;  %v14671_v26 = vor.u32 %v6341_v63, %v6338_v36  ;;  %v14680_v11 = vpop.f32.mrf.mxu1  ;;  %v6284_v14 = vrot.slane %v6282_v30, 4  ;;  %v14688_v36 = vadd.f32 %v6770_v52, %v14516_v45  ;;  %v16989_v48 = vunpack.c.l.b16 %v13752_v47 }
 0x449   : > { %vm4902_vm8 = vcmp.ne.s32.totalorder %v4864_v53, 0  ;;  %vm4938_vm12 = vcmp.lt.s32.totalorder %v4864_v53, 0  ;;  %v5010_v16 = vadd.s32 18, %v4864_v53  ;;  %v14673_v57 = vld [vmem:[#allocation2 + $0x98] sm:$0xff]   ;;  %v14682_v17 = vpop.f32.mrf.mxu0  ;;  %vm16996_vm0 = vsmask.f32 7424 }
 0x44a   : > { %vm4974_vm11 = vmand %vm4938_vm12, %vm4902_vm8  ;;  %v14676_v39 = vunpack.c.l.b16 %v14673_v57  ;;  %16988 = vst [vmem:[#allocation52_spill] sm:$0xff] %v14682_v17  ;;  %v6343_v31 = vsel %vm1006_vm2, %v14561_v27, %v14671_v26  ;;  %v14695_v43 = vpack.c.b16 %v16989_v48, %v5476_v62  ;;  %v14703_v27 = vsel %vm5913_vm10, %v5937_v8, %v16686_v33  ;;  %v16993_v33 = vld [vmem:[#allocation8_spill] sm:$0xff] }
 0x44b   : > { %v5046_v50 = vsel %vm4974_vm11, %v5010_v16, %v4864_v53  ;;  %6804 = vmatmul.bf16.gmra.mxu2 %v6343_v31  ;;  %v14698_v53 = vadd.f32 %v6849_v18, %v14303_v46  ;;  %v6376_v30 = vshrl.u32 %v14673_v57, 16  ;;  %v6379_v3 = vshll.u32 %v14673_v57, 16  ;;  %vm16998_vm14 = vmmov %vm16996_vm0 }
 0x44c   : > { %16987 = vst [vmem:[#allocation51_spill] sm:$0xff] %v14676_v39  ;;  %vm5082_vm6 = vcmp.ge.s32.totalorder %v5046_v50, 1  ;;  %vm5118_vm9 = vcmp.le.s32.totalorder %v5046_v50, 16  ;;  %v14691_v63 = vpack.c.b16 %v14676_v39, %v10933_v38  ;;  %v14708_v47 = vor.u32 %v6284_v14, %v6281_v29  ;;  %vm17023_vm4 = vmmov %vm16996_vm0 }
 0x44d   : > { %vm5154_vm15 = vmand %vm5082_vm6, %vm5118_vm9  ;;  %v14710_v62 = vor.u32 %v7147_v12, %v7146_v40  ;;  %v6378_v52 = vrot.slane %v6376_v30, 3  ;;  %v6381_v18 = vrot.slane %v6379_v3, 4  ;;  %v6301_v8 = vshrl.u32 %v14703_v27, 16 }
 0x44e   : > { %v5262_v45 = vsel %vm5154_vm15, %v3785_v59, 0.0  ;;  %v5893_v38 = vshrl.u32 %v14691_v63, 16  ;;  %v5896_v46 = vshll.u32 %v14691_v63, 16  ;;  %v5479_v54 = vshrl.u32 %v14695_v43, 16  ;;  %vm17031_vm7 = vmmov %vm16996_vm0 }
 0x44f   : > { %v5306_v16 = vpack.c.bf16 %v5262_v45, %v5262_v45  ;;  %v14714_v31 = vpop.f32.mrf.mxu2  ;;  %v14716_v48 = vpop.f32.mrf.mxu3  ;;  %v5481_v29 = vshll.u32 %v14695_v43, 16  ;;  %v14720_v14 = vor.u32 %v6381_v18, %v6378_v52  ;;  %v7168_v45 = vrot.slane %v13900_v49, 2  ;;  %vm17034_vm8 = vmmov %vm16996_vm0 }
 0x450   : > { %v5895_v50 = vrot.slane %v5893_v38, 4  ;;  %v5898_v59 = vrot.slane %v5896_v46, 5  ;;  %16990 = vst [vmem:[#allocation53_spill] sm:$0xff] %v14714_v31  ;;  %v14722_v40 = vpop.f32.mrf.mxu1  ;;  %v7149_v30 = vsel %vm646_vm3, %v14630_v15, %v14710_v62  ;;  %v6286_v52 = vsel %vm1006_vm2, %v14652_v56, %v14708_v47  ;;  %v16995_v56 = vld [vmem:[#allocation32_spill] sm:$0xff]  ;;  %vm17045_vm12 = vmmov %vm16996_vm0 }
 0x451   : > { %5342 = vst [vmem:[#allocation2 + $0xa0] sm:$0xf] %v5306_v16  ;;  %v7561_v12 = vpop.f32.mrf.mxu0  ;;  %v5483_v16 = vrot.slane %v5481_v29, 1  ;;  %v6383_v46 = vsel %vm1006_vm2, %v14608_v6, %v14720_v14  ;;  %v6303_v18 = vrot.slane %v6301_v8, 3  ;;  %v16688_v39 = vrot.slane %v16993_v33, 1  ;;  %vm17055_vm11 = vmmov %vm16996_vm0 }
 0x452   : > { %16991 = vst [vmem:[#allocation54_spill] sm:$0xff] %v14716_v48  ;;  %v14728_v3 = vor.u32 %v5898_v59, %v5895_v50  ;;  %v14731_v38 = vadd.f32 %v7561_v12, %v14628_v13  ;;  %6715 = vmatmul.bf16.gmra.mxu1 %v6383_v46  ;;  %v6304_v13 = vshll.u32 %v14703_v27, 16  ;;  %v16689_v59 = vrot.slane %v14493_v22, 5  ;;  %v16994_v12 = vld [vmem:[#allocation33_spill] sm:$0xff]  ;;  %vm17059_vm6 = vmmov %vm16996_vm0 }
 0x453   : > { %7595 = vmatmul.bf16.gmra.mxu0 %v7149_v30  ;;  %v5484_v50 = vor.u32 %v5483_v16, %v5479_v54  ;;  %v7169_v58 = vrot.slane %v16994_v12, 3  ;;  %v5497_v8 = vsel %vm16996_vm0, %v16995_v56, %v16688_v39  ;;  %v16997_v30 = vld [vmem:[#allocation31_spill] sm:$0xff]  ;;  %vm17064_vm9 = vmmov %vm16996_vm0 }
 0x454   : > { %16992 = vst [vmem:[#allocation55_spill] sm:$0xff] %v14731_v38  ;;  %v5900_v15 = vsel %vm5748_vm13, %v14638_v55, %v14728_v3  ;;  %v6945_v7 = vshrl.u32 %v5497_v8, 16  ;;  %v6948_v31 = vshll.u32 %v5497_v8, 16  ;;  %v16999_v55 = vrot.slane %v14391_v19, 5  ;;  %vm17065_vm15 = vmmov %vm16996_vm0 }
 0x455   : > { %v6358_v29 = vshrl.u32 %v5900_v15, 16  ;;  %v6361_v6 = vshll.u32 %v5900_v15, 16  ;;  %v5489_v46 = vsel %vm16998_vm14, %v5484_v50, %v16997_v30  ;;  %vm17072_vm14 = vmmov %vm16996_vm0 }
 0x456   : > { %v5942_v54 = vsel %vm5913_vm10, %v16999_v55, %v16689_v59  ;;  %v6937_v21 = vshrl.u32 %v5489_v46, 16  ;;  %v6940_v1 = vshll.u32 %v5489_v46, 16  ;;  %v6947_v39 = vrot.slane %v6945_v7, 2 }
 0x457   : > { %v6360_v27 = vrot.slane %v6358_v29, 3  ;;  %v6363_v16 = vrot.slane %v6361_v6, 4  ;;  %v6775_v32 = vpop.f32.mrf.mxu2  ;;  %v6854_v56 = vpop.f32.mrf.mxu3  ;;  %v6950_v28 = vrot.slane %v6948_v31, 3  ;;  %v6323_v50 = vshrl.u32 %v5942_v54, 16 }
 0x458   : > { %6888 = vmatmul.bf16.gmra.mxu3 %v6286_v52  ;;  %v5719_v15 = vld [vmem:[#allocation2 + $0xa0] sm:$0xf]  ;;  %v14760_v8 = vadd.f32 %v6775_v32, %v14604_v34  ;;  %v14763_v19 = vadd.f32 %v6854_v56, %v14419_v44  ;;  %v6939_v29 = vrot.slane %v6937_v21, 2  ;;  %v17001_v46 = vunpack.c.h.b16 %v14673_v57 }
 0x459   : > { %v5726_v48 = vunpack.c.l.b16 %v5719_v15  ;;  %v14757_v30 = vor.u32 %v6363_v16, %v6360_v27  ;;  %v14765_v52 = vpop.f32.mrf.mxu0  ;;  %v6306_v15 = vrot.slane %v6304_v13, 4  ;;  %v6942_v7 = vrot.slane %v6940_v1, 3  ;;  %v14774_v27 = vpop.f32.mrf.mxu1 }
 0x45a   : > { %17000 = vst [vmem:[#allocation8_spill] sm:$0xff] %v14765_v52  ;;  %v14776_v34 = vor.u32 %v6950_v28, %v6947_v39  ;;  %v6325_v44 = vrot.slane %v6323_v50, 3  ;;  %v6326_v32 = vshll.u32 %v5942_v54, 16 }
 0x45b   : > { %v5729_v6 = vpack.c.b16 %v5726_v48, %v5726_v48  ;;  %v14769_v55 = vpack.c.b16 %v5726_v48, %v17001_v46  ;;  %v6365_v31 = vsel %vm1006_vm2, %v14671_v26, %v14757_v30  ;;  %v14780_v48 = vor.u32 %v7169_v58, %v7168_v45 }
 0x45c   : > { %6809 = vmatmul.bf16.gmra.mxu2 %v6365_v31  ;;  %v6943_v1 = vor.u32 %v6942_v7, %v6939_v29  ;;  %v6328_v13 = vrot.slane %v6326_v32, 4  ;;  %v6307_v38 = vor.u32 %v6306_v15, %v6303_v18  ;;  %v5943_v32 = vrot.slane %v14600_v23, 5 }
 0x45d   : > { %v6403_v16 = vshrl.u32 %v5729_v6, 16  ;;  %v6406_v21 = vshll.u32 %v5729_v6, 16  ;;  %v5902_v56 = vshrl.u32 %v14769_v55, 16  ;;  %v5905_v57 = vshll.u32 %v14769_v55, 16 }
 0x45e   : > { %v14784_v28 = vsel %vm646_vm3, %v6943_v1, %v14776_v34  ;;  %v6329_v39 = vor.u32 %v6328_v13, %v6325_v44  ;;  %v7171_v29 = vsel %vm646_vm3, %v14710_v62, %v14780_v48  ;;  %v10674_v44 = vld [vmem:[%s16572_s3 + $0x1b8] sm:$0xff] }
 0x45f   : > { %v6405_v46 = vrot.slane %v6403_v16, 3  ;;  %v6408_v59 = vrot.slane %v6406_v21, 4  ;;  %v5904_v26 = vrot.slane %v5902_v56, 4  ;;  %v5907_v52 = vrot.slane %v5905_v57, 5  ;;  %v14786_v6 = vpop.f32.mrf.mxu2  ;;  %v14788_v31 = vpop.f32.mrf.mxu3  ;;  %8714 = vmatpush.bf16.msra.mxu3 %v10674_v44 }
 0x460   : > { %17002 = vst [vmem:[#allocation33_spill] sm:$0xff] %v14786_v6  ;;  %v14791_v45 = vsel %vm1006_vm2, %v6307_v38, %v6329_v39 }
 0x461   : > { %v6409_v54 = vor.u32 %v6408_v59, %v6405_v46  ;;  %v5908_v50 = vor.u32 %v5907_v52, %v5904_v26  ;;  %17003 = vst [vmem:[#allocation32_spill] sm:$0xff] %v14788_v31  ;;  %v7566_v58 = vpop.f32.mrf.mxu0  ;;  %v14807_v21 = vpop.f32.mrf.mxu1  ;;  %v17016_v31 = vld [vmem:[#allocation37_spill] sm:$0xff] }
 0x462   : > { %v14799_v15 = vadd.f32 %v7566_v58, %v14698_v53  ;;  %v6308_v53 = vsel %vm1006_vm2, %v14708_v47, %v6307_v38  ;;  %v17007_v47 = vld [vmem:[#allocation25_spill] sm:$0xff] }
 0x463   : > { %v5909_v18 = vsel %vm5748_vm13, %v14728_v3, %v5908_v50  ;;  %v6410_v59 = vsel %vm1006_vm2, %v14720_v14, %v6409_v54  ;;  %7600 = vmatmul.bf16.gmra.mxu0 %v7171_v29  ;;  %v17005_v14 = vrot.slane %v14493_v22, 5  ;;  %v7190_v38 = vrot.slane %v17007_v47, 2  ;;  %v17008_v22 = vld [vmem:[#allocation34_spill] sm:$0xff]  ;;  %vm17014_vm13 = vmmov %vm16996_vm0 }
 0x464   : > { %17004 = vst [vmem:[#allocation31_spill] sm:$0xff] %v14799_v15  ;;  %v6385_v52 = vshrl.u32 %v5909_v18, 16  ;;  %v6388_v7 = vshll.u32 %v5909_v18, 16  ;;  %6720 = vmatmul.bf16.gmra.mxu1 %v6410_v59  ;;  %v7191_v58 = vrot.slane %v17008_v22, 3 }
 0x465   : > { %v5944_v3 = vsel %vm5913_vm10, %v17005_v14, %v5943_v32  ;;  %v17009_v14 = vld [vmem:[#allocation12_spill] sm:$0xff] }
 0x466   : > { %v6387_v62 = vrot.slane %v6385_v52, 3  ;;  %v6390_v16 = vrot.slane %v6388_v7, 4  ;;  %v6345_v57 = vshrl.u32 %v5944_v3, 16  ;;  %v6348_v1 = vshll.u32 %v5944_v3, 16  ;;  %v10690_v7 = vld [vmem:[%s16572_s3 + $0x238] sm:$0xff] }
 0x467   : > { %v6780_v13 = vpop.f32.mrf.mxu2  ;;  %v6859_v46 = vpop.f32.mrf.mxu3  ;;  %v14838_v44 = vor.u32 %v7191_v58, %v7190_v38  ;;  %v5504_v3 = vrot.slane %v17009_v14, 1  ;;  %8912 = vmatpush.bf16.msra.mxu1 %v10690_v7  ;;  %v11281_v7 = vld [vmem:[#allocation2 + $0x1c] sm:$0xe] }
 0x468   : > { %6893 = vmatmul.bf16.gmra.mxu3 %v6308_v53  ;;  %v14814_v56 = vor.u32 %v6390_v16, %v6387_v62  ;;  %v14817_v23 = vadd.f32 %v6780_v13, %v14680_v11  ;;  %v14820_v26 = vadd.f32 %v6859_v46, %v14537_v0  ;;  %v6347_v29 = vrot.slane %v6345_v57, 3  ;;  %v10682_v11 = vld [vmem:[%s16572_s3 + $0x1f8] sm:$0xff]  ;;  %v17012_v46 = vld [vmem:[#allocation10_spill] sm:$0xff] }
 0x469   : > { %v14822_v54 = vpop.f32.mrf.mxu0  ;;  %v6350_v18 = vrot.slane %v6348_v1, 4  ;;  %v10712_v0 = vld [vmem:[%s16574_s5 + $0x18] sm:$0xff]  ;;  %8813 = vmatpush.bf16.msra.mxu0 %v10682_v11  ;;  %v6415_v16 = vshll.u32 %v5908_v50, 16  ;;  %v14843_v53 = vpop.f32.mrf.mxu1  ;;  %v17011_v13 = vrot.slane %v16993_v33, 1  ;;  %v5945_v33 = vrot.slane %v14691_v63, 5 }
 0x46a   : > { %17006 = vst [vmem:[#allocation56_spill] sm:$0xff] %v14822_v54  ;;  %v6392_v59 = vsel %vm1006_vm2, %v14757_v30, %v14814_v56  ;;  %9307 = vmatpush.bf16.msra.mxu2 %v10712_v0  ;;  %v6412_v30 = vshrl.u32 %v5908_v50, 16  ;;  %v7193_v50 = vsel %vm646_vm3, %v14780_v48, %v14838_v44  ;;  %v7212_v54 = vrot.slane %v17016_v31, 2  ;;  %v17021_v31 = vld [vmem:[#allocation11_spill] sm:$0xff] }
 0x46b   : > { %v6351_v52 = vor.u32 %v6350_v18, %v6347_v29  ;;  %v5500_v38 = vor.u32 %v17012_v46, %v17011_v13  ;;  %v11280_v29 = vld [vmem:[#allocation2 + $0x1c] sm:$0xf0]  ;;  %v6417_v11 = vrot.slane %v6415_v16, 4  ;;  %v5946_v46 = vsel %vm5913_vm10, %v5943_v32, %v5945_v33 }
 0x46c   : > { %6814 = vmatmul.bf16.gmra.mxu2 %v6392_v59  ;;  %v6414_v59 = vrot.slane %v6412_v30, 3  ;;  %v6367_v6 = vshrl.u32 %v5946_v46, 16  ;;  %v11256_v30 = vld [vmem:[#allocation2 + $0x10] sm:$0xff]   ;;  %v14870_v63 = vor.u32 %v11281_v7, %v11280_v29  ;;  %v5508_v15 = vor.u32 %v17021_v31, %v5504_v3 }
 0x46d   : > { %v14841_v62 = vsel %vm1006_vm2, %v6329_v39, %v6351_v52  ;;  %v14853_v39 = vld [vmem:[#allocation2 + $0x1c] sm:$0xff]   ;;  %v5505_v0 = vsel %vm17014_vm13, %v5500_v38, %v5504_v3  ;;  %v5633_v16 = vrot.slane %v11256_v30, 1  ;;  %v17017_v29 = vld [vmem:[#allocation3_spill] sm:$0xff]  ;;  %vm17073_vm13 = vmmov %vm16996_vm0 }
 0x46e   : > { %v6975_v14 = vshrl.u32 %v5505_v0, 16  ;;  %v6978_v13 = vshll.u32 %v5505_v0, 16  ;;  %v6418_v48 = vor.u32 %v6417_v11, %v6414_v59  ;;  %v7213_v7 = vrot.slane %v17017_v29, 3 }
 0x46f   : > { %v14846_v57 = vpop.f32.mrf.mxu2  ;;  %v14848_v1 = vpop.f32.mrf.mxu3 }
 0x470   : > { %17010 = vst [vmem:[#allocation34_spill] sm:$0xff] %v14848_v1  ;;  %v6977_v30 = vrot.slane %v6975_v14, 2  ;;  %v6980_v38 = vrot.slane %v6978_v13, 3  ;;  %v8127_v13 = vrot.slane %v14870_v63, 1 }
 0x471   : > { %v7571_v58 = vpop.f32.mrf.mxu0  ;;  %v14872_v0 = vpop.f32.mrf.mxu1 }
 0x472   : > { %v14859_v18 = vadd.f32 %v7571_v58, %v14763_v19  ;;  %v6370_v19 = vshll.u32 %v5946_v46, 16  ;;  %v5632_v58 = vrot.slane %v14695_v43, 1  ;;  %v6369_v43 = vrot.slane %v6367_v6, 3  ;;  %v14882_v46 = vld [vmem:[#allocation2 + $0x24] sm:$0xff] }
 0x473   : > { %7605 = vmatmul.bf16.gmra.mxu0 %v7193_v50  ;;  %v14867_v50 = vld [vmem:[#allocation2 + $0x18] sm:$0xff] }
 0x474   : > { %17013 = vst [vmem:[#allocation12_spill] sm:$0xff] %v14859_v18  ;;  %7649 = vmatmul.bf16.vlgmr.msrb.gmra.mxu1 %v14784_v28  ;;  %v6372_v11 = vrot.slane %v6370_v19, 4  ;;  %v6419_v18 = vsel %vm1006_vm2, %v14814_v56, %v6418_v48  ;;  %v5634_v6 = vsel %vm3076_vm5, %v5632_v58, %v5633_v16  ;;  %v8128_v19 = vrot.slane %v14882_v46, 1 }
 0x475   : > { %v14902_v56 = vor.u32 %v7213_v7, %v7212_v54  ;;  %v6954_v58 = vshrl.u32 %v5634_v6, 16 }
 0x477   : > { %v6785_v28 = vpop.f32.mrf.mxu2  ;;  %v6864_v1 = vpop.f32.mrf.mxu3  ;;  %v7215_v54 = vsel %vm646_vm3, %v14838_v44, %v14902_v56  ;;  %v6956_v3 = vrot.slane %v6954_v58, 2  ;;  %v16691_v44 = vrot.slane %v14769_v55, 5  ;;  %v14937_v58 = vld [vmem:[#allocation2 + $0x2c] sm:$0xff] }
 0x478   : > { %6898 = vmatmul.bf16.gmra.mxu3 %v14791_v45  ;;  %v14875_v32 = vadd.f32 %v6785_v28, %v14774_v27  ;;  %v14878_v45 = vadd.f32 %v6864_v1, %v14622_v61  ;;  %v14888_v27 = vor.u32 %v6372_v11, %v6369_v43  ;;  %v17018_v61 = vrot.slane %v14867_v50, 1  ;;  %v17019_v43 = vld [vmem:[#allocation13_spill] sm:$0xff] }
 0x479   : > { %v14880_v59 = vpop.f32.mrf.mxu0  ;;  %v14900_v28 = vor.u32 %v6980_v38, %v6977_v30  ;;  %v16690_v11 = vrot.slane %v17019_v43, 1 }
 0x47a   : > { %17015 = vst [vmem:[#allocation10_spill] sm:$0xff] %v14880_v59  ;;  %v5636_v1 = vsel %vm3076_vm5, %v5633_v16, %v17018_v61  ;;  %v14896_v14 = vsel %vm1006_vm2, %v6351_v52, %v14888_v27  ;;  %v14906_v61 = vsel %vm3076_vm5, %v8127_v13, %v8128_v19  ;;  %v6957_v16 = vshll.u32 %v5634_v6, 16  ;;  %v14922_v6 = vpop.f32.mrf.mxu1 }
 0x47b   : > { %v6962_v48 = vshrl.u32 %v5636_v1, 16  ;;  %v6982_v30 = vsel %vm646_vm3, %v14776_v34, %v14900_v28  ;;  %v5513_v31 = vsel %vm17023_vm4, %v5508_v15, %v16690_v11  ;;  %v10673_v15 = vld [vmem:[%s16572_s3 + $0x1b0] sm:$0xff]  ;;  %v7235_v11 = vrot.slane %v14222_v4, 3  ;;  %vm17074_vm4 = vmmov %vm16996_vm0 }
 0x47c   : > { %6819 = vmatmul.bf16.gmra.mxu2 %v6419_v18  ;;  %v6965_v18 = vshll.u32 %v5636_v1, 16  ;;  %v6959_v13 = vrot.slane %v6957_v16, 3  ;;  %8715 = vmatpush.bf16.msra.mxu3 %v10673_v15 }
 0x47d   : > { %v6964_v7 = vrot.slane %v6962_v48, 2  ;;  %v7000_v48 = vshll.u32 %v5513_v31, 16 }
 0x47e   : > { %v6967_v1 = vrot.slane %v6965_v18, 3  ;;  %v6960_v16 = vor.u32 %v6959_v13, %v6956_v3  ;;  %v7234_v13 = vrot.slane %v14216_v25, 2 }
 0x47f   : > { %v14908_v59 = vpop.f32.mrf.mxu2  ;;  %v14910_v52 = vpop.f32.mrf.mxu3  ;;  %v7002_v29 = vrot.slane %v7000_v48, 3 }
 0x480   : > { %17020 = vst [vmem:[#allocation13_spill] sm:$0xff] %v14910_v52  ;;  %v14932_v34 = vor.u32 %v6967_v1, %v6964_v7 }
 0x481   : > { %v7576_v47 = vpop.f32.mrf.mxu0 }
 0x482   : > { %v14917_v38 = vadd.f32 %v7576_v47, %v14820_v26  ;;  %v6997_v26 = vshrl.u32 %v5513_v31, 16  ;;  %v5948_v47 = vsel %vm5913_vm10, %v5945_v33, %v16691_v44 }
 0x483   : > { %7610 = vmatmul.bf16.gmra.mxu0 %v7215_v54  ;;  %v6394_v18 = vshrl.u32 %v5948_v47, 16  ;;  %v6397_v54 = vshll.u32 %v5948_v47, 16 }
 0x484   : > { %17022 = vst [vmem:[#allocation11_spill] sm:$0xff] %v14917_v38  ;;  %7654 = vmatmul.bf16.gmra.mxu1 %v6982_v30  ;;  %v14939_v30 = vld [vmem:[#allocation2 + $0x20] sm:$0xff]  ;;  %v6999_v3 = vrot.slane %v6997_v26, 2  ;;  %v6969_v38 = vsel %vm646_vm3, %v6960_v16, %v14932_v34  ;;  %v10681_v26 = vld [vmem:[%s16572_s3 + $0x1f0] sm:$0xff]  ;;  %v14984_v16 = vor.u32 %v7235_v11, %v7234_v13  ;;  %v17029_v11 = vrot.slane %v17019_v43, 1 }
 0x485   : > { %v6396_v47 = vrot.slane %v6394_v18, 3  ;;  %v6399_v44 = vrot.slane %v6397_v54, 4  ;;  %v10689_v54 = vld [vmem:[%s16572_s3 + $0x230] sm:$0xff]  ;;  %8814 = vmatpush.bf16.msra.mxu0 %v10681_v26  ;;  %v10671_v43 = vld [vmem:[%s16572_s3 + $0x1a0] sm:$0xff] }
 0x486   : > { %8913 = vmatpush.bf16.msra.mxu1 %v10689_v54 }
 0x487   : > { %v6790_v52 = vpop.f32.mrf.mxu2  ;;  %v6869_v33 = vpop.f32.mrf.mxu3  ;;  %v14955_v17 = vor.u32 %v6399_v44, %v6396_v47  ;;  %v10672_v44 = vld [vmem:[%s16572_s3 + $0x1a8] sm:$0xff]  ;;  %v14988_v47 = vor.u32 %v7002_v29, %v6999_v3 }
 0x488   : > { %6903 = vmatmul.bf16.gmra.mxu3 %v14841_v62  ;;  %v8235_v62 = vshll.u32 %v14906_v61, 16  ;;  %v14944_v7 = vadd.f32 %v6790_v52, %v14843_v53  ;;  %v14947_v1 = vadd.f32 %v6869_v33, %v14688_v36  ;;  %v16696_v53 = vrot.slane %v14937_v58, 1 }
 0x489   : > { %v14949_v31 = vpop.f32.mrf.mxu0  ;;  %v17025_v36 = vrot.slane %v14939_v30, 1  ;;  %v17026_v52 = vrot.slane %v14867_v50, 1  ;;  %v14977_v50 = vsel %vm1006_vm2, %v14888_v27, %v14955_v17  ;;  %v8233_v33 = vshrl.u32 %v14906_v61, 16  ;;  %8716 = vmatpush.bf16.msra.mxu3 %v10672_v44  ;;  %v17030_v61 = vld [vmem:[#allocation15_spill] sm:$0xff] }
 0x48a   : > { %17024 = vst [vmem:[#allocation57_spill] sm:$0xff] %v14949_v31  ;;  %v8237_v48 = vrot.slane %v8235_v62, 1  ;;  %v14982_v15 = vsel %vm3076_vm5, %v8128_v19, %v16696_v53  ;;  %v16695_v27 = vrot.slane %v16945_v42, 1  ;;  %v7237_v19 = vsel %vm646_vm3, %v14902_v56, %v14984_v16 }
 0x48b   : > { %v5638_v18 = vsel %vm3076_vm5, %v17026_v52, %v17025_v36  ;;  %v8240_v62 = vshll.u32 %v14982_v15, 16  ;;  %v5516_v13 = vor.u32 %v17030_v61, %v17029_v11  ;;  %v7004_v3 = vsel %vm646_vm3, %v14900_v28, %v14988_v47  ;;  %v15016_v28 = vld [vmem:[#allocation2 + $0x28] sm:$0xff]  ;;  %v10670_v61 = vld [vmem:[%s16572_s3 + $0x198] sm:$0xff] }
 0x48c   : > { %7748 = vmatmul.bf16.vlgmr.msrb.gmra.mxu2 %v6969_v38  ;;  %v14972_v38 = vpop.f32.mrf.mxu1  ;;  %v6984_v36 = vshrl.u32 %v5638_v18, 16  ;;  %v6987_v52 = vshll.u32 %v5638_v18, 16  ;;  %v8238_v31 = vor.u32 %v8237_v48, %v8233_v33  ;;  %v17037_v53 = vrot.slane %v14769_v55, 5 }
 0x48d   : > { %17027 = vst [vmem:[#allocation58_spill] sm:$0xff] %v14972_v38  ;;  %v8242_v25 = vrot.slane %v8240_v62, 1  ;;  %v5521_v56 = vsel %vm17034_vm8, %v5516_v13, %v16695_v27  ;;  %v16697_v62 = vrot.slane %v15016_v28, 1  ;;  %8717 = vmatpush.bf16.msra.mxu3 %v10671_v43  ;;  %v15027_v13 = vld [vmem:[#allocation2 + $0x34] sm:$0xff]  ;;  %v8252_v55 = vshrl.u32 %v14982_v15, 16  ;;  %vm17078_vm8 = vmmov %vm16996_vm0 }
 0x48e   : > { %v6986_v18 = vrot.slane %v6984_v36, 2  ;;  %v6989_v54 = vrot.slane %v6987_v52, 3  ;;  %v7019_v52 = vshrl.u32 %v5521_v56, 16  ;;  %v5528_v38 = vrot.slane %v17039_v10, 1 }
 0x48f   : > { %v14991_v4 = vpop.f32.mrf.mxu3  ;;  %v15000_v29 = vsel %vm17031_vm7, %v8238_v31, %v8242_v25  ;;  %v15005_v44 = vpop.f32.mrf.mxu2  ;;  %v5720_v31 = vld [vmem:[#allocation2 + $0xa4] sm:$0x1]  ;;  %vm17077_vm7 = vmmov %vm16996_vm0 }
 0x490   : > { %17028 = vst [vmem:[#allocation59_spill] sm:$0xff] %v14991_v4  ;;  %v5911_v33 = vunpack.c.l.b16 %v5720_v31  ;;  %v17035_v31 = vld [vmem:[#allocation39_spill] sm:$0xff] }
 0x491   : > { %17032 = vst [vmem:[#allocation15_spill] sm:$0xff] %v15000_v29  ;;  %v7257_v43 = vrot.slane %v17035_v31, 3  ;;  %8718 = vmatpush.bf16.msra.mxu3 %v10670_v61  ;;  %v10669_v61 = vld [vmem:[%s16572_s3 + $0x190] sm:$0xff]  ;;  %v8254_v31 = vor.u32 %v8252_v55, %v8242_v25 }
 0x492   : > { %v7581_v26 = vpop.f32.mrf.mxu0  ;;  %v5912_v11 = vpack.c.b16 %v5911_v33, %v5911_v33  ;;  %v7021_v33 = vrot.slane %v7019_v52, 2 }
 0x493   : > { %7615 = vmatmul.bf16.gmra.mxu0 %v7237_v19  ;;  %v15008_v48 = vadd.f32 %v7581_v26, %v14878_v45  ;;  %v15020_v45 = vor.u32 %v6989_v54, %v6986_v18  ;;  %v7022_v19 = vshll.u32 %v5521_v56, 16  ;;  %v8132_v54 = vrot.slane %v15027_v13, 1 }
 0x494   : > { %7659 = vmatmul.bf16.gmra.mxu1 %v7004_v3  ;;  %v15022_v36 = vpop.f32.mrf.mxu1  ;;  %v5949_v26 = vrot.slane %v5912_v11, 5  ;;  %v7256_v3 = vrot.slane %v14330_v24, 2 }
 0x495   : > { %17033 = vst [vmem:[#allocation60_spill] sm:$0xff] %v15008_v48  ;;  %v6991_v56 = vsel %vm646_vm3, %v14932_v34, %v15020_v45  ;;  %v7024_v27 = vrot.slane %v7022_v19, 3  ;;  %8719 = vmatpush.bf16.msra.mxu3 %v10669_v61  ;;  %v15083_v61 = vld [vmem:[#allocation2 + $0x3c] sm:$0xff] }
 0x496   : > { %v5950_v29 = vsel %vm5913_vm10, %v17037_v53, %v5949_v26  ;;  %v7258_v53 = vor.u32 %v7257_v43, %v7256_v3  ;;  %vm17040_vm10 = vmmov %vm16996_vm0  ;;  %v17042_v43 = vrot.slane %v16945_v42, 1  ;;  %v10667_v42 = vld [vmem:[%s16572_s3 + $0x180] sm:$0xff] }
 0x498   : > { %6908 = vmatmul.bf16.gmra.mxu3 %v14896_v14  ;;  %v17036_v14 = vrot.slane %v14939_v30, 1  ;;  %v6421_v30 = vshrl.u32 %v5950_v29, 16 }
 0x49a   : > { %v5640_v18 = vsel %vm3076_vm5, %v17036_v14, %v16697_v62  ;;  %v6424_v14 = vshll.u32 %v5950_v29, 16  ;;  %v17038_v62 = vrot.slane %v14937_v58, 1  ;;  %v10668_v29 = vld [vmem:[%s16572_s3 + $0x188] sm:$0xff] }
 0x49b   : > { %v6874_v11 = vpop.f32.mrf.mxu3  ;;  %v7006_v52 = vshrl.u32 %v5640_v18, 16  ;;  %v7009_v24 = vshll.u32 %v5640_v18, 16  ;;  %8720 = vmatpush.bf16.msra.mxu3 %v10668_v29  ;;  %v15074_v18 = vpop.f32.mrf.mxu0 }
 0x49c   : > { %7753 = vmatmul.bf16.gmra.mxu2 %v6991_v56  ;;  %v15044_v4 = vadd.f32 %v6874_v11, %v14760_v8  ;;  %v8133_v34 = vsel %vm3076_vm5, %v17038_v62, %v8132_v54  ;;  %v6423_v8 = vrot.slane %v6421_v30, 3  ;;  %v6426_v56 = vrot.slane %v6424_v14, 4  ;;  %v15060_v15 = vpop.f32.mrf.mxu1  ;;  %v17043_v30 = vld [vmem:[#allocation14_spill] sm:$0xff] }
 0x49d   : > { %v6795_v19 = vpop.f32.mrf.mxu2  ;;  %v8256_v48 = vshll.u32 %v8133_v34, 16  ;;  %v7025_v11 = vor.u32 %v7024_v27, %v7021_v33  ;;  %v5524_v14 = vor.u32 %v17043_v30, %v17042_v43  ;;  %v7008_v10 = vrot.slane %v7006_v52, 2  ;;  %17044 = vst [vmem:[#allocation14_spill] sm:$0xff] %v15074_v18 }
 0x49e   : > { %v15054_v26 = vadd.f32 %v6795_v19, %v14922_v6  ;;  %v6427_v49 = vor.u32 %v6426_v56, %v6423_v8  ;;  %v7259_v6 = vsel %vm646_vm3, %v14984_v16, %v7258_v53  ;;  %v17047_v19 = vld [vmem:[#allocation16_spill] sm:$0xff]  ;;  %v16700_v8 = vrot.slane %v15083_v61, 1 }
 0x49f   : > { %v8258_v62 = vrot.slane %v8256_v48, 1  ;;  %v7026_v25 = vsel %vm646_vm3, %v14988_v47, %v7025_v11  ;;  %v7011_v48 = vrot.slane %v7009_v24, 3  ;;  %8721 = vmatpush.bf16.msra.mxu3 %v10667_v42  ;;  %v11260_v47 = vld [vmem:[#allocation2 + $0x30] sm:$0xff]  ;;  %v17046_v24 = vld [vmem:[#allocation29_spill] sm:$0xff]  ;;  %v7279_v55 = vrot.slane %v17047_v19, 3 }
 0x4a0   : > { %v6428_v27 = vsel %vm1006_vm2, %v14955_v17, %v6427_v49  ;;  %v5641_v33 = vrot.slane %v11260_v47, 1  ;;  %v7278_v52 = vrot.slane %v17046_v24, 2  ;;  %v17048_v43 = vrot.slane %v15016_v28, 1  ;;  %vm17052_vm2 = vmmov %vm16996_vm0 }
 0x4a1   : > { %v15063_v3 = vsel %vm17040_vm10, %v8254_v31, %v8258_v62  ;;  %v5529_v31 = vsel %vm17045_vm12, %v5524_v14, %v5528_v38  ;;  %v15081_v49 = vor.u32 %v7011_v48, %v7008_v10  ;;  %v8213_v24 = vshrl.u32 %v14853_v39, 16  ;;  %vm17081_vm10 = vmmov %vm16996_vm0 }
 0x4a2   : > { %17041 = vst [vmem:[#allocation19_spill] sm:$0xff] %v15063_v3  ;;  %v7041_v17 = vshrl.u32 %v5529_v31, 16  ;;  %v7044_v16 = vshll.u32 %v5529_v31, 16  ;;  %v5642_v30 = vsel %vm3076_vm5, %v17048_v43, %v5641_v33  ;;  %v15109_v28 = vor.u32 %v7279_v55, %v7278_v52  ;;  %v17051_v3 = vld [vmem:[#allocation21_spill] sm:$0xff]  ;;  %v17054_v55 = vld [vmem:[#allocation18_spill] sm:$0xff]  ;;  %vm17082_vm12 = vmmov %vm16996_vm0 }
 0x4a3   : > { %7620 = vmatmul.bf16.gmra.mxu0 %v7259_v6  ;;  %v7013_v56 = vsel %vm646_vm3, %v15020_v45, %v15081_v49  ;;  %v15096_v14 = vpop.f32.mrf.mxu3  ;;  %v8268_v45 = vshrl.u32 %v8133_v34, 16  ;;  %v7031_v47 = vshll.u32 %v5642_v30, 16  ;;  %v10711_v34 = vld [vmem:[%s16574_s5 + $0x10] sm:$0xff] }
 0x4a4   : > { %7664 = vmatmul.bf16.gmra.mxu1 %v7026_v25  ;;  %v15091_v29 = vpop.f32.mrf.mxu1  ;;  %v7046_v6 = vrot.slane %v7044_v16, 3  ;;  %17049 = vst [vmem:[#allocation61_spill] sm:$0xff] %v15096_v14  ;;  %v15101_v25 = vsel %vm3076_vm5, %v8132_v54, %v16700_v8  ;;  %v16701_v54 = vrot.slane %v17051_v3, 1  ;;  %v10680_v8 = vld [vmem:[%s16572_s3 + $0x1e8] sm:$0xff]  ;;  %v7281_v52 = vsel %vm646_vm3, %v7258_v53, %v15109_v28  ;;  %9308 = vmatpush.bf16.msra.mxu2 %v10711_v34  ;;  %v15135_v53 = vld [vmem:[#allocation2 + $0x38] sm:$0xff] }
 0x4a5   : > { %v15103_v10 = vpop.f32.mrf.mxu2  ;;  %v8272_v31 = vshll.u32 %v15101_v25, 16  ;;  %8815 = vmatpush.bf16.msra.mxu0 %v10680_v8  ;;  %v10688_v8 = vld [vmem:[%s16572_s3 + $0x228] sm:$0xff]  ;;  %v8284_v14 = vshrl.u32 %v15101_v25, 16  ;;  %v16705_v25 = vrot.slane %v16974_v35, 1 }
 0x4a6   : > { %8914 = vmatpush.bf16.msra.mxu1 %v10688_v8  ;;  %v5379_v8 = vld [vmem:[#allocation2 + $0x98] sm:$0x7] }
 0x4a7   : > { %v8274_v43 = vrot.slane %v8272_v31, 1 }
 0x4a8   : > { %6913 = vmatmul.bf16.gmra.mxu3 %v14977_v50  ;;  %v7043_v50 = vrot.slane %v7041_v17, 2  ;;  %v7028_v17 = vshrl.u32 %v5642_v30, 16  ;;  %v7033_v30 = vrot.slane %v7031_v47, 3 }
 0x4aa   : > { %v15111_v16 = vor.u32 %v7046_v6, %v7043_v50  ;;  %v5532_v50 = vor.u32 %v17054_v55, %v5528_v38  ;;  %v7030_v6 = vrot.slane %v7028_v17, 2  ;;  %v16702_v38 = vrot.slane %v15135_v53, 1  ;;  %v10679_v55 = vld [vmem:[%s16572_s3 + $0x1e0] sm:$0xff] }
 0x4ab   : > { %8816 = vmatpush.bf16.msra.mxu0 %v10679_v55  ;;  %v8215_v55 = vshll.u32 %v14853_v39, 16 }
 0x4ac   : > { %7758 = vmatmul.bf16.gmra.mxu2 %v7013_v56  ;;  %v8270_v56 = vor.u32 %v8268_v45, %v8258_v62  ;;  %v7048_v62 = vsel %vm646_vm3, %v7025_v11, %v15111_v16  ;;  %v15131_v45 = vpop.f32.mrf.mxu1  ;;  %v15138_v11 = vor.u32 %v7033_v30, %v7030_v6  ;;  %v7301_v6 = vrot.slane %v14588_v51, 3 }
 0x4ad   : > { %v5644_v30 = vsel %vm3076_vm5, %v5641_v33, %v16702_v38  ;;  %v7982_v33 = vshll.u32 %v14882_v46, 16 }
 0x4ae   : > { %v7586_v48 = vpop.f32.mrf.mxu0  ;;  %v7050_v38 = vshrl.u32 %v5644_v30, 16 }
 0x4af   : > { %v15107_v42 = vadd.f32 %v7586_v48, %v14947_v1  ;;  %v15121_v1 = vsel %vm17052_vm2, %v8270_v56, %v8274_v43  ;;  %v5537_v48 = vsel %vm17055_vm11, %v5532_v50, %v16701_v54  ;;  %v15149_v50 = vld [vmem:[#allocation2 + $0x44] sm:$0xff]  ;;  %v17057_v54 = vrot.slane %v15083_v61, 1  ;;  %vm17085_vm2 = vmmov %vm16996_vm0 }
 0x4b0   : > { %17053 = vst [vmem:[#allocation21_spill] sm:$0xff] %v15121_v1  ;;  %v7063_v34 = vshrl.u32 %v5537_v48, 16  ;;  %vm17086_vm11 = vmmov %vm16996_vm0 }
 0x4b1   : > { %17050 = vst [vmem:[#allocation62_spill] sm:$0xff] %v15107_v42  ;;  %v8286_v42 = vor.u32 %v8284_v14, %v8274_v43 }
 0x4b3   : > { %7625 = vmatmul.bf16.gmra.mxu0 %v7281_v52  ;;  %v7066_v52 = vshll.u32 %v5537_v48, 16  ;;  %v16704_v48 = vrot.slane %v15149_v50, 1 }
 0x4b4   : > { %7669 = vmatmul.bf16.gmra.mxu1 %v7048_v62  ;;  %v7300_v62 = vrot.slane %v14594_v20, 2 }
 0x4b5   : > { %v15172_v1 = vsel %vm3076_vm5, %v17057_v54, %v16704_v48 }
 0x4b6   : > { %v6879_v31 = vpop.f32.mrf.mxu3  ;;  %v15133_v56 = vpop.f32.mrf.mxu0 }
 0x4b7   : > { %17056 = vst [vmem:[#allocation18_spill] sm:$0xff] %v15133_v56  ;;  %v6800_v17 = vpop.f32.mrf.mxu2  ;;  %v15141_v47 = vadd.f32 %v6879_v31, %v14817_v23  ;;  %v10678_v23 = vld [vmem:[%s16572_s3 + $0x1d8] sm:$0xff]  ;;  %v7065_v31 = vrot.slane %v7063_v34, 2  ;;  %v15177_v34 = vor.u32 %v7301_v6, %v7300_v62  ;;  %v10677_v62 = vld [vmem:[%s16572_s3 + $0x1d0] sm:$0xff] }
 0x4b8   : > { %6918 = vmatmul.bf16.gmra.mxu3 %v6428_v27  ;;  %v15152_v27 = vadd.f32 %v6800_v17, %v15022_v36  ;;  %v7035_v36 = vsel %vm646_vm3, %v15081_v49, %v15138_v11  ;;  %v7068_v17 = vrot.slane %v7066_v52, 3  ;;  %8817 = vmatpush.bf16.msra.mxu0 %v10678_v23  ;;  %v8288_v49 = vshll.u32 %v15172_v1, 16 }
 0x4b9   : > { %v7053_v52 = vshll.u32 %v5644_v30, 16  ;;  %v8217_v23 = vrot.slane %v8215_v55, 1  ;;  %v15193_v30 = vrot.slane %v7982_v33, 1  ;;  %v7303_v39 = vsel %vm646_vm3, %v15109_v28, %v15177_v34 }
 0x4ba   : > { %v15179_v18 = vpop.f32.mrf.mxu1  ;;  %v15181_v56 = vor.u32 %v7068_v17, %v7065_v31  ;;  %v8290_v20 = vrot.slane %v8288_v49, 1  ;;  %v7052_v31 = vrot.slane %v7050_v38, 2  ;;  %v17061_v17 = vrot.slane %v17051_v3, 1 }
 0x4bb   : > { %v7055_v43 = vrot.slane %v7053_v52, 3  ;;  %v8218_v28 = vor.u32 %v8217_v23, %v8213_v24  ;;  %v15226_v23 = vld [vmem:[#allocation2 + $0x4c] sm:$0xff] }
 0x4bc   : > { %7763 = vmatmul.bf16.gmra.mxu2 %v7035_v36  ;;  %v5455_v36 = vunpack.c.l.b16 %v5379_v8  ;;  %v15196_v14 = vsel %vm17059_vm6, %v8286_v42, %v8290_v20  ;;  %v17062_v8 = vld [vmem:[#allocation17_spill] sm:$0xff]  ;;  %8818 = vmatpush.bf16.msra.mxu0 %v10677_v62  ;;  %v7070_v42 = vsel %vm646_vm3, %v15111_v16, %v15181_v56  ;;  %vm17089_vm6 = vmmov %vm16996_vm0 }
 0x4bd   : > { %17060 = vst [vmem:[#allocation64_spill] sm:$0xff] %v15196_v14  ;;  %v5540_v55 = vor.u32 %v17062_v8, %v17061_v17  ;;  %v15219_v33 = vor.u32 %v7055_v43, %v7052_v31  ;;  %v10675_v31 = vld [vmem:[%s16572_s3 + $0x1c0] sm:$0xff]  ;;  %v7977_v8 = vshll.u32 %v14870_v63, 16 }
 0x4be   : > { %v15183_v54 = vpop.f32.mrf.mxu3  ;;  %v15204_v49 = vpack.c.b16 %v5455_v36, %v5455_v36 }
 0x4bf   : > { %v15212_v38 = vpop.f32.mrf.mxu2  ;;  %v5545_v3 = vsel %vm17064_vm9, %v5540_v55, %v16705_v25  ;;  %v7057_v55 = vsel %vm646_vm3, %v15138_v11, %v15219_v33  ;;  %vm17090_vm9 = vmmov %vm16996_vm0 }
 0x4c0   : > { %v7591_v48 = vpop.f32.mrf.mxu0  ;;  %17063 = vst [vmem:[#allocation17_spill] sm:$0xff] %v15204_v49  ;;  %v16707_v52 = vshll.u32 %v15204_v49, 16  ;;  %v16706_v36 = vshrl.u32 %v15204_v49, 16  ;;  %v7085_v16 = vshrl.u32 %v5545_v3, 16  ;;  %v7088_v62 = vshll.u32 %v5545_v3, 16 }
 0x4c1   : > { %v15191_v6 = vadd.f32 %v7591_v48, %v15044_v4  ;;  %v10676_v4 = vld [vmem:[%s16572_s3 + $0x1c8] sm:$0xff]  ;;  %v8219_v48 = vsel %vm17065_vm15, %v8218_v28, %v15193_v30  ;;  %v16710_v3 = vrot.slane %v15226_v23, 1  ;;  %vm17093_vm15 = vmmov %vm16996_vm0 }
 0x4c2   : > { %8819 = vmatpush.bf16.msra.mxu0 %v10676_v4  ;;  %v15233_v43 = vpop.f32.mrf.mxu1  ;;  %v7323_v28 = vrot.slane %v16707_v52, 3  ;;  %v7087_v25 = vrot.slane %v7085_v16, 2  ;;  %v7090_v24 = vrot.slane %v7088_v62, 3  ;;  %v7990_v52 = vshll.u32 %v14937_v58, 16 }
 0x4c3   : > { %17058 = vst [vmem:[#allocation63_spill] sm:$0xff] %v15191_v6  ;;  %7630 = vmatmul.bf16.gmra.mxu0 %v7303_v39  ;;  %v15223_v39 = vld [vmem:[#allocation2 + $0x40] sm:$0xff]  ;;  %v8300_v16 = vshrl.u32 %v15172_v1, 16  ;;  %v16714_v1 = vrot.slane %v13682_v41, 1 }
 0x4c4   : > { %7674 = vmatmul.bf16.gmra.mxu1 %v7070_v42  ;;  %v7322_v42 = vrot.slane %v16706_v36, 2  ;;  %v17067_v14 = vrot.slane %v15223_v39, 1  ;;  %v17069_v36 = vrot.slane %v15149_v50, 1 }
 0x4c6   : > { %8820 = vmatpush.bf16.msra.mxu0 %v10675_v31  ;;  %v15257_v31 = vsel %vm3076_vm5, %v17069_v36, %v16710_v3  ;;  %v7324_v6 = vor.u32 %v7323_v28, %v7322_v42  ;;  %v8302_v36 = vor.u32 %v8300_v16, %v8290_v20  ;;  %v15275_v28 = vrot.slane %v7990_v52, 1  ;;  %v17071_v16 = vld [vmem:[#allocation30_spill] sm:$0xff] }
 0x4c7   : > { %v8304_v62 = vshll.u32 %v15257_v31, 16 }
 0x4c8   : > { %8722 = vmatmul.bf16.vlgmr.msra.gmra.mxu3 %v8219_v48  ;;  %v15228_v17 = vpop.f32.mrf.mxu0  ;;  %v7325_v20 = vsel %vm646_vm3, %v15177_v34, %v7324_v6 }
 0x4c9   : > { %17066 = vst [vmem:[#allocation65_spill] sm:$0xff] %v15228_v17  ;;  %v17068_v17 = vrot.slane %v15135_v53, 1  ;;  %v8306_v3 = vrot.slane %v8304_v62, 1 }
 0x4cb   : > { %v6884_v4 = vpop.f32.mrf.mxu3  ;;  %v5646_v11 = vsel %vm3076_vm5, %v17068_v17, %v17067_v14  ;;  %v7975_v14 = vshrl.u32 %v14870_v63, 16 }
 0x4cc   : > { %v15245_v48 = vadd.f32 %v6884_v4, %v14875_v32  ;;  %7768 = vmatmul.bf16.gmra.mxu2 %v7057_v55  ;;  %v7979_v32 = vrot.slane %v7977_v8, 1  ;;  %v7072_v53 = vshrl.u32 %v5646_v11, 16  ;;  %v7075_v49 = vshll.u32 %v5646_v11, 16 }
 0x4cd   : > { %v15266_v55 = vor.u32 %v7090_v24, %v7087_v25  ;;  %v7986_v8 = vshrl.u32 %v14882_v46, 16  ;;  %v17070_v11 = vrot.slane %v16974_v35, 1  ;;  %v6783_v35 = vadd.f32 %v14846_v57, %v14722_v40 }
 0x4ce   : > { %v6805_v4 = vpop.f32.mrf.mxu2  ;;  %v7980_v63 = vor.u32 %v7979_v32, %v7975_v14  ;;  %v7074_v24 = vrot.slane %v7072_v53, 2  ;;  %v7077_v46 = vrot.slane %v7075_v49, 3 }
 0x4cf   : > { %v15264_v17 = vadd.f32 %v6805_v4, %v15091_v29  ;;  %v15270_v19 = vpop.f32.mrf.mxu1  ;;  %v15278_v29 = vsel %vm16996_vm0, %v8302_v36, %v8306_v3  ;;  %v5548_v62 = vor.u32 %v17071_v16, %v17070_v11  ;;  %v7988_v52 = vor.u32 %v7986_v8, %v15193_v30  ;;  %v15304_v4 = vld [vmem:[#allocation2 + $0x48] sm:$0xff]  ;;  %v15312_v36 = vld [vmem:[#allocation2 + $0x54] sm:$0xff]  ;;  %v10687_v11 = vld [vmem:[%s16572_s3 + $0x220] sm:$0xff] }
 0x4d0   : > { %v7596_v51 = vpop.f32.mrf.mxu0  ;;  %v16713_v53 = vrot.slane %v15304_v4, 1  ;;  %v16715_v16 = vrot.slane %v15312_v36, 1  ;;  %8915 = vmatpush.bf16.msra.mxu1 %v10687_v11 }
 0x4d1   : > { %v15273_v42 = vadd.f32 %v7596_v51, %v15141_v47  ;;  %v7092_v51 = vsel %vm646_vm3, %v15181_v56, %v15266_v55  ;;  %v7985_v47 = vsel %vm17072_vm14, %v7980_v63, %v15193_v30  ;;  %v5553_v34 = vsel %vm17073_vm13, %v5548_v62, %v16714_v1  ;;  %vm17098_vm14 = vmmov %vm16996_vm0 }
 0x4d2   : > { %v15300_v49 = vsel %vm17074_vm4, %v7988_v52, %v15275_v28  ;;  %v15302_v56 = vor.u32 %v7077_v46, %v7074_v24  ;;  %v8223_v32 = vshll.u32 %v7985_v47, 16  ;;  %v6882_v30 = vadd.f32 %v15183_v54, %v6783_v35  ;;  %vm17101_vm13 = vmmov %vm16996_vm0 }
 0x4d3   : > { %v15280_v25 = vpop.f32.mrf.mxu3  ;;  %7635 = vmatmul.bf16.gmra.mxu0 %v7325_v20  ;;  %v7107_v40 = vshrl.u32 %v5553_v34, 16  ;;  %v7110_v57 = vshll.u32 %v5553_v34, 16  ;;  %v8228_v20 = vshll.u32 %v15300_v49, 16  ;;  %v17075_v34 = vrot.slane %v15223_v39, 1  ;;  %vm17109_vm4 = vmmov %vm16996_vm0 }
 0x4d4   : > { %7679 = vmatmul.bf16.gmra.mxu1 %v7092_v51  ;;  %v7079_v54 = vsel %vm646_vm3, %v15219_v33, %v15302_v56  ;;  %v17076_v33 = vrot.slane %v15226_v23, 1 }
 0x4d5   : > { %v7109_v51 = vrot.slane %v7107_v40, 2  ;;  %v7112_v52 = vrot.slane %v7110_v57, 3  ;;  %v5648_v35 = vsel %vm3076_vm5, %v17075_v34, %v16713_v53  ;;  %v7998_v57 = vshll.u32 %v15027_v13, 16 }
 0x4d6   : > { %v6807_v6 = vpop.f32.mrf.mxu2  ;;  %v7094_v39 = vshrl.u32 %v5648_v35, 16 }
 0x4d7   : > { %v15309_v14 = vadd.f32 %v6807_v6, %v15131_v45  ;;  %v15314_v63 = vpop.f32.mrf.mxu1  ;;  %v8225_v45 = vrot.slane %v8223_v32, 1  ;;  %v15339_v6 = vsel %vm3076_vm5, %v17076_v33, %v16715_v16  ;;  %v8230_v32 = vrot.slane %v8228_v20, 1 }
 0x4d8   : > { %8727 = vmatmul.bf16.gmra.mxu3 %v15300_v49  ;;  %v7598_v8 = vpop.f32.mrf.mxu0  ;;  %v8320_v40 = vshll.u32 %v15339_v6, 16  ;;  %v7994_v16 = vshrl.u32 %v14937_v58, 16 }
 0x4d9   : > { %v15317_v24 = vadd.f32 %v7598_v8, %v6882_v30  ;;  %v8316_v30 = vshrl.u32 %v15257_v31, 16  ;;  %v7097_v8 = vshll.u32 %v5648_v35, 16 }
 0x4da   : > { %v8322_v53 = vrot.slane %v8320_v40, 1  ;;  %v7996_v58 = vor.u32 %v7994_v16, %v15275_v28  ;;  %v15381_v28 = vld [vmem:[#allocation2 + $0x50] sm:$0xff] }
 0x4db   : > { %v6889_v46 = vpop.f32.mrf.mxu3  ;;  %v8318_v34 = vor.u32 %v8316_v30, %v8306_v3  ;;  %v16716_v16 = vrot.slane %v15381_v28, 1 }
 0x4dc   : > { %v15327_v62 = vadd.f32 %v6889_v46, %v14944_v7  ;;  %7773 = vmatmul.bf16.gmra.mxu2 %v7079_v54  ;;  %v8221_v7 = vshrl.u32 %v7985_v47, 16  ;;  %v15344_v54 = vor.u32 %v7112_v52, %v7109_v51  ;;  %v16718_v47 = vrot.slane %v13790_v37, 1 }
 0x4dd   : > { %v15358_v51 = vsel %vm17078_vm8, %v8318_v34, %v8322_v53  ;;  %v7099_v52 = vrot.slane %v7097_v8, 3  ;;  %vm17116_vm8 = vmmov %vm16996_vm0 }
 0x4de   : > { %v8226_v11 = vor.u32 %v8225_v45, %v8221_v7  ;;  %17079 = vst [vmem:[#allocation30_spill] sm:$0xff] %v15358_v51  ;;  %v8000_v45 = vrot.slane %v7998_v57, 1  ;;  %v17080_v7 = vrot.slane %v13682_v41, 1  ;;  %v6788_v57 = vadd.f32 %v14908_v59, %v14807_v21 }
 0x4df   : > { %v6810_v46 = vpop.f32.mrf.mxu2 }
 0x4e0   : > { %v15347_v1 = vadd.f32 %v6810_v46, %v15179_v18  ;;  %v7601_v33 = vpop.f32.mrf.mxu0  ;;  %v8231_v35 = vsel %vm17077_vm7, %v8226_v11, %v8230_v32  ;;  %v7096_v18 = vrot.slane %v7094_v39, 2  ;;  %v5556_v30 = vor.u32 %v13692_v60, %v17080_v7  ;;  %v15384_v11 = vld [vmem:[#allocation2 + $0x5c] sm:$0xff]  ;;  %vm17110_vm7 = vmmov %vm16996_vm0 }
 0x4e1   : > { %v15350_v20 = vpop.f32.mrf.mxu1  ;;  %v15353_v31 = vadd.f32 %v7601_v33, %v15245_v48  ;;  %v7114_v48 = vsel %vm646_vm3, %v15266_v55, %v15344_v54  ;;  %v15375_v39 = vsel %vm17082_vm12, %v7996_v58, %v8000_v45  ;;  %v6887_v60 = vadd.f32 %v15280_v25, %v6788_v57  ;;  %vm17123_vm12 = vmmov %vm16996_vm0 }
 0x4e2   : > { %v5561_v40 = vsel %vm17081_vm10, %v5556_v30, %v16718_v47  ;;  %v15377_v41 = vor.u32 %v7099_v52, %v7096_v18  ;;  %v8248_v33 = vshll.u32 %v15375_v39, 16  ;;  %v16717_v52 = vrot.slane %v15384_v11, 1  ;;  %vm17117_vm10 = vmmov %vm16996_vm0 }
 0x4e3   : > { %v15360_v3 = vpop.f32.mrf.mxu3  ;;  %8821 = vmatmul.bf16.vlgmr.msra.gmra.mxu0 %v8231_v35  ;;  %v7129_v55 = vshrl.u32 %v5561_v40, 16  ;;  %v7132_v46 = vshll.u32 %v5561_v40, 16  ;;  %v8244_v40 = vshrl.u32 %v15300_v49, 16 }
 0x4e4   : > { %7684 = vmatmul.bf16.gmra.mxu1 %v7114_v48  ;;  %v7101_v35 = vsel %vm646_vm3, %v15302_v56, %v15377_v41  ;;  %v17083_v48 = vrot.slane %v15304_v4, 1  ;;  %v17084_v56 = vrot.slane %v15312_v36, 1 }
 0x4e5   : > { %v7131_v30 = vrot.slane %v7129_v55, 2 }
 0x4e6   : > { %v5650_v58 = vsel %vm3076_vm5, %v17083_v48, %v16716_v16  ;;  %v15412_v57 = vsel %vm3076_vm5, %v17084_v56, %v16717_v52  ;;  %v5568_v52 = vrot.slane %v16994_v12, 1  ;;  %v17099_v12 = vld [vmem:[#allocation58_spill] sm:$0xff] }
 0x4e7   : > { %v6812_v8 = vpop.f32.mrf.mxu2  ;;  %v8336_v55 = vshll.u32 %v15412_v57, 16  ;;  %v7116_v4 = vshrl.u32 %v5650_v58, 16 }
 0x4e8   : > { %8732 = vmatmul.bf16.gmra.mxu3 %v15375_v39  ;;  %v15387_v21 = vadd.f32 %v6812_v8, %v15233_v43  ;;  %v7603_v59 = vpop.f32.mrf.mxu0  ;;  %v7134_v43 = vrot.slane %v7132_v46, 3  ;;  %v8332_v8 = vshrl.u32 %v15339_v6, 16  ;;  %v7119_v46 = vshll.u32 %v5650_v58, 16 }
 0x4e9   : > { %v15389_v34 = vpop.f32.mrf.mxu1  ;;  %v15392_v25 = vadd.f32 %v7603_v59, %v6887_v60  ;;  %v8006_v60 = vshll.u32 %v15083_v61, 16  ;;  %v8246_v59 = vor.u32 %v8244_v40, %v8230_v32  ;;  %v8338_v48 = vrot.slane %v8336_v55, 1 }
 0x4ea   : > { %v15417_v49 = vor.u32 %v7134_v43, %v7131_v30  ;;  %v7118_v43 = vrot.slane %v7116_v4, 2  ;;  %v17088_v58 = vrot.slane %v13790_v37, 1  ;;  %v15457_v4 = vld [vmem:[#allocation2 + $0x58] sm:$0xff] }
 0x4eb   : > { %v6894_v18 = vpop.f32.mrf.mxu3  ;;  %v15427_v51 = vrot.slane %v8006_v60, 1 }
 0x4ec   : > { %v15399_v7 = vadd.f32 %v6894_v18, %v15054_v26  ;;  %7778 = vmatmul.bf16.gmra.mxu2 %v7101_v35  ;;  %v8250_v26 = vrot.slane %v8248_v33, 1  ;;  %v8334_v35 = vor.u32 %v8332_v8, %v8322_v53  ;;  %v8002_v33 = vshrl.u32 %v15027_v13, 16 }
 0x4ed   : > { %v7121_v13 = vrot.slane %v7119_v46, 3  ;;  %v5564_v40 = vor.u32 %v13795_v5, %v17088_v58  ;;  %v5651_v46 = vrot.slane %v15457_v4, 1  ;;  %v17091_v58 = vrot.slane %v15381_v28, 1 }
 0x4ee   : > { %v8251_v32 = vsel %vm17085_vm2, %v8246_v59, %v8250_v26  ;;  %v15431_v30 = vsel %vm17086_vm11, %v8334_v35, %v8338_v48  ;;  %v8004_v60 = vor.u32 %v8002_v33, %v8000_v45  ;;  %v15460_v59 = vld [vmem:[#allocation2 + $0x64] sm:$0xff]  ;;  %vm17124_vm2 = vmmov %vm16996_vm0 }
 0x4ef   : > { %v6815_v18 = vpop.f32.mrf.mxu2  ;;  %17087 = vst [vmem:[#allocation66_spill] sm:$0xff] %v15431_v30  ;;  %v15453_v37 = vor.u32 %v7121_v13, %v7118_v43  ;;  %vm17129_vm11 = vmmov %vm16996_vm0 }
 0x4f0   : > { %v15420_v16 = vadd.f32 %v6815_v18, %v15270_v19  ;;  %v7606_v56 = vpop.f32.mrf.mxu0  ;;  %v15451_v8 = vsel %vm17090_vm9, %v8004_v60, %v15427_v51  ;;  %vm17139_vm9 = vmmov %vm16996_vm0 }
 0x4f1   : > { %v7650_v47 = vpop.f32.mrf.mxu1  ;;  %v15425_v6 = vadd.f32 %v7606_v56, %v15327_v62  ;;  %v7136_v62 = vsel %vm646_vm3, %v15344_v54, %v15417_v49  ;;  %v7123_v56 = vsel %vm646_vm3, %v15377_v41, %v15453_v37  ;;  %v10710_v41 = vld [vmem:[%s16574_s5 + $0x8] sm:$0xff] }
 0x4f2   : > { %v15434_v53 = vadd.f32 %v7650_v47, %v14612_v2  ;;  %v5569_v2 = vsel %vm17089_vm6, %v5564_v40, %v5568_v52  ;;  %v6793_v47 = vadd.f32 %v15005_v44, %v14872_v0  ;;  %v8264_v44 = vshll.u32 %v15451_v8, 16  ;;  %9309 = vmatpush.bf16.msra.mxu2 %v10710_v41  ;;  %vm17130_vm6 = vmmov %vm16996_vm0 }
 0x4f3   : > { %v15436_v19 = vpop.f32.mrf.mxu3  ;;  %8826 = vmatmul.bf16.gmra.mxu0 %v8251_v32  ;;  %v7151_v54 = vshrl.u32 %v5569_v2, 16  ;;  %v7154_v45 = vshll.u32 %v5569_v2, 16  ;;  %v16719_v32 = vrot.slane %v15460_v59, 1  ;;  %v5652_v40 = vsel %vm3076_vm5, %v17091_v58, %v5651_v46 }
 0x4f4   : > { %7689 = vmatmul.bf16.gmra.mxu1 %v7136_v62  ;;  %v6892_v5 = vadd.f32 %v15360_v3, %v6793_v47  ;;  %v8260_v62 = vshrl.u32 %v15375_v39, 16  ;;  %v15483_v60 = vrot.slane %v8264_v44, 1  ;;  %v17092_v2 = vrot.slane %v15384_v11, 1 }
 0x4f5   : > { %v7153_v13 = vrot.slane %v7151_v54, 2  ;;  %v8014_v39 = vshll.u32 %v15149_v50, 16  ;;  %v8348_v47 = vshrl.u32 %v15412_v57, 16  ;;  %v7138_v54 = vshrl.u32 %v5652_v40, 16 }
 0x4f6   : > { %v15496_v28 = vsel %vm3076_vm5, %v17092_v2, %v16719_v32  ;;  %v8010_v32 = vshrl.u32 %v15083_v61, 16 }
 0x4f7   : > { %v6817_v55 = vpop.f32.mrf.mxu2  ;;  %v7140_v41 = vrot.slane %v7138_v54, 2 }
 0x4f8   : > { %8737 = vmatmul.bf16.gmra.mxu3 %v15451_v8  ;;  %v15463_v0 = vadd.f32 %v6817_v55, %v15314_v63  ;;  %v7608_v18 = vpop.f32.mrf.mxu0  ;;  %v7156_v63 = vrot.slane %v7154_v45, 3  ;;  %v8262_v55 = vor.u32 %v8260_v62, %v8250_v26  ;;  %v7141_v45 = vshll.u32 %v5652_v40, 16 }
 0x4f9   : > { %v15466_v35 = vpop.f32.mrf.mxu1  ;;  %v15468_v3 = vadd.f32 %v7608_v18, %v6892_v5  ;;  %v8352_v5 = vshll.u32 %v15496_v28, 16  ;;  %v16722_v26 = vrot.slane %v17008_v22, 1  ;;  %v6803_v40 = vadd.f32 %v15212_v38, %v15060_v15 }
 0x4fa   : > { %v15501_v18 = vor.u32 %v7156_v63, %v7153_v13  ;;  %v8267_v57 = vsel %vm17093_vm15, %v8262_v55, %v15483_v60  ;;  %vm17140_vm15 = vmmov %vm16996_vm0 }
 0x4fb   : > { %v6899_v33 = vpop.f32.mrf.mxu3 }
 0x4fc   : > { %v15475_v43 = vadd.f32 %v6899_v33, %v15152_v27  ;;  %7783 = vmatmul.bf16.gmra.mxu2 %v7123_v56  ;;  %v10686_v27 = vld [vmem:[%s16572_s3 + $0x218] sm:$0xff]  ;;  %v8350_v56 = vor.u32 %v8348_v47, %v8338_v48  ;;  %v8354_v33 = vrot.slane %v8352_v5, 1  ;;  %v15515_v48 = vrot.slane %v8014_v39, 1 }
 0x4fd   : > { %8916 = vmatpush.bf16.msra.mxu1 %v10686_v27  ;;  %v7143_v27 = vrot.slane %v7141_v45, 3  ;;  %v17095_v47 = vld [vmem:[#allocation20_spill] sm:$0xff]  ;;  %v7158_v38 = vsel %vm646_vm3, %v15417_v49, %v15501_v18  ;;  %v17100_v45 = vld [vmem:[#allocation43_spill] sm:$0xff] }
 0x4fe   : > { %v5572_v5 = vor.u32 %v17095_v47, %v5568_v52  ;;  %v17097_v39 = vld [vmem:[#allocation28_spill] sm:$0xff]  ;;  %v6798_v52 = vadd.f32 %v15103_v10, %v17099_v12  ;;  %v15551_v10 = vld [vmem:[#allocation2 + $0x6c] sm:$0xff] }
 0x4ff   : > { %v6820_v44 = vpop.f32.mrf.mxu2  ;;  %v15544_v49 = vor.u32 %v7143_v27, %v7140_v41 }
 0x500   : > { %v15504_v58 = vadd.f32 %v6820_v44, %v15350_v20  ;;  %v7611_v2 = vpop.f32.mrf.mxu0  ;;  %v15518_v20 = vsel %vm16996_vm0, %v8350_v56, %v8354_v33  ;;  %v5577_v54 = vsel %vm17098_vm14, %v5572_v5, %v16722_v26  ;;  %v17108_v26 = vld [vmem:[#allocation3_spill] sm:$0xff]  ;;  %vm17146_vm14 = vmmov %vm16996_vm0 }
 0x501   : > { %v7655_v62 = vpop.f32.mrf.mxu1  ;;  %v15513_v13 = vadd.f32 %v7611_v2, %v15399_v7  ;;  %17094 = vst [vmem:[#allocation67_spill] sm:$0xff] %v15518_v20  ;;  %v17096_v7 = vld [vmem:[#allocation36_spill] sm:$0xff]  ;;  %v6897_v2 = vadd.f32 %v15436_v19, %v6798_v52  ;;  %v16725_v20 = vrot.slane %v17108_v26, 1 }
 0x502   : > { %v15521_v63 = vadd.f32 %v7655_v62, %v14649_v9  ;;  %v6743_v55 = vadd.f32 %v17097_v39, %v17096_v7  ;;  %v8012_v9 = vor.u32 %v8010_v32, %v15427_v51  ;;  %v7173_v51 = vshrl.u32 %v5577_v54, 16 }
 0x503   : > { %v6901_v61 = vpop.f32.mrf.mxu3  ;;  %8831 = vmatmul.bf16.gmra.mxu0 %v8267_v57  ;;  %v7176_v32 = vshll.u32 %v5577_v54, 16  ;;  %v7145_v39 = vsel %vm646_vm3, %v15453_v37, %v15544_v49  ;;  %v17103_v37 = vrot.slane %v15460_v59, 1 }
 0x504   : > { %v15526_v15 = vadd.f32 %v6901_v61, %v6803_v40  ;;  %7694 = vmatmul.bf16.gmra.mxu1 %v7158_v38  ;;  %v6842_v44 = vadd.f32 %v17100_v45, %v6743_v55  ;;  %v15542_v56 = vsel %vm17101_vm13, %v8012_v9, %v15515_v48  ;;  %v15548_v40 = vld [vmem:[#allocation2 + $0x60] sm:$0xff]  ;;  %v17102_v61 = vld [vmem:[#allocation52_spill] sm:$0xff]  ;;  %v16720_v9 = vrot.slane %v15551_v10, 1  ;;  %vm17156_vm13 = vmmov %vm16996_vm0 }
 0x505   : > { %v16721_v62 = vrot.slane %v15548_v40, 1  ;;  %v8280_v19 = vshll.u32 %v15542_v56, 16  ;;  %v7178_v12 = vrot.slane %v7176_v32, 3  ;;  %v8276_v45 = vshrl.u32 %v15451_v8, 16 }
 0x506   : > { %v7559_v47 = vadd.f32 %v17102_v61, %v6842_v44  ;;  %v15580_v44 = vsel %vm3076_vm5, %v17103_v37, %v16720_v9 }
 0x507   : > { %v6822_v57 = vpop.f32.mrf.mxu2  ;;  %v5654_v52 = vsel %vm3076_vm5, %v5651_v46, %v16721_v62  ;;  %v8368_v4 = vshll.u32 %v15580_v44, 16  ;;  %v17105_v46 = vld [vmem:[#allocation35_spill] sm:$0xff]  ;;  %v8018_v62 = vshrl.u32 %v15149_v50, 16 }
 0x508   : > { %8742 = vmatmul.bf16.gmra.mxu3 %v15542_v56  ;;  %v15555_v5 = vadd.f32 %v6822_v57, %v15389_v34  ;;  %v7613_v41 = vpop.f32.mrf.mxu0  ;;  %v7175_v34 = vrot.slane %v7173_v51, 2  ;;  %v8364_v57 = vshrl.u32 %v15496_v28, 16  ;;  %v17104_v51 = vld [vmem:[#allocation24_spill] sm:$0xff]  ;;  %v7160_v8 = vshrl.u32 %v5654_v52, 16 }
 0x509   : > { %v7657_v27 = vpop.f32.mrf.mxu1  ;;  %v15558_v38 = vadd.f32 %v7613_v41, %v6897_v2  ;;  %v8022_v2 = vshll.u32 %v15226_v23, 16  ;;  %v6738_v32 = vadd.f32 %v17105_v46, %v17104_v51  ;;  %v7163_v61 = vshll.u32 %v5654_v52, 16  ;;  %v17114_v46 = vld [vmem:[#allocation25_spill] sm:$0xff] }
 0x50a   : > { %v15560_v7 = vadd.f32 %v7657_v27, %v7559_v47  ;;  %v8278_v47 = vor.u32 %v8276_v45, %v15483_v60  ;;  %v15590_v27 = vor.u32 %v7178_v12, %v7175_v34  ;;  %v17112_v12 = vld [vmem:[#allocation55_spill] sm:$0xff] }
 0x50b   : > { %v6904_v55 = vpop.f32.mrf.mxu3  ;;  %v15601_v60 = vrot.slane %v8022_v2, 1  ;;  %v7165_v50 = vrot.slane %v7163_v61, 3 }
 0x50c   : > { %v15567_v54 = vadd.f32 %v6904_v55, %v15264_v17  ;;  %7788 = vmatmul.bf16.gmra.mxu2 %v7145_v39  ;;  %v15582_v17 = vrot.slane %v8280_v19, 1  ;;  %v8366_v39 = vor.u32 %v8364_v57, %v8354_v33  ;;  %v8370_v55 = vrot.slane %v8368_v4, 1  ;;  %v17106_v19 = vld [vmem:[#allocation7_spill] sm:$0xff] }
 0x50d   : > { %v6837_v37 = vadd.f32 %v17106_v19, %v6738_v32  ;;  %v7162_v57 = vrot.slane %v7160_v8, 2  ;;  %v17113_v4 = vrot.slane %v17008_v22, 1  ;;  %v7180_v2 = vsel %vm646_vm3, %v15501_v18, %v15590_v27 }
 0x50e   : > { %v8283_v33 = vsel %vm17109_vm4, %v8278_v47, %v15582_v17  ;;  %v15606_v34 = vsel %vm17110_vm7, %v8366_v39, %v8370_v55  ;;  %v17115_v47 = vld [vmem:[#allocation47_spill] sm:$0xff]  ;;  %v8020_v39 = vor.u32 %v8018_v62, %v15515_v48  ;;  %vm17159_vm4 = vmmov %vm16996_vm0 }
 0x50f   : > { %v7749_v41 = vpop.f32.mrf.mxu2  ;;  %17111 = vst [vmem:[#allocation36_spill] sm:$0xff] %v15606_v34  ;;  %v5580_v32 = vor.u32 %v17114_v46, %v17113_v4  ;;  %v15630_v61 = vor.u32 %v7165_v50, %v7162_v57  ;;  %v15636_v62 = vld [vmem:[#allocation2 + $0x74] sm:$0xff]  ;;  %vm17163_vm7 = vmmov %vm16996_vm0 }
 0x510   : > { %v15594_v9 = vadd.f32 %v7749_v41, %v15434_v53  ;;  %v7616_v28 = vpop.f32.mrf.mxu0  ;;  %v7554_v41 = vadd.f32 %v17115_v47, %v6837_v37  ;;  %v16723_v4 = vrot.slane %v15636_v62, 1  ;;  %v17119_v47 = vrot.slane %v15548_v40, 1  ;;  %v17138_v34 = vld [vmem:[#allocation39_spill] sm:$0xff] }
 0x511   : > { %v7660_v51 = vpop.f32.mrf.mxu1  ;;  %v15599_v52 = vadd.f32 %v7616_v28, %v15475_v43  ;;  %v5585_v8 = vsel %vm17116_vm8, %v5580_v32, %v16725_v20  ;;  %v15633_v28 = vld [vmem:[#allocation2 + $0x68] sm:$0xff]  ;;  %v7167_v57 = vsel %vm646_vm3, %v15544_v49, %v15630_v61  ;;  %v17120_v49 = vrot.slane %v15551_v10, 1  ;;  %vm17164_vm8 = vmmov %vm16996_vm0 }
 0x512   : > { %17107 = vst [vmem:[#allocation20_spill] sm:$0xff] %v15594_v9  ;;  %v15609_v53 = vadd.f32 %v7660_v51, %v17112_v12  ;;  %v7653_v22 = vadd.f32 %v15466_v35, %v7554_v41  ;;  %v7195_v18 = vshrl.u32 %v5585_v8, 16  ;;  %v7198_v37 = vshll.u32 %v5585_v8, 16 }
 0x513   : > { %v6906_v45 = vpop.f32.mrf.mxu3  ;;  %8836 = vmatmul.bf16.gmra.mxu0 %v8283_v33  ;;  %v16724_v48 = vrot.slane %v15633_v28, 1  ;;  %v8030_v8 = vshll.u32 %v15312_v36, 16  ;;  %v16731_v9 = vrot.slane %v17138_v34, 1 }
 0x514   : > { %v15615_v43 = vadd.f32 %v6906_v45, %v15309_v14  ;;  %7699 = vmatmul.bf16.gmra.mxu1 %v7180_v2  ;;  %v15628_v14 = vsel %vm17117_vm10, %v8020_v39, %v15601_v60  ;;  %v7197_v32 = vrot.slane %v7195_v18, 2  ;;  %v7200_v2 = vrot.slane %v7198_v37, 3  ;;  %vm17174_vm10 = vmmov %vm16996_vm0 }
 0x515   : > { %v8296_v12 = vshll.u32 %v15628_v14, 16  ;;  %v5656_v41 = vsel %vm3076_vm5, %v17119_v47, %v16724_v48  ;;  %v15664_v39 = vsel %vm3076_vm5, %v17120_v49, %v16723_v4  ;;  %v8026_v49 = vshrl.u32 %v15226_v23, 16  ;;  %v17122_v4 = vld [vmem:[#allocation4_spill] sm:$0xff] }
 0x516   : > { %v8384_v40 = vshll.u32 %v15664_v39, 16  ;;  %v7185_v18 = vshll.u32 %v5656_v41, 16  ;;  %v16727_v48 = vrot.slane %v17122_v4, 1 }
 0x517   : > { %v7751_v19 = vpop.f32.mrf.mxu2 }
 0x518   : > { %8747 = vmatmul.bf16.gmra.mxu3 %v15628_v14  ;;  %v15638_v51 = vadd.f32 %v7751_v19, %v7653_v22  ;;  %v7618_v35 = vpop.f32.mrf.mxu0  ;;  %v8380_v22 = vshrl.u32 %v15580_v44, 16  ;;  %v7182_v19 = vshrl.u32 %v5656_v41, 16  ;;  %v15682_v41 = vrot.slane %v8030_v8, 1 }
 0x519   : > { %v15640_v33 = vpop.f32.mrf.mxu1  ;;  %v15644_v45 = vadd.f32 %v7618_v35, %v15526_v15  ;;  %v8292_v15 = vshrl.u32 %v15542_v56, 16  ;;  %v15672_v35 = vor.u32 %v7200_v2, %v7197_v32  ;;  %v17126_v32 = vld [vmem:[#allocation31_spill] sm:$0xff]  ;;  %v7187_v23 = vrot.slane %v7185_v18, 3 }
 0x51a   : > { %17118 = vst [vmem:[#allocation28_spill] sm:$0xff] %v15638_v51  ;;  %v8034_v51 = vshrl.u32 %v15312_v36, 16 }
 0x51b   : > { %v6909_v50 = vpop.f32.mrf.mxu3  ;;  %v8294_v56 = vor.u32 %v8292_v15, %v15582_v17  ;;  %v7184_v15 = vrot.slane %v7182_v19, 2  ;;  %v8028_v19 = vor.u32 %v8026_v49, %v15601_v60  ;;  %v15718_v49 = vld [vmem:[#allocation2 + $0x7c] sm:$0xff] }
 0x51c   : > { %v15651_v46 = vadd.f32 %v6909_v50, %v15347_v1  ;;  %7793 = vmatmul.bf16.gmra.mxu2 %v7167_v57  ;;  %v15666_v1 = vrot.slane %v8296_v12, 1  ;;  %v8382_v57 = vor.u32 %v8380_v22, %v8370_v55  ;;  %v8386_v50 = vrot.slane %v8384_v40, 1  ;;  %v17128_v40 = vld [vmem:[#allocation37_spill] sm:$0xff] }
 0x51d   : > { %v17127_v22 = vrot.slane %v17108_v26, 1  ;;  %v15710_v18 = vsel %vm17130_vm6, %v8028_v19, %v15682_v41  ;;  %v17132_v19 = vrot.slane %v15633_v28, 1  ;;  %vm17194_vm6 = vmmov %vm16996_vm0 }
 0x51e   : > { %v8299_v17 = vsel %vm17123_vm12, %v8294_v56, %v15666_v1  ;;  %v15687_v55 = vsel %vm17124_vm2, %v8382_v57, %v8386_v50  ;;  %v7202_v56 = vsel %vm646_vm3, %v15590_v27, %v15672_v35  ;;  %v15712_v57 = vor.u32 %v7187_v23, %v7184_v15  ;;  %vm17178_vm12 = vmmov %vm16996_vm0 }
 0x51f   : > { %v7754_v37 = vpop.f32.mrf.mxu2  ;;  %17125 = vst [vmem:[#allocation43_spill] sm:$0xff] %v15687_v55  ;;  %v8312_v15 = vshll.u32 %v15710_v18, 16  ;;  %vm17182_vm2 = vmmov %vm16996_vm0 }
 0x520   : > { %v15675_v47 = vadd.f32 %v7754_v37, %v15521_v63  ;;  %v7621_v12 = vpop.f32.mrf.mxu0  ;;  %v5588_v37 = vor.u32 %v17128_v40, %v17127_v22  ;;  %v7189_v22 = vsel %vm646_vm3, %v15630_v61, %v15712_v57  ;;  %v17133_v61 = vrot.slane %v15636_v62, 1 }
 0x521   : > { %v7665_v44 = vpop.f32.mrf.mxu1  ;;  %v15680_v20 = vadd.f32 %v7621_v12, %v15567_v54  ;;  %v10685_v54 = vld [vmem:[%s16572_s3 + $0x210] sm:$0xff] }
 0x522   : > { %17121 = vst [vmem:[#allocation58_spill] sm:$0xff] %v15675_v47  ;;  %v15690_v63 = vadd.f32 %v7665_v44, %v17126_v32  ;;  %v5593_v26 = vsel %vm17129_vm11, %v5588_v37, %v16727_v48  ;;  %8917 = vmatpush.bf16.msra.mxu1 %v10685_v54  ;;  %v15715_v44 = vld [vmem:[#allocation2 + $0x70] sm:$0xff]  ;;  %v16728_v37 = vrot.slane %v15718_v49, 1  ;;  %vm17183_vm11 = vmmov %vm16996_vm0 }
 0x523   : > { %v6911_v2 = vpop.f32.mrf.mxu3  ;;  %8841 = vmatmul.bf16.gmra.mxu0 %v8299_v17  ;;  %v7217_v12 = vshrl.u32 %v5593_v26, 16  ;;  %v7220_v27 = vshll.u32 %v5593_v26, 16  ;;  %v16726_v60 = vrot.slane %v15715_v44, 1 }
 0x524   : > { %v15699_v8 = vadd.f32 %v6911_v2, %v15387_v21  ;;  %7704 = vmatmul.bf16.gmra.mxu1 %v7202_v56 }
 0x525   : > { %v7222_v56 = vrot.slane %v7220_v27, 3  ;;  %v5658_v26 = vsel %vm3076_vm5, %v17132_v19, %v16726_v60  ;;  %v8396_v27 = vshrl.u32 %v15664_v39, 16 }
 0x527   : > { %v7756_v21 = vpop.f32.mrf.mxu2 }
 0x528   : > { %8752 = vmatmul.bf16.gmra.mxu3 %v15710_v18  ;;  %v15721_v17 = vadd.f32 %v7756_v21, %v15560_v7  ;;  %v7623_v32 = vpop.f32.mrf.mxu0  ;;  %v7219_v7 = vrot.slane %v7217_v12, 2  ;;  %v15747_v21 = vsel %vm3076_vm5, %v17133_v61, %v16728_v37  ;;  %v8038_v12 = vshll.u32 %v15384_v11, 16 }
 0x529   : > { %v15723_v2 = vpop.f32.mrf.mxu1  ;;  %v15727_v23 = vadd.f32 %v7623_v32, %v15615_v43  ;;  %v8308_v43 = vshrl.u32 %v15628_v14, 16  ;;  %v8400_v28 = vshll.u32 %v15747_v21, 16  ;;  %v17134_v32 = vld [vmem:[#allocation23_spill] sm:$0xff]  ;;  %v7204_v14 = vshrl.u32 %v5658_v26, 16 }
 0x52a   : > { %17131 = vst [vmem:[#allocation52_spill] sm:$0xff] %v15721_v17  ;;  %v15757_v17 = vor.u32 %v7222_v56, %v7219_v7  ;;  %v8398_v61 = vor.u32 %v8396_v27, %v8386_v50  ;;  %v17142_v56 = vld [vmem:[#allocation12_spill] sm:$0xff]  ;;  %v17143_v27 = vrot.slane %v17122_v4, 1 }
 0x52b   : > { %v6914_v40 = vpop.f32.mrf.mxu3  ;;  %v8310_v60 = vor.u32 %v8308_v43, %v15666_v1  ;;  %v8402_v37 = vrot.slane %v8400_v28, 1  ;;  %v15768_v1 = vrot.slane %v8038_v12, 1  ;;  %v7206_v43 = vrot.slane %v7204_v14, 2  ;;  %v17144_v28 = vld [vmem:[#allocation27_spill] sm:$0xff]  ;;  %v17145_v12 = vld [vmem:[#allocation8_spill] sm:$0xff] }
 0x52c   : > { %v15734_v54 = vadd.f32 %v6914_v40, %v15420_v16  ;;  %7798 = vmatmul.bf16.gmra.mxu2 %v7189_v22  ;;  %v15749_v16 = vrot.slane %v8312_v15, 1  ;;  %v17135_v40 = vld [vmem:[#allocation38_spill] sm:$0xff]  ;;  %v7207_v22 = vshll.u32 %v5658_v26, 16  ;;  %v17136_v15 = vld [vmem:[#allocation49_spill] sm:$0xff] }
 0x52d   : > { %v6748_v19 = vadd.f32 %v17135_v40, %v17134_v32  ;;  %v15773_v7 = vsel %vm17140_vm15, %v8398_v61, %v8402_v37  ;;  %v5596_v40 = vor.u32 %v17144_v28, %v17143_v27  ;;  %v8036_v61 = vor.u32 %v8034_v51, %v15682_v41  ;;  %v15803_v41 = vld [vmem:[#allocation2 + $0x84] sm:$0xff]  ;;  %vm17202_vm15 = vmmov %vm16996_vm0 }
 0x52e   : > { %v8315_v50 = vsel %vm17139_vm9, %v8310_v60, %v15749_v16  ;;  %17141 = vst [vmem:[#allocation35_spill] sm:$0xff] %v15773_v7  ;;  %v7209_v36 = vrot.slane %v7207_v22, 3  ;;  %v7224_v60 = vsel %vm646_vm3, %v15672_v35, %v15757_v17  ;;  %v16729_v27 = vrot.slane %v15803_v41, 1  ;;  %vm17199_vm9 = vmmov %vm16996_vm0 }
 0x52f   : > { %v7759_v48 = vpop.f32.mrf.mxu2  ;;  %v6847_v55 = vadd.f32 %v17136_v15, %v6748_v19  ;;  %v5601_v14 = vsel %vm16996_vm0, %v5596_v40, %v16731_v9 }
 0x530   : > { %v15761_v47 = vadd.f32 %v7759_v48, %v15609_v53  ;;  %v7626_v39 = vpop.f32.mrf.mxu0  ;;  %v15797_v22 = vor.u32 %v7209_v36, %v7206_v43  ;;  %v7239_v35 = vshrl.u32 %v5601_v14, 16 }
 0x531   : > { %v7670_v32 = vpop.f32.mrf.mxu1  ;;  %v15766_v26 = vadd.f32 %v7626_v39, %v15651_v46  ;;  %v7564_v19 = vadd.f32 %v17145_v12, %v6847_v55  ;;  %v7242_v55 = vshll.u32 %v5601_v14, 16  ;;  %v15800_v39 = vld [vmem:[#allocation2 + $0x78] sm:$0xff]  ;;  %v17148_v12 = vrot.slane %v15715_v44, 1  ;;  %v17151_v14 = vld [vmem:[#allocation6_spill] sm:$0xff] }
 0x532   : > { %17137 = vst [vmem:[#allocation24_spill] sm:$0xff] %v15761_v47  ;;  %v15776_v53 = vadd.f32 %v7670_v32, %v17142_v56  ;;  %v16730_v51 = vrot.slane %v15800_v39, 1  ;;  %v7211_v43 = vsel %vm646_vm3, %v15712_v57, %v15797_v22  ;;  %v7241_v40 = vrot.slane %v7239_v35, 2 }
 0x533   : > { %v6916_v48 = vpop.f32.mrf.mxu3  ;;  %8846 = vmatmul.bf16.gmra.mxu0 %v8315_v50  ;;  %v7663_v4 = vadd.f32 %v15640_v33, %v7564_v19  ;;  %v17149_v19 = vrot.slane %v15718_v49, 1  ;;  %v8324_v35 = vshrl.u32 %v15710_v18, 16  ;;  %v17154_v18 = vld [vmem:[#allocation54_spill] sm:$0xff] }
 0x534   : > { %v15782_v46 = vadd.f32 %v6916_v48, %v15463_v0  ;;  %7709 = vmatmul.bf16.gmra.mxu1 %v7224_v60  ;;  %v15795_v0 = vsel %vm17146_vm14, %v8036_v61, %v15768_v1  ;;  %v7244_v60 = vrot.slane %v7242_v55, 3  ;;  %v17150_v61 = vld [vmem:[#allocation26_spill] sm:$0xff]  ;;  %v8046_v55 = vshll.u32 %v15460_v59, 16  ;;  %vm17217_vm14 = vmmov %vm16996_vm0 }
 0x535   : > { %v8328_v48 = vshll.u32 %v15795_v0, 16  ;;  %v15830_v57 = vsel %vm3076_vm5, %v17149_v19, %v16729_v27 }
 0x537   : > { %v7761_v15 = vpop.f32.mrf.mxu2  ;;  %v15837_v44 = vrot.slane %v8328_v48, 1 }
 0x538   : > { %8757 = vmatmul.bf16.gmra.mxu3 %v15795_v0  ;;  %v15805_v32 = vadd.f32 %v7761_v15, %v7663_v4  ;;  %v7628_v33 = vpop.f32.mrf.mxu0  ;;  %v8412_v4 = vshrl.u32 %v15747_v21, 16  ;;  %v8416_v15 = vshll.u32 %v15830_v57, 16 }
 0x539   : > { %v15807_v50 = vpop.f32.mrf.mxu1  ;;  %v15810_v56 = vadd.f32 %v7628_v33, %v15699_v8  ;;  %v5660_v8 = vsel %vm3076_vm5, %v17148_v12, %v16730_v51  ;;  %v8326_v51 = vor.u32 %v8324_v35, %v15749_v16 }
 0x53a   : > { %17147 = vst [vmem:[#allocation7_spill] sm:$0xff] %v15805_v32  ;;  %v7226_v33 = vshrl.u32 %v5660_v8, 16  ;;  %v7229_v12 = vshll.u32 %v5660_v8, 16  ;;  %v8414_v19 = vor.u32 %v8412_v4, %v8402_v37  ;;  %v8418_v27 = vrot.slane %v8416_v15, 1  ;;  %v17158_v37 = vld [vmem:[#allocation11_spill] sm:$0xff]  ;;  %v17161_v15 = vld [vmem:[#allocation40_spill] sm:$0xff] }
 0x53b   : > { %v6919_v36 = vpop.f32.mrf.mxu3  ;;  %v8331_v4 = vsel %vm17159_vm4, %v8326_v51, %v15837_v44  ;;  %vm17221_vm4 = vmmov %vm16996_vm0 }
 0x53c   : > { %v15818_v28 = vadd.f32 %v6919_v36, %v15504_v58  ;;  %7803 = vmatmul.bf16.gmra.mxu2 %v7211_v43  ;;  %v6753_v58 = vadd.f32 %v17151_v14, %v17150_v61  ;;  %v15840_v36 = vor.u32 %v7244_v60, %v7241_v40  ;;  %v17153_v14 = vld [vmem:[#allocation16_spill] sm:$0xff]  ;;  %v8042_v40 = vshrl.u32 %v15384_v11, 16  ;;  %v10709_v11 = vld [vmem:[%s16574_s5] sm:$0xff] }
 0x53d   : > { %v16734_v9 = vrot.slane %v17153_v14, 1  ;;  %v15853_v60 = vsel %vm17156_vm13, %v8414_v19, %v8418_v27  ;;  %v17162_v19 = vld [vmem:[#allocation56_spill] sm:$0xff]  ;;  %9310 = vmatpush.bf16.msra.mxu2 %v10709_v11  ;;  %vm17218_vm13 = vmmov %vm16996_vm0 }
 0x53e   : > { %v6852_v48 = vadd.f32 %v17154_v18, %v6753_v58  ;;  %17157 = vst [vmem:[#allocation25_spill] sm:$0xff] %v15853_v60  ;;  %v17160_v58 = vrot.slane %v17138_v34, 1  ;;  %v8044_v34 = vor.u32 %v8042_v40, %v15768_v1  ;;  %v15890_v40 = vld [vmem:[#allocation2 + $0x80] sm:$0xff] }
 0x53f   : > { %v7764_v43 = vpop.f32.mrf.mxu2 }
 0x540   : > { %v15844_v61 = vadd.f32 %v7764_v43, %v15690_v63  ;;  %v7631_v21 = vpop.f32.mrf.mxu0  ;;  %v15858_v63 = vrot.slane %v8046_v55, 1  ;;  %v5604_v35 = vor.u32 %v17161_v15, %v17160_v58  ;;  %v7228_v55 = vrot.slane %v7226_v33, 2 }
 0x541   : > { %v7675_v32 = vpop.f32.mrf.mxu1  ;;  %v15849_v7 = vadd.f32 %v7631_v21, %v15734_v54  ;;  %v7231_v43 = vrot.slane %v7229_v12, 3  ;;  %v7569_v51 = vadd.f32 %v17162_v19, %v6852_v48  ;;  %v17167_v19 = vrot.slane %v15800_v39, 1 }
 0x542   : > { %17152 = vst [vmem:[#allocation3_spill] sm:$0xff] %v15844_v61  ;;  %v15856_v8 = vadd.f32 %v7675_v32, %v17158_v37  ;;  %v7246_v32 = vsel %vm646_vm3, %v15757_v17, %v15840_v36  ;;  %v5609_v21 = vsel %vm17163_vm7, %v5604_v35, %v16734_v9  ;;  %v15885_v17 = vsel %vm17164_vm8, %v8044_v34, %v15858_v63  ;;  %vm17225_vm7 = vmmov %vm16996_vm0 }
 0x543   : > { %17155 = vst [vmem:[#allocation55_spill] sm:$0xff] %v15849_v7  ;;  %v6921_v16 = vpop.f32.mrf.mxu3  ;;  %8851 = vmatmul.bf16.gmra.mxu0 %v8331_v4  ;;  %v7668_v18 = vadd.f32 %v15723_v2, %v7569_v51  ;;  %v15888_v1 = vor.u32 %v7231_v43, %v7228_v55  ;;  %v7261_v12 = vshrl.u32 %v5609_v21, 16  ;;  %v7264_v48 = vshll.u32 %v5609_v21, 16  ;;  %vm17226_vm8 = vmmov %vm16996_vm0 }
 0x544   : > { %v15869_v54 = vadd.f32 %v6921_v16, %v15555_v5  ;;  %7714 = vmatmul.bf16.gmra.mxu1 %v7246_v32  ;;  %v10684_v5 = vld [vmem:[%s16572_s3 + $0x208] sm:$0xff]  ;;  %v16732_v37 = vrot.slane %v15890_v40, 1  ;;  %v8344_v35 = vshll.u32 %v15885_v17, 16  ;;  %v8054_v21 = vshll.u32 %v15551_v10, 16 }
 0x545   : > { %8918 = vmatpush.bf16.msra.mxu1 %v10684_v5  ;;  %v15893_v16 = vld [vmem:[#allocation2 + $0x8c] sm:$0xff]  ;;  %v7233_v32 = vsel %vm646_vm3, %v15797_v22, %v15888_v1  ;;  %v7263_v55 = vrot.slane %v7261_v12, 2  ;;  %v7266_v43 = vrot.slane %v7264_v48, 3  ;;  %v8428_v22 = vshrl.u32 %v15830_v57, 16 }
 0x546   : > { %v16733_v11 = vrot.slane %v15893_v16, 1  ;;  %v5662_v51 = vsel %vm3076_vm5, %v17167_v19, %v16732_v37 }
 0x547   : > { %v7766_v33 = vpop.f32.mrf.mxu2  ;;  %v7248_v12 = vshrl.u32 %v5662_v51, 16  ;;  %v8430_v19 = vor.u32 %v8428_v22, %v8418_v27  ;;  %v8056_v27 = vrot.slane %v8054_v21, 1 }
 0x548   : > { %8762 = vmatmul.bf16.gmra.mxu3 %v15885_v17  ;;  %v15895_v4 = vadd.f32 %v7766_v33, %v7668_v18  ;;  %v7633_v2 = vpop.f32.mrf.mxu0  ;;  %v8340_v18 = vshrl.u32 %v15795_v0, 16  ;;  %v8346_v33 = vrot.slane %v8344_v35, 1  ;;  %v17172_v35 = vld [vmem:[#allocation45_spill] sm:$0xff] }
 0x549   : > { %v15897_v58 = vpop.f32.mrf.mxu1  ;;  %v15900_v15 = vadd.f32 %v7633_v2, %v15782_v46  ;;  %v17168_v46 = vrot.slane %v15803_v41, 1  ;;  %v15925_v2 = vor.u32 %v7266_v43, %v7263_v55  ;;  %v16736_v60 = vrot.slane %v17172_v35, 1 }
 0x54a   : > { %17165 = vst [vmem:[#allocation47_spill] sm:$0xff] %v15895_v4  ;;  %v8342_v57 = vor.u32 %v8340_v18, %v15837_v44  ;;  %v8050_v55 = vshrl.u32 %v15460_v59, 16  ;;  %v17177_v44 = vld [vmem:[#allocation60_spill] sm:$0xff]  ;;  %v17180_v18 = vld [vmem:[#allocation29_spill] sm:$0xff]  ;;  %v7250_v21 = vrot.slane %v7248_v12, 2 }
 0x54b   : > { %17166 = vst [vmem:[#allocation4_spill] sm:$0xff] %v15900_v15  ;;  %v15917_v34 = vsel %vm3076_vm5, %v17168_v46, %v16733_v11  ;;  %v15923_v39 = vpop.f32.mrf.mxu3  ;;  %v17169_v46 = vld [vmem:[#allocation5_spill] sm:$0xff]  ;;  %v7268_v59 = vsel %vm646_vm3, %v15840_v36, %v15925_v2 }
 0x54c   : > { %7808 = vmatmul.bf16.gmra.mxu2 %v7233_v32  ;;  %v8432_v5 = vshll.u32 %v15917_v34, 16  ;;  %v7251_v32 = vshll.u32 %v5662_v51, 16  ;;  %v17170_v11 = vld [vmem:[#allocation9_spill] sm:$0xff] }
 0x54d   : > { %v6758_v9 = vadd.f32 %v17170_v11, %v17169_v46  ;;  %v17176_v11 = vld [vmem:[#allocation32_spill] sm:$0xff]  ;;  %v17181_v46 = vld [vmem:[#allocation10_spill] sm:$0xff] }
 0x54e   : > { %v15927_v37 = vrot.slane %v8432_v5, 1  ;;  %v17179_v5 = vrot.slane %v17153_v14, 1 }
 0x54f   : > { %v7769_v48 = vpop.f32.mrf.mxu2  ;;  %v6857_v51 = vadd.f32 %v17176_v11, %v6758_v9  ;;  %v15970_v11 = vld [vmem:[#allocation2 + $0x94] sm:$0xff] }
 0x550   : > { %v15933_v4 = vadd.f32 %v7769_v48, %v15776_v53  ;;  %v7636_v0 = vpop.f32.mrf.mxu0  ;;  %v15942_v43 = vsel %vm17174_vm10, %v8430_v19, %v15927_v37  ;;  %v8347_v53 = vsel %vm17178_vm12, %v8342_v57, %v8346_v33  ;;  %v5612_v48 = vor.u32 %v17180_v18, %v17179_v5  ;;  %vm17230_vm10 = vmmov %vm16996_vm0 }
 0x551   : > { %v7680_v61 = vpop.f32.mrf.mxu1  ;;  %v15937_v47 = vadd.f32 %v7636_v0, %v15818_v28  ;;  %17175 = vst [vmem:[#allocation23_spill] sm:$0xff] %v15942_v43  ;;  %v8052_v28 = vor.u32 %v8050_v55, %v15858_v63  ;;  %v7253_v19 = vrot.slane %v7251_v32, 3  ;;  %v7574_v9 = vadd.f32 %v17181_v46, %v6857_v51  ;;  %v15964_v0 = vld [vmem:[#allocation2 + $0x88] sm:$0xff]  ;;  %vm17231_vm12 = vmmov %vm16996_vm0 }
 0x552   : > { %17171 = vst [vmem:[#allocation31_spill] sm:$0xff] %v15933_v4  ;;  %v15946_v22 = vadd.f32 %v7680_v61, %v17177_v44  ;;  %v5617_v61 = vsel %vm17182_vm2, %v5612_v48, %v16736_v60  ;;  %v16735_v36 = vrot.slane %v15964_v0, 1  ;;  %v8062_v48 = vshll.u32 %v15636_v62, 16  ;;  %vm17233_vm2 = vmmov %vm16996_vm0 }
 0x553   : > { %17173 = vst [vmem:[#allocation37_spill] sm:$0xff] %v15937_v47  ;;  %8856 = vmatmul.bf16.gmra.mxu0 %v8347_v53  ;;  %v15961_v14 = vsel %vm17183_vm11, %v8052_v28, %v8056_v27  ;;  %v7673_v57 = vadd.f32 %v15807_v50, %v7574_v9  ;;  %v15968_v12 = vor.u32 %v7253_v19, %v7250_v21  ;;  %v7283_v32 = vshrl.u32 %v5617_v61, 16  ;;  %v15972_v51 = vpop.f32.mrf.mxu3  ;;  %vm17236_vm11 = vmmov %vm16996_vm0 }
 0x554   : > { %7719 = vmatmul.bf16.gmra.mxu1 %v7268_v59  ;;  %v7286_v55 = vshll.u32 %v5617_v61, 16  ;;  %v8360_v53 = vshll.u32 %v15961_v14, 16  ;;  %v17186_v59 = vrot.slane %v15890_v40, 1  ;;  %v16737_v21 = vrot.slane %v15970_v11, 1 }
 0x555   : > { %v7255_v19 = vsel %vm646_vm3, %v15888_v1, %v15968_v12  ;;  %v7285_v46 = vrot.slane %v7283_v32, 2  ;;  %v8356_v61 = vshrl.u32 %v15885_v17, 16  ;;  %v8058_v32 = vshrl.u32 %v15551_v10, 16 }
 0x556   : > { %v5664_v28 = vsel %vm3076_vm5, %v17186_v59, %v16735_v36  ;;  %v7288_v9 = vrot.slane %v7286_v55, 3  ;;  %v16005_v55 = vrot.slane %v8062_v48, 1 }
 0x557   : > { %v7771_v63 = vpop.f32.mrf.mxu2  ;;  %v7270_v36 = vshrl.u32 %v5664_v28, 16  ;;  %v7273_v60 = vshll.u32 %v5664_v28, 16  ;;  %v8358_v1 = vor.u32 %v8356_v61, %v8346_v33  ;;  %v8060_v33 = vor.u32 %v8058_v32, %v8056_v27  ;;  %v17201_v32 = vld [vmem:[#allocation53_spill] sm:$0xff] }
 0x558   : > { %8767 = vmatmul.bf16.gmra.mxu3 %v15961_v14  ;;  %v15974_v44 = vadd.f32 %v7771_v63, %v7673_v57  ;;  %v7638_v50 = vpop.f32.mrf.mxu0  ;;  %v17187_v57 = vrot.slane %v15893_v16, 1  ;;  %v17188_v63 = vld [vmem:[#allocation41_spill] sm:$0xff]  ;;  %v16012_v4 = vor.u32 %v7288_v9, %v7285_v46  ;;  %v17197_v46 = vld [vmem:[#allocation46_spill] sm:$0xff] }
 0x559   : > { %v15977_v5 = vpop.f32.mrf.mxu1  ;;  %v15980_v18 = vadd.f32 %v7638_v50, %v15869_v54  ;;  %v15993_v54 = vrot.slane %v8360_v53, 1  ;;  %v17189_v50 = vld [vmem:[#allocation22_spill] sm:$0xff]  ;;  %v17190_v53 = vld [vmem:[#allocation17_spill] sm:$0xff]  ;;  %v16033_v27 = vsel %vm17199_vm9, %v8060_v33, %v16005_v55  ;;  %vm17239_vm9 = vmmov %vm16996_vm0 }
 0x55a   : > { %17184 = vst [vmem:[#allocation38_spill] sm:$0xff] %v15974_v44  ;;  %v16000_v40 = vsel %vm3076_vm5, %v17187_v57, %v16737_v21  ;;  %v6763_v59 = vadd.f32 %v17189_v50, %v17188_v63  ;;  %v17192_v57 = vld [vmem:[#allocation34_spill] sm:$0xff]  ;;  %v7272_v50 = vrot.slane %v7270_v36, 2 }
 0x55b   : > { %17185 = vst [vmem:[#allocation49_spill] sm:$0xff] %v15980_v18  ;;  %v8448_v17 = vshll.u32 %v16000_v40, 16  ;;  %v8363_v10 = vsel %vm17194_vm6, %v8358_v1, %v15993_v54  ;;  %v17196_v18 = vrot.slane %v17172_v35, 1  ;;  %v16026_v47 = vpop.f32.mrf.mxu3  ;;  %vm17237_vm6 = vmmov %vm16996_vm0 }
 0x55c   : > { %7813 = vmatmul.bf16.gmra.mxu2 %v7255_v19  ;;  %v17191_v19 = vshll.u32 %v17190_v53, 16  ;;  %v6862_v21 = vadd.f32 %v17192_v57, %v6763_v59  ;;  %v17198_v59 = vld [vmem:[#allocation62_spill] sm:$0xff]  ;;  %v17203_v57 = vld [vmem:[#allocation57_spill] sm:$0xff] }
 0x55d   : > { %v5620_v9 = vor.u32 %v17197_v46, %v17196_v18  ;;  %v8450_v1 = vrot.slane %v8448_v17, 1  ;;  %v16043_v18 = vld [vmem:[#allocation2 + $0x9c] sm:$0xff] }
 0x55e   : > { %v16010_v44 = vrot.slane %v17191_v19, 1  ;;  %v7275_v19 = vrot.slane %v7273_v60, 3  ;;  %v7290_v60 = vsel %vm646_vm3, %v15925_v2, %v16012_v4 }
 0x55f   : > { %v7774_v43 = vpop.f32.mrf.mxu2 }
 0x560   : > { %v16016_v63 = vadd.f32 %v7774_v43, %v15856_v8  ;;  %v8822_v28 = vpop.f32.mrf.mxu0  ;;  %v8444_v43 = vshrl.u32 %v15917_v34, 16  ;;  %v5625_v35 = vsel %vm17202_vm15, %v5620_v9, %v16010_v44  ;;  %v17204_v34 = vld [vmem:[#allocation59_spill] sm:$0xff]  ;;  %v16049_v46 = vor.u32 %v7275_v19, %v7272_v50  ;;  %v17209_v19 = vld [vmem:[#allocation33_spill] sm:$0xff]  ;;  %vm17240_vm15 = vmmov %vm16996_vm0 }
 0x561   : > { %v7685_v48 = vpop.f32.mrf.mxu1  ;;  %v16021_v61 = vadd.f32 %v8822_v28, %v15923_v39  ;;  %v17200_v39 = vld [vmem:[#allocation44_spill] sm:$0xff]  ;;  %v7579_v28 = vadd.f32 %v17203_v57, %v6862_v21  ;;  %v7305_v2 = vshrl.u32 %v5625_v35, 16  ;;  %v17206_v21 = vld [vmem:[#allocation42_spill] sm:$0xff]  ;;  %v8158_v50 = vrot.slane %v16043_v18, 1 }
 0x562   : > { %17193 = vst [vmem:[#allocation39_spill] sm:$0xff] %v16016_v63  ;;  %v16029_v8 = vadd.f32 %v7685_v48, %v17198_v59  ;;  %v6773_v36 = vadd.f32 %v17201_v32, %v17200_v39  ;;  %v8446_v33 = vor.u32 %v8444_v43, %v15927_v37  ;;  %v8376_v48 = vshll.u32 %v16033_v27, 16  ;;  %v17207_v32 = vld [vmem:[#allocation48_spill] sm:$0xff]  ;;  %v17212_v63 = vld [vmem:[#allocation13_spill] sm:$0xff] }
 0x563   : > { %17195 = vst [vmem:[#allocation12_spill] sm:$0xff] %v16021_v61  ;;  %8861 = vmatmul.bf16.gmra.mxu0 %v8363_v10  ;;  %v7678_v59 = vadd.f32 %v15897_v58, %v7579_v28  ;;  %v16052_v10 = vld [vmem:[#allocation2 + $0x90] sm:$0xff]  ;;  %v7308_v43 = vshll.u32 %v5625_v35, 16  ;;  %v17208_v58 = vld [vmem:[#allocation50_spill] sm:$0xff] }
 0x564   : > { %7724 = vmatmul.bf16.gmra.mxu1 %v7290_v60  ;;  %v6872_v17 = vadd.f32 %v17204_v34, %v6773_v36  ;;  %v16056_v39 = vsel %vm16996_vm0, %v8446_v33, %v8450_v1  ;;  %v6768_v60 = vadd.f32 %v17207_v32, %v17206_v21  ;;  %v16061_v36 = vld [vmem:[#allocation2 + $0xa4] sm:$0xff]  ;;  %v16066_v57 = vadd.f32 %v17209_v19, %v17208_v58 }
 0x565   : > { %17205 = vst [vmem:[#allocation27_spill] sm:$0xff] %v16056_v39  ;;  %v17210_v28 = vld [vmem:[#allocation18_spill] sm:$0xff]  ;;  %v8372_v32 = vshrl.u32 %v15961_v14, 16  ;;  %v16073_v35 = vrot.slane %v8376_v48, 1  ;;  %v17215_v58 = vrot.slane %v15964_v0, 1  ;;  %v10683_v14 = vld [vmem:[%s16572_s3 + $0x200] sm:$0xff] }
 0x566   : > { %v7589_v34 = vadd.f32 %v17210_v28, %v6872_v17  ;;  %v7877_v39 = vld [vmem:[#allocation2 + $0xac] sm:$0x3]  ;;  %v6867_v21 = vadd.f32 %v17212_v63, %v6768_v60  ;;  %v7277_v17 = vsel %vm646_vm3, %v15968_v12, %v16049_v46  ;;  %v7310_v48 = vrot.slane %v7308_v43, 3  ;;  %8919 = vmatpush.bf16.msra.mxu1 %v10683_v14 }
 0x567   : > { %v7776_v37 = vpop.f32.mrf.mxu2  ;;  %v8160_v60 = vrot.slane %v16061_v36, 1  ;;  %v8125_v19 = vunpack.c.l.b16 %v7877_v39  ;;  %v8374_v12 = vor.u32 %v8372_v32, %v15993_v54  ;;  %v8070_v0 = vshll.u32 %v15718_v49, 16 }
 0x568   : > { %8772 = vmatmul.bf16.gmra.mxu3 %v16033_v27  ;;  %v16069_v9 = vadd.f32 %v7776_v37, %v7678_v59  ;;  %v8824_v33 = vpop.f32.mrf.mxu0  ;;  %v7307_v59 = vrot.slane %v7305_v2, 2  ;;  %v17214_v37 = vrot.slane %v16052_v10, 1  ;;  %v8730_v2 = vpop.f32.mrf.mxu3  ;;  %v8460_v28 = vshrl.u32 %v16000_v40, 16 }
 0x569   : > { %v7687_v61 = vpop.f32.mrf.mxu1  ;;  %v16076_v15 = vadd.f32 %v8824_v33, %v15972_v51  ;;  %v17216_v51 = vrot.slane %v15970_v11, 1  ;;  %v8161_v43 = vsel %vm3076_vm5, %v8158_v50, %v8160_v60  ;;  %v8066_v32 = vshrl.u32 %v15636_v62, 16 }
 0x56a   : > { %17211 = vst [vmem:[#allocation8_spill] sm:$0xff] %v16069_v9  ;;  %v16078_v30 = vadd.f32 %v7687_v61, %v7589_v34  ;;  %v5666_v63 = vsel %vm3076_vm5, %v17215_v58, %v17214_v37  ;;  %v16099_v58 = vpack.c.b16 %v8125_v19, %v8125_v19  ;;  %v8480_v39 = vshll.u32 %v8161_v43, 16 }
 0x56b   : > { %17213 = vst [vmem:[#allocation26_spill] sm:$0xff] %v16076_v15  ;;  %v8159_v61 = vsel %vm3076_vm5, %v17216_v51, %v8158_v50  ;;  %v7292_v33 = vshrl.u32 %v5666_v63, 16  ;;  %v7295_v37 = vshll.u32 %v5666_v63, 16  ;;  %v8462_v51 = vor.u32 %v8460_v28, %v8450_v1 }
 0x56c   : > { %7818 = vmatmul.bf16.gmra.mxu2 %v7277_v17  ;;  %v8464_v34 = vshll.u32 %v8159_v61, 16  ;;  %v8476_v15 = vshrl.u32 %v8159_v61, 16  ;;  %v16101_v54 = vor.u32 %v7310_v48, %v7307_v59  ;;  %v8379_v17 = vsel %vm17217_vm14, %v8374_v12, %v16073_v35  ;;  %vm17242_vm14 = vmmov %vm16996_vm0 }
 0x56d   : > { %v8162_v40 = vrot.slane %v16099_v58, 1  ;;  %v16110_v14 = vrot.slane %v8070_v0, 1  ;;  %v8482_v62 = vrot.slane %v8480_v39, 1  ;;  %v8492_v12 = vshrl.u32 %v8161_v43, 16 }
 0x56e   : > { %v8466_v9 = vrot.slane %v8464_v34, 1  ;;  %v7294_v0 = vrot.slane %v7292_v33, 2  ;;  %v7297_v28 = vrot.slane %v7295_v37, 3  ;;  %v8068_v33 = vor.u32 %v8066_v32, %v16005_v55  ;;  %v17223_v37 = vld [vmem:[#allocation51_spill] sm:$0xff] }
 0x56f   : > { %v7779_v7 = vpop.f32.mrf.mxu2  ;;  %v16121_v48 = vsel %vm3076_vm5, %v8160_v60, %v8162_v40  ;;  %v8494_v43 = vor.u32 %v8492_v12, %v8482_v62 }
 0x570   : > { %v16108_v63 = vadd.f32 %v7779_v7, %v15946_v22  ;;  %v8827_v50 = vpop.f32.mrf.mxu0  ;;  %v16113_v1 = vsel %vm17218_vm13, %v8462_v51, %v8466_v9  ;;  %v8478_v61 = vor.u32 %v8476_v15, %v8466_v9  ;;  %v17219_v7 = vld [vmem:[#allocation63_spill] sm:$0xff]  ;;  %v8496_v34 = vshll.u32 %v16121_v48, 16  ;;  %v17222_v51 = vld [vmem:[#allocation14_spill] sm:$0xff]  ;;  %vm17243_vm13 = vmmov %vm16996_vm0 }
 0x571   : > { %v7690_v19 = vpop.f32.mrf.mxu1  ;;  %v16116_v59 = vadd.f32 %v8827_v50, %v16026_v47  ;;  %v7312_v15 = vsel %vm646_vm3, %v16012_v4, %v16101_v54  ;;  %v17220_v47 = vshrl.u32 %v17190_v53, 16  ;;  %v7584_v39 = vadd.f32 %v17222_v51, %v6867_v21  ;;  %v17224_v4 = vld [vmem:[#allocation61_spill] sm:$0xff] }
 0x572   : > { %v16124_v22 = vadd.f32 %v7690_v19, %v17219_v7  ;;  %v16134_v60 = vsel %vm17221_vm4, %v8478_v61, %v8482_v62  ;;  %v5631_v50 = vpack.c.b16 %v17223_v37, %v17223_v37  ;;  %v16140_v19 = vrot.slane %v8496_v34, 1  ;;  %v17227_v7 = vld [vmem:[#allocation65_spill] sm:$0xff]  ;;  %vm17244_vm4 = vmmov %vm16996_vm0 }
 0x573   : > { %8866 = vmatmul.bf16.gmra.mxu0 %v8379_v17  ;;  %v5628_v9 = vor.u32 %v17220_v47, %v16010_v44  ;;  %v6877_v17 = vadd.f32 %v17224_v4, %v16066_v57  ;;  %v7683_v53 = vadd.f32 %v15977_v5, %v7584_v39  ;;  %v8733_v44 = vpop.f32.mrf.mxu3  ;;  %v16147_v61 = vsel %vm17225_vm7, %v8068_v33, %v16110_v14  ;;  %vm17272_vm7 = vmmov %vm16996_vm0 }
 0x574   : > { %7729 = vmatmul.bf16.gmra.mxu1 %v7312_v15  ;;  %v16151_v21 = vsel %vm17226_vm8, %v8494_v43, %v16140_v19  ;;  %v7298_v32 = vor.u32 %v7297_v28, %v7294_v0  ;;  %v16157_v15 = vrot.slane %v5631_v50, 1  ;;  %v8392_v43 = vshll.u32 %v16147_v61, 16  ;;  %vm17273_vm8 = vmmov %vm16996_vm0 }
 0x575   : > { %v7327_v62 = vshrl.u32 %v5628_v9, 16  ;;  %v7330_v12 = vshll.u32 %v5628_v9, 16  ;;  %v7594_v34 = vadd.f32 %v17227_v7, %v6877_v17  ;;  %v17228_v9 = vrot.slane %v16052_v10, 1 }
 0x576   : > { %v7299_v33 = vsel %vm646_vm3, %v16049_v46, %v7298_v32  ;;  %v8388_v50 = vshrl.u32 %v16033_v27, 16  ;;  %v8394_v4 = vrot.slane %v8392_v43, 1  ;;  %v8074_v27 = vshrl.u32 %v15718_v49, 16 }
 0x577   : > { %v7781_v55 = vpop.f32.mrf.mxu2  ;;  %v7329_v0 = vrot.slane %v7327_v62, 2  ;;  %v7332_v28 = vrot.slane %v7330_v12, 3  ;;  %v5668_v37 = vsel %vm3076_vm5, %v17228_v9, %v16157_v15  ;;  %vm17229_vm5 = vmmov %vm16996_vm0 }
 0x578   : > { %8777 = vmatmul.bf16.gmra.mxu3 %v16147_v61  ;;  %v16155_v57 = vadd.f32 %v7781_v55, %v7683_v53  ;;  %v8829_v5 = vpop.f32.mrf.mxu0  ;;  %v7314_v55 = vshrl.u32 %v5668_v37, 16  ;;  %v7317_v7 = vshll.u32 %v5668_v37, 16 }
 0x579   : > { %v7692_v47 = vpop.f32.mrf.mxu1  ;;  %v16159_v51 = vadd.f32 %v8829_v5, %v8730_v2  ;;  %v8078_v2 = vshll.u32 %v15803_v41, 16  ;;  %v7333_v53 = vor.u32 %v7332_v28, %v7329_v0 }
 0x57a   : > { %v16161_v39 = vadd.f32 %v7692_v47, %v7594_v34  ;;  %v8390_v34 = vor.u32 %v8388_v50, %v16073_v35  ;;  %v7316_v35 = vrot.slane %v7314_v55, 2  ;;  %v7319_v28 = vrot.slane %v7317_v7, 3 }
 0x57b   : > { %v8735_v46 = vpop.f32.mrf.mxu3  ;;  %v8080_v43 = vrot.slane %v8078_v2, 1  ;;  %v7334_v0 = vsel %vm646_vm3, %v16101_v54, %v7333_v53 }
 0x57c   : > { %7823 = vmatmul.bf16.gmra.mxu2 %v7299_v33  ;;  %v8395_v33 = vsel %vm17229_vm5, %v8390_v34, %v8394_v4  ;;  %v7320_v37 = vor.u32 %v7319_v28, %v7316_v35  ;;  %v8086_v34 = vshll.u32 %v15893_v16, 16 }
 0x57e   : > { %v7321_v55 = vsel %vm646_vm3, %v7298_v32, %v7320_v37  ;;  %v8088_v35 = vrot.slane %v8086_v34, 1 }
 0x57f   : > { %v7784_v17 = vpop.f32.mrf.mxu2 }
 0x580   : > { %v16174_v62 = vadd.f32 %v7784_v17, %v16029_v8  ;;  %v8832_v12 = vpop.f32.mrf.mxu0  ;;  %v8076_v8 = vor.u32 %v8074_v27, %v16110_v14  ;;  %v8404_v14 = vshrl.u32 %v16147_v61, 16  ;;  %v8082_v61 = vshrl.u32 %v15803_v41, 16 }
 0x581   : > { %v7695_v5 = vpop.f32.mrf.mxu1  ;;  %v16176_v10 = vadd.f32 %v8832_v12, %v8733_v44 }
 0x582   : > { %v7696_v47 = vadd.f32 %v7695_v5, %v15273_v42  ;;  %v8081_v9 = vsel %vm17230_vm10, %v8076_v8, %v8080_v43  ;;  %v7339_v5 = vshll.u32 %v16157_v15, 16  ;;  %v8406_v27 = vor.u32 %v8404_v14, %v8394_v4 }
 0x583   : > { %8871 = vmatmul.bf16.gmra.mxu0 %v8395_v33  ;;  %v8738_v17 = vpop.f32.mrf.mxu3  ;;  %v8408_v53 = vshll.u32 %v8081_v9, 16  ;;  %v8084_v4 = vor.u32 %v8082_v61, %v8080_v43 }
 0x584   : > { %7734 = vmatmul.bf16.gmra.mxu1 %v7334_v0 }
 0x585   : > { %v8410_v7 = vrot.slane %v8408_v53, 1 }
 0x587   : > { %v7786_v44 = vpop.f32.mrf.mxu2  ;;  %v8411_v28 = vsel %vm17231_vm12, %v8406_v27, %v8410_v7  ;;  %v8094_v27 = vshll.u32 %v15970_v11, 16 }
 0x588   : > { %8782 = vmatmul.bf16.gmra.mxu3 %v8081_v9  ;;  %v16186_v42 = vadd.f32 %v7786_v44, %v16078_v30  ;;  %v8834_v49 = vpop.f32.mrf.mxu0  ;;  %v7336_v30 = vshrl.u32 %v16157_v15, 16  ;;  %v7341_v44 = vrot.slane %v7339_v5, 3  ;;  %v17232_v15 = vld [vmem:[#allocation15_spill] sm:$0xff] }
 0x589   : > { %v7697_v50 = vpop.f32.mrf.mxu1  ;;  %v16188_v2 = vadd.f32 %v8834_v49, %v8735_v46 }
 0x58a   : > { %v7698_v54 = vadd.f32 %v7697_v50, %v15317_v24  ;;  %v7338_v8 = vrot.slane %v7336_v30, 2  ;;  %v8420_v30 = vshrl.u32 %v8081_v9, 16 }
 0x58b   : > { %v8740_v49 = vpop.f32.mrf.mxu3 }
 0x58c   : > { %7828 = vmatmul.bf16.gmra.mxu2 %v7321_v55 }
 0x58f   : > { %v7789_v12 = vpop.f32.mrf.mxu2 }
 0x590   : > { %v16197_v46 = vadd.f32 %v7789_v12, %v16124_v22  ;;  %v8837_v33 = vpop.f32.mrf.mxu0  ;;  %v8089_v22 = vsel %vm17233_vm2, %v8084_v4, %v8088_v35 }
 0x591   : > { %v7700_v24 = vpop.f32.mrf.mxu1  ;;  %v16199_v0 = vadd.f32 %v8837_v33, %v8738_v17  ;;  %v7342_v17 = vor.u32 %v7341_v44, %v7338_v8  ;;  %v8424_v34 = vshll.u32 %v8089_v22, 16  ;;  %v8090_v44 = vshrl.u32 %v15893_v16, 16 }
 0x592   : > { %v7701_v32 = vadd.f32 %v7700_v24, %v15353_v31  ;;  %v8422_v24 = vor.u32 %v8420_v30, %v8410_v7 }
 0x593   : > { %8876 = vmatmul.bf16.gmra.mxu0 %v8411_v28  ;;  %v7343_v12 = vsel %vm646_vm3, %v7320_v37, %v7342_v17  ;;  %v8743_v43 = vpop.f32.mrf.mxu3  ;;  %v8426_v5 = vrot.slane %v8424_v34, 1  ;;  %v8096_v37 = vrot.slane %v8094_v27, 1  ;;  %vm17234_vm3 = vmmov %vm16996_vm0  ;;  %v10691_v17 = vld [vmem:[%s11383_s26 + $0x14] sm:$0xff] }
 0x594   : > { %8920 = vmatmul.bf16.vlgmr.msra.gmra.mxu1 %v17232_v15  ;;  %v8092_v15 = vor.u32 %v8090_v44, %v8088_v35  ;;  %v8102_v35 = vshll.u32 %v16043_v18, 16  ;;  %v17238_v44 = vld [vmem:[#allocation21_spill] sm:$0xff] }
 0x595   : > { %v8427_v9 = vsel %vm17234_vm3, %v8422_v24, %v8426_v5 }
 0x596   : > { %v8097_v7 = vsel %vm17236_vm11, %v8092_v15, %v8096_v37 }
 0x597   : > { %v7791_v50 = vpop.f32.mrf.mxu2  ;;  %v8440_v34 = vshll.u32 %v8097_v7, 16 }
 0x598   : > { %8787 = vmatmul.bf16.gmra.mxu3 %v8089_v22  ;;  %v16207_v53 = vadd.f32 %v7791_v50, %v16161_v39  ;;  %v8839_v31 = vpop.f32.mrf.mxu0 }
 0x599   : > { %v7702_v41 = vpop.f32.mrf.mxu1  ;;  %v16209_v55 = vadd.f32 %v8839_v31, %v8740_v49  ;;  %v17235_v49 = vld [vmem:[#allocation19_spill] sm:$0xff]  ;;  %v8442_v30 = vrot.slane %v8440_v34, 1  ;;  %v8106_v34 = vshrl.u32 %v16043_v18, 16 }
 0x59a   : > { %v7703_v14 = vadd.f32 %v7702_v41, %v15392_v25 }
 0x59b   : > { %v8745_v4 = vpop.f32.mrf.mxu3 }
 0x59c   : > { %7833 = vmatmul.bf16.gmra.mxu2 %v7343_v12  ;;  %v8436_v12 = vshrl.u32 %v8089_v22, 16 }
 0x59e   : > { %v8438_v27 = vor.u32 %v8436_v12, %v8426_v5 }
 0x59f   : > { %v7794_v33 = vpop.f32.mrf.mxu2 }
 0x5a0   : > { %v16214_v61 = vadd.f32 %v7794_v33, %v7696_v47  ;;  %v8842_v39 = vpop.f32.mrf.mxu0 }
 0x5a1   : > { %v7705_v28 = vpop.f32.mrf.mxu1  ;;  %v16216_v8 = vadd.f32 %v8842_v39, %v8743_v43  ;;  %v8098_v39 = vshrl.u32 %v15970_v11, 16  ;;  %v8452_v11 = vshrl.u32 %v8097_v7, 16 }
 0x5a2   : > { %v7706_v25 = vadd.f32 %v7705_v28, %v15425_v6  ;;  %v8104_v28 = vrot.slane %v8102_v35, 1 }
 0x5a3   : > { %8881 = vmatmul.bf16.gmra.mxu0 %v8427_v9  ;;  %v8100_v22 = vor.u32 %v8098_v39, %v8096_v37 }
 0x5a4   : > { %8925 = vmatmul.bf16.gmra.mxu1 %v17235_v49  ;;  %v8108_v35 = vor.u32 %v8106_v34, %v8104_v28 }
 0x5a5   : > { %v8105_v9 = vsel %vm17239_vm9, %v8100_v22, %v8104_v28 }
 0x5a6   : > { %v8468_v22 = vshrl.u32 %v8105_v9, 16 }
 0x5a7   : > { %v7796_v47 = vpop.f32.mrf.mxu2 }
 0x5a8   : > { %8792 = vmatmul.bf16.gmra.mxu3 %v8097_v7  ;;  %v16223_v50 = vadd.f32 %v7796_v47, %v7698_v54  ;;  %v8844_v31 = vpop.f32.mrf.mxu0  ;;  %v17241_v7 = vld [vmem:[#allocation64_spill] sm:$0xff] }
 0x5a9   : > { %v7707_v41 = vpop.f32.mrf.mxu1  ;;  %v16226_v6 = vadd.f32 %v8844_v31, %v8745_v4 }
 0x5aa   : > { %v7708_v16 = vadd.f32 %v7707_v41, %v15468_v3  ;;  %v8443_v3 = vsel %vm17237_vm6, %v8438_v27, %v8442_v30  ;;  %v8454_v41 = vor.u32 %v8452_v11, %v8442_v30  ;;  %v7875_v27 = vld [vmem:[#allocation2 + $0xac] sm:$0x1] }
 0x5ab   : > { %v7951_v39 = vunpack.c.l.b16 %v7875_v27 }
 0x5ac   : > { %10494 = vmatmul.msk.bf16.vlgmr.msra.gmra.mxu2 %vm489_vm1, %v10691_v17  ;;  %v8110_v17 = vshll.u32 %v16061_v36, 16 }
 0x5ad   : > { %v16255_v28 = vpack.c.b16 %v7951_v39, %v7951_v39 }
 0x5af   : > { %v7799_v43 = vpop.f32.mrf.mxu2 }
 0x5b0   : > { %v16231_v33 = vadd.f32 %v7799_v43, %v7701_v32  ;;  %v10692_v32 = vld [vmem:[%s11383_s26 + $0x1c] sm:$0xff]  ;;  %v8112_v43 = vrot.slane %v8110_v17, 1 }
 0x5b1   : > { %v7710_v54 = vpop.f32.mrf.mxu1 }
 0x5b2   : > { %v7711_v24 = vadd.f32 %v7710_v54, %v15513_v13  ;;  %v8456_v13 = vshll.u32 %v8105_v9, 16  ;;  %v8113_v54 = vsel %vm16996_vm0, %v8108_v35, %v8112_v43  ;;  %v10694_v35 = vld [vmem:[%s11383_s26 + $0x2c] sm:$0xff] }
 0x5b3   : > { %8886 = vmatmul.bf16.gmra.mxu0 %v8443_v3  ;;  %v10693_v3 = vld [vmem:[%s11383_s26 + $0x24] sm:$0xff]  ;;  %v8484_v27 = vshrl.u32 %v8113_v54, 16 }
 0x5b4   : > { %8930 = vmatmul.bf16.gmra.mxu1 %v17238_v44  ;;  %v8458_v4 = vrot.slane %v8456_v13, 1 }
 0x5b7   : > { %v7801_v49 = vpop.f32.mrf.mxu2 }
 0x5b8   : > { %8797 = vmatmul.bf16.gmra.mxu3 %v8105_v9  ;;  %v16238_v15 = vadd.f32 %v7801_v49, %v7703_v14  ;;  %v16258_v49 = vpop.f32.mrf.mxu3 }
 0x5b9   : > { %v7712_v5 = vpop.f32.mrf.mxu1 }
 0x5ba   : > { %v7713_v47 = vadd.f32 %v7712_v5, %v15558_v38  ;;  %v8459_v38 = vsel %vm17240_vm15, %v8454_v41, %v8458_v4  ;;  %v8114_v5 = vshrl.u32 %v16061_v36, 16 }
 0x5bc   : > { %10495 = vmatmul.msk.bf16.gmra.mxu2 %vm489_vm1, %v10692_v32  ;;  %v8470_v32 = vor.u32 %v8468_v22, %v8458_v4  ;;  %v10695_v22 = vld [vmem:[%s11383_s26 + $0x34] sm:$0xff] }
 0x5bf   : > { %v7804_v31 = vpop.f32.mrf.mxu2 }
 0x5c0   : > { %v16244_v37 = vadd.f32 %v7804_v31, %v7706_v25  ;;  %v16270_v36 = vpop.f32.mrf.mxu3 }
 0x5c1   : > { %v7715_v14 = vpop.f32.mrf.mxu1 }
 0x5c2   : > { %v7716_v12 = vadd.f32 %v7715_v14, %v15599_v52  ;;  %v8472_v52 = vshll.u32 %v8113_v54, 16 }
 0x5c3   : > { %8891 = vmatmul.bf16.gmra.mxu0 %v8459_v38 }
 0x5c4   : > { %8935 = vmatmul.bf16.gmra.mxu1 %v17241_v7  ;;  %v8474_v13 = vrot.slane %v8472_v52, 1 }
 0x5c6   : > { %v8475_v9 = vsel %vm17242_vm14, %v8470_v32, %v8474_v13 }
 0x5c7   : > { %v7806_v30 = vpop.f32.mrf.mxu2 }
 0x5c8   : > { %8802 = vmatmul.bf16.gmra.mxu3 %v8113_v54  ;;  %v16251_v25 = vadd.f32 %v7806_v30, %v7708_v16  ;;  %v8118_v16 = vshll.u32 %v16255_v28, 16 }
 0x5c9   : > { %v7717_v18 = vpop.f32.mrf.mxu1 }
 0x5ca   : > { %v7718_v44 = vadd.f32 %v7717_v18, %v15644_v45  ;;  %v8116_v45 = vor.u32 %v8114_v5, %v8112_v43  ;;  %v8120_v34 = vrot.slane %v8118_v16, 1  ;;  %v17246_v16 = vld [vmem:[#allocation55_spill] sm:$0xff] }
 0x5cc   : > { %10496 = vmatmul.msk.bf16.gmra.mxu2 %vm489_vm1, %v10693_v3  ;;  %v16268_v4 = vsel %vm17243_vm13, %v8116_v45, %v8120_v34 }
 0x5cd   : > { %v8488_v38 = vshll.u32 %v16268_v4, 16 }
 0x5cf   : > { %v7809_v11 = vpop.f32.mrf.mxu2  ;;  %v16279_v7 = vrot.slane %v8488_v38, 1  ;;  %v17249_v38 = vld [vmem:[#allocation37_spill] sm:$0xff] }
 0x5d0   : > { %v16262_v17 = vadd.f32 %v7809_v11, %v7711_v24 }
 0x5d1   : > { %v7720_v31 = vpop.f32.mrf.mxu1 }
 0x5d2   : > { %v7721_v41 = vadd.f32 %v7720_v31, %v15680_v20  ;;  %v17247_v31 = vld [vmem:[#allocation66_spill] sm:$0xff] }
 0x5d3   : > { %8896 = vmatmul.bf16.gmra.mxu0 %v8475_v9 }
 0x5d4   : > { %8940 = vmatmul.bf16.gmra.mxu1 %v15278_v29  ;;  %v8486_v29 = vor.u32 %v8484_v27, %v8474_v13 }
 0x5d6   : > { %v8491_v18 = vsel %vm17244_vm4, %v8486_v29, %v16279_v7  ;;  %v17250_v29 = vld [vmem:[#allocation67_spill] sm:$0xff] }
 0x5d7   : > { %v7811_v14 = vpop.f32.mrf.mxu2 }
 0x5d8   : > { %8807 = vmatmul.bf16.gmra.mxu3 %v16268_v4  ;;  %v16273_v24 = vadd.f32 %v7811_v14, %v7713_v47  ;;  %v17248_v14 = vld [vmem:[#allocation4_spill] sm:$0xff] }
 0x5d9   : > { %v7722_v43 = vpop.f32.mrf.mxu1 }
 0x5da   : > { %v7723_v20 = vadd.f32 %v7722_v43, %v15727_v23  ;;  %v17245_v23 = vld [vmem:[#allocation30_spill] sm:$0xff] }
 0x5dc   : > { %10497 = vmatmul.msk.bf16.gmra.mxu2 %vm489_vm1, %v10694_v35 }
 0x5df   : > { %v7814_v39 = vpop.f32.mrf.mxu2 }
 0x5e0   : > { %v16281_v30 = vadd.f32 %v7814_v39, %v7716_v12 }
 0x5e1   : > { %v7725_v3 = vpop.f32.mrf.mxu1 }
 0x5e2   : > { %v7726_v47 = vadd.f32 %v7725_v3, %v15766_v26 }
 0x5e3   : > { %8901 = vmatmul.bf16.gmra.mxu0 %v8491_v18 }
 0x5e4   : > { %8945 = vmatmul.bf16.gmra.mxu1 %v17245_v23  ;;  %v17251_v23 = vld [vmem:[#allocation49_spill] sm:$0xff] }
 0x5e7   : > { %v7816_v52 = vpop.f32.mrf.mxu2 }
 0x5e8   : > { %v16287_v54 = vadd.f32 %v7816_v52, %v7718_v44  ;;  %v10696_v44 = vld [vmem:[%s11383_s26 + $0x3c] sm:$0xff] }
 0x5e9   : > { %v7727_v32 = vpop.f32.mrf.mxu1 }
 0x5ea   : > { %v7728_v5 = vadd.f32 %v7727_v32, %v15810_v56 }
 0x5ec   : > { %10498 = vmatmul.msk.bf16.gmra.mxu2 %vm489_vm1, %v10695_v22 }
 0x5ef   : > { %v7819_v12 = vpop.f32.mrf.mxu2 }
 0x5f0   : > { %v16292_v13 = vadd.f32 %v7819_v12, %v7721_v41  ;;  %v17252_v12 = vld [vmem:[#allocation12_spill] sm:$0xff] }
 0x5f1   : > { %v7730_v26 = vpop.f32.mrf.mxu1 }
 0x5f2   : > { %v7731_v11 = vadd.f32 %v7730_v26, %v17246_v16  ;;  %v17253_v16 = vld [vmem:[#allocation20_spill] sm:$0xff] }
 0x5f4   : > { %8950 = vmatmul.bf16.gmra.mxu1 %v17247_v31 }
 0x5f7   : > { %v7821_v45 = vpop.f32.mrf.mxu2 }
 0x5f8   : > { %v16296_v9 = vadd.f32 %v7821_v45, %v7723_v20  ;;  %v10697_v20 = vld [vmem:[%s11383_s26 + $0x44] sm:$0xff]  ;;  %v17254_v45 = vld [vmem:[#allocation36_spill] sm:$0xff] }
 0x5f9   : > { %v7732_v34 = vpop.f32.mrf.mxu1 }
 0x5fa   : > { %v7733_v35 = vadd.f32 %v7732_v34, %v17248_v14  ;;  %v10698_v34 = vld [vmem:[%s11383_s26 + $0x4c] sm:$0xff] }
 0x5fc   : > { %10499 = vmatmul.msk.bf16.gmra.mxu2 %vm489_vm1, %v10696_v44 }
 0x5ff   : > { %v7824_v56 = vpop.f32.mrf.mxu2 }
 0x600   : > { %v16301_v43 = vadd.f32 %v7824_v56, %v7726_v47  ;;  %v17255_v56 = vld [vmem:[#allocation26_spill] sm:$0xff] }
 0x601   : > { %v7735_v41 = vpop.f32.mrf.mxu1 }
 0x602   : > { %v7736_v27 = vadd.f32 %v7735_v41, %v17249_v38  ;;  %v17256_v38 = vld [vmem:[#allocation28_spill] sm:$0xff] }
 0x604   : > { %8955 = vmatmul.bf16.gmra.mxu1 %v17250_v29 }
 0x607   : > { %v7826_v39 = vpop.f32.mrf.mxu2 }
 0x608   : > { %v16305_v3 = vadd.f32 %v7826_v39, %v7728_v5 }
 0x609   : > { %v7737_v18 = vpop.f32.mrf.mxu1 }
 0x60a   : > { %v7738_v52 = vadd.f32 %v7737_v18, %v17251_v23  ;;  %v17257_v23 = vld [vmem:[#allocation58_spill] sm:$0xff] }
 0x60c   : > { %10500 = vmatmul.msk.bf16.gmra.mxu2 %vm489_vm1, %v10697_v20 }
 0x60f   : > { %v7829_v22 = vpop.f32.mrf.mxu2 }
 0x610   : > { %v16310_v32 = vadd.f32 %v7829_v22, %v7731_v11 }
 0x611   : > { %v8921_v47 = vpop.f32.mrf.mxu1 }
 0x612   : > { %v8922_v26 = vadd.f32 %v8921_v47, %v17252_v12  ;;  %v17258_v47 = vld [vmem:[#allocation43_spill] sm:$0xff] }
 0x614   : > { %v9011_v31 = vadd.f32 %v8922_v26, %v17253_v16  ;;  %8960 = vmatmul.bf16.gmra.mxu1 %v17254_v45  ;;  %v10699_v26 = vld [vmem:[%s11383_s26 + $0x54] sm:$0xff] }
 0x617   : > { %v7831_v44 = vpop.f32.mrf.mxu2 }
 0x618   : > { %v16315_v5 = vadd.f32 %v7831_v44, %v7733_v35  ;;  %v17259_v44 = vld [vmem:[#allocation52_spill] sm:$0xff] }
 0x619   : > { %v8923_v14 = vpop.f32.mrf.mxu1 }
 0x61a   : > { %v8924_v41 = vadd.f32 %v8923_v14, %v17255_v56 }
 0x61c   : > { %v9012_v29 = vadd.f32 %v8924_v41, %v17256_v38  ;;  %10501 = vmatmul.msk.bf16.gmra.mxu2 %vm489_vm1, %v10698_v34 }
 0x61f   : > { %v7834_v11 = vpop.f32.mrf.mxu2 }
 0x620   : > { %v16321_v39 = vadd.f32 %v7834_v11, %v7736_v27  ;;  %v16335_v27 = vld [vmem:[%s16573_s4] ss:$0 sm:$0xff]  ;;  %v17260_v11 = vld [vmem:[#allocation24_spill] sm:$0xff] }
 0x621   : > { %v8926_v20 = vpop.f32.mrf.mxu1  ;;  %v9051_v14 = vadd.f32 %v16335_v27, %v9011_v31  ;;  %v9052_v31 = vadd.f32 %v16335_v27, %v9012_v29  ;;  %v8847_v29 = vpop.f32.mrf.mxu0 }
 0x622   : > { %v8927_v18 = vadd.f32 %v8926_v20, %v16116_v59  ;;  %v16340_v59 = vld [vmem:[%s16575_s6] ss:$0 sm:$0xff] }
 0x624   : > { %v9013_v22 = vadd.f32 %v8927_v18, %v17257_v23  ;;  %8965 = vmatmul.bf16.gmra.mxu1 %v17258_v47  ;;  %v17261_v18 = vld [vmem:[#allocation35_spill] sm:$0xff] }
 0x627   : > { %v7836_v35 = vpop.f32.mrf.mxu2 }
 0x628   : > { %v16326_v12 = vadd.f32 %v7836_v35, %v7738_v52  ;;  %v10700_v35 = vld [vmem:[%s11383_s26 + $0x5c] sm:$0xff] }
 0x629   : > { %v8928_v16 = vpop.f32.mrf.mxu1 }
 0x62a   : > { %v8929_v45 = vadd.f32 %v8928_v16, %v16159_v51 }
 0x62c   : > { %v9014_v34 = vadd.f32 %v8929_v45, %v17259_v44  ;;  %10502 = vmatmul.msk.bf16.gmra.mxu2 %vm489_vm1, %v10699_v26  ;;  %v17262_v44 = vld [vmem:[#allocation7_spill] sm:$0xff] }
 0x62f   : > { %v9312_v52 = vpop.f32.mrf.mxu2 }
 0x630   : > { %v9313_v51 = vadd.f32 %v16340_v59, %v9312_v52 }
 0x631   : > { %v8931_v56 = vpop.f32.mrf.mxu1 }
 0x632   : > { %v9402_v41 = vadd.f32 %v9313_v51, %v9051_v14  ;;  %v8932_v38 = vadd.f32 %v8931_v56, %v16176_v10  ;;  %v9053_v14 = vadd.f32 %v16335_v27, %v9013_v22  ;;  %v10701_v22 = vld [vmem:[%s11383_s26 + $0x64] sm:$0xff] }
 0x634   : > { %9438 = vst [vmem:[%s16348_s28] sm:$0xff] %v9402_v41  ;;  %v9015_v20 = vadd.f32 %v8932_v38, %v17260_v11  ;;  %8970 = vmatmul.bf16.gmra.mxu1 %v17261_v18  ;;  %v17263_v11 = vld [vmem:[#allocation3_spill] sm:$0xff]  ;;  %v17264_v18 = vld [vmem:[#allocation25_spill] sm:$0xff] }
 0x637   : > { %v9314_v23 = vpop.f32.mrf.mxu2 }
 0x638   : > { %v9315_v47 = vadd.f32 %v16340_v59, %v9314_v23 }
 0x639   : > { %v8933_v26 = vpop.f32.mrf.mxu1 }
 0x63a   : > { %v9403_v16 = vadd.f32 %v9315_v47, %v9052_v31  ;;  %v8934_v45 = vadd.f32 %v8933_v26, %v16188_v2  ;;  %v9054_v31 = vadd.f32 %v16335_v27, %v9014_v34 }
 0x63c   : > { %9439 = vst [vmem:[%s16348_s28 + $0x8] sm:$0xff] %v9403_v16  ;;  %v9016_v10 = vadd.f32 %v8934_v45, %v17262_v44  ;;  %10503 = vmatmul.msk.bf16.gmra.mxu2 %vm489_vm1, %v10700_v35  ;;  %v8849_v45 = vpop.f32.mrf.mxu0  ;;  %v17265_v44 = vld [vmem:[#allocation47_spill] sm:$0xff] }
 0x63f   : > { %v9317_v52 = vpop.f32.mrf.mxu2 }
 0x640   : > { %v9318_v51 = vadd.f32 %v16340_v59, %v9317_v52 }
 0x641   : > { %v8936_v56 = vpop.f32.mrf.mxu1 }
 0x642   : > { %v9404_v41 = vadd.f32 %v9318_v51, %v9053_v14  ;;  %v8937_v38 = vadd.f32 %v8936_v56, %v16199_v0  ;;  %v9055_v14 = vadd.f32 %v16335_v27, %v9015_v20 }
 0x644   : > { %9440 = vst [vmem:[%s16348_s28 + $0x10] sm:$0xff] %v9404_v41  ;;  %v9017_v2 = vadd.f32 %v8937_v38, %v17263_v11  ;;  %8975 = vmatmul.bf16.gmra.mxu1 %v17264_v18  ;;  %v16377_v38 = vpop.f32.mrf.mxu3  ;;  %v17267_v18 = vld [vmem:[#allocation23_spill] sm:$0xff] }
 0x647   : > { %v9319_v23 = vpop.f32.mrf.mxu2 }
 0x648   : > { %v9320_v47 = vadd.f32 %v16340_v59, %v9319_v23  ;;  %v16382_v23 = vpop.f32.mrf.mxu0 }
 0x649   : > { %v8938_v35 = vpop.f32.mrf.mxu1 }
 0x64a   : > { %v9405_v26 = vadd.f32 %v9320_v47, %v9054_v31  ;;  %v8939_v16 = vadd.f32 %v8938_v35, %v16209_v55  ;;  %v17266_v55 = vld [vmem:[#allocation31_spill] sm:$0xff]  ;;  %v9056_v47 = vadd.f32 %v16335_v27, %v9016_v10  ;;  %v8848_v10 = vadd.f32 %v8847_v29, %v16258_v49 }
 0x64c   : > { %9441 = vst [vmem:[%s16348_s28 + $0x18] sm:$0xff] %v9405_v26  ;;  %v9018_v0 = vadd.f32 %v8939_v16, %v17265_v44  ;;  %10504 = vmatmul.msk.bf16.gmra.mxu2 %vm489_vm1, %v10701_v22  ;;  %v10702_v22 = vld [vmem:[%s11383_s26 + $0x6c] sm:$0xff] }
 0x64d   : > { %v17268_v16 = vld [vmem:[#allocation38_spill] sm:$0xff] }
 0x64e   : > { %v9058_v49 = vadd.f32 %v16335_v27, %v9018_v0 }
 0x64f   : > { %v9322_v52 = vpop.f32.mrf.mxu2 }
 0x650   : > { %v9323_v34 = vadd.f32 %v16340_v59, %v9322_v52  ;;  %v16391_v52 = vpop.f32.mrf.mxu3 }
 0x651   : > { %v8941_v51 = vpop.f32.mrf.mxu1 }
 0x652   : > { %v9406_v56 = vadd.f32 %v9323_v34, %v9055_v14  ;;  %v8942_v41 = vadd.f32 %v8941_v51, %v16216_v8  ;;  %v16393_v14 = vpop.f32.mrf.mxu0  ;;  %v9057_v51 = vadd.f32 %v16335_v27, %v9017_v2  ;;  %v10703_v2 = vld [vmem:[%s11383_s26 + $0x74] sm:$0xff] }
 0x654   : > { %9442 = vst [vmem:[%s16348_s28 + $0x20] sm:$0xff] %v9406_v56  ;;  %v9019_v11 = vadd.f32 %v8942_v41, %v17266_v55  ;;  %8980 = vmatmul.bf16.gmra.mxu1 %v17267_v18  ;;  %v17269_v18 = vld [vmem:[#allocation39_spill] sm:$0xff] }
 0x657   : > { %v9324_v31 = vpop.f32.mrf.mxu2 }
 0x658   : > { %v9325_v20 = vadd.f32 %v16340_v59, %v9324_v31 }
 0x659   : > { %v8943_v35 = vpop.f32.mrf.mxu1 }
 0x65a   : > { %v9407_v26 = vadd.f32 %v9325_v20, %v9056_v47  ;;  %v8944_v8 = vadd.f32 %v8943_v35, %v16226_v6  ;;  %v17270_v47 = vld [vmem:[#allocation27_spill] sm:$0xff]  ;;  %v8850_v35 = vadd.f32 %v8849_v45, %v16270_v36  ;;  %v9059_v36 = vadd.f32 %v16335_v27, %v9019_v11 }
 0x65c   : > { %9443 = vst [vmem:[%s16348_s28 + $0x28] sm:$0xff] %v9407_v26  ;;  %v9020_v44 = vadd.f32 %v8944_v8, %v17268_v16  ;;  %10505 = vmatmul.msk.bf16.gmra.mxu2 %vm489_vm1, %v10702_v22  ;;  %v16401_v22 = vpop.f32.mrf.mxu3  ;;  %v16407_v26 = vpop.f32.mrf.mxu0 }
 0x65f   : > { %v9327_v34 = vpop.f32.mrf.mxu2 }
 0x660   : > { %v9328_v56 = vadd.f32 %v16340_v59, %v9327_v34 }
 0x661   : > { %v8946_v41 = vpop.f32.mrf.mxu1 }
 0x662   : > { %v9408_v6 = vadd.f32 %v9328_v56, %v9057_v51  ;;  %v8947_v55 = vadd.f32 %v8946_v41, %v8848_v10  ;;  %v17271_v10 = vld [vmem:[#allocation8_spill] sm:$0xff] }
 0x664   : > { %9444 = vst [vmem:[%s16348_s28 + $0x30] sm:$0xff] %v9408_v6  ;;  %v9021_v31 = vadd.f32 %v8947_v55, %v17269_v18  ;;  %8985 = vmatmul.bf16.gmra.mxu1 %v17270_v47  ;;  %v16414_v41 = vpop.f32.mrf.mxu3  ;;  %v16416_v55 = vpop.f32.mrf.mxu0  ;;  %v9060_v47 = vadd.f32 %v16335_v27, %v9020_v44 }
 0x667   : > { %v9329_v20 = vpop.f32.mrf.mxu2 }
 0x668   : > { %v9330_v29 = vadd.f32 %v16340_v59, %v9329_v20 }
 0x669   : > { %v8948_v8 = vpop.f32.mrf.mxu1 }
 0x66a   : > { %v9409_v16 = vadd.f32 %v9330_v29, %v9058_v49  ;;  %v8949_v34 = vadd.f32 %v8948_v8, %v8850_v35  ;;  %v10704_v35 = vld [vmem:[%s11383_s26 + $0x7c] sm:$0xff] }
 0x66c   : > { %9445 = vst [vmem:[%s16348_s28 + $0x38] sm:$0xff] %v9409_v16  ;;  %v9022_v51 = vadd.f32 %v8949_v34, %v17271_v10  ;;  %10506 = vmatmul.msk.bf16.gmra.mxu2 %vm489_vm1, %v10703_v2  ;;  %v16423_v29 = vpop.f32.mrf.mxu3  ;;  %v16427_v2 = vpop.f32.mrf.mxu0  ;;  %v9061_v16 = vadd.f32 %v16335_v27, %v9021_v31  ;;  %v8122_v10 = vshrl.u32 %v16255_v28, 16  ;;  %v10705_v28 = vld [vmem:[%s11383_s26 + $0x84] sm:$0xff] }
 0x66f   : > { %v9332_v56 = vpop.f32.mrf.mxu2 }
 0x670   : > { %v9333_v45 = vadd.f32 %v16340_v59, %v9332_v56  ;;  %v8500_v56 = vshrl.u32 %v16268_v4, 16 }
 0x671   : > { %v8951_v0 = vpop.f32.mrf.mxu1 }
 0x672   : > { %v9410_v6 = vadd.f32 %v9333_v45, %v9059_v36  ;;  %v8853_v36 = vadd.f32 %v16382_v23, %v16377_v38  ;;  %v8502_v31 = vor.u32 %v8500_v56, %v16279_v7  ;;  %v8855_v7 = vadd.f32 %v16393_v14, %v16391_v52 }
 0x674   : > { %9446 = vst [vmem:[%s16348_s28 + $0x40] sm:$0xff] %v9410_v6  ;;  %8990 = vmatmul.bf16.gmra.mxu1 %v16113_v1  ;;  %v16437_v45 = vpop.f32.mrf.mxu3  ;;  %v8504_v6 = vshll.u32 %v8122_v10, 16 }
 0x677   : > { %v9334_v18 = vpop.f32.mrf.mxu2 }
 0x678   : > { %v9335_v20 = vadd.f32 %v16340_v59, %v9334_v18  ;;  %v16440_v18 = vpop.f32.mrf.mxu0 }
 0x679   : > { %v8953_v49 = vpop.f32.mrf.mxu1 }
 0x67a   : > { %v9411_v11 = vadd.f32 %v9335_v20, %v9060_v47  ;;  %v8952_v20 = vadd.f32 %v8951_v0, %v8853_v36 }
 0x67c   : > { %9447 = vst [vmem:[%s16348_s28 + $0x48] sm:$0xff] %v9411_v11  ;;  %10507 = vmatmul.msk.bf16.gmra.mxu2 %vm489_vm1, %v10704_v35  ;;  %v9062_v35 = vadd.f32 %v16335_v27, %v9022_v51  ;;  %v8506_v11 = vrot.slane %v8504_v6, 1  ;;  %v9023_v23 = vadd.f32 %v8952_v20, %v16108_v63  ;;  %v8768_v51 = vpop.f32.mrf.mxu3  ;;  %v8858_v63 = vadd.f32 %v16407_v26, %v16401_v22 }
 0x67e   : > { %v8507_v38 = vsel %vm17272_vm7, %v8502_v31, %v8506_v11 }
 0x67f   : > { %v9337_v8 = vpop.f32.mrf.mxu2  ;;  %8906 = vmatmul.bf16.gmra.mxu0 %v8507_v38 }
 0x680   : > { %v9338_v1 = vadd.f32 %v16340_v59, %v9337_v8  ;;  %v8867_v10 = vpop.f32.mrf.mxu0 }
 0x681   : > { %v8956_v34 = vpop.f32.mrf.mxu1 }
 0x682   : > { %v9412_v44 = vadd.f32 %v9338_v1, %v9061_v16  ;;  %v8954_v16 = vadd.f32 %v8953_v49, %v8855_v7  ;;  %v9063_v1 = vadd.f32 %v16335_v27, %v9023_v23  ;;  %v8957_v14 = vadd.f32 %v8956_v34, %v8858_v63 }
 0x683   : > { %v8860_v34 = vadd.f32 %v16416_v55, %v16414_v41  ;;  %v8863_v41 = vadd.f32 %v16427_v2, %v16423_v29 }
 0x684   : > { %9448 = vst [vmem:[%s16348_s28 + $0x50] sm:$0xff] %v9412_v44  ;;  %8995 = vmatmul.bf16.gmra.mxu1 %v16134_v60  ;;  %v9024_v31 = vadd.f32 %v8954_v16, %v16155_v57  ;;  %v8512_v57 = vshll.u32 %v8162_v40, 16 }
 0x686   : > { %v9064_v49 = vadd.f32 %v16335_v27, %v9024_v31  ;;  %v8514_v26 = vrot.slane %v8512_v57, 1 }
 0x687   : > { %v9339_v47 = vpop.f32.mrf.mxu2 }
 0x688   : > { %v9340_v60 = vadd.f32 %v16340_v59, %v9339_v47  ;;  %v10706_v47 = vld [vmem:[%s11383_s26 + $0x8c] sm:$0xff]  ;;  %v8869_v11 = vpop.f32.mrf.mxu0 }
 0x689   : > { %v8958_v4 = vpop.f32.mrf.mxu1 }
 0x68a   : > { %v9413_v8 = vadd.f32 %v9340_v60, %v9062_v35  ;;  %v8508_v35 = vshrl.u32 %v16121_v48, 16  ;;  %v8770_v60 = vpop.f32.mrf.mxu3  ;;  %v8959_v48 = vadd.f32 %v8958_v4, %v8860_v34 }
 0x68c   : > { %9449 = vst [vmem:[%s16348_s28 + $0x58] sm:$0xff] %v9413_v8  ;;  %10508 = vmatmul.msk.bf16.gmra.mxu2 %vm489_vm1, %v10705_v28  ;;  %v8510_v22 = vor.u32 %v8508_v35, %v16140_v19  ;;  %v8868_v35 = vadd.f32 %v8867_v10, %v8768_v51 }
 0x68e   : > { %v8515_v23 = vsel %vm17273_vm8, %v8510_v22, %v8514_v26  ;;  %v10708_v22 = vld [vmem:[%s11383_s26 + $0x9c] sm:$0xff] }
 0x68f   : > { %v9342_v0 = vpop.f32.mrf.mxu2 }
 0x690   : > { %v9343_v44 = vadd.f32 %v16340_v59, %v9342_v0  ;;  %v9026_v0 = vadd.f32 %v8959_v48, %v16186_v42  ;;  %v8872_v19 = vpop.f32.mrf.mxu0  ;;  %v8865_v42 = vadd.f32 %v16440_v18, %v16437_v45 }
 0x691   : > { %v8961_v56 = vpop.f32.mrf.mxu1 }
 0x692   : > { %v9414_v36 = vadd.f32 %v9343_v44, %v9063_v1  ;;  %v8773_v7 = vpop.f32.mrf.mxu3  ;;  %v8962_v4 = vadd.f32 %v8961_v56, %v8863_v41  ;;  %v9066_v16 = vadd.f32 %v16335_v27, %v9026_v0  ;;  %v10707_v44 = vld [vmem:[%s11383_s26 + $0x94] sm:$0xff] }
 0x693   : > { %v8873_v41 = vadd.f32 %v8872_v19, %v8773_v7 }
 0x694   : > { %9450 = vst [vmem:[%s16348_s28 + $0x60] sm:$0xff] %v9414_v36  ;;  %9000 = vmatmul.bf16.gmra.mxu1 %v16151_v21  ;;  %v9025_v21 = vadd.f32 %v8957_v14, %v16174_v62  ;;  %v9027_v63 = vadd.f32 %v8962_v4, %v16197_v46 }
 0x696   : > { %v9065_v58 = vadd.f32 %v16335_v27, %v9025_v21  ;;  %v9067_v14 = vadd.f32 %v16335_v27, %v9027_v63 }
 0x697   : > { %v9344_v52 = vpop.f32.mrf.mxu2 }
 0x698   : > { %v9345_v6 = vadd.f32 %v16340_v59, %v9344_v52  ;;  %v8874_v29 = vpop.f32.mrf.mxu0 }
 0x699   : > { %v8963_v20 = vpop.f32.mrf.mxu1 }
 0x69a   : > { %v9415_v28 = vadd.f32 %v9345_v6, %v9064_v49  ;;  %v8775_v52 = vpop.f32.mrf.mxu3  ;;  %v8964_v56 = vadd.f32 %v8963_v20, %v8865_v42 }
 0x69c   : > { %9451 = vst [vmem:[%s16348_s28 + $0x68] sm:$0xff] %v9415_v28  ;;  %10509 = vmatmul.msk.bf16.gmra.mxu2 %vm489_vm1, %v10706_v47  ;;  %v9028_v46 = vadd.f32 %v8964_v56, %v16207_v53  ;;  %v8870_v53 = vadd.f32 %v8869_v11, %v8770_v60 }
 0x69e   : > { %v9068_v45 = vadd.f32 %v16335_v27, %v9028_v46 }
 0x69f   : > { %v9347_v8 = vpop.f32.mrf.mxu2 }
 0x6a0   : > { %v9348_v40 = vadd.f32 %v16340_v59, %v9347_v8  ;;  %v8877_v20 = vpop.f32.mrf.mxu0 }
 0x6a1   : > { %v8966_v38 = vpop.f32.mrf.mxu1 }
 0x6a2   : > { %v9416_v62 = vadd.f32 %v9348_v40, %v9065_v58  ;;  %v8778_v28 = vpop.f32.mrf.mxu3  ;;  %v8967_v21 = vadd.f32 %v8966_v38, %v8868_v35 }
 0x6a4   : > { %9452 = vst [vmem:[%s16348_s28 + $0x70] sm:$0xff] %v9416_v62  ;;  %9005 = vmatmul.bf16.gmra.mxu1 %v8515_v23  ;;  %v9029_v8 = vadd.f32 %v8967_v21, %v16214_v61 }
 0x6a6   : > { %v9069_v10 = vadd.f32 %v16335_v27, %v9029_v8 }
 0x6a7   : > { %v9349_v55 = vpop.f32.mrf.mxu2 }
 0x6a8   : > { %v9350_v1 = vadd.f32 %v16340_v59, %v9349_v55  ;;  %v8879_v62 = vpop.f32.mrf.mxu0 }
 0x6a9   : > { %v8968_v36 = vpop.f32.mrf.mxu1 }
 0x6aa   : > { %v9417_v31 = vadd.f32 %v9350_v1, %v9066_v16  ;;  %v8969_v51 = vadd.f32 %v8968_v36, %v8870_v53  ;;  %v8780_v38 = vpop.f32.mrf.mxu3 }
 0x6ab   : > { %v8880_v21 = vadd.f32 %v8879_v62, %v8780_v38 }
 0x6ac   : > { %9453 = vst [vmem:[%s16348_s28 + $0x78] sm:$0xff] %v9417_v31  ;;  %10510 = vmatmul.msk.bf16.gmra.mxu2 %vm489_vm1, %v10707_v44  ;;  %v9030_v0 = vadd.f32 %v8969_v51, %v16223_v50  ;;  %v8875_v31 = vadd.f32 %v8874_v29, %v8775_v52 }
 0x6ae   : > { %v9070_v4 = vadd.f32 %v16335_v27, %v9030_v0 }
 0x6af   : > { %v9352_v2 = vpop.f32.mrf.mxu2 }
 0x6b0   : > { %v9353_v49 = vadd.f32 %v16340_v59, %v9352_v2  ;;  %v8882_v36 = vpop.f32.mrf.mxu0 }
 0x6b1   : > { %v8971_v6 = vpop.f32.mrf.mxu1 }
 0x6b2   : > { %v9418_v47 = vadd.f32 %v9353_v49, %v9067_v14  ;;  %v8972_v55 = vadd.f32 %v8971_v6, %v8873_v41  ;;  %v8783_v1 = vpop.f32.mrf.mxu3  ;;  %v8878_v49 = vadd.f32 %v8877_v20, %v8778_v28 }
 0x6b3   : > { %v8883_v53 = vadd.f32 %v8882_v36, %v8783_v1 }
 0x6b4   : > { %9454 = vst [vmem:[%s16348_s28 + $0x80] sm:$0xff] %v9418_v47  ;;  %v9031_v44 = vadd.f32 %v8972_v55, %v16231_v33 }
 0x6b6   : > { %v9071_v50 = vadd.f32 %v16335_v27, %v9031_v44 }
 0x6b7   : > { %v9354_v57 = vpop.f32.mrf.mxu2 }
 0x6b8   : > { %v9355_v18 = vadd.f32 %v16340_v59, %v9354_v57  ;;  %v8884_v6 = vpop.f32.mrf.mxu0 }
 0x6b9   : > { %v8973_v26 = vpop.f32.mrf.mxu1 }
 0x6ba   : > { %v9419_v34 = vadd.f32 %v9355_v18, %v9068_v45  ;;  %v8974_v42 = vadd.f32 %v8973_v26, %v8875_v31  ;;  %v8785_v14 = vpop.f32.mrf.mxu3 }
 0x6bb   : > { %v8885_v0 = vadd.f32 %v8884_v6, %v8785_v14 }
 0x6bc   : > { %9455 = vst [vmem:[%s16348_s28 + $0x88] sm:$0xff] %v9419_v34  ;;  %10511 = vmatmul.msk.bf16.gmra.mxu2 %vm489_vm1, %v10708_v22  ;;  %v9032_v56 = vadd.f32 %v8974_v42, %v16238_v15 }
 0x6be   : > { %v9072_v46 = vadd.f32 %v16335_v27, %v9032_v56 }
 0x6bf   : > { %v9357_v48 = vpop.f32.mrf.mxu2 }
 0x6c0   : > { %v9358_v58 = vadd.f32 %v16340_v59, %v9357_v48  ;;  %v8887_v20 = vpop.f32.mrf.mxu0 }
 0x6c1   : > { %v8976_v40 = vpop.f32.mrf.mxu1 }
 0x6c2   : > { %v9420_v23 = vadd.f32 %v9358_v58, %v9069_v10  ;;  %v8977_v33 = vadd.f32 %v8976_v40, %v8878_v49  ;;  %v8788_v18 = vpop.f32.mrf.mxu3 }
 0x6c3   : > { %v8888_v1 = vadd.f32 %v8887_v20, %v8788_v18 }
 0x6c4   : > { %9456 = vst [vmem:[%s16348_s28 + $0x90] sm:$0xff] %v9420_v23  ;;  %v9033_v57 = vadd.f32 %v8977_v33, %v16244_v37 }
 0x6c6   : > { %v9073_v22 = vadd.f32 %v16335_v27, %v9033_v57 }
 0x6c7   : > { %v9359_v61 = vpop.f32.mrf.mxu2 }
 0x6c8   : > { %v9360_v60 = vadd.f32 %v16340_v59, %v9359_v61  ;;  %v8889_v38 = vpop.f32.mrf.mxu0 }
 0x6c9   : > { %v8978_v11 = vpop.f32.mrf.mxu1 }
 0x6ca   : > { %v9421_v16 = vadd.f32 %v9360_v60, %v9070_v4  ;;  %v8979_v15 = vadd.f32 %v8978_v11, %v8880_v21  ;;  %v8790_v58 = vpop.f32.mrf.mxu3 }
 0x6cc   : > { %9457 = vst [vmem:[%s16348_s28 + $0x98] sm:$0xff] %v9421_v16  ;;  %v9034_v8 = vadd.f32 %v8979_v15, %v16251_v25 }
 0x6ce   : > { %v9074_v37 = vadd.f32 %v16335_v27, %v9034_v8 }
 0x6cf   : > { %v9362_v63 = vpop.f32.mrf.mxu2 }
 0x6d0   : > { %v9363_v7 = vadd.f32 %v16340_v59, %v9362_v63  ;;  %v8892_v16 = vpop.f32.mrf.mxu0 }
 0x6d1   : > { %v8981_v19 = vpop.f32.mrf.mxu1 }
 0x6d2   : > { %v9422_v2 = vadd.f32 %v9363_v7, %v9071_v50  ;;  %v8982_v51 = vadd.f32 %v8981_v19, %v8883_v53  ;;  %v8793_v60 = vpop.f32.mrf.mxu3  ;;  %v8890_v19 = vadd.f32 %v8889_v38, %v8790_v58 }
 0x6d4   : > { %9458 = vst [vmem:[%s16348_s28 + $0xa0] sm:$0xff] %v9422_v2  ;;  %v9035_v23 = vadd.f32 %v8982_v51, %v16262_v17 }
 0x6d6   : > { %v9075_v25 = vadd.f32 %v16335_v27, %v9035_v23 }
 0x6d7   : > { %v9364_v47 = vpop.f32.mrf.mxu2 }
 0x6d8   : > { %v9365_v52 = vadd.f32 %v16340_v59, %v9364_v47  ;;  %v8894_v2 = vpop.f32.mrf.mxu0 }
 0x6d9   : > { %v8983_v29 = vpop.f32.mrf.mxu1 }
 0x6da   : > { %v9423_v35 = vadd.f32 %v9365_v52, %v9072_v46  ;;  %v8984_v61 = vadd.f32 %v8983_v29, %v8885_v0  ;;  %v8795_v7 = vpop.f32.mrf.mxu3  ;;  %v8893_v46 = vadd.f32 %v8892_v16, %v8793_v60 }
 0x6dc   : > { %9459 = vst [vmem:[%s16348_s28 + $0xa8] sm:$0xff] %v9423_v35  ;;  %v9036_v11 = vadd.f32 %v8984_v61, %v16273_v24 }
 0x6de   : > { %v9076_v31 = vadd.f32 %v16335_v27, %v9036_v11 }
 0x6df   : > { %v9367_v45 = vpop.f32.mrf.mxu2 }
 0x6e0   : > { %v9368_v28 = vadd.f32 %v16340_v59, %v9367_v45  ;;  %v8897_v21 = vpop.f32.mrf.mxu0 }
 0x6e1   : > { %v8986_v34 = vpop.f32.mrf.mxu1 }
 0x6e2   : > { %v9424_v26 = vadd.f32 %v9368_v28, %v9073_v22  ;;  %v8987_v17 = vadd.f32 %v8986_v34, %v8888_v1  ;;  %v8798_v29 = vpop.f32.mrf.mxu3  ;;  %v8895_v22 = vadd.f32 %v8894_v2, %v8795_v7 }
 0x6e4   : > { %9460 = vst [vmem:[%s16348_s28 + $0xb0] sm:$0xff] %v9424_v26  ;;  %v9037_v50 = vadd.f32 %v8987_v17, %v16281_v30 }
 0x6e6   : > { %v9077_v14 = vadd.f32 %v16335_v27, %v9037_v50 }
 0x6e7   : > { %v9369_v48 = vpop.f32.mrf.mxu2 }
 0x6e8   : > { %v9370_v10 = vadd.f32 %v16340_v59, %v9369_v48  ;;  %v8899_v53 = vpop.f32.mrf.mxu0 }
 0x6e9   : > { %v8988_v62 = vpop.f32.mrf.mxu1 }
 0x6ea   : > { %v9425_v40 = vadd.f32 %v9370_v10, %v9074_v37  ;;  %v8989_v24 = vadd.f32 %v8988_v62, %v8890_v19  ;;  %v8800_v34 = vpop.f32.mrf.mxu3  ;;  %v8898_v37 = vadd.f32 %v8897_v21, %v8798_v29 }
 0x6ec   : > { %9461 = vst [vmem:[%s16348_s28 + $0xb8] sm:$0xff] %v9425_v40  ;;  %v9038_v33 = vadd.f32 %v8989_v24, %v16287_v54 }
 0x6ee   : > { %v9078_v35 = vadd.f32 %v16335_v27, %v9038_v33 }
 0x6ef   : > { %v9372_v41 = vpop.f32.mrf.mxu2 }
 0x6f0   : > { %v9373_v55 = vadd.f32 %v16340_v59, %v9372_v41  ;;  %v8902_v0 = vpop.f32.mrf.mxu0  ;;  %v8900_v41 = vadd.f32 %v8899_v53, %v8800_v34 }
 0x6f1   : > { %v8991_v44 = vpop.f32.mrf.mxu1 }
 0x6f2   : > { %v9426_v4 = vadd.f32 %v9373_v55, %v9075_v25  ;;  %v8992_v30 = vadd.f32 %v8991_v44, %v8893_v46  ;;  %v8803_v23 = vpop.f32.mrf.mxu3 }
 0x6f3   : > { %v8903_v1 = vadd.f32 %v8902_v0, %v8803_v23 }
 0x6f4   : > { %9462 = vst [vmem:[%s16348_s28 + $0xc0] sm:$0xff] %v9426_v4  ;;  %v9039_v15 = vadd.f32 %v8992_v30, %v16292_v13 }
 0x6f6   : > { %v9079_v54 = vadd.f32 %v16335_v27, %v9039_v15 }
 0x6f7   : > { %v9374_v36 = vpop.f32.mrf.mxu2 }
 0x6f8   : > { %v9375_v63 = vadd.f32 %v16340_v59, %v9374_v36  ;;  %v8904_v44 = vpop.f32.mrf.mxu0 }
 0x6f9   : > { %v8993_v6 = vpop.f32.mrf.mxu1 }
 0x6fa   : > { %v9427_v42 = vadd.f32 %v9375_v63, %v9076_v31  ;;  %v8994_v20 = vadd.f32 %v8993_v6, %v8895_v22  ;;  %v8805_v16 = vpop.f32.mrf.mxu3 }
 0x6fb   : > { %v8905_v7 = vadd.f32 %v8904_v44, %v8805_v16 }
 0x6fc   : > { %9463 = vst [vmem:[%s16348_s28 + $0xc8] sm:$0xff] %v9427_v42  ;;  %v9040_v48 = vadd.f32 %v8994_v20, %v16296_v9 }
 0x6fe   : > { %v9080_v13 = vadd.f32 %v16335_v27, %v9040_v48 }
 0x6ff   : > { %v9377_v56 = vpop.f32.mrf.mxu2 }
 0x700   : > { %v9378_v49 = vadd.f32 %v16340_v59, %v9377_v56  ;;  %v8907_v2 = vpop.f32.mrf.mxu0 }
 0x701   : > { %v8996_v18 = vpop.f32.mrf.mxu1 }
 0x702   : > { %v9428_v47 = vadd.f32 %v9378_v49, %v9077_v14  ;;  %v8997_v58 = vadd.f32 %v8996_v18, %v8898_v37  ;;  %v8808_v19 = vpop.f32.mrf.mxu3 }
 0x703   : > { %v8908_v33 = vadd.f32 %v8907_v2, %v8808_v19 }
 0x704   : > { %9464 = vst [vmem:[%s16348_s28 + $0xd0] sm:$0xff] %v9428_v47  ;;  %v9041_v62 = vadd.f32 %v8997_v58, %v16301_v43 }
 0x706   : > { %v9081_v55 = vadd.f32 %v16335_v27, %v9041_v62 }
 0x707   : > { %v9379_v52 = vpop.f32.mrf.mxu2 }
 0x708   : > { %v9380_v57 = vadd.f32 %v16340_v59, %v9379_v52 }
 0x709   : > { %v8998_v51 = vpop.f32.mrf.mxu1 }
 0x70a   : > { %v9429_v45 = vadd.f32 %v9380_v57, %v9078_v35  ;;  %v8999_v9 = vadd.f32 %v8998_v51, %v8900_v41  ;;  %v8810_v30 = vpop.f32.mrf.mxu3  ;;  %v8909_v35 = vpop.f32.mrf.mxu0 }
 0x70c   : > { %9465 = vst [vmem:[%s16348_s28 + $0xd8] sm:$0xff] %v9429_v45  ;;  %v9042_v11 = vadd.f32 %v8999_v9, %v16305_v3  ;;  %v8910_v45 = vadd.f32 %v8909_v35, %v8810_v30 }
 0x70e   : > { %v9082_v17 = vadd.f32 %v16335_v27, %v9042_v11 }
 0x70f   : > { %v9382_v28 = vpop.f32.mrf.mxu2 }
 0x710   : > { %v9383_v26 = vadd.f32 %v16340_v59, %v9382_v28 }
 0x711   : > { %v9001_v61 = vpop.f32.mrf.mxu1 }
 0x712   : > { %v9430_v8 = vadd.f32 %v9383_v26, %v9079_v54  ;;  %v9002_v43 = vadd.f32 %v9001_v61, %v8903_v1 }
 0x714   : > { %9466 = vst [vmem:[%s16348_s28 + $0xe0] sm:$0xff] %v9430_v8  ;;  %v9043_v50 = vadd.f32 %v9002_v43, %v16310_v32 }
 0x716   : > { %v9083_v24 = vadd.f32 %v16335_v27, %v9043_v50 }
 0x717   : > { %v9384_v10 = vpop.f32.mrf.mxu2 }
 0x718   : > { %v9385_v40 = vadd.f32 %v16340_v59, %v9384_v10 }
 0x719   : > { %v9003_v63 = vpop.f32.mrf.mxu1 }
 0x71a   : > { %v9431_v38 = vadd.f32 %v9385_v40, %v9080_v13  ;;  %v9004_v56 = vadd.f32 %v9003_v63, %v8905_v7 }
 0x71c   : > { %9467 = vst [vmem:[%s16348_s28 + $0xe8] sm:$0xff] %v9431_v38  ;;  %v9044_v47 = vadd.f32 %v9004_v56, %v16315_v5 }
 0x71e   : > { %v9084_v32 = vadd.f32 %v16335_v27, %v9044_v47 }
 0x71f   : > { %v9387_v25 = vpop.f32.mrf.mxu2 }
 0x720   : > { %v9388_v4 = vadd.f32 %v16340_v59, %v9387_v25 }
 0x721   : > { %v9006_v6 = vpop.f32.mrf.mxu1 }
 0x722   : > { %v9432_v60 = vadd.f32 %v9388_v4, %v9081_v55  ;;  %v9007_v52 = vadd.f32 %v9006_v6, %v8908_v33 }
 0x724   : > { %9468 = vst [vmem:[%s16348_s28 + $0xf0] sm:$0xff] %v9432_v60  ;;  %v9045_v21 = vadd.f32 %v9007_v52, %v16321_v39 }
 0x726   : > { %v9085_v22 = vadd.f32 %v16335_v27, %v9045_v21 }
 0x727   : > { %v9389_v36 = vpop.f32.mrf.mxu2 }
 0x728   : > { %v9390_v31 = vadd.f32 %v16340_v59, %v9389_v36 }
 0x729   : > { %v9008_v18 = vpop.f32.mrf.mxu1 }
 0x72a   : > { %v9433_v42 = vadd.f32 %v9390_v31, %v9082_v17  ;;  %v9009_v5 = vadd.f32 %v9008_v18, %v8910_v45 }
 0x72c   : > { %9469 = vst [vmem:[%s16348_s28 + $0xf8] sm:$0xff] %v9433_v42  ;;  %v9046_v54 = vadd.f32 %v9009_v5, %v16326_v12 }
 0x72e   : > { %v9086_v34 = vadd.f32 %v16335_v27, %v9046_v54 }
 0x72f   : > { %v9392_v3 = vpop.f32.mrf.mxu2 }
 0x730   : > { %v9393_v14 = vadd.f32 %v16340_v59, %v9392_v3 }
 0x732   : > { %v9434_v49 = vadd.f32 %v9393_v14, %v9083_v24 }
 0x734   : > { %9470 = vst [vmem:[%s16348_s28 + $0x100] sm:$0xff] %v9434_v49 }
 0x737   : > { %v9394_v46 = vpop.f32.mrf.mxu2 }
 0x738   : > { %v9395_v29 = vadd.f32 %v16340_v59, %v9394_v46 }
 0x73a   : > { %v9435_v57 = vadd.f32 %v9395_v29, %v9084_v32 }
 0x73c   : > { %9471 = vst [vmem:[%s16348_s28 + $0x108] sm:$0xff] %v9435_v57 }
 0x73f   : > { %v9397_v15 = vpop.f32.mrf.mxu2 }
 0x740   : > { %v9398_v28 = vadd.f32 %v16340_v59, %v9397_v15 }
 0x742   : > { %v9436_v20 = vadd.f32 %v9398_v28, %v9085_v22 }
 0x744   : > { %9472 = vst [vmem:[%s16348_s28 + $0x110] sm:$0xff] %v9436_v20 }
 0x747   : > { %v9399_v26 = vpop.f32.mrf.mxu2 }
 0x748   : > { %v9400_v8 = vadd.f32 %v16340_v59, %v9399_v26 }
 0x74a   : > { %v9437_v53 = vadd.f32 %v9400_v8, %v9086_v34 }
 0x74c   : > { %9473 = vst [vmem:[%s16348_s28 + $0x118] sm:$0xff] %v9437_v53 }
 0x74d PF: > { %s17_s24 = sadd.s32 1, %s11285_s24  }
 0x74e   : > { %p14_p4 = scmp.ge.s32.totalorder %s17_s24, 4  }
 0x750   :  { %16 = sbr.rel (!%p14_p4) target bundleno = 1 (0x1), region = 78 }

</bundles_post_ra>
